<compile_context>
chip_gen: v7x
topology: tpu7x:2x2x1
jax: 0.10.0
libtpu: 0.0.40
codegen_flags: <defaults>
</compile_context>

<pallas_src>
import functools

import jax
import jax.numpy as jnp
from jax import lax
from jax.experimental import pallas as pl
from jax.experimental.pallas import tpu as pltpu


def _vmem_limit(need_bytes):
    # Explicit scoped-VMEM budget: generous headroom over the actual working
    # set, kept below every chip's physical VMEM (v7x: 64 MiB / TC).
    return int(min(max(4 * int(need_bytes) + (8 << 20), 24 << 20), 40 << 20))


def _pick_tr(Ho, Wo, target_m=256):
    """Largest divisor of Ho with TR*Wo <= target_m (fills the 256-wide MXU)."""
    best = 1
    for cand in range(1, Ho + 1):
        if Ho % cand == 0 and cand * Wo <= max(target_m, Wo):
            best = cand
    return best


# ----------------------------- Linear (matmul) -------------------------------
def _linear_kernel(x_ref, w_ref, b_ref, o_ref):
    o_ref[...] = (
        jnp.dot(x_ref[...], w_ref[...], preferred_element_type=jnp.float32)
        + b_ref[...]
    ).astype(o_ref.dtype)


def linear(x, w, b):
    """y = x @ w + b.  Rows padded to 8 (unmasked stores); the feature dim is
    only tiled when it is large enough to be worth an extra grid step."""
    B, Din = x.shape
    Dout = w.shape[1]
    Bp = ((B + 7) // 8) * 8
    xp = jnp.pad(x, ((0, Bp - B), (0, 0))) if Bp != B else x
    Dt = Dout
    for cand in (4096, 2048):
        if Dout > cand and Dout % cand == 0:
            Dt = cand
            break
    n_tiles = Dout // Dt
    need = Bp * Din * 4 + 2 * (Din * Dt * 4 + Dt * 4 + Bp * Dt * 4)
    out = pl.pallas_call(
        _linear_kernel,
        out_shape=jax.ShapeDtypeStruct((Bp, Dout), jnp.float32),
        grid=(n_tiles,),
        in_specs=[
            pl.BlockSpec((Bp, Din), lambda i: (0, 0)),
            pl.BlockSpec((Din, Dt), lambda i: (0, i)),
            pl.BlockSpec((1, Dt), lambda i: (0, i)),
        ],
        out_specs=pl.BlockSpec((Bp, Dt), lambda i: (0, i)),
        compiler_params=pltpu.CompilerParams(
            dimension_semantics=("parallel",),
            vmem_limit_bytes=_vmem_limit(need),
        ),
    )(xp, w, b.reshape(1, Dout))
    return out[:B]


# ----------------- BatchNorm scale/shift (single pass over batch) ------------
def _bn_scale_shift_kernel(x_ref, g_ref, b_ref, o_ref, *, eps, inv_n):
    """Accumulates per-channel sum / sum-of-squares across the batch grid axis
    and finalizes scale/shift on the last step.  Output: [2, C] (scale, shift)."""
    bi = pl.program_id(0)
    C = x_ref.shape[-1]

    @pl.when(bi == 0)
    def _init():
        o_ref[...] = jnp.zeros_like(o_ref)

    x = x_ref[0].astype(jnp.float32)                           # [H, W, C]
    s1 = jnp.sum(x, axis=(0, 1), keepdims=True).reshape(1, C)
    s2 = jnp.sum(x * x, axis=(0, 1), keepdims=True).reshape(1, C)
    o_ref[0:1, :] = o_ref[0:1, :] + s1
    o_ref[1:2, :] = o_ref[1:2, :] + s2

    @pl.when(bi == pl.num_programs(0) - 1)
    def _finalize():
        mean = o_ref[0:1, :] * inv_n
        var = jnp.maximum(o_ref[1:2, :] * inv_n - mean * mean, 0.0)
        scale = g_ref[...] * lax.rsqrt(var + eps)               # biased var
        shift = b_ref[...] - mean * scale
        o_ref[0:1, :] = scale
        o_ref[1:2, :] = shift


def bn_scale_shift(x, gamma, beta, *, eps):
    """x: [B,H,W,C] -> [2,C] f32 (row0 = scale, row1 = shift), training-mode
    BatchNorm statistics (per-batch mean, biased variance)."""
    B, H, W, C = x.shape
    kern = functools.partial(
        _bn_scale_shift_kernel, eps=float(eps), inv_n=1.0 / float(B * H * W)
    )
    return pl.pallas_call(
        kern,
        out_shape=jax.ShapeDtypeStruct((2, C), jnp.float32),
        grid=(B,),
        in_specs=[
            pl.BlockSpec((1, H, W, C), lambda i: (i, 0, 0, 0)),
            pl.BlockSpec((1, C), lambda i: (0, 0)),
            pl.BlockSpec((1, C), lambda i: (0, 0)),
        ],
        out_specs=pl.BlockSpec((2, C), lambda i: (0, 0)),
        compiler_params=pltpu.CompilerParams(
            dimension_semantics=("arbitrary",),   # reduction over batch
        ),
    )(x, gamma.reshape(1, C), beta.reshape(1, C))


# ----- fused BN-affine (+LeakyReLU) -> Upsample(2x) -> pad -> Conv3x3 [-> tanh]
def _fused_bn_up_conv_kernel(
    x_ref, ss_ref, w_ref, cb_ref, o_ref, xs_ref,
    *, H, W, Cin, Cout, slope, upsample, apply_tanh, TR,
):
    """One grid step = one image.  BN scale/shift are precomputed over the whole
    batch (ss_ref), so this step is fully independent (per-image double-buffered
    input DMA).  Conv is 3 K-fused MXU matmuls (K = 3*Cin) per row chunk."""
    Ho = 2 * H if upsample else H
    Wo = 2 * W if upsample else W

    # ---- BN affine + LeakyReLU (f32 on the VPU), then ONE bf16 cast ----
    scale = ss_ref[0:1, :]                                     # [1, Cin]
    shift = ss_ref[1:2, :]
    xb = x_ref[0].astype(jnp.float32) * scale + shift          # [H, W, Cin]
    if slope != 1.0:
        xb = jnp.where(xb >= 0.0, xb, slope * xb)
    xb = xb.astype(xs_ref.dtype)                               # bf16 once

    # ---- nearest 2x upsample in registers/VMEM (no HBM blow-up) ----
    if upsample:
        # column duplication (sublane interleave, once, in bf16)
        xw = jnp.broadcast_to(xb[:, :, None, :], (H, W, 2, Cin)).reshape(H, Wo, Cin)
        # row duplication is a leading-dim broadcast (vreg copies only)
        xb = jnp.broadcast_to(xw[:, None, :, :], (H, 2, Wo, Cin)).reshape(Ho, Wo, Cin)
        # TODO(synk): fold the column duplication into sublane-strided slab
        # stores so the interleaved xw value is never materialized.

    # ---- zero ONLY the slab halo (rows 0 / Ho+1, shifted edge columns) ----
    zero_row = jnp.zeros((1, Wo, 3 * Cin), xs_ref.dtype)
    xs_ref[0:1, :, :] = zero_row
    xs_ref[Ho + 1:Ho + 2, :, :] = zero_row
    zero_col = jnp.zeros((Ho, 1, Cin), xs_ref.dtype)
    xs_ref[1:Ho + 1, 0:1, 0:Cin] = zero_col                    # dx=0 left edge
    xs_ref[1:Ho + 1, Wo - 1:Wo, 2 * Cin:3 * Cin] = zero_col    # dx=2 right edge

    # ---- interior: three dx-shifted lane groups (K = 3*Cin fusion) ----
    xs_ref[1:Ho + 1, 1:Wo, 0:Cin] = xb[:, :Wo - 1, :]          # dx = 0
    xs_ref[1:Ho + 1, :, Cin:2 * Cin] = xb                      # dx = 1
    xs_ref[1:Ho + 1, 0:Wo - 1, 2 * Cin:3 * Cin] = xb[:, 1:, :] # dx = 2

    # ---- 3x3 conv: 3 K-fused MXU matmuls per row chunk, f32 accumulation ----
    bias = cb_ref[...].astype(jnp.float32)                     # [1, Cout]
    acc0 = jnp.broadcast_to(bias, (TR * Wo, Cout))             # hoisted once
    n_chunks = Ho // TR

    def chunk(ci, carry):
        oy0 = pl.multiple_of(ci * TR, TR)
        acc = acc0
        for dy in range(3):
            patch = xs_ref[pl.ds(oy0 + dy, TR), :, :]          # [TR, Wo, 3Cin]
            acc = acc + jnp.dot(
                patch.reshape(TR * Wo, 3 * Cin),               # bf16 MXU operand
                w_ref[dy],                                     # [3Cin, Cout] bf16
                preferred_element_type=jnp.float32,
            )
        out = jnp.tanh(acc) if apply_tanh else acc
        o_ref[0, pl.ds(oy0, TR), :, :] = (
            out.reshape(TR, Wo, Cout).astype(o_ref.dtype)
        )
        return carry

    lax.fori_loop(0, n_chunks, chunk, 0, unroll=True)


def fused_bn_up_conv(x, ss, w_fused, cb, *, slope, upsample, apply_tanh, out_dtype):
    """x: [B,H,W,Cin] NHWC f32 (raw, pre-BN); ss: [2,Cin] precomputed BN
    scale/shift; w_fused: [3, 3*Cin, Cout] bf16; cb: [Cout] f32.
    Returns [B, Ho, Wo, Cout] in out_dtype."""
    B, H, W, Cin = x.shape
    Cout = w_fused.shape[-1]
    assert w_fused.shape == (3, 3 * Cin, Cout)
    Ho = 2 * H if upsample else H
    Wo = 2 * W if upsample else W
    TR = _pick_tr(Ho, Wo)
    kern = functools.partial(
        _fused_bn_up_conv_kernel,
        H=H, W=W, Cin=Cin, Cout=Cout, slope=float(slope),
        upsample=upsample, apply_tanh=apply_tanh, TR=TR,
    )
    out_bytes = Ho * Wo * Cout * jnp.dtype(out_dtype).itemsize
    need = (
        2 * H * W * Cin * 4                     # double-buffered per-image input
        + 2 * Cin * 4 + 3 * 3 * Cin * Cout * 2 + Cout * 4
        + 2 * out_bytes                         # double-buffered per-image output
        + (Ho + 2) * Wo * 3 * Cin * 2           # bf16 slab scratch
    )
    # TODO(synk): on v7x, shard the batch axis across the 2 TensorCores
    # explicitly (pltpu.CORE_PARALLEL / pl.core_map); plain "parallel" is kept
    # here for portability across v5e/v6e/v7x.
    return pl.pallas_call(
        kern,
        out_shape=jax.ShapeDtypeStruct((B, Ho, Wo, Cout), out_dtype),
        grid=(B,),
        in_specs=[
            pl.BlockSpec((1, H, W, Cin), lambda i: (i, 0, 0, 0)),
            pl.BlockSpec((2, Cin), lambda i: (0, 0)),
            pl.BlockSpec((3, 3 * Cin, Cout), lambda i: (0, 0, 0)),
            pl.BlockSpec((1, Cout), lambda i: (0, 0)),
        ],
        out_specs=pl.BlockSpec((1, Ho, Wo, Cout), lambda i: (i, 0, 0, 0)),
        scratch_shapes=[pltpu.VMEM((Ho + 2, Wo, 3 * Cin), jnp.bfloat16)],
        compiler_params=pltpu.CompilerParams(
            dimension_semantics=("parallel",),
            vmem_limit_bytes=_vmem_limit(need),
        ),
    )(x, ss, w_fused, cb.reshape(1, Cout))


# ----------------------------- Generator -------------------------------------
def init_params(key, z_dim, n_classes, img_shape):
    C_img, H_img, _ = img_shape
    init_size = H_img // 4
    ks = jax.random.split(key, 16)

    def nrm(k, shape, scale=0.05):
        return scale * jax.random.normal(k, shape, jnp.float32)

    def fuse(w):  # (3,3,Cin,Cout) HWIO f32 -> (3, 3*Cin, Cout) bf16 (K-fused)
        return w.reshape(3, 3 * w.shape[2], w.shape[3]).astype(jnp.bfloat16)

    # conv2: 128 -> 64, output channels zero-padded to 128 (lane-dense stores).
    conv2_w = jnp.pad(nrm(ks[9], (3, 3, 128, 64)), ((0, 0),) * 3 + ((0, 64),))
    conv2_b = jnp.pad(nrm(ks[10], (64,)), (0, 64))
    # conv3: 64 -> C_img; Cin padded 64->128 (zeros) and Cout padded to 128.
    conv3_w = jnp.pad(
        nrm(ks[13], (3, 3, 64, C_img)),
        ((0, 0), (0, 0), (0, 64), (0, 128 - C_img)),
    )
    conv3_b = jnp.pad(nrm(ks[14], (C_img,)), (0, 128 - C_img))

    return {
        "emb": jax.random.normal(ks[0], (n_classes, 1), jnp.float32),
        # l1 weight columns stored in (h, w, c) order so the linear output
        # reshapes directly to NHWC.  (A torch checkpoint, whose columns are
        # (c, h, w)-ordered, would be permuted once here.)
        "l1_w": nrm(ks[1], (z_dim + 1, init_size * init_size * 128)),
        "l1_b": nrm(ks[2], (init_size * init_size * 128,)),
        "bn1_g": 1.0 + nrm(ks[3], (128,)),
        "bn1_b": nrm(ks[4], (128,)),
        "conv1_wf": fuse(nrm(ks[5], (3, 3, 128, 128))),
        "conv1_b": nrm(ks[6], (128,)),
        "bn2_g": 1.0 + nrm(ks[7], (128,)),
        "bn2_b": nrm(ks[8], (128,)),
        "conv2_wf": fuse(conv2_w),
        "conv2_b_p": conv2_b,
        # BN3 params zero-padded so the 64 padded channels stay exactly 0.
        "bn3_g_p": jnp.pad(1.0 + nrm(ks[11], (64,)), (0, 64)),
        "bn3_b_p": jnp.pad(nrm(ks[12], (64,)), (0, 64)),
        "conv3_wf": fuse(conv3_w),
        "conv3_b_p": conv3_b,
    }


def generator_forward(params, noise, labels, img_shape):
    C_img, H_img, _ = img_shape
    init_size = H_img // 4
    B = noise.shape[0]

    # nn.Embedding lookup + concat (tiny gather — XLA glue).
    label_input = params["emb"][labels]                         # [B, 1]
    gen_input = jnp.concatenate([noise, label_input], axis=1)   # [B, z+1]

    # l1: Linear(z+1 -> 128 * init_size^2)  (Pallas matmul)
    out = linear(gen_input, params["l1_w"], params["l1_b"])
    # Columns are (h, w, c)-ordered -> direct NHWC view, no transpose.
    x = out.reshape(B, init_size, init_size, 128)

    # Block 1: BN(128, eps=1e-5) -> Upsample(2x) -> Conv(128->128)
    ss1 = bn_scale_shift(x, params["bn1_g"], params["bn1_b"], eps=1e-5)
    x = fused_bn_up_conv(x, ss1, params["conv1_wf"], params["conv1_b"],
                         slope=1.0, upsample=True, apply_tanh=False,
                         out_dtype=jnp.float32)

    # Block 2: BN(128, eps=0.8) -> LeakyReLU(0.2) -> Upsample -> Conv(128->64)
    ss2 = bn_scale_shift(x, params["bn2_g"], params["bn2_b"], eps=0.8)
    x = fused_bn_up_conv(x, ss2, params["conv2_wf"], params["conv2_b_p"],
                         slope=0.2, upsample=True, apply_tanh=False,
                         out_dtype=jnp.float32)

    # Block 3: BN(64, eps=0.8) -> LeakyReLU(0.2) -> Conv(64->C) -> Tanh
    # (64-channel quantities are zero-padded to 128 lanes; results identical.)
    ss3 = bn_scale_shift(x, params["bn3_g_p"], params["bn3_b_p"], eps=0.8)
    x = fused_bn_up_conv(x, ss3, params["conv3_wf"], params["conv3_b_p"],
                         slope=0.2, upsample=False, apply_tanh=True,
                         out_dtype=jnp.bfloat16)   # tanh in [-1,1]: bf16 writeback
    # TODO(synk): pack C_img into the lane axis of the final store to avoid
    # writing the 128-lane padded slab at all for very small C_img.

    img = x[..., :C_img].astype(jnp.float32)    # drop lane padding, back to f32
    return jnp.transpose(img, (0, 3, 1, 2))     # NHWC -> NCHW


if __name__ == "__main__":
    z_dim = 8
    n_classes = 10
    img_shape = (1, 16, 16)   # (C, H, W); init_size = 4
    B = 2

    key = jax.random.PRNGKey(0)
    k_param, k_noise, k_label = jax.random.split(key, 3)

    params = init_params(k_param, z_dim, n_classes, img_shape)
    noise = jax.random.normal(k_noise, (B, z_dim), jnp.float32)
    labels = jax.random.randint(k_label, (B,), 0, n_classes)

    fwd = jax.jit(functools.partial(generator_forward, img_shape=img_shape))
    img = jax.block_until_ready(fwd(params, noise, labels))

    assert img.shape == (B, img_shape[0], img_shape[1], img_shape[2])
    assert img.dtype == jnp.float32
    print("KERNEL_OK")
</pallas_src>

<mosaic_0001>
module attributes {stable_mosaic.version = 11 : i64} {
  func.func @_linear_kernel(%arg0: i32, %arg1: memref<8x9xf32, #tpu.memory_space<vmem>>, %arg2: memref<9x2048xf32, #tpu.memory_space<vmem>>, %arg3: memref<1x2048xf32, #tpu.memory_space<vmem>>, %arg4: memref<8x2048xf32, #tpu.memory_space<vmem>>) attributes {dimension_semantics = [#tpu.dimension_semantics<parallel>], iteration_bounds = array<i64: 1>, scalar_prefetch = 0 : i64, scratch_operands = 0 : i64, tpu.core_type = #tpu.core_type<tc>, window_params = [{pipeline_mode = #tpu.pipeline_mode<synchronous>, transform_indices = @transform_0, window_bounds = array<i64: 8, 9>}, {transform_indices = @transform_1, window_bounds = array<i64: 9, 2048>}, {transform_indices = @transform_2, window_bounds = array<i64: 1, 2048>}, {transform_indices = @transform_3, window_bounds = array<i64: 8, 2048>}]} {
    %c0 = arith.constant 0 : index
    %c0_0 = arith.constant 0 : index
    %0 = vector.load %arg1[%c0, %c0_0] : memref<8x9xf32, #tpu.memory_space<vmem>>, vector<8x9xf32>
    %c0_1 = arith.constant 0 : index
    %c0_2 = arith.constant 0 : index
    %1 = vector.load %arg2[%c0_1, %c0_2] : memref<9x2048xf32, #tpu.memory_space<vmem>>, vector<9x2048xf32>
    %cst = arith.constant dense<0.000000e+00> : vector<8x2048xf32>
    %2 = tpu.matmul %0, %1, %cst {dimension_numbers = #tpu.dot_dimension_numbers<[1], [0], [0], [1], [0, 0, 1, 1], [], []>} : vector<8x9xf32>, vector<9x2048xf32>, vector<8x2048xf32> -> vector<8x2048xf32>
    %c0_3 = arith.constant 0 : index
    %c0_4 = arith.constant 0 : index
    %3 = vector.load %arg3[%c0_3, %c0_4] : memref<1x2048xf32, #tpu.memory_space<vmem>>, vector<1x2048xf32>
    %4 = vector.broadcast %3 : vector<1x2048xf32> to vector<8x2048xf32>
    %5 = arith.addf %2, %4 : vector<8x2048xf32>
    %c0_5 = arith.constant 0 : index
    %c0_6 = arith.constant 0 : index
    %6 = vector.load %arg4[%c0_5, %c0_6] : memref<8x2048xf32, #tpu.memory_space<vmem>>, vector<8x2048xf32>
    tpu.vector_store %arg4[%c0_5, %c0_6], %5 {strides = array<i32>} : memref<8x2048xf32, #tpu.memory_space<vmem>>, vector<8x2048xf32>,
    return
  }
  func.func @transform_0(%arg0: i32) -> (i32, i32) {
    %c0_i32 = arith.constant 0 : i32
    %c0_i32_0 = arith.constant 0 : i32
    %c0_i32_1 = arith.constant 0 : i32
    return %c0_i32, %c0_i32_0 : i32, i32
  }
  func.func @transform_1(%arg0: i32) -> (i32, i32) {
    %c0_i32 = arith.constant 0 : i32
    %c0_i32_0 = arith.constant 0 : i32
    return %c0_i32, %arg0 : i32, i32
  }
  func.func @transform_2(%arg0: i32) -> (i32, i32) {
    %c0_i32 = arith.constant 0 : i32
    %c0_i32_0 = arith.constant 0 : i32
    return %c0_i32, %arg0 : i32, i32
  }
  func.func @transform_3(%arg0: i32) -> (i32, i32) {
    %c0_i32 = arith.constant 0 : i32
    %c0_i32_0 = arith.constant 0 : i32
    return %c0_i32, %arg0 : i32, i32
  }
}

module attributes {stable_mosaic.version = 11 : i64} {
  func.func @_bn_scale_shift_kernel(%arg0: i32, %arg1: memref<1x4x4x128xf32, #tpu.memory_space<vmem>>, %arg2: memref<1x128xf32, #tpu.memory_space<vmem>>, %arg3: memref<1x128xf32, #tpu.memory_space<vmem>>, %arg4: memref<2x128xf32, #tpu.memory_space<vmem>>) attributes {dimension_semantics = [#tpu.dimension_semantics<arbitrary>], iteration_bounds = array<i64: 2>, scalar_prefetch = 0 : i64, scratch_operands = 0 : i64, tpu.core_type = #tpu.core_type<tc>, window_params = [{transform_indices = @transform_0, window_bounds = array<i64: 1, 4, 4, 128>}, {pipeline_mode = #tpu.pipeline_mode<synchronous>, transform_indices = @transform_1, window_bounds = array<i64: 1, 128>}, {pipeline_mode = #tpu.pipeline_mode<synchronous>, transform_indices = @transform_2, window_bounds = array<i64: 1, 128>}, {pipeline_mode = #tpu.pipeline_mode<synchronous>, transform_indices = @transform_3, window_bounds = array<i64: 2, 128>}]} {
    %c0_i32 = arith.constant 0 : i32
    %0 = arith.cmpi eq, %arg0, %c0_i32 : i32
    %1 = arith.extui %0 : i1 to i32
    %c0_i32_0 = arith.constant 0 : i32
    %2 = arith.cmpi ne, %1, %c0_i32_0 : i32
    scf.if %2 {
      %cst_13 = arith.constant 0.000000e+00 : f32
      %21 = vector.broadcast %cst_13 : f32 to vector<2x128xf32>
      %c0_14 = arith.constant 0 : index
      %c0_15 = arith.constant 0 : index
      %22 = vector.load %arg4[%c0_14, %c0_15] : memref<2x128xf32, #tpu.memory_space<vmem>>, vector<2x128xf32>
      tpu.vector_store %arg4[%c0_14, %c0_15], %21 {strides = array<i32>} : memref<2x128xf32, #tpu.memory_space<vmem>>, vector<2x128xf32>,
    } else {
    }
    %c0 = arith.constant 0 : index
    %c0_1 = arith.constant 0 : index
    %c0_2 = arith.constant 0 : index
    %c0_3 = arith.constant 0 : index
    %3 = vector.load %arg1[%c0, %c0_1, %c0_2, %c0_3] : memref<1x4x4x128xf32, #tpu.memory_space<vmem>>, vector<1x4x4x128xf32>
    %4 = vector.shape_cast %3 : vector<1x4x4x128xf32> to vector<4x4x128xf32>
    %cst = arith.constant dense<0.000000e+00> : vector<128xf32>
    %5 = vector.multi_reduction <add>, %4, %cst [0, 1] : vector<4x4x128xf32> to vector<128xf32>
    %6 = vector.shape_cast %5 : vector<128xf32> to vector<1x1x128xf32>
    %7 = vector.shape_cast %6 : vector<1x1x128xf32> to vector<1x128xf32>
    %8 = arith.mulf %4, %4 : vector<4x4x128xf32>
    %cst_4 = arith.constant dense<0.000000e+00> : vector<128xf32>
    %9 = vector.multi_reduction <add>, %8, %cst_4 [0, 1] : vector<4x4x128xf32> to vector<128xf32>
    %10 = vector.shape_cast %9 : vector<128xf32> to vector<1x1x128xf32>
    %11 = vector.shape_cast %10 : vector<1x1x128xf32> to vector<1x128xf32>
    %c0_5 = arith.constant 0 : index
    %c0_6 = arith.constant 0 : index
    %12 = vector.load %arg4[%c0_5, %c0_6] : memref<2x128xf32, #tpu.memory_space<vmem>>, vector<1x128xf32>
    %13 = arith.addf %12, %7 : vector<1x128xf32>
    %c0_7 = arith.constant 0 : index
    %c0_8 = arith.constant 0 : index
    %14 = vector.load %arg4[%c0_7, %c0_8] : memref<2x128xf32, #tpu.memory_space<vmem>>, vector<1x128xf32>
    tpu.vector_store %arg4[%c0_7, %c0_8], %13 {strides = array<i32>} : memref<2x128xf32, #tpu.memory_space<vmem>>, vector<1x128xf32>,
    %c1 = arith.constant 1 : index
    %c0_9 = arith.constant 0 : index
    %15 = vector.load %arg4[%c1, %c0_9] : memref<2x128xf32, #tpu.memory_space<vmem>>, vector<1x128xf32>
    %16 = arith.addf %15, %11 : vector<1x128xf32>
    %c1_10 = arith.constant 1 : index
    %c0_11 = arith.constant 0 : index
    %17 = vector.load %arg4[%c1_10, %c0_11] : memref<2x128xf32, #tpu.memory_space<vmem>>, vector<1x128xf32>
    tpu.vector_store %arg4[%c1_10, %c0_11], %16 {strides = array<i32>} : memref<2x128xf32, #tpu.memory_space<vmem>>, vector<1x128xf32>,
    %c1_i32 = arith.constant 1 : i32
    %18 = arith.cmpi eq, %arg0, %c1_i32 : i32
    %19 = arith.extui %18 : i1 to i32
    %c0_i32_12 = arith.constant 0 : i32
    %20 = arith.cmpi ne, %19, %c0_i32_12 : i32
    scf.if %20 {
      %c0_13 = arith.constant 0 : index
      %c0_14 = arith.constant 0 : index
      %21 = vector.load %arg4[%c0_13, %c0_14] : memref<2x128xf32, #tpu.memory_space<vmem>>, vector<1x128xf32>
      %cst_15 = arith.constant 3.125000e-02 : f32
      %22 = vector.broadcast %cst_15 : f32 to vector<1x128xf32>
      %23 = arith.mulf %21, %22 : vector<1x128xf32>
      %c1_16 = arith.constant 1 : index
      %c0_17 = arith.constant 0 : index
      %24 = vector.load %arg4[%c1_16, %c0_17] : memref<2x128xf32, #tpu.memory_space<vmem>>, vector<1x128xf32>
      %cst_18 = arith.constant 3.125000e-02 : f32
      %25 = vector.broadcast %cst_18 : f32 to vector<1x128xf32>
      %26 = arith.mulf %24, %25 : vector<1x128xf32>
      %27 = arith.mulf %23, %23 : vector<1x128xf32>
      %28 = arith.subf %26, %27 : vector<1x128xf32>
      %cst_19 = arith.constant 0.000000e+00 : f32
      %29 = vector.broadcast %cst_19 : f32 to vector<1x128xf32>
      %30 = arith.maximumf %28, %29 : vector<1x128xf32>
      %c0_20 = arith.constant 0 : index
      %c0_21 = arith.constant 0 : index
      %31 = vector.load %arg2[%c0_20, %c0_21] : memref<1x128xf32, #tpu.memory_space<vmem>>, vector<1x128xf32>
      %cst_22 = arith.constant 9.99999974E-6 : f32
      %32 = vector.broadcast %cst_22 : f32 to vector<1x128xf32>
      %33 = arith.addf %30, %32 : vector<1x128xf32>
      %34 = math.rsqrt %33 : vector<1x128xf32>
      %35 = arith.mulf %31, %34 : vector<1x128xf32>
      %c0_23 = arith.constant 0 : index
      %c0_24 = arith.constant 0 : index
      %36 = vector.load %arg3[%c0_23, %c0_24] : memref<1x128xf32, #tpu.memory_space<vmem>>, vector<1x128xf32>
      %37 = arith.mulf %23, %35 : vector<1x128xf32>
      %38 = arith.subf %36, %37 : vector<1x128xf32>
      %c0_25 = arith.constant 0 : index
      %c0_26 = arith.constant 0 : index
      %39 = vector.load %arg4[%c0_25, %c0_26] : memref<2x128xf32, #tpu.memory_space<vmem>>, vector<1x128xf32>
      tpu.vector_store %arg4[%c0_25, %c0_26], %35 {strides = array<i32>} : memref<2x128xf32, #tpu.memory_space<vmem>>, vector<1x128xf32>,
      %c1_27 = arith.constant 1 : index
      %c0_28 = arith.constant 0 : index
      %40 = vector.load %arg4[%c1_27, %c0_28] : memref<2x128xf32, #tpu.memory_space<vmem>>, vector<1x128xf32>
      tpu.vector_store %arg4[%c1_27, %c0_28], %38 {strides = array<i32>} : memref<2x128xf32, #tpu.memory_space<vmem>>, vector<1x128xf32>,
    } else {
    }
    return
  }
  func.func @transform_0(%arg0: i32) -> (i32, i32, i32, i32) {
    %c0_i32 = arith.constant 0 : i32
    %c0_i32_0 = arith.constant 0 : i32
    %c0_i32_1 = arith.constant 0 : i32
    %c0_i32_2 = arith.constant 0 : i32
    return %arg0, %c0_i32, %c0_i32_0, %c0_i32_1 : i32, i32, i32, i32
  }
  func.func @transform_1(%arg0: i32) -> (i32, i32) {
    %c0_i32 = arith.constant 0 : i32
    %c0_i32_0 = arith.constant 0 : i32
    %c0_i32_1 = arith.constant 0 : i32
    return %c0_i32, %c0_i32_0 : i32, i32
  }
  func.func @transform_2(%arg0: i32) -> (i32, i32) {
    %c0_i32 = arith.constant 0 : i32
    %c0_i32_0 = arith.constant 0 : i32
    %c0_i32_1 = arith.constant 0 : i32
    return %c0_i32, %c0_i32_0 : i32, i32
  }
  func.func @transform_3(%arg0: i32) -> (i32, i32) {
    %c0_i32 = arith.constant 0 : i32
    %c0_i32_0 = arith.constant 0 : i32
    %c0_i32_1 = arith.constant 0 : i32
    return %c0_i32, %c0_i32_0 : i32, i32
  }
}

module attributes {stable_mosaic.version = 11 : i64} {
  func.func @_fused_bn_up_conv_kernel(%arg0: i32, %arg1: memref<1x4x4x128xf32, #tpu.memory_space<vmem>>, %arg2: memref<2x128xf32, #tpu.memory_space<vmem>>, %arg3: memref<3x384x128xbf16, #tpu.memory_space<vmem>>, %arg4: memref<1x128xf32, #tpu.memory_space<vmem>>, %arg5: memref<1x8x8x128xf32, #tpu.memory_space<vmem>>, %arg6: memref<10x8x384xbf16, #tpu.memory_space<vmem>>) attributes {dimension_semantics = [#tpu.dimension_semantics<parallel>], iteration_bounds = array<i64: 2>, scalar_prefetch = 0 : i64, scratch_operands = 1 : i64, tpu.core_type = #tpu.core_type<tc>, window_params = [{transform_indices = @transform_0, window_bounds = array<i64: 1, 4, 4, 128>}, {pipeline_mode = #tpu.pipeline_mode<synchronous>, transform_indices = @transform_1, window_bounds = array<i64: 2, 128>}, {pipeline_mode = #tpu.pipeline_mode<synchronous>, transform_indices = @transform_2, window_bounds = array<i64: 3, 384, 128>}, {pipeline_mode = #tpu.pipeline_mode<synchronous>, transform_indices = @transform_3, window_bounds = array<i64: 1, 128>}, {transform_indices = @transform_4, window_bounds = array<i64: 1, 8, 8, 128>}]} {
    %c0 = arith.constant 0 : index
    %c0_0 = arith.constant 0 : index
    %0 = vector.load %arg2[%c0, %c0_0] : memref<2x128xf32, #tpu.memory_space<vmem>>, vector<1x128xf32>
    %c1 = arith.constant 1 : index
    %c0_1 = arith.constant 0 : index
    %1 = vector.load %arg2[%c1, %c0_1] : memref<2x128xf32, #tpu.memory_space<vmem>>, vector<1x128xf32>
    %c0_2 = arith.constant 0 : index
    %c0_3 = arith.constant 0 : index
    %c0_4 = arith.constant 0 : index
    %c0_5 = arith.constant 0 : index
    %2 = vector.load %arg1[%c0_2, %c0_3, %c0_4, %c0_5] : memref<1x4x4x128xf32, #tpu.memory_space<vmem>>, vector<1x4x4x128xf32>
    %3 = vector.shape_cast %2 : vector<1x4x4x128xf32> to vector<4x4x128xf32>
    %4 = vector.shape_cast %0 : vector<1x128xf32> to vector<1x1x128xf32>
    %5 = vector.broadcast %4 : vector<1x1x128xf32> to vector<4x4x128xf32>
    %6 = arith.mulf %3, %5 : vector<4x4x128xf32>
    %7 = vector.shape_cast %1 : vector<1x128xf32> to vector<1x1x128xf32>
    %8 = vector.broadcast %7 : vector<1x1x128xf32> to vector<4x4x128xf32>
    %9 = arith.addf %6, %8 : vector<4x4x128xf32>
    %10 = arith.truncf %9 : vector<4x4x128xf32> to vector<4x4x128xbf16>
    %11 = vector.shape_cast %10 : vector<4x4x128xbf16> to vector<4x4x1x128xbf16>
    %12 = vector.shape_cast %11 : vector<4x4x1x128xbf16> to vector<4x4x1x128xbf16>
    %13 = vector.broadcast %12 : vector<4x4x1x128xbf16> to vector<4x4x2x128xbf16>
    %14 = vector.shape_cast %13 : vector<4x4x2x128xbf16> to vector<4x8x128xbf16>
    %15 = vector.shape_cast %14 : vector<4x8x128xbf16> to vector<4x1x8x128xbf16>
    %16 = vector.shape_cast %15 : vector<4x1x8x128xbf16> to vector<4x1x8x128xbf16>
    %17 = vector.broadcast %16 : vector<4x1x8x128xbf16> to vector<4x2x8x128xbf16>
    %18 = vector.shape_cast %17 : vector<4x2x8x128xbf16> to vector<8x8x128xbf16>
    %cst = arith.constant 0.000000e+00 : bf16
    %19 = vector.broadcast %cst : bf16 to vector<1x8x384xbf16>
    %c0_6 = arith.constant 0 : index
    %c0_7 = arith.constant 0 : index
    %c0_8 = arith.constant 0 : index
    %20 = vector.load %arg6[%c0_6, %c0_7, %c0_8] : memref<10x8x384xbf16, #tpu.memory_space<vmem>>, vector<1x8x384xbf16>
    tpu.vector_store %arg6[%c0_6, %c0_7, %c0_8], %19 {strides = array<i32>} : memref<10x8x384xbf16, #tpu.memory_space<vmem>>, vector<1x8x384xbf16>,
    %c9 = arith.constant 9 : index
    %c0_9 = arith.constant 0 : index
    %c0_10 = arith.constant 0 : index
    %21 = vector.load %arg6[%c9, %c0_9, %c0_10] : memref<10x8x384xbf16, #tpu.memory_space<vmem>>, vector<1x8x384xbf16>
    tpu.vector_store %arg6[%c9, %c0_9, %c0_10], %19 {strides = array<i32>} : memref<10x8x384xbf16, #tpu.memory_space<vmem>>, vector<1x8x384xbf16>,
    %cst_11 = arith.constant 0.000000e+00 : bf16
    %22 = vector.broadcast %cst_11 : bf16 to vector<8x1x128xbf16>
    %c1_12 = arith.constant 1 : index
    %c0_13 = arith.constant 0 : index
    %c0_14 = arith.constant 0 : index
    %23 = vector.load %arg6[%c1_12, %c0_13, %c0_14] : memref<10x8x384xbf16, #tpu.memory_space<vmem>>, vector<8x1x128xbf16>
    tpu.vector_store %arg6[%c1_12, %c0_13, %c0_14], %22 {strides = array<i32>} : memref<10x8x384xbf16, #tpu.memory_space<vmem>>, vector<8x1x128xbf16>,
    %c1_15 = arith.constant 1 : index
    %c7 = arith.constant 7 : index
    %c256 = arith.constant 256 : index
    %24 = vector.load %arg6[%c1_15, %c7, %c256] : memref<10x8x384xbf16, #tpu.memory_space<vmem>>, vector<8x1x128xbf16>
    tpu.vector_store %arg6[%c1_15, %c7, %c256], %22 {strides = array<i32>} : memref<10x8x384xbf16, #tpu.memory_space<vmem>>, vector<8x1x128xbf16>,
    %25 = vector.extract_strided_slice %18 {offsets = [0, 0, 0], sizes = [8, 7, 128], strides = [1, 1, 1]} : vector<8x8x128xbf16> to vector<8x7x128xbf16>
    %c1_16 = arith.constant 1 : index
    %c1_17 = arith.constant 1 : index
    %c0_18 = arith.constant 0 : index
    %26 = vector.load %arg6[%c1_16, %c1_17, %c0_18] : memref<10x8x384xbf16, #tpu.memory_space<vmem>>, vector<8x7x128xbf16>
    tpu.vector_store %arg6[%c1_16, %c1_17, %c0_18], %25 {strides = array<i32>} : memref<10x8x384xbf16, #tpu.memory_space<vmem>>, vector<8x7x128xbf16>,
    %c1_19 = arith.constant 1 : index
    %c0_20 = arith.constant 0 : index
    %c128 = arith.constant 128 : index
    %27 = vector.load %arg6[%c1_19, %c0_20, %c128] : memref<10x8x384xbf16, #tpu.memory_space<vmem>>, vector<8x8x128xbf16>
    tpu.vector_store %arg6[%c1_19, %c0_20, %c128], %18 {strides = array<i32>} : memref<10x8x384xbf16, #tpu.memory_space<vmem>>, vector<8x8x128xbf16>,
    %28 = vector.extract_strided_slice %18 {offsets = [0, 1, 0], sizes = [8, 7, 128], strides = [1, 1, 1]} : vector<8x8x128xbf16> to vector<8x7x128xbf16>
    %c1_21 = arith.constant 1 : index
    %c0_22 = arith.constant 0 : index
    %c256_23 = arith.constant 256 : index
    %29 = vector.load %arg6[%c1_21, %c0_22, %c256_23] : memref<10x8x384xbf16, #tpu.memory_space<vmem>>, vector<8x7x128xbf16>
    tpu.vector_store %arg6[%c1_21, %c0_22, %c256_23], %28 {strides = array<i32>} : memref<10x8x384xbf16, #tpu.memory_space<vmem>>, vector<8x7x128xbf16>,
    %c0_24 = arith.constant 0 : index
    %c0_25 = arith.constant 0 : index
    %30 = vector.load %arg4[%c0_24, %c0_25] : memref<1x128xf32, #tpu.memory_space<vmem>>, vector<1x128xf32>
    %31 = vector.shape_cast %30 : vector<1x128xf32> to vector<1x128xf32>
    %32 = vector.broadcast %31 : vector<1x128xf32> to vector<64x128xf32>
    %c0_i32 = arith.constant 0 : i32
    %c8_i32 = arith.constant 8 : i32
    %33 = arith.muli %c0_i32, %c8_i32 : i32
    %34 = tpu.assume_multiple %33, 8 : i32
    %c0_i32_26 = arith.constant 0 : i32
    %35 = arith.addi %34, %c0_i32_26 : i32
    %36 = arith.index_cast %35 : i32 to index
    %c0_27 = arith.constant 0 : index
    %c0_28 = arith.constant 0 : index
    %37 = vector.load %arg6[%36, %c0_27, %c0_28] : memref<10x8x384xbf16, #tpu.memory_space<vmem>>, vector<8x8x384xbf16>
    %38 = vector.shape_cast %37 : vector<8x8x384xbf16> to vector<64x384xbf16>
    %c0_29 = arith.constant 0 : index
    %c0_30 = arith.constant 0 : index
    %c0_31 = arith.constant 0 : index
    %39 = vector.load %arg3[%c0_29, %c0_30, %c0_31] : memref<3x384x128xbf16, #tpu.memory_space<vmem>>, vector<1x384x128xbf16>
    %40 = vector.shape_cast %39 : vector<1x384x128xbf16> to vector<384x128xbf16>
    %cst_32 = arith.constant dense<0.000000e+00> : vector<64x128xf32>
    %41 = tpu.matmul %38, %40, %cst_32 {dimension_numbers = #tpu.dot_dimension_numbers<[1], [0], [0], [1], [0, 0, 1, 1], [], []>} : vector<64x384xbf16>, vector<384x128xbf16>, vector<64x128xf32> -> vector<64x128xf32>
    %42 = arith.addf %32, %41 : vector<64x128xf32>
    %c1_i32 = arith.constant 1 : i32
    %43 = arith.addi %34, %c1_i32 : i32
    %44 = arith.index_cast %43 : i32 to index
    %c0_33 = arith.constant 0 : index
    %c0_34 = arith.constant 0 : index
    %45 = vector.load %arg6[%44, %c0_33, %c0_34] : memref<10x8x384xbf16, #tpu.memory_space<vmem>>, vector<8x8x384xbf16>
    %46 = vector.shape_cast %45 : vector<8x8x384xbf16> to vector<64x384xbf16>
    %c1_35 = arith.constant 1 : index
    %c0_36 = arith.constant 0 : index
    %c0_37 = arith.constant 0 : index
    %47 = vector.load %arg3[%c1_35, %c0_36, %c0_37] : memref<3x384x128xbf16, #tpu.memory_space<vmem>>, vector<1x384x128xbf16>
    %48 = vector.shape_cast %47 : vector<1x384x128xbf16> to vector<384x128xbf16>
    %cst_38 = arith.constant dense<0.000000e+00> : vector<64x128xf32>
    %49 = tpu.matmul %46, %48, %cst_38 {dimension_numbers = #tpu.dot_dimension_numbers<[1], [0], [0], [1], [0, 0, 1, 1], [], []>} : vector<64x384xbf16>, vector<384x128xbf16>, vector<64x128xf32> -> vector<64x128xf32>
    %50 = arith.addf %42, %49 : vector<64x128xf32>
    %c2_i32 = arith.constant 2 : i32
    %51 = arith.addi %34, %c2_i32 : i32
    %52 = arith.index_cast %51 : i32 to index
    %c0_39 = arith.constant 0 : index
    %c0_40 = arith.constant 0 : index
    %53 = vector.load %arg6[%52, %c0_39, %c0_40] : memref<10x8x384xbf16, #tpu.memory_space<vmem>>, vector<8x8x384xbf16>
    %54 = vector.shape_cast %53 : vector<8x8x384xbf16> to vector<64x384xbf16>
    %c2 = arith.constant 2 : index
    %c0_41 = arith.constant 0 : index
    %c0_42 = arith.constant 0 : index
    %55 = vector.load %arg3[%c2, %c0_41, %c0_42] : memref<3x384x128xbf16, #tpu.memory_space<vmem>>, vector<1x384x128xbf16>
    %56 = vector.shape_cast %55 : vector<1x384x128xbf16> to vector<384x128xbf16>
    %cst_43 = arith.constant dense<0.000000e+00> : vector<64x128xf32>
    %57 = tpu.matmul %54, %56, %cst_43 {dimension_numbers = #tpu.dot_dimension_numbers<[1], [0], [0], [1], [0, 0, 1, 1], [], []>} : vector<64x384xbf16>, vector<384x128xbf16>, vector<64x128xf32> -> vector<64x128xf32>
    %58 = arith.addf %50, %57 : vector<64x128xf32>
    %59 = vector.shape_cast %58 : vector<64x128xf32> to vector<8x8x128xf32>
    %c0_44 = arith.constant 0 : index
    %60 = arith.index_cast %34 : i32 to index
    %c0_45 = arith.constant 0 : index
    %c0_46 = arith.constant 0 : index
    %61 = vector.load %arg5[%c0_44, %60, %c0_45, %c0_46] : memref<1x8x8x128xf32, #tpu.memory_space<vmem>>, vector<1x8x8x128xf32>
    %62 = vector.shape_cast %61 : vector<1x8x8x128xf32> to vector<8x8x128xf32>
    %63 = vector.shape_cast %59 : vector<8x8x128xf32> to vector<1x8x8x128xf32>
    tpu.vector_store %arg5[%c0_44, %60, %c0_45, %c0_46], %63 {strides = array<i32>} : memref<1x8x8x128xf32, #tpu.memory_space<vmem>>, vector<1x8x8x128xf32>,
    %c1_i32_47 = arith.constant 1 : i32
    return
  }
  func.func @transform_0(%arg0: i32) -> (i32, i32, i32, i32) {
    %c0_i32 = arith.constant 0 : i32
    %c0_i32_0 = arith.constant 0 : i32
    %c0_i32_1 = arith.constant 0 : i32
    %c0_i32_2 = arith.constant 0 : i32
    return %arg0, %c0_i32, %c0_i32_0, %c0_i32_1 : i32, i32, i32, i32
  }
  func.func @transform_1(%arg0: i32) -> (i32, i32) {
    %c0_i32 = arith.constant 0 : i32
    %c0_i32_0 = arith.constant 0 : i32
    %c0_i32_1 = arith.constant 0 : i32
    return %c0_i32, %c0_i32_0 : i32, i32
  }
  func.func @transform_2(%arg0: i32) -> (i32, i32, i32) {
    %c0_i32 = arith.constant 0 : i32
    %c0_i32_0 = arith.constant 0 : i32
    %c0_i32_1 = arith.constant 0 : i32
    %c0_i32_2 = arith.constant 0 : i32
    return %c0_i32, %c0_i32_0, %c0_i32_1 : i32, i32, i32
  }
  func.func @transform_3(%arg0: i32) -> (i32, i32) {
    %c0_i32 = arith.constant 0 : i32
    %c0_i32_0 = arith.constant 0 : i32
    %c0_i32_1 = arith.constant 0 : i32
    return %c0_i32, %c0_i32_0 : i32, i32
  }
  func.func @transform_4(%arg0: i32) -> (i32, i32, i32, i32) {
    %c0_i32 = arith.constant 0 : i32
    %c0_i32_0 = arith.constant 0 : i32
    %c0_i32_1 = arith.constant 0 : i32
    %c0_i32_2 = arith.constant 0 : i32
    return %arg0, %c0_i32, %c0_i32_0, %c0_i32_1 : i32, i32, i32, i32
  }
}

module attributes {stable_mosaic.version = 11 : i64} {
  func.func @_bn_scale_shift_kernel(%arg0: i32, %arg1: memref<1x8x8x128xf32, #tpu.memory_space<vmem>>, %arg2: memref<1x128xf32, #tpu.memory_space<vmem>>, %arg3: memref<1x128xf32, #tpu.memory_space<vmem>>, %arg4: memref<2x128xf32, #tpu.memory_space<vmem>>) attributes {dimension_semantics = [#tpu.dimension_semantics<arbitrary>], iteration_bounds = array<i64: 2>, scalar_prefetch = 0 : i64, scratch_operands = 0 : i64, tpu.core_type = #tpu.core_type<tc>, window_params = [{transform_indices = @transform_0, window_bounds = array<i64: 1, 8, 8, 128>}, {pipeline_mode = #tpu.pipeline_mode<synchronous>, transform_indices = @transform_1, window_bounds = array<i64: 1, 128>}, {pipeline_mode = #tpu.pipeline_mode<synchronous>, transform_indices = @transform_2, window_bounds = array<i64: 1, 128>}, {pipeline_mode = #tpu.pipeline_mode<synchronous>, transform_indices = @transform_3, window_bounds = array<i64: 2, 128>}]} {
    %c0_i32 = arith.constant 0 : i32
    %0 = arith.cmpi eq, %arg0, %c0_i32 : i32
    %1 = arith.extui %0 : i1 to i32
    %c0_i32_0 = arith.constant 0 : i32
    %2 = arith.cmpi ne, %1, %c0_i32_0 : i32
    scf.if %2 {
      %cst_13 = arith.constant 0.000000e+00 : f32
      %21 = vector.broadcast %cst_13 : f32 to vector<2x128xf32>
      %c0_14 = arith.constant 0 : index
      %c0_15 = arith.constant 0 : index
      %22 = vector.load %arg4[%c0_14, %c0_15] : memref<2x128xf32, #tpu.memory_space<vmem>>, vector<2x128xf32>
      tpu.vector_store %arg4[%c0_14, %c0_15], %21 {strides = array<i32>} : memref<2x128xf32, #tpu.memory_space<vmem>>, vector<2x128xf32>,
    } else {
    }
    %c0 = arith.constant 0 : index
    %c0_1 = arith.constant 0 : index
    %c0_2 = arith.constant 0 : index
    %c0_3 = arith.constant 0 : index
    %3 = vector.load %arg1[%c0, %c0_1, %c0_2, %c0_3] : memref<1x8x8x128xf32, #tpu.memory_space<vmem>>, vector<1x8x8x128xf32>
    %4 = vector.shape_cast %3 : vector<1x8x8x128xf32> to vector<8x8x128xf32>
    %cst = arith.constant dense<0.000000e+00> : vector<128xf32>
    %5 = vector.multi_reduction <add>, %4, %cst [0, 1] : vector<8x8x128xf32> to vector<128xf32>
    %6 = vector.shape_cast %5 : vector<128xf32> to vector<1x1x128xf32>
    %7 = vector.shape_cast %6 : vector<1x1x128xf32> to vector<1x128xf32>
    %8 = arith.mulf %4, %4 : vector<8x8x128xf32>
    %cst_4 = arith.constant dense<0.000000e+00> : vector<128xf32>
    %9 = vector.multi_reduction <add>, %8, %cst_4 [0, 1] : vector<8x8x128xf32> to vector<128xf32>
    %10 = vector.shape_cast %9 : vector<128xf32> to vector<1x1x128xf32>
    %11 = vector.shape_cast %10 : vector<1x1x128xf32> to vector<1x128xf32>
    %c0_5 = arith.constant 0 : index
    %c0_6 = arith.constant 0 : index
    %12 = vector.load %arg4[%c0_5, %c0_6] : memref<2x128xf32, #tpu.memory_space<vmem>>, vector<1x128xf32>
    %13 = arith.addf %12, %7 : vector<1x128xf32>
    %c0_7 = arith.constant 0 : index
    %c0_8 = arith.constant 0 : index
    %14 = vector.load %arg4[%c0_7, %c0_8] : memref<2x128xf32, #tpu.memory_space<vmem>>, vector<1x128xf32>
    tpu.vector_store %arg4[%c0_7, %c0_8], %13 {strides = array<i32>} : memref<2x128xf32, #tpu.memory_space<vmem>>, vector<1x128xf32>,
    %c1 = arith.constant 1 : index
    %c0_9 = arith.constant 0 : index
    %15 = vector.load %arg4[%c1, %c0_9] : memref<2x128xf32, #tpu.memory_space<vmem>>, vector<1x128xf32>
    %16 = arith.addf %15, %11 : vector<1x128xf32>
    %c1_10 = arith.constant 1 : index
    %c0_11 = arith.constant 0 : index
    %17 = vector.load %arg4[%c1_10, %c0_11] : memref<2x128xf32, #tpu.memory_space<vmem>>, vector<1x128xf32>
    tpu.vector_store %arg4[%c1_10, %c0_11], %16 {strides = array<i32>} : memref<2x128xf32, #tpu.memory_space<vmem>>, vector<1x128xf32>,
    %c1_i32 = arith.constant 1 : i32
    %18 = arith.cmpi eq, %arg0, %c1_i32 : i32
    %19 = arith.extui %18 : i1 to i32
    %c0_i32_12 = arith.constant 0 : i32
    %20 = arith.cmpi ne, %19, %c0_i32_12 : i32
    scf.if %20 {
      %c0_13 = arith.constant 0 : index
      %c0_14 = arith.constant 0 : index
      %21 = vector.load %arg4[%c0_13, %c0_14] : memref<2x128xf32, #tpu.memory_space<vmem>>, vector<1x128xf32>
      %cst_15 = arith.constant 7.812500e-03 : f32
      %22 = vector.broadcast %cst_15 : f32 to vector<1x128xf32>
      %23 = arith.mulf %21, %22 : vector<1x128xf32>
      %c1_16 = arith.constant 1 : index
      %c0_17 = arith.constant 0 : index
      %24 = vector.load %arg4[%c1_16, %c0_17] : memref<2x128xf32, #tpu.memory_space<vmem>>, vector<1x128xf32>
      %cst_18 = arith.constant 7.812500e-03 : f32
      %25 = vector.broadcast %cst_18 : f32 to vector<1x128xf32>
      %26 = arith.mulf %24, %25 : vector<1x128xf32>
      %27 = arith.mulf %23, %23 : vector<1x128xf32>
      %28 = arith.subf %26, %27 : vector<1x128xf32>
      %cst_19 = arith.constant 0.000000e+00 : f32
      %29 = vector.broadcast %cst_19 : f32 to vector<1x128xf32>
      %30 = arith.maximumf %28, %29 : vector<1x128xf32>
      %c0_20 = arith.constant 0 : index
      %c0_21 = arith.constant 0 : index
      %31 = vector.load %arg2[%c0_20, %c0_21] : memref<1x128xf32, #tpu.memory_space<vmem>>, vector<1x128xf32>
      %cst_22 = arith.constant 8.000000e-01 : f32
      %32 = vector.broadcast %cst_22 : f32 to vector<1x128xf32>
      %33 = arith.addf %30, %32 : vector<1x128xf32>
      %34 = math.rsqrt %33 : vector<1x128xf32>
      %35 = arith.mulf %31, %34 : vector<1x128xf32>
      %c0_23 = arith.constant 0 : index
      %c0_24 = arith.constant 0 : index
      %36 = vector.load %arg3[%c0_23, %c0_24] : memref<1x128xf32, #tpu.memory_space<vmem>>, vector<1x128xf32>
      %37 = arith.mulf %23, %35 : vector<1x128xf32>
      %38 = arith.subf %36, %37 : vector<1x128xf32>
      %c0_25 = arith.constant 0 : index
      %c0_26 = arith.constant 0 : index
      %39 = vector.load %arg4[%c0_25, %c0_26] : memref<2x128xf32, #tpu.memory_space<vmem>>, vector<1x128xf32>
      tpu.vector_store %arg4[%c0_25, %c0_26], %35 {strides = array<i32>} : memref<2x128xf32, #tpu.memory_space<vmem>>, vector<1x128xf32>,
      %c1_27 = arith.constant 1 : index
      %c0_28 = arith.constant 0 : index
      %40 = vector.load %arg4[%c1_27, %c0_28] : memref<2x128xf32, #tpu.memory_space<vmem>>, vector<1x128xf32>
      tpu.vector_store %arg4[%c1_27, %c0_28], %38 {strides = array<i32>} : memref<2x128xf32, #tpu.memory_space<vmem>>, vector<1x128xf32>,
    } else {
    }
    return
  }
  func.func @transform_0(%arg0: i32) -> (i32, i32, i32, i32) {
    %c0_i32 = arith.constant 0 : i32
    %c0_i32_0 = arith.constant 0 : i32
    %c0_i32_1 = arith.constant 0 : i32
    %c0_i32_2 = arith.constant 0 : i32
    return %arg0, %c0_i32, %c0_i32_0, %c0_i32_1 : i32, i32, i32, i32
  }
  func.func @transform_1(%arg0: i32) -> (i32, i32) {
    %c0_i32 = arith.constant 0 : i32
    %c0_i32_0 = arith.constant 0 : i32
    %c0_i32_1 = arith.constant 0 : i32
    return %c0_i32, %c0_i32_0 : i32, i32
  }
  func.func @transform_2(%arg0: i32) -> (i32, i32) {
    %c0_i32 = arith.constant 0 : i32
    %c0_i32_0 = arith.constant 0 : i32
    %c0_i32_1 = arith.constant 0 : i32
    return %c0_i32, %c0_i32_0 : i32, i32
  }
  func.func @transform_3(%arg0: i32) -> (i32, i32) {
    %c0_i32 = arith.constant 0 : i32
    %c0_i32_0 = arith.constant 0 : i32
    %c0_i32_1 = arith.constant 0 : i32
    return %c0_i32, %c0_i32_0 : i32, i32
  }
}

module attributes {stable_mosaic.version = 11 : i64} {
  func.func @_fused_bn_up_conv_kernel(%arg0: i32, %arg1: memref<1x8x8x128xf32, #tpu.memory_space<vmem>>, %arg2: memref<2x128xf32, #tpu.memory_space<vmem>>, %arg3: memref<3x384x128xbf16, #tpu.memory_space<vmem>>, %arg4: memref<1x128xf32, #tpu.memory_space<vmem>>, %arg5: memref<1x16x16x128xf32, #tpu.memory_space<vmem>>, %arg6: memref<18x16x384xbf16, #tpu.memory_space<vmem>>) attributes {dimension_semantics = [#tpu.dimension_semantics<parallel>], iteration_bounds = array<i64: 2>, scalar_prefetch = 0 : i64, scratch_operands = 1 : i64, tpu.core_type = #tpu.core_type<tc>, window_params = [{transform_indices = @transform_0, window_bounds = array<i64: 1, 8, 8, 128>}, {pipeline_mode = #tpu.pipeline_mode<synchronous>, transform_indices = @transform_1, window_bounds = array<i64: 2, 128>}, {pipeline_mode = #tpu.pipeline_mode<synchronous>, transform_indices = @transform_2, window_bounds = array<i64: 3, 384, 128>}, {pipeline_mode = #tpu.pipeline_mode<synchronous>, transform_indices = @transform_3, window_bounds = array<i64: 1, 128>}, {transform_indices = @transform_4, window_bounds = array<i64: 1, 16, 16, 128>}]} {
    %c0 = arith.constant 0 : index
    %c0_0 = arith.constant 0 : index
    %0 = vector.load %arg2[%c0, %c0_0] : memref<2x128xf32, #tpu.memory_space<vmem>>, vector<1x128xf32>
    %c1 = arith.constant 1 : index
    %c0_1 = arith.constant 0 : index
    %1 = vector.load %arg2[%c1, %c0_1] : memref<2x128xf32, #tpu.memory_space<vmem>>, vector<1x128xf32>
    %c0_2 = arith.constant 0 : index
    %c0_3 = arith.constant 0 : index
    %c0_4 = arith.constant 0 : index
    %c0_5 = arith.constant 0 : index
    %2 = vector.load %arg1[%c0_2, %c0_3, %c0_4, %c0_5] : memref<1x8x8x128xf32, #tpu.memory_space<vmem>>, vector<1x8x8x128xf32>
    %3 = vector.shape_cast %2 : vector<1x8x8x128xf32> to vector<8x8x128xf32>
    %4 = vector.shape_cast %0 : vector<1x128xf32> to vector<1x1x128xf32>
    %5 = vector.broadcast %4 : vector<1x1x128xf32> to vector<8x8x128xf32>
    %6 = arith.mulf %3, %5 : vector<8x8x128xf32>
    %7 = vector.shape_cast %1 : vector<1x128xf32> to vector<1x1x128xf32>
    %8 = vector.broadcast %7 : vector<1x1x128xf32> to vector<8x8x128xf32>
    %9 = arith.addf %6, %8 : vector<8x8x128xf32>
    %cst = arith.constant 0.000000e+00 : f32
    %10 = vector.broadcast %cst : f32 to vector<8x8x128xf32>
    %11 = arith.cmpf oge, %9, %10 : vector<8x8x128xf32>
    %cst_6 = arith.constant 2.000000e-01 : f32
    %12 = vector.broadcast %cst_6 : f32 to vector<8x8x128xf32>
    %13 = arith.mulf %12, %9 : vector<8x8x128xf32>
    %14 = arith.select %11, %9, %13 : vector<8x8x128xi1>, vector<8x8x128xf32>
    %15 = arith.truncf %14 : vector<8x8x128xf32> to vector<8x8x128xbf16>
    %16 = vector.shape_cast %15 : vector<8x8x128xbf16> to vector<8x8x1x128xbf16>
    %17 = vector.shape_cast %16 : vector<8x8x1x128xbf16> to vector<8x8x1x128xbf16>
    %18 = vector.broadcast %17 : vector<8x8x1x128xbf16> to vector<8x8x2x128xbf16>
    %19 = vector.shape_cast %18 : vector<8x8x2x128xbf16> to vector<8x16x128xbf16>
    %20 = vector.shape_cast %19 : vector<8x16x128xbf16> to vector<8x1x16x128xbf16>
    %21 = vector.shape_cast %20 : vector<8x1x16x128xbf16> to vector<8x1x16x128xbf16>
    %22 = vector.broadcast %21 : vector<8x1x16x128xbf16> to vector<8x2x16x128xbf16>
    %23 = vector.shape_cast %22 : vector<8x2x16x128xbf16> to vector<16x16x128xbf16>
    %cst_7 = arith.constant 0.000000e+00 : bf16
    %24 = vector.broadcast %cst_7 : bf16 to vector<1x16x384xbf16>
    %c0_8 = arith.constant 0 : index
    %c0_9 = arith.constant 0 : index
    %c0_10 = arith.constant 0 : index
    %25 = vector.load %arg6[%c0_8, %c0_9, %c0_10] : memref<18x16x384xbf16, #tpu.memory_space<vmem>>, vector<1x16x384xbf16>
    tpu.vector_store %arg6[%c0_8, %c0_9, %c0_10], %24 {strides = array<i32>} : memref<18x16x384xbf16, #tpu.memory_space<vmem>>, vector<1x16x384xbf16>,
    %c17 = arith.constant 17 : index
    %c0_11 = arith.constant 0 : index
    %c0_12 = arith.constant 0 : index
    %26 = vector.load %arg6[%c17, %c0_11, %c0_12] : memref<18x16x384xbf16, #tpu.memory_space<vmem>>, vector<1x16x384xbf16>
    tpu.vector_store %arg6[%c17, %c0_11, %c0_12], %24 {strides = array<i32>} : memref<18x16x384xbf16, #tpu.memory_space<vmem>>, vector<1x16x384xbf16>,
    %cst_13 = arith.constant 0.000000e+00 : bf16
    %27 = vector.broadcast %cst_13 : bf16 to vector<16x1x128xbf16>
    %c1_14 = arith.constant 1 : index
    %c0_15 = arith.constant 0 : index
    %c0_16 = arith.constant 0 : index
    %28 = vector.load %arg6[%c1_14, %c0_15, %c0_16] : memref<18x16x384xbf16, #tpu.memory_space<vmem>>, vector<16x1x128xbf16>
    tpu.vector_store %arg6[%c1_14, %c0_15, %c0_16], %27 {strides = array<i32>} : memref<18x16x384xbf16, #tpu.memory_space<vmem>>, vector<16x1x128xbf16>,
    %c1_17 = arith.constant 1 : index
    %c15 = arith.constant 15 : index
    %c256 = arith.constant 256 : index
    %29 = vector.load %arg6[%c1_17, %c15, %c256] : memref<18x16x384xbf16, #tpu.memory_space<vmem>>, vector<16x1x128xbf16>
    tpu.vector_store %arg6[%c1_17, %c15, %c256], %27 {strides = array<i32>} : memref<18x16x384xbf16, #tpu.memory_space<vmem>>, vector<16x1x128xbf16>,
    %30 = vector.extract_strided_slice %23 {offsets = [0, 0, 0], sizes = [16, 15, 128], strides = [1, 1, 1]} : vector<16x16x128xbf16> to vector<16x15x128xbf16>
    %c1_18 = arith.constant 1 : index
    %c1_19 = arith.constant 1 : index
    %c0_20 = arith.constant 0 : index
    %31 = vector.load %arg6[%c1_18, %c1_19, %c0_20] : memref<18x16x384xbf16, #tpu.memory_space<vmem>>, vector<16x15x128xbf16>
    tpu.vector_store %arg6[%c1_18, %c1_19, %c0_20], %30 {strides = array<i32>} : memref<18x16x384xbf16, #tpu.memory_space<vmem>>, vector<16x15x128xbf16>,
    %c1_21 = arith.constant 1 : index
    %c0_22 = arith.constant 0 : index
    %c128 = arith.constant 128 : index
    %32 = vector.load %arg6[%c1_21, %c0_22, %c128] : memref<18x16x384xbf16, #tpu.memory_space<vmem>>, vector<16x16x128xbf16>
    tpu.vector_store %arg6[%c1_21, %c0_22, %c128], %23 {strides = array<i32>} : memref<18x16x384xbf16, #tpu.memory_space<vmem>>, vector<16x16x128xbf16>,
    %33 = vector.extract_strided_slice %23 {offsets = [0, 1, 0], sizes = [16, 15, 128], strides = [1, 1, 1]} : vector<16x16x128xbf16> to vector<16x15x128xbf16>
    %c1_23 = arith.constant 1 : index
    %c0_24 = arith.constant 0 : index
    %c256_25 = arith.constant 256 : index
    %34 = vector.load %arg6[%c1_23, %c0_24, %c256_25] : memref<18x16x384xbf16, #tpu.memory_space<vmem>>, vector<16x15x128xbf16>
    tpu.vector_store %arg6[%c1_23, %c0_24, %c256_25], %33 {strides = array<i32>} : memref<18x16x384xbf16, #tpu.memory_space<vmem>>, vector<16x15x128xbf16>,
    %c0_26 = arith.constant 0 : index
    %c0_27 = arith.constant 0 : index
    %35 = vector.load %arg4[%c0_26, %c0_27] : memref<1x128xf32, #tpu.memory_space<vmem>>, vector<1x128xf32>
    %36 = vector.shape_cast %35 : vector<1x128xf32> to vector<1x128xf32>
    %37 = vector.broadcast %36 : vector<1x128xf32> to vector<256x128xf32>
    %c0_i32 = arith.constant 0 : i32
    %c16_i32 = arith.constant 16 : i32
    %38 = arith.muli %c0_i32, %c16_i32 : i32
    %39 = tpu.assume_multiple %38, 16 : i32
    %c0_i32_28 = arith.constant 0 : i32
    %40 = arith.addi %39, %c0_i32_28 : i32
    %41 = arith.index_cast %40 : i32 to index
    %c0_29 = arith.constant 0 : index
    %c0_30 = arith.constant 0 : index
    %42 = vector.load %arg6[%41, %c0_29, %c0_30] : memref<18x16x384xbf16, #tpu.memory_space<vmem>>, vector<16x16x384xbf16>
    %43 = vector.shape_cast %42 : vector<16x16x384xbf16> to vector<256x384xbf16>
    %c0_31 = arith.constant 0 : index
    %c0_32 = arith.constant 0 : index
    %c0_33 = arith.constant 0 : index
    %44 = vector.load %arg3[%c0_31, %c0_32, %c0_33] : memref<3x384x128xbf16, #tpu.memory_space<vmem>>, vector<1x384x128xbf16>
    %45 = vector.shape_cast %44 : vector<1x384x128xbf16> to vector<384x128xbf16>
    %cst_34 = arith.constant dense<0.000000e+00> : vector<256x128xf32>
    %46 = tpu.matmul %43, %45, %cst_34 {dimension_numbers = #tpu.dot_dimension_numbers<[1], [0], [0], [1], [0, 0, 1, 1], [], []>} : vector<256x384xbf16>, vector<384x128xbf16>, vector<256x128xf32> -> vector<256x128xf32>
    %47 = arith.addf %37, %46 : vector<256x128xf32>
    %c1_i32 = arith.constant 1 : i32
    %48 = arith.addi %39, %c1_i32 : i32
    %49 = arith.index_cast %48 : i32 to index
    %c0_35 = arith.constant 0 : index
    %c0_36 = arith.constant 0 : index
    %50 = vector.load %arg6[%49, %c0_35, %c0_36] : memref<18x16x384xbf16, #tpu.memory_space<vmem>>, vector<16x16x384xbf16>
    %51 = vector.shape_cast %50 : vector<16x16x384xbf16> to vector<256x384xbf16>
    %c1_37 = arith.constant 1 : index
    %c0_38 = arith.constant 0 : index
    %c0_39 = arith.constant 0 : index
    %52 = vector.load %arg3[%c1_37, %c0_38, %c0_39] : memref<3x384x128xbf16, #tpu.memory_space<vmem>>, vector<1x384x128xbf16>
    %53 = vector.shape_cast %52 : vector<1x384x128xbf16> to vector<384x128xbf16>
    %cst_40 = arith.constant dense<0.000000e+00> : vector<256x128xf32>
    %54 = tpu.matmul %51, %53, %cst_40 {dimension_numbers = #tpu.dot_dimension_numbers<[1], [0], [0], [1], [0, 0, 1, 1], [], []>} : vector<256x384xbf16>, vector<384x128xbf16>, vector<256x128xf32> -> vector<256x128xf32>
    %55 = arith.addf %47, %54 : vector<256x128xf32>
    %c2_i32 = arith.constant 2 : i32
    %56 = arith.addi %39, %c2_i32 : i32
    %57 = arith.index_cast %56 : i32 to index
    %c0_41 = arith.constant 0 : index
    %c0_42 = arith.constant 0 : index
    %58 = vector.load %arg6[%57, %c0_41, %c0_42] : memref<18x16x384xbf16, #tpu.memory_space<vmem>>, vector<16x16x384xbf16>
    %59 = vector.shape_cast %58 : vector<16x16x384xbf16> to vector<256x384xbf16>
    %c2 = arith.constant 2 : index
    %c0_43 = arith.constant 0 : index
    %c0_44 = arith.constant 0 : index
    %60 = vector.load %arg3[%c2, %c0_43, %c0_44] : memref<3x384x128xbf16, #tpu.memory_space<vmem>>, vector<1x384x128xbf16>
    %61 = vector.shape_cast %60 : vector<1x384x128xbf16> to vector<384x128xbf16>
    %cst_45 = arith.constant dense<0.000000e+00> : vector<256x128xf32>
    %62 = tpu.matmul %59, %61, %cst_45 {dimension_numbers = #tpu.dot_dimension_numbers<[1], [0], [0], [1], [0, 0, 1, 1], [], []>} : vector<256x384xbf16>, vector<384x128xbf16>, vector<256x128xf32> -> vector<256x128xf32>
    %63 = arith.addf %55, %62 : vector<256x128xf32>
    %64 = vector.shape_cast %63 : vector<256x128xf32> to vector<16x16x128xf32>
    %c0_46 = arith.constant 0 : index
    %65 = arith.index_cast %39 : i32 to index
    %c0_47 = arith.constant 0 : index
    %c0_48 = arith.constant 0 : index
    %66 = vector.load %arg5[%c0_46, %65, %c0_47, %c0_48] : memref<1x16x16x128xf32, #tpu.memory_space<vmem>>, vector<1x16x16x128xf32>
    %67 = vector.shape_cast %66 : vector<1x16x16x128xf32> to vector<16x16x128xf32>
    %68 = vector.shape_cast %64 : vector<16x16x128xf32> to vector<1x16x16x128xf32>
    tpu.vector_store %arg5[%c0_46, %65, %c0_47, %c0_48], %68 {strides = array<i32>} : memref<1x16x16x128xf32, #tpu.memory_space<vmem>>, vector<1x16x16x128xf32>,
    %c1_i32_49 = arith.constant 1 : i32
    return
  }
  func.func @transform_0(%arg0: i32) -> (i32, i32, i32, i32) {
    %c0_i32 = arith.constant 0 : i32
    %c0_i32_0 = arith.constant 0 : i32
    %c0_i32_1 = arith.constant 0 : i32
    %c0_i32_2 = arith.constant 0 : i32
    return %arg0, %c0_i32, %c0_i32_0, %c0_i32_1 : i32, i32, i32, i32
  }
  func.func @transform_1(%arg0: i32) -> (i32, i32) {
    %c0_i32 = arith.constant 0 : i32
    %c0_i32_0 = arith.constant 0 : i32
    %c0_i32_1 = arith.constant 0 : i32
    return %c0_i32, %c0_i32_0 : i32, i32
  }
  func.func @transform_2(%arg0: i32) -> (i32, i32, i32) {
    %c0_i32 = arith.constant 0 : i32
    %c0_i32_0 = arith.constant 0 : i32
    %c0_i32_1 = arith.constant 0 : i32
    %c0_i32_2 = arith.constant 0 : i32
    return %c0_i32, %c0_i32_0, %c0_i32_1 : i32, i32, i32
  }
  func.func @transform_3(%arg0: i32) -> (i32, i32) {
    %c0_i32 = arith.constant 0 : i32
    %c0_i32_0 = arith.constant 0 : i32
    %c0_i32_1 = arith.constant 0 : i32
    return %c0_i32, %c0_i32_0 : i32, i32
  }
  func.func @transform_4(%arg0: i32) -> (i32, i32, i32, i32) {
    %c0_i32 = arith.constant 0 : i32
    %c0_i32_0 = arith.constant 0 : i32
    %c0_i32_1 = arith.constant 0 : i32
    %c0_i32_2 = arith.constant 0 : i32
    return %arg0, %c0_i32, %c0_i32_0, %c0_i32_1 : i32, i32, i32, i32
  }
}

module attributes {stable_mosaic.version = 11 : i64} {
  func.func @_bn_scale_shift_kernel(%arg0: i32, %arg1: memref<1x16x16x128xf32, #tpu.memory_space<vmem>>, %arg2: memref<1x128xf32, #tpu.memory_space<vmem>>, %arg3: memref<1x128xf32, #tpu.memory_space<vmem>>, %arg4: memref<2x128xf32, #tpu.memory_space<vmem>>) attributes {dimension_semantics = [#tpu.dimension_semantics<arbitrary>], iteration_bounds = array<i64: 2>, scalar_prefetch = 0 : i64, scratch_operands = 0 : i64, tpu.core_type = #tpu.core_type<tc>, window_params = [{transform_indices = @transform_0, window_bounds = array<i64: 1, 16, 16, 128>}, {pipeline_mode = #tpu.pipeline_mode<synchronous>, transform_indices = @transform_1, window_bounds = array<i64: 1, 128>}, {pipeline_mode = #tpu.pipeline_mode<synchronous>, transform_indices = @transform_2, window_bounds = array<i64: 1, 128>}, {pipeline_mode = #tpu.pipeline_mode<synchronous>, transform_indices = @transform_3, window_bounds = array<i64: 2, 128>}]} {
    %c0_i32 = arith.constant 0 : i32
    %0 = arith.cmpi eq, %arg0, %c0_i32 : i32
    %1 = arith.extui %0 : i1 to i32
    %c0_i32_0 = arith.constant 0 : i32
    %2 = arith.cmpi ne, %1, %c0_i32_0 : i32
    scf.if %2 {
      %cst_13 = arith.constant 0.000000e+00 : f32
      %21 = vector.broadcast %cst_13 : f32 to vector<2x128xf32>
      %c0_14 = arith.constant 0 : index
      %c0_15 = arith.constant 0 : index
      %22 = vector.load %arg4[%c0_14, %c0_15] : memref<2x128xf32, #tpu.memory_space<vmem>>, vector<2x128xf32>
      tpu.vector_store %arg4[%c0_14, %c0_15], %21 {strides = array<i32>} : memref<2x128xf32, #tpu.memory_space<vmem>>, vector<2x128xf32>,
    } else {
    }
    %c0 = arith.constant 0 : index
    %c0_1 = arith.constant 0 : index
    %c0_2 = arith.constant 0 : index
    %c0_3 = arith.constant 0 : index
    %3 = vector.load %arg1[%c0, %c0_1, %c0_2, %c0_3] : memref<1x16x16x128xf32, #tpu.memory_space<vmem>>, vector<1x16x16x128xf32>
    %4 = vector.shape_cast %3 : vector<1x16x16x128xf32> to vector<16x16x128xf32>
    %cst = arith.constant dense<0.000000e+00> : vector<128xf32>
    %5 = vector.multi_reduction <add>, %4, %cst [0, 1] : vector<16x16x128xf32> to vector<128xf32>
    %6 = vector.shape_cast %5 : vector<128xf32> to vector<1x1x128xf32>
    %7 = vector.shape_cast %6 : vector<1x1x128xf32> to vector<1x128xf32>
    %8 = arith.mulf %4, %4 : vector<16x16x128xf32>
    %cst_4 = arith.constant dense<0.000000e+00> : vector<128xf32>
    %9 = vector.multi_reduction <add>, %8, %cst_4 [0, 1] : vector<16x16x128xf32> to vector<128xf32>
    %10 = vector.shape_cast %9 : vector<128xf32> to vector<1x1x128xf32>
    %11 = vector.shape_cast %10 : vector<1x1x128xf32> to vector<1x128xf32>
    %c0_5 = arith.constant 0 : index
    %c0_6 = arith.constant 0 : index
    %12 = vector.load %arg4[%c0_5, %c0_6] : memref<2x128xf32, #tpu.memory_space<vmem>>, vector<1x128xf32>
    %13 = arith.addf %12, %7 : vector<1x128xf32>
    %c0_7 = arith.constant 0 : index
    %c0_8 = arith.constant 0 : index
    %14 = vector.load %arg4[%c0_7, %c0_8] : memref<2x128xf32, #tpu.memory_space<vmem>>, vector<1x128xf32>
    tpu.vector_store %arg4[%c0_7, %c0_8], %13 {strides = array<i32>} : memref<2x128xf32, #tpu.memory_space<vmem>>, vector<1x128xf32>,
    %c1 = arith.constant 1 : index
    %c0_9 = arith.constant 0 : index
    %15 = vector.load %arg4[%c1, %c0_9] : memref<2x128xf32, #tpu.memory_space<vmem>>, vector<1x128xf32>
    %16 = arith.addf %15, %11 : vector<1x128xf32>
    %c1_10 = arith.constant 1 : index
    %c0_11 = arith.constant 0 : index
    %17 = vector.load %arg4[%c1_10, %c0_11] : memref<2x128xf32, #tpu.memory_space<vmem>>, vector<1x128xf32>
    tpu.vector_store %arg4[%c1_10, %c0_11], %16 {strides = array<i32>} : memref<2x128xf32, #tpu.memory_space<vmem>>, vector<1x128xf32>,
    %c1_i32 = arith.constant 1 : i32
    %18 = arith.cmpi eq, %arg0, %c1_i32 : i32
    %19 = arith.extui %18 : i1 to i32
    %c0_i32_12 = arith.constant 0 : i32
    %20 = arith.cmpi ne, %19, %c0_i32_12 : i32
    scf.if %20 {
      %c0_13 = arith.constant 0 : index
      %c0_14 = arith.constant 0 : index
      %21 = vector.load %arg4[%c0_13, %c0_14] : memref<2x128xf32, #tpu.memory_space<vmem>>, vector<1x128xf32>
      %cst_15 = arith.constant 0.001953125 : f32
      %22 = vector.broadcast %cst_15 : f32 to vector<1x128xf32>
      %23 = arith.mulf %21, %22 : vector<1x128xf32>
      %c1_16 = arith.constant 1 : index
      %c0_17 = arith.constant 0 : index
      %24 = vector.load %arg4[%c1_16, %c0_17] : memref<2x128xf32, #tpu.memory_space<vmem>>, vector<1x128xf32>
      %cst_18 = arith.constant 0.001953125 : f32
      %25 = vector.broadcast %cst_18 : f32 to vector<1x128xf32>
      %26 = arith.mulf %24, %25 : vector<1x128xf32>
      %27 = arith.mulf %23, %23 : vector<1x128xf32>
      %28 = arith.subf %26, %27 : vector<1x128xf32>
      %cst_19 = arith.constant 0.000000e+00 : f32
      %29 = vector.broadcast %cst_19 : f32 to vector<1x128xf32>
      %30 = arith.maximumf %28, %29 : vector<1x128xf32>
      %c0_20 = arith.constant 0 : index
      %c0_21 = arith.constant 0 : index
      %31 = vector.load %arg2[%c0_20, %c0_21] : memref<1x128xf32, #tpu.memory_space<vmem>>, vector<1x128xf32>
      %cst_22 = arith.constant 8.000000e-01 : f32
      %32 = vector.broadcast %cst_22 : f32 to vector<1x128xf32>
      %33 = arith.addf %30, %32 : vector<1x128xf32>
      %34 = math.rsqrt %33 : vector<1x128xf32>
      %35 = arith.mulf %31, %34 : vector<1x128xf32>
      %c0_23 = arith.constant 0 : index
      %c0_24 = arith.constant 0 : index
      %36 = vector.load %arg3[%c0_23, %c0_24] : memref<1x128xf32, #tpu.memory_space<vmem>>, vector<1x128xf32>
      %37 = arith.mulf %23, %35 : vector<1x128xf32>
      %38 = arith.subf %36, %37 : vector<1x128xf32>
      %c0_25 = arith.constant 0 : index
      %c0_26 = arith.constant 0 : index
      %39 = vector.load %arg4[%c0_25, %c0_26] : memref<2x128xf32, #tpu.memory_space<vmem>>, vector<1x128xf32>
      tpu.vector_store %arg4[%c0_25, %c0_26], %35 {strides = array<i32>} : memref<2x128xf32, #tpu.memory_space<vmem>>, vector<1x128xf32>,
      %c1_27 = arith.constant 1 : index
      %c0_28 = arith.constant 0 : index
      %40 = vector.load %arg4[%c1_27, %c0_28] : memref<2x128xf32, #tpu.memory_space<vmem>>, vector<1x128xf32>
      tpu.vector_store %arg4[%c1_27, %c0_28], %38 {strides = array<i32>} : memref<2x128xf32, #tpu.memory_space<vmem>>, vector<1x128xf32>,
    } else {
    }
    return
  }
  func.func @transform_0(%arg0: i32) -> (i32, i32, i32, i32) {
    %c0_i32 = arith.constant 0 : i32
    %c0_i32_0 = arith.constant 0 : i32
    %c0_i32_1 = arith.constant 0 : i32
    %c0_i32_2 = arith.constant 0 : i32
    return %arg0, %c0_i32, %c0_i32_0, %c0_i32_1 : i32, i32, i32, i32
  }
  func.func @transform_1(%arg0: i32) -> (i32, i32) {
    %c0_i32 = arith.constant 0 : i32
    %c0_i32_0 = arith.constant 0 : i32
    %c0_i32_1 = arith.constant 0 : i32
    return %c0_i32, %c0_i32_0 : i32, i32
  }
  func.func @transform_2(%arg0: i32) -> (i32, i32) {
    %c0_i32 = arith.constant 0 : i32
    %c0_i32_0 = arith.constant 0 : i32
    %c0_i32_1 = arith.constant 0 : i32
    return %c0_i32, %c0_i32_0 : i32, i32
  }
  func.func @transform_3(%arg0: i32) -> (i32, i32) {
    %c0_i32 = arith.constant 0 : i32
    %c0_i32_0 = arith.constant 0 : i32
    %c0_i32_1 = arith.constant 0 : i32
    return %c0_i32, %c0_i32_0 : i32, i32
  }
}

module attributes {stable_mosaic.version = 11 : i64} {
  func.func @_fused_bn_up_conv_kernel(%arg0: i32, %arg1: memref<1x16x16x128xf32, #tpu.memory_space<vmem>>, %arg2: memref<2x128xf32, #tpu.memory_space<vmem>>, %arg3: memref<3x384x128xbf16, #tpu.memory_space<vmem>>, %arg4: memref<1x128xf32, #tpu.memory_space<vmem>>, %arg5: memref<1x16x16x128xbf16, #tpu.memory_space<vmem>>, %arg6: memref<18x16x384xbf16, #tpu.memory_space<vmem>>) attributes {dimension_semantics = [#tpu.dimension_semantics<parallel>], iteration_bounds = array<i64: 2>, scalar_prefetch = 0 : i64, scratch_operands = 1 : i64, tpu.core_type = #tpu.core_type<tc>, window_params = [{transform_indices = @transform_0, window_bounds = array<i64: 1, 16, 16, 128>}, {pipeline_mode = #tpu.pipeline_mode<synchronous>, transform_indices = @transform_1, window_bounds = array<i64: 2, 128>}, {pipeline_mode = #tpu.pipeline_mode<synchronous>, transform_indices = @transform_2, window_bounds = array<i64: 3, 384, 128>}, {pipeline_mode = #tpu.pipeline_mode<synchronous>, transform_indices = @transform_3, window_bounds = array<i64: 1, 128>}, {transform_indices = @transform_4, window_bounds = array<i64: 1, 16, 16, 128>}]} {
    %c0 = arith.constant 0 : index
    %c0_0 = arith.constant 0 : index
    %0 = vector.load %arg2[%c0, %c0_0] : memref<2x128xf32, #tpu.memory_space<vmem>>, vector<1x128xf32>
    %c1 = arith.constant 1 : index
    %c0_1 = arith.constant 0 : index
    %1 = vector.load %arg2[%c1, %c0_1] : memref<2x128xf32, #tpu.memory_space<vmem>>, vector<1x128xf32>
    %c0_2 = arith.constant 0 : index
    %c0_3 = arith.constant 0 : index
    %c0_4 = arith.constant 0 : index
    %c0_5 = arith.constant 0 : index
    %2 = vector.load %arg1[%c0_2, %c0_3, %c0_4, %c0_5] : memref<1x16x16x128xf32, #tpu.memory_space<vmem>>, vector<1x16x16x128xf32>
    %3 = vector.shape_cast %2 : vector<1x16x16x128xf32> to vector<16x16x128xf32>
    %4 = vector.shape_cast %0 : vector<1x128xf32> to vector<1x1x128xf32>
    %5 = vector.broadcast %4 : vector<1x1x128xf32> to vector<16x16x128xf32>
    %6 = arith.mulf %3, %5 : vector<16x16x128xf32>
    %7 = vector.shape_cast %1 : vector<1x128xf32> to vector<1x1x128xf32>
    %8 = vector.broadcast %7 : vector<1x1x128xf32> to vector<16x16x128xf32>
    %9 = arith.addf %6, %8 : vector<16x16x128xf32>
    %cst = arith.constant 0.000000e+00 : f32
    %10 = vector.broadcast %cst : f32 to vector<16x16x128xf32>
    %11 = arith.cmpf oge, %9, %10 : vector<16x16x128xf32>
    %cst_6 = arith.constant 2.000000e-01 : f32
    %12 = vector.broadcast %cst_6 : f32 to vector<16x16x128xf32>
    %13 = arith.mulf %12, %9 : vector<16x16x128xf32>
    %14 = arith.select %11, %9, %13 : vector<16x16x128xi1>, vector<16x16x128xf32>
    %15 = arith.truncf %14 : vector<16x16x128xf32> to vector<16x16x128xbf16>
    %cst_7 = arith.constant 0.000000e+00 : bf16
    %16 = vector.broadcast %cst_7 : bf16 to vector<1x16x384xbf16>
    %c0_8 = arith.constant 0 : index
    %c0_9 = arith.constant 0 : index
    %c0_10 = arith.constant 0 : index
    %17 = vector.load %arg6[%c0_8, %c0_9, %c0_10] : memref<18x16x384xbf16, #tpu.memory_space<vmem>>, vector<1x16x384xbf16>
    tpu.vector_store %arg6[%c0_8, %c0_9, %c0_10], %16 {strides = array<i32>} : memref<18x16x384xbf16, #tpu.memory_space<vmem>>, vector<1x16x384xbf16>,
    %c17 = arith.constant 17 : index
    %c0_11 = arith.constant 0 : index
    %c0_12 = arith.constant 0 : index
    %18 = vector.load %arg6[%c17, %c0_11, %c0_12] : memref<18x16x384xbf16, #tpu.memory_space<vmem>>, vector<1x16x384xbf16>
    tpu.vector_store %arg6[%c17, %c0_11, %c0_12], %16 {strides = array<i32>} : memref<18x16x384xbf16, #tpu.memory_space<vmem>>, vector<1x16x384xbf16>,
    %cst_13 = arith.constant 0.000000e+00 : bf16
    %19 = vector.broadcast %cst_13 : bf16 to vector<16x1x128xbf16>
    %c1_14 = arith.constant 1 : index
    %c0_15 = arith.constant 0 : index
    %c0_16 = arith.constant 0 : index
    %20 = vector.load %arg6[%c1_14, %c0_15, %c0_16] : memref<18x16x384xbf16, #tpu.memory_space<vmem>>, vector<16x1x128xbf16>
    tpu.vector_store %arg6[%c1_14, %c0_15, %c0_16], %19 {strides = array<i32>} : memref<18x16x384xbf16, #tpu.memory_space<vmem>>, vector<16x1x128xbf16>,
    %c1_17 = arith.constant 1 : index
    %c15 = arith.constant 15 : index
    %c256 = arith.constant 256 : index
    %21 = vector.load %arg6[%c1_17, %c15, %c256] : memref<18x16x384xbf16, #tpu.memory_space<vmem>>, vector<16x1x128xbf16>
    tpu.vector_store %arg6[%c1_17, %c15, %c256], %19 {strides = array<i32>} : memref<18x16x384xbf16, #tpu.memory_space<vmem>>, vector<16x1x128xbf16>,
    %22 = vector.extract_strided_slice %15 {offsets = [0, 0, 0], sizes = [16, 15, 128], strides = [1, 1, 1]} : vector<16x16x128xbf16> to vector<16x15x128xbf16>
    %c1_18 = arith.constant 1 : index
    %c1_19 = arith.constant 1 : index
    %c0_20 = arith.constant 0 : index
    %23 = vector.load %arg6[%c1_18, %c1_19, %c0_20] : memref<18x16x384xbf16, #tpu.memory_space<vmem>>, vector<16x15x128xbf16>
    tpu.vector_store %arg6[%c1_18, %c1_19, %c0_20], %22 {strides = array<i32>} : memref<18x16x384xbf16, #tpu.memory_space<vmem>>, vector<16x15x128xbf16>,
    %c1_21 = arith.constant 1 : index
    %c0_22 = arith.constant 0 : index
    %c128 = arith.constant 128 : index
    %24 = vector.load %arg6[%c1_21, %c0_22, %c128] : memref<18x16x384xbf16, #tpu.memory_space<vmem>>, vector<16x16x128xbf16>
    tpu.vector_store %arg6[%c1_21, %c0_22, %c128], %15 {strides = array<i32>} : memref<18x16x384xbf16, #tpu.memory_space<vmem>>, vector<16x16x128xbf16>,
    %25 = vector.extract_strided_slice %15 {offsets = [0, 1, 0], sizes = [16, 15, 128], strides = [1, 1, 1]} : vector<16x16x128xbf16> to vector<16x15x128xbf16>
    %c1_23 = arith.constant 1 : index
    %c0_24 = arith.constant 0 : index
    %c256_25 = arith.constant 256 : index
    %26 = vector.load %arg6[%c1_23, %c0_24, %c256_25] : memref<18x16x384xbf16, #tpu.memory_space<vmem>>, vector<16x15x128xbf16>
    tpu.vector_store %arg6[%c1_23, %c0_24, %c256_25], %25 {strides = array<i32>} : memref<18x16x384xbf16, #tpu.memory_space<vmem>>, vector<16x15x128xbf16>,
    %c0_26 = arith.constant 0 : index
    %c0_27 = arith.constant 0 : index
    %27 = vector.load %arg4[%c0_26, %c0_27] : memref<1x128xf32, #tpu.memory_space<vmem>>, vector<1x128xf32>
    %28 = vector.shape_cast %27 : vector<1x128xf32> to vector<1x128xf32>
    %29 = vector.broadcast %28 : vector<1x128xf32> to vector<256x128xf32>
    %c0_i32 = arith.constant 0 : i32
    %c16_i32 = arith.constant 16 : i32
    %30 = arith.muli %c0_i32, %c16_i32 : i32
    %31 = tpu.assume_multiple %30, 16 : i32
    %c0_i32_28 = arith.constant 0 : i32
    %32 = arith.addi %31, %c0_i32_28 : i32
    %33 = arith.index_cast %32 : i32 to index
    %c0_29 = arith.constant 0 : index
    %c0_30 = arith.constant 0 : index
    %34 = vector.load %arg6[%33, %c0_29, %c0_30] : memref<18x16x384xbf16, #tpu.memory_space<vmem>>, vector<16x16x384xbf16>
    %35 = vector.shape_cast %34 : vector<16x16x384xbf16> to vector<256x384xbf16>
    %c0_31 = arith.constant 0 : index
    %c0_32 = arith.constant 0 : index
    %c0_33 = arith.constant 0 : index
    %36 = vector.load %arg3[%c0_31, %c0_32, %c0_33] : memref<3x384x128xbf16, #tpu.memory_space<vmem>>, vector<1x384x128xbf16>
    %37 = vector.shape_cast %36 : vector<1x384x128xbf16> to vector<384x128xbf16>
    %cst_34 = arith.constant dense<0.000000e+00> : vector<256x128xf32>
    %38 = tpu.matmul %35, %37, %cst_34 {dimension_numbers = #tpu.dot_dimension_numbers<[1], [0], [0], [1], [0, 0, 1, 1], [], []>} : vector<256x384xbf16>, vector<384x128xbf16>, vector<256x128xf32> -> vector<256x128xf32>
    %39 = arith.addf %29, %38 : vector<256x128xf32>
    %c1_i32 = arith.constant 1 : i32
    %40 = arith.addi %31, %c1_i32 : i32
    %41 = arith.index_cast %40 : i32 to index
    %c0_35 = arith.constant 0 : index
    %c0_36 = arith.constant 0 : index
    %42 = vector.load %arg6[%41, %c0_35, %c0_36] : memref<18x16x384xbf16, #tpu.memory_space<vmem>>, vector<16x16x384xbf16>
    %43 = vector.shape_cast %42 : vector<16x16x384xbf16> to vector<256x384xbf16>
    %c1_37 = arith.constant 1 : index
    %c0_38 = arith.constant 0 : index
    %c0_39 = arith.constant 0 : index
    %44 = vector.load %arg3[%c1_37, %c0_38, %c0_39] : memref<3x384x128xbf16, #tpu.memory_space<vmem>>, vector<1x384x128xbf16>
    %45 = vector.shape_cast %44 : vector<1x384x128xbf16> to vector<384x128xbf16>
    %cst_40 = arith.constant dense<0.000000e+00> : vector<256x128xf32>
    %46 = tpu.matmul %43, %45, %cst_40 {dimension_numbers = #tpu.dot_dimension_numbers<[1], [0], [0], [1], [0, 0, 1, 1], [], []>} : vector<256x384xbf16>, vector<384x128xbf16>, vector<256x128xf32> -> vector<256x128xf32>
    %47 = arith.addf %39, %46 : vector<256x128xf32>
    %c2_i32 = arith.constant 2 : i32
    %48 = arith.addi %31, %c2_i32 : i32
    %49 = arith.index_cast %48 : i32 to index
    %c0_41 = arith.constant 0 : index
    %c0_42 = arith.constant 0 : index
    %50 = vector.load %arg6[%49, %c0_41, %c0_42] : memref<18x16x384xbf16, #tpu.memory_space<vmem>>, vector<16x16x384xbf16>
    %51 = vector.shape_cast %50 : vector<16x16x384xbf16> to vector<256x384xbf16>
    %c2 = arith.constant 2 : index
    %c0_43 = arith.constant 0 : index
    %c0_44 = arith.constant 0 : index
    %52 = vector.load %arg3[%c2, %c0_43, %c0_44] : memref<3x384x128xbf16, #tpu.memory_space<vmem>>, vector<1x384x128xbf16>
    %53 = vector.shape_cast %52 : vector<1x384x128xbf16> to vector<384x128xbf16>
    %cst_45 = arith.constant dense<0.000000e+00> : vector<256x128xf32>
    %54 = tpu.matmul %51, %53, %cst_45 {dimension_numbers = #tpu.dot_dimension_numbers<[1], [0], [0], [1], [0, 0, 1, 1], [], []>} : vector<256x384xbf16>, vector<384x128xbf16>, vector<256x128xf32> -> vector<256x128xf32>
    %55 = arith.addf %47, %54 : vector<256x128xf32>
    %56 = math.tanh %55 : vector<256x128xf32>
    %57 = vector.shape_cast %56 : vector<256x128xf32> to vector<16x16x128xf32>
    %58 = arith.truncf %57 : vector<16x16x128xf32> to vector<16x16x128xbf16>
    %c0_46 = arith.constant 0 : index
    %59 = arith.index_cast %31 : i32 to index
    %c0_47 = arith.constant 0 : index
    %c0_48 = arith.constant 0 : index
    %60 = vector.load %arg5[%c0_46, %59, %c0_47, %c0_48] : memref<1x16x16x128xbf16, #tpu.memory_space<vmem>>, vector<1x16x16x128xbf16>
    %61 = vector.shape_cast %60 : vector<1x16x16x128xbf16> to vector<16x16x128xbf16>
    %62 = vector.shape_cast %58 : vector<16x16x128xbf16> to vector<1x16x16x128xbf16>
    tpu.vector_store %arg5[%c0_46, %59, %c0_47, %c0_48], %62 {strides = array<i32>} : memref<1x16x16x128xbf16, #tpu.memory_space<vmem>>, vector<1x16x16x128xbf16>,
    %c1_i32_49 = arith.constant 1 : i32
    return
  }
  func.func @transform_0(%arg0: i32) -> (i32, i32, i32, i32) {
    %c0_i32 = arith.constant 0 : i32
    %c0_i32_0 = arith.constant 0 : i32
    %c0_i32_1 = arith.constant 0 : i32
    %c0_i32_2 = arith.constant 0 : i32
    return %arg0, %c0_i32, %c0_i32_0, %c0_i32_1 : i32, i32, i32, i32
  }
  func.func @transform_1(%arg0: i32) -> (i32, i32) {
    %c0_i32 = arith.constant 0 : i32
    %c0_i32_0 = arith.constant 0 : i32
    %c0_i32_1 = arith.constant 0 : i32
    return %c0_i32, %c0_i32_0 : i32, i32
  }
  func.func @transform_2(%arg0: i32) -> (i32, i32, i32) {
    %c0_i32 = arith.constant 0 : i32
    %c0_i32_0 = arith.constant 0 : i32
    %c0_i32_1 = arith.constant 0 : i32
    %c0_i32_2 = arith.constant 0 : i32
    return %c0_i32, %c0_i32_0, %c0_i32_1 : i32, i32, i32
  }
  func.func @transform_3(%arg0: i32) -> (i32, i32) {
    %c0_i32 = arith.constant 0 : i32
    %c0_i32_0 = arith.constant 0 : i32
    %c0_i32_1 = arith.constant 0 : i32
    return %c0_i32, %c0_i32_0 : i32, i32
  }
  func.func @transform_4(%arg0: i32) -> (i32, i32, i32, i32) {
    %c0_i32 = arith.constant 0 : i32
    %c0_i32_0 = arith.constant 0 : i32
    %c0_i32_1 = arith.constant 0 : i32
    %c0_i32_2 = arith.constant 0 : i32
    return %arg0, %c0_i32, %c0_i32_0, %c0_i32_1 : i32, i32, i32, i32
  }
}

</mosaic_0001>

<bundles_post_ra>
// kernel: generator_forward.8
= control target key start
LH: loop header
LB: loop body
LE: loop exit
PB: predicated region body
PF: predicated region fallthrough
CT: control target
= control target key end

     0   :  { %s301_s12 = smov 0   ;;  %s354_s0 = inlined_call_operand.vmem [shape: f32[2,4,4,128], index: 0, kind: input, shape index: {}]   ;;  %s355_s1 = inlined_call_operand.vmem [shape: f32[1,128], index: 1, kind: input, shape index: {}]   ;;  %s356_s2 = inlined_call_operand.vmem [shape: f32[1,128], index: 2, kind: input, shape index: {}]   ;;  %s357_s3 = inlined_call_operand.vmem [shape: f32[2,128], index: 3, kind: output, shape index: {}]  }
   0x1 LB: > { %s307_s13 = sadd.s32 4294967295, %s278_s12   ;;  %p253_p0 = scmp.ge.s32.totalorder %s278_s12, 1  ;;  %s278_s12 = sphi %s301_s12, %s13_s12  }
   0x2   : > { %p132_p1 = scmp.lt.s32.totalorder %s278_s12, 3 }
   0x4   : > { %p133_p2 = pnand %p253_p0, %p132_p1 }
   0x5   : > { %p151_p3 = scmp.lt.s32.totalorder (!%p133_p2), %s307_s13, 1  ;;  %p256_p4 = scmp.ne.s32.totalorder (!%p133_p2), %s307_s13, 0 }
   0x6   : > { %136 = sbr.rel (%p133_p2) target bundleno = 80 (0x50), region = 32 }
   0xd   : > { %s152_s14 = scalar_select %p151_p3, %s307_s13, 1 }
   0xe   : > { %159 = sbr.rel (%p256_p4) target bundleno = 21 (0x15), region = 36  ;;  %v280_v0 = vmov (!%p256_p4), 0.0  }
   0xf   : > { %s260_s15 = sshll.u32 %s152_s14, 4  ;;  %160 = vst [vmem:[%s357_s3] sm:$0x3] (!%p256_p4), %v280_v0 }
  0x10   : > { %s155_s18 = scalar_lea.vmem %s354_s0, %s260_s15 }
  0x15 PF: > { %v161_v1 = vld [vmem:[%s155_s18] sm:$0xf]  ;;  %v162_v2 = vld [vmem:[%s155_s18 + $0x4] sm:$0xf]  ;;  %v163_v3 = vld [vmem:[%s155_s18 + $0x8] sm:$0xf] }
  0x16   : > { %v164_v4 = vld [vmem:[%s155_s18 + $0xc] sm:$0xf]  ;;  %vm165_vm0 = vcmask 1043456   ;;  %v179_v5 = vmul.f32 %v161_v1, %v161_v1  ;;  %v180_v6 = vmul.f32 %v162_v2, %v162_v2  ;;  %v181_v7 = vmul.f32 %v163_v3, %v163_v3  ;;  %v196_v32 = vld [vmem:[%s357_s3] sm:$0x1]  ;;  %p257_p5 = scmp.ne.s32.totalorder %s307_s13, 1 }
  0x17   : > { %v166_v8 = vsel %vm165_vm0, %v161_v1, 0.0  ;;  %v167_v9 = vsel %vm165_vm0, %v162_v2, 0.0  ;;  %v169_v10 = vsel %vm165_vm0, %v163_v3, 0.0  ;;  %v182_v12 = vmul.f32 %v164_v4, %v164_v4  ;;  %v199_v35 = vld [vmem:[%s357_s3 + $0x1] sm:$0x1] }
  0x18   : > { %v168_v11 = vadd.f32 %v167_v9, %v166_v8  ;;  %v183_v13 = vsel %vm165_vm0, %v179_v5, 0.0  ;;  %v184_v14 = vsel %vm165_vm0, %v180_v6, 0.0  ;;  %v171_v15 = vsel %vm165_vm0, %v164_v4, 0.0  ;;  %v213_v47 = vld [vmem:[%s355_s1] sm:$0x1] (!%p257_p5) }
  0x19   : > { %v185_v16 = vadd.f32 %v184_v14, %v183_v13  ;;  %v186_v17 = vsel %vm165_vm0, %v181_v7, 0.0  ;;  %v188_v19 = vsel %vm165_vm0, %v182_v12, 0.0  ;;  %v217_v50 = vld [vmem:[%s356_s2] sm:$0x1] (!%p257_p5) }
  0x1a   : > { %v170_v18 = vadd.f32 %v169_v10, %v168_v11 }
  0x1b   : > { %v187_v20 = vadd.f32 %v186_v17, %v185_v16 }
  0x1c   : > { %v172_v21 = vadd.f32 %v171_v15, %v170_v18 }
  0x1d   : > { %v189_v22 = vadd.f32 %v188_v19, %v187_v20 }
  0x1e   : > { %v173_v23 = vrot.slane %v172_v21, 4 }
  0x1f   : > { %v190_v24 = vrot.slane %v189_v22, 4 }
  0x20   : > { %v174_v25 = vadd.f32 %v173_v23, %v172_v21 }
  0x21   : > { %v191_v26 = vadd.f32 %v190_v24, %v189_v22 }
  0x22   : > { %v175_v27 = vrot.slane %v174_v25, 2 }
  0x23   : > { %v192_v28 = vrot.slane %v191_v26, 2 }
  0x24   : > { %v176_v29 = vadd.f32 %v175_v27, %v174_v25 }
  0x25   : > { %v193_v30 = vadd.f32 %v192_v28, %v191_v26 }
  0x26   : > { %v177_v31 = vrot.slane %v176_v29, 1 }
  0x27   : > { %v194_v33 = vrot.slane %v193_v30, 1  ;;  %205 = sbr.rel (%p257_p5) target bundleno = 80 (0x50), region = 40 }
  0x28   : > { %v178_v34 = vadd.f32 %v177_v31, %v176_v29 }
  0x29   : > { %v195_v36 = vadd.f32 %v194_v33, %v193_v30 }
  0x2a   : > { %v197_v37 = vadd.f32 %v196_v32, %v178_v34 }
  0x2b   : > { %v200_v38 = vadd.f32 %v199_v35, %v195_v36 }
  0x2c   : > { %198 = vst [vmem:[%s357_s3] sm:$0x1] %v197_v37 }
  0x2d   : > { %201 = vst [vmem:[%s357_s3 + $0x1] sm:$0x1] %v200_v38 }
  0x33   : > { %v206_v39 = vld [vmem:[%s357_s3] sm:$0x1] }
  0x34   : > { %v208_v40 = vld [vmem:[%s357_s3 + $0x1] sm:$0x1]  ;;  %v207_v41 = vmul.f32 0.03125, %v206_v39 }
  0x35   : > { %v209_v42 = vmul.f32 0.03125, %v208_v40 }
  0x36   : > { %v210_v43 = vmul.f32 %v207_v41, %v207_v41 }
  0x38   : > { %v211_v44 = vsub.f32 %v209_v42, %v210_v43 }
  0x3a   : > { %v212_v45 = vmax.f32 %v211_v44, 0.0 }
  0x3c   : > { %v214_v46 = vadd.f32 1e-05, %v212_v45 }
  0x3e   : > { %270 = vrsqrt.f32 %v214_v46 }
  0x48   : > { %v271_v48 = vpop.eup %270 }
  0x49   : > { %v216_v49 = vmul.f32 %v271_v48, %v213_v47 }
  0x4b   : > { %220 = vst [vmem:[%s357_s3] sm:$0x1] %v216_v49  ;;  %v218_v51 = vmul.f32 %v216_v49, %v207_v41 }
  0x4d   : > { %v219_v52 = vsub.f32 %v217_v50, %v218_v51 }
  0x4f   : > { %221 = vst [vmem:[%s357_s3 + $0x1] sm:$0x1] %v219_v52 }
  0x50 PF: > { %s13_s12 = sadd.s32 1, %s278_s12  }
  0x51   : > { %p10_p6 = scmp.ge.s32.totalorder %s13_s12, 4  }
  0x53   :  { %12 = sbr.rel (!%p10_p6) target bundleno = 1 (0x1), region = 66 }

// kernel: generator_forward.10
= control target key start
LH: loop header
LB: loop body
LE: loop exit
PB: predicated region body
PF: predicated region fallthrough
CT: control target
= control target key end

     0   :  { %s308_s12 = smov 0   ;;  %s361_s0 = inlined_call_operand.vmem [shape: f32[2,8,8,128], index: 0, kind: input, shape index: {}]   ;;  %s362_s1 = inlined_call_operand.vmem [shape: f32[1,128], index: 1, kind: input, shape index: {}]   ;;  %s363_s2 = inlined_call_operand.vmem [shape: f32[1,128], index: 2, kind: input, shape index: {}]   ;;  %s364_s3 = inlined_call_operand.vmem [shape: f32[2,128], index: 3, kind: output, shape index: {}]  }
   0x1 LB: > { %s314_s13 = sadd.s32 4294967295, %s285_s12   ;;  %p260_p0 = scmp.ge.s32.totalorder %s285_s12, 1  ;;  %s285_s12 = sphi %s308_s12, %s13_s12  }
   0x2   : > { %p132_p1 = scmp.lt.s32.totalorder %s285_s12, 3 }
   0x4   : > { %p133_p2 = pnand %p260_p0, %p132_p1 }
   0x5   : > { %p151_p3 = scmp.lt.s32.totalorder (!%p133_p2), %s314_s13, 1  ;;  %p263_p4 = scmp.ne.s32.totalorder (!%p133_p2), %s314_s13, 0 }
   0x6   : > { %136 = sbr.rel (%p133_p2) target bundleno = 86 (0x56), region = 32 }
   0xd   : > { %s152_s14 = scalar_select %p151_p3, %s314_s13, 1 }
   0xe   : > { %159 = sbr.rel (%p263_p4) target bundleno = 21 (0x15), region = 36  ;;  %v287_v0 = vmov (!%p263_p4), 0.0  }
   0xf   : > { %s267_s15 = sshll.u32 %s152_s14, 6  ;;  %160 = vst [vmem:[%s364_s3] sm:$0x3] (!%p263_p4), %v287_v0 }
  0x10   : > { %s155_s18 = scalar_lea.vmem %s361_s0, %s267_s15 }
  0x15 PF: > { %v161_v1 = vld [vmem:[%s155_s18] sm:$0xff]  ;;  %v162_v2 = vld [vmem:[%s155_s18 + $0x8] sm:$0xff]  ;;  %v163_v3 = vld [vmem:[%s155_s18 + $0x10] sm:$0xff]  ;;  %p264_p5 = scmp.ne.s32.totalorder %s314_s13, 1 }
  0x16   : > { %v164_v4 = vld [vmem:[%s155_s18 + $0x18] sm:$0xff]  ;;  %v169_v5 = vadd.f32 %v162_v2, %v161_v1  ;;  %v182_v6 = vmul.f32 %v161_v1, %v161_v1  ;;  %v183_v7 = vmul.f32 %v162_v2, %v162_v2  ;;  %v184_v8 = vmul.f32 %v163_v3, %v163_v3  ;;  %v165_v9 = vld [vmem:[%s155_s18 + $0x20] sm:$0xff]  ;;  %v166_v13 = vld [vmem:[%s155_s18 + $0x28] sm:$0xff] }
  0x17   : > { %v185_v11 = vmul.f32 %v164_v4, %v164_v4  ;;  %v186_v15 = vmul.f32 %v165_v9, %v165_v9  ;;  %v167_v17 = vld [vmem:[%s155_s18 + $0x30] sm:$0xff]  ;;  %v187_v19 = vmul.f32 %v166_v13, %v166_v13  ;;  %v168_v21 = vld [vmem:[%s155_s18 + $0x38] sm:$0xff]  ;;  %v203_v40 = vld [vmem:[%s364_s3] sm:$0x1] }
  0x18   : > { %v170_v10 = vadd.f32 %v169_v5, %v163_v3  ;;  %v190_v12 = vadd.f32 %v183_v7, %v182_v6  ;;  %v188_v23 = vmul.f32 %v167_v17, %v167_v17  ;;  %v189_v26 = vmul.f32 %v168_v21, %v168_v21  ;;  %v206_v43 = vld [vmem:[%s364_s3 + $0x1] sm:$0x1]  ;;  %v220_v55 = vld [vmem:[%s362_s1] sm:$0x1] (!%p264_p5) }
  0x19   : > { %v224_v58 = vld [vmem:[%s363_s2] sm:$0x1] (!%p264_p5) }
  0x1a   : > { %v171_v14 = vadd.f32 %v170_v10, %v164_v4  ;;  %v191_v16 = vadd.f32 %v190_v12, %v184_v8 }
  0x1c   : > { %v172_v18 = vadd.f32 %v171_v14, %v165_v9  ;;  %v192_v20 = vadd.f32 %v191_v16, %v185_v11 }
  0x1e   : > { %v173_v22 = vadd.f32 %v172_v18, %v166_v13  ;;  %v193_v24 = vadd.f32 %v192_v20, %v186_v15 }
  0x20   : > { %v174_v25 = vadd.f32 %v173_v22, %v167_v17  ;;  %v194_v27 = vadd.f32 %v193_v24, %v187_v19 }
  0x22   : > { %v175_v28 = vadd.f32 %v174_v25, %v168_v21  ;;  %v195_v29 = vadd.f32 %v194_v27, %v188_v23 }
  0x24   : > { %v176_v30 = vrot.slane %v175_v28, 4  ;;  %v196_v31 = vadd.f32 %v195_v29, %v189_v26 }
  0x26   : > { %v177_v32 = vadd.f32 %v176_v30, %v175_v28  ;;  %v197_v33 = vrot.slane %v196_v31, 4 }
  0x28   : > { %v178_v34 = vrot.slane %v177_v32, 2  ;;  %v198_v35 = vadd.f32 %v197_v33, %v196_v31 }
  0x2a   : > { %v179_v36 = vadd.f32 %v178_v34, %v177_v32  ;;  %v199_v37 = vrot.slane %v198_v35, 2 }
  0x2c   : > { %v180_v38 = vrot.slane %v179_v36, 1  ;;  %v200_v39 = vadd.f32 %v199_v37, %v198_v35 }
  0x2e   : > { %v181_v41 = vadd.f32 %v180_v38, %v179_v36  ;;  %v201_v42 = vrot.slane %v200_v39, 1  ;;  %212 = sbr.rel (%p264_p5) target bundleno = 86 (0x56), region = 40 }
  0x30   : > { %v204_v44 = vadd.f32 %v203_v40, %v181_v41  ;;  %v202_v45 = vadd.f32 %v201_v42, %v200_v39 }
  0x32   : > { %205 = vst [vmem:[%s364_s3] sm:$0x1] %v204_v44  ;;  %v207_v46 = vadd.f32 %v206_v43, %v202_v45 }
  0x34   : > { %208 = vst [vmem:[%s364_s3 + $0x1] sm:$0x1] %v207_v46 }
  0x39   : > { %v213_v47 = vld [vmem:[%s364_s3] sm:$0x1] }
  0x3a   : > { %v214_v49 = vmul.f32 0.0078125, %v213_v47 }
  0x3b   : > { %v215_v48 = vld [vmem:[%s364_s3 + $0x1] sm:$0x1] }
  0x3c   : > { %v216_v50 = vmul.f32 0.0078125, %v215_v48  ;;  %v217_v51 = vmul.f32 %v214_v49, %v214_v49 }
  0x3e   : > { %v218_v52 = vsub.f32 %v216_v50, %v217_v51 }
  0x40   : > { %v219_v53 = vmax.f32 %v218_v52, 0.0 }
  0x42   : > { %v221_v54 = vadd.f32 0.8, %v219_v53 }
  0x44   : > { %277 = vrsqrt.f32 %v221_v54 }
  0x4e   : > { %v278_v56 = vpop.eup %277 }
  0x4f   : > { %v223_v57 = vmul.f32 %v278_v56, %v220_v55 }
  0x51   : > { %227 = vst [vmem:[%s364_s3] sm:$0x1] %v223_v57  ;;  %v225_v59 = vmul.f32 %v223_v57, %v214_v49 }
  0x53   : > { %v226_v60 = vsub.f32 %v224_v58, %v225_v59 }
  0x55   : > { %228 = vst [vmem:[%s364_s3 + $0x1] sm:$0x1] %v226_v60 }
  0x56 PF: > { %s13_s12 = sadd.s32 1, %s285_s12  }
  0x57   : > { %p10_p6 = scmp.ge.s32.totalorder %s13_s12, 4  }
  0x59   :  { %12 = sbr.rel (!%p10_p6) target bundleno = 1 (0x1), region = 66 }

// kernel: generator_forward.7
= control target key start
LH: loop header
LB: loop body
LE: loop exit
PB: predicated region body
PF: predicated region fallthrough
CT: control target
= control target key end

     0   :  { %vm135_vm0 = vcmask 1040384   ;;  %vm846_vm1 = vmmov 1   ;;  %v847_v3 = vmov 0.0   ;;  %vm131_vm3 = vcmask 72704   ;;  %s1083_s1 = inlined_call_operand.vmem [shape: f32[9,2048], index: 1, kind: input, shape index: {}]   ;;  %s1084_s0 = inlined_call_operand.vmem [shape: f32[8,9], index: 0, kind: input, shape index: {}]   ;;  %s1085_s2 = inlined_call_operand.vmem [shape: f32[1,2048], index: 2, kind: input, shape index: {}]   ;;  %s1086_s3 = inlined_call_operand.vmem [shape: f32[8,2048], index: 3, kind: output, shape index: {}]  }
   0x1   :  { %v16_v0 = vld [vmem:[%s1083_s1 + $0x8] sm:$0xff]  ;;  %vm874_vm2 = vmpackc.low %vm135_vm0, %vm846_vm1  ;;  %248 = vmatprep.mubr.f32.mxu0 %v847_v3  ;;  %319 = vmatprep.mubr.f32.mxu1 %v847_v3  ;;  %v18_v5 = vld [vmem:[%s1083_s1 + $0x18] sm:$0xff]  ;;  %v51_v51 = vlaneseq }
   0x2   :  { %v32_v1 = vld [vmem:[%s1083_s1 + $0x88] sm:$0x1]  ;;  %v34_v6 = vld [vmem:[%s1083_s1 + $0x98] sm:$0x1]  ;;  %v15_v7 = vld [vmem:[%s1083_s1] sm:$0xff] }
   0x3   :  { %v796_v4 = vpack.c.bf16 %v32_v1, %v16_v0  ;;  %v802_v8 = vpack.c.bf16 %v34_v6, %v18_v5  ;;  %v31_v9 = vld [vmem:[%s1083_s1 + $0x80] sm:$0x1]  ;;  %v17_v10 = vld [vmem:[%s1083_s1 + $0x10] sm:$0xff]  ;;  %v20_v15 = vld [vmem:[%s1083_s1 + $0x28] sm:$0xff]  ;;  %v52_v52 = vshrl.u32 %v51_v51, 7 }
   0x4   :  { %v33_v11 = vld [vmem:[%s1083_s1 + $0x90] sm:$0x1]  ;;  %v799_v12 = vpack.c.bf16 %v31_v9, %v15_v7  ;;  %v903_v14 = vld [vmem:[%s1084_s0] sm:$0xff]  ;;  %v36_v16 = vld [vmem:[%s1083_s1 + $0xa8] sm:$0x1] }
   0x5   :  { %798 = vmatprep.subr.msk.bf16.mxu0 %vm874_vm2, %v796_v4  ;;  %v805_v13 = vpack.c.bf16 %v33_v11, %v17_v10  ;;  %804 = vmatprep.subr.msk.bf16.mxu1 %vm874_vm2, %v802_v8  ;;  %v808_v17 = vpack.c.bf16 %v36_v16, %v20_v15  ;;  %v22_v18 = vld [vmem:[%s1083_s1 + $0x38] sm:$0xff]  ;;  %v19_v20 = vld [vmem:[%s1083_s1 + $0x20] sm:$0xff]  ;;  %v21_v23 = vld [vmem:[%s1083_s1 + $0x30] sm:$0xff]  ;;  %v53_v53 = vsub.s32 0, %v52_v52  ;;  %v61_v54 = vsub.s32 2, %v52_v52 }
   0x6   :  { %v38_v19 = vld [vmem:[%s1083_s1 + $0xb8] sm:$0x1]  ;;  %801 = vmatpush1.bf16.msk.msra.mxu0 %vm874_vm2, %v799_v12  ;;  %v35_v22 = vld [vmem:[%s1083_s1 + $0xa0] sm:$0x1]  ;;  %v37_v24 = vld [vmem:[%s1083_s1 + $0xb0] sm:$0x1] }
   0x7   :  { %807 = vmatpush1.bf16.msk.msra.mxu1 %vm874_vm2, %v805_v13  ;;  %v814_v21 = vpack.c.bf16 %v38_v19, %v22_v18  ;;  %810 = vmatprep.subr.msk.bf16.mxu0 %vm874_vm2, %v808_v17  ;;  %v811_v25 = vpack.c.bf16 %v35_v22, %v19_v20  ;;  %v817_v26 = vpack.c.bf16 %v37_v24, %v21_v23  ;;  %v24_v27 = vld [vmem:[%s1083_s1 + $0x48] sm:$0xff]  ;;  %v26_v29 = vld [vmem:[%s1083_s1 + $0x58] sm:$0xff]  ;;  %v23_v32 = vld [vmem:[%s1083_s1 + $0x40] sm:$0xff]  ;;  %v57_v56 = vsub.s32 1, %v52_v52 }
   0x8   :  { %v40_v28 = vld [vmem:[%s1083_s1 + $0xc8] sm:$0x1]  ;;  %v42_v31 = vld [vmem:[%s1083_s1 + $0xd8] sm:$0x1]  ;;  %v39_v33 = vld [vmem:[%s1083_s1 + $0xc0] sm:$0x1] }
   0x9   :  { %816 = vmatprep.subr.msk.bf16.mxu1 %vm874_vm2, %v814_v21  ;;  %v820_v30 = vpack.c.bf16 %v40_v28, %v24_v27  ;;  %774 = vmatmul.mubr.msk.f32.vlgmr.msra.gmra.mrb[0].mxu0 %vm131_vm3, %v903_v14  ;;  %v826_v34 = vpack.c.bf16 %v42_v31, %v26_v29  ;;  %v25_v35 = vld [vmem:[%s1083_s1 + $0x50] sm:$0xff]  ;;  %v28_v37 = vld [vmem:[%s1083_s1 + $0x68] sm:$0xff]  ;;  %v823_v38 = vpack.c.bf16 %v39_v33, %v23_v32  ;;  %v30_v41 = vld [vmem:[%s1083_s1 + $0x78] sm:$0xff]  ;;  %v65_v57 = vsub.s32 3, %v52_v52 }
   0xa   :  { %777 = vmatmul.mubr.msk.f32.vlgmr.msra.gmra.mrb[0].mxu1 %vm131_vm3, %v903_v14  ;;  %v41_v36 = vld [vmem:[%s1083_s1 + $0xd0] sm:$0x1]  ;;  %813 = vmatpush1.bf16.msk.msra.mxu0 %vm874_vm2, %v811_v25  ;;  %v44_v40 = vld [vmem:[%s1083_s1 + $0xe8] sm:$0x1]  ;;  %v46_v42 = vld [vmem:[%s1083_s1 + $0xf8] sm:$0x1] }
   0xb   :  { %819 = vmatpush1.bf16.msk.msra.mxu1 %vm874_vm2, %v817_v26  ;;  %v829_v39 = vpack.c.bf16 %v41_v36, %v25_v35  ;;  %390 = vmatprep.mubr.f32.mxu0 %v847_v3  ;;  %v27_v43 = vld [vmem:[%s1083_s1 + $0x60] sm:$0xff]  ;;  %v29_v45 = vld [vmem:[%s1083_s1 + $0x70] sm:$0xff]  ;;  %v832_v46 = vpack.c.bf16 %v44_v40, %v28_v37  ;;  %v838_v47 = vpack.c.bf16 %v46_v42, %v30_v41  ;;  %v69_v60 = vsub.s32 4, %v52_v52 }
   0xc   :  { %461 = vmatprep.mubr.f32.mxu1 %v847_v3  ;;  %v43_v44 = vld [vmem:[%s1083_s1 + $0xe0] sm:$0x1]  ;;  %822 = vmatprep.subr.msk.bf16.mxu0 %vm874_vm2, %v820_v30  ;;  %v45_v48 = vld [vmem:[%s1083_s1 + $0xf0] sm:$0x1]  ;;  %v77_v61 = vsub.s32 6, %v52_v52  ;;  %v73_v0 = vsub.s32 5, %v52_v52 }
   0xd   :  { %828 = vmatprep.subr.msk.bf16.mxu1 %vm874_vm2, %v826_v34  ;;  %780 = vmatmul.mubr.msk.f32.vlgmr.msra.gmra.mrb[2].mxu0 %vm131_vm3, %v903_v14  ;;  %v835_v49 = vpack.c.bf16 %v43_v44, %v27_v43  ;;  %v841_v50 = vpack.c.bf16 %v45_v48, %v29_v45  ;;  %v47_v55 = vld [vmem:[%s1085_s2] sm:$0xff]  ;;  %v81_v1 = vsub.s32 7, %v52_v52 }
   0xe   :  { %783 = vmatmul.mubr.msk.f32.vlgmr.msra.gmra.mrb[2].mxu1 %vm131_vm3, %v903_v14  ;;  %825 = vmatpush1.bf16.msk.msra.mxu0 %vm874_vm2, %v823_v38  ;;  %v54_v58 = vrot.slane %v47_v55, %v53_v53  ;;  %v62_v59 = vrot.slane %v47_v55, %v61_v54  ;;  %v58_v62 = vrot.slane %v47_v55, %v57_v56 }
   0xf   :  { %831 = vmatpush1.bf16.msk.msra.mxu1 %vm874_vm2, %v829_v39  ;;  %532 = vmatprep.mubr.f32.mxu0 %v847_v3  ;;  %v66_v63 = vrot.slane %v47_v55, %v65_v57  ;;  %v70_v8 = vrot.slane %v47_v55, %v69_v60  ;;  %v78_v9 = vrot.slane %v47_v55, %v77_v61 }
  0x10   :  { %603 = vmatprep.mubr.f32.mxu1 %v847_v3  ;;  %834 = vmatprep.subr.msk.bf16.mxu0 %vm874_vm2, %v832_v46  ;;  %v74_v12 = vrot.slane %v47_v55, %v73_v0  ;;  %v82_v13 = vrot.slane %v47_v55, %v81_v1 }
  0x11   :  { %840 = vmatprep.subr.msk.bf16.mxu1 %vm874_vm2, %v838_v47  ;;  %786 = vmatmul.mubr.msk.f32.vlgmr.msra.gmra.mrb[4].mxu0 %vm131_vm3, %v903_v14 }
  0x12   :  { %789 = vmatmul.mubr.msk.f32.vlgmr.msra.gmra.mrb[4].mxu1 %vm131_vm3, %v903_v14  ;;  %837 = vmatpush1.bf16.msk.msra.mxu0 %vm874_vm2, %v835_v49 }
  0x13   :  { %843 = vmatpush1.bf16.msk.msra.mxu1 %vm874_vm2, %v841_v50  ;;  %674 = vmatprep.mubr.f32.mxu0 %v847_v3 }
  0x14   :  { %745 = vmatprep.mubr.f32.mxu1 %v847_v3 }
  0x15   :  { %792 = vmatmul.mubr.msk.f32.vlgmr.msra.gmra.mrb[6].mxu0 %vm131_vm3, %v903_v14 }
  0x16   :  { %795 = vmatmul.mubr.msk.f32.vlgmr.msra.gmra.mrb[6].mxu1 %vm131_vm3, %v903_v14  ;;  %v48_v14 = vld [vmem:[%s1085_s2 + $0x8] sm:$0xff] }
  0x17   :  { %v86_v21 = vrot.slane %v48_v14, %v53_v53  ;;  %v94_v22 = vrot.slane %v48_v14, %v61_v54  ;;  %v90_v25 = vrot.slane %v48_v14, %v57_v56  ;;  %v98_v26 = vrot.slane %v48_v14, %v65_v57 }
  0x18   :  { %v102_v33 = vrot.slane %v48_v14, %v69_v60  ;;  %v110_v34 = vrot.slane %v48_v14, %v77_v61  ;;  %v106_v37 = vrot.slane %v48_v14, %v73_v0  ;;  %v114_v38 = vrot.slane %v48_v14, %v81_v1 }
  0xdc   :  { %v250_v2 = vpop.f32.mrb[0].mxu0 }
  0xdd   :  { %v321_v3 = vpop.f32.mrb[0].mxu1  ;;  %v251_v4 = vadd.f32 %v250_v2, %v54_v58  ;;  %v252_v6 = vpop.f32.mrb[1].mxu0 }
  0xde   :  { %v322_v5 = vadd.f32 %v321_v3, %v62_v59  ;;  %v323_v7 = vpop.f32.mrb[1].mxu1  ;;  %v253_v10 = vadd.f32 %v252_v6, %v58_v62 }
  0xdf   :  { %v324_v11 = vadd.f32 %v323_v7, %v66_v63  ;;  %752 = vst [vmem:[%s1086_s3] sm:$0xff] %v251_v4 }
  0xe0   :  { %754 = vst [vmem:[%s1086_s3 + $0x10] sm:$0xff] %v322_v5  ;;  %753 = vst [vmem:[%s1086_s3 + $0x8] sm:$0xff] %v253_v10  ;;  %v392_v15 = vpop.f32.mrb[2].mxu0 }
  0xe1   :  { %755 = vst [vmem:[%s1086_s3 + $0x18] sm:$0xff] %v324_v11  ;;  %v463_v16 = vpop.f32.mrb[2].mxu1  ;;  %v393_v17 = vadd.f32 %v392_v15, %v70_v8  ;;  %v394_v19 = vpop.f32.mrb[3].mxu0 }
  0xe2   :  { %v464_v18 = vadd.f32 %v463_v16, %v78_v9  ;;  %v465_v20 = vpop.f32.mrb[3].mxu1  ;;  %v395_v23 = vadd.f32 %v394_v19, %v74_v12 }
  0xe3   :  { %v466_v24 = vadd.f32 %v465_v20, %v82_v13  ;;  %756 = vst [vmem:[%s1086_s3 + $0x20] sm:$0xff] %v393_v17 }
  0xe4   :  { %758 = vst [vmem:[%s1086_s3 + $0x30] sm:$0xff] %v464_v18  ;;  %757 = vst [vmem:[%s1086_s3 + $0x28] sm:$0xff] %v395_v23  ;;  %v534_v27 = vpop.f32.mrb[4].mxu0 }
  0xe5   :  { %759 = vst [vmem:[%s1086_s3 + $0x38] sm:$0xff] %v466_v24  ;;  %v605_v28 = vpop.f32.mrb[4].mxu1  ;;  %v535_v29 = vadd.f32 %v534_v27, %v86_v21  ;;  %v536_v31 = vpop.f32.mrb[5].mxu0 }
  0xe6   :  { %v606_v30 = vadd.f32 %v605_v28, %v94_v22  ;;  %v607_v32 = vpop.f32.mrb[5].mxu1  ;;  %v537_v35 = vadd.f32 %v536_v31, %v90_v25 }
  0xe7   :  { %v608_v36 = vadd.f32 %v607_v32, %v98_v26  ;;  %760 = vst [vmem:[%s1086_s3 + $0x40] sm:$0xff] %v535_v29 }
  0xe8   :  { %762 = vst [vmem:[%s1086_s3 + $0x50] sm:$0xff] %v606_v30  ;;  %761 = vst [vmem:[%s1086_s3 + $0x48] sm:$0xff] %v537_v35  ;;  %v676_v39 = vpop.f32.mrb[6].mxu0 }
  0xe9   :  { %763 = vst [vmem:[%s1086_s3 + $0x58] sm:$0xff] %v608_v36  ;;  %v747_v40 = vpop.f32.mrb[6].mxu1  ;;  %v677_v41 = vadd.f32 %v676_v39, %v102_v33  ;;  %v678_v43 = vpop.f32.mrb[7].mxu0 }
  0xea   :  { %v748_v42 = vadd.f32 %v747_v40, %v110_v34  ;;  %v749_v44 = vpop.f32.mrb[7].mxu1  ;;  %v679_v45 = vadd.f32 %v678_v43, %v106_v37 }
  0xeb   :  { %v750_v46 = vadd.f32 %v749_v44, %v114_v38  ;;  %764 = vst [vmem:[%s1086_s3 + $0x60] sm:$0xff] %v677_v41 }
  0xec   :  { %766 = vst [vmem:[%s1086_s3 + $0x70] sm:$0xff] %v748_v42  ;;  %765 = vst [vmem:[%s1086_s3 + $0x68] sm:$0xff] %v679_v45 }
  0xed   :  { %767 = vst [vmem:[%s1086_s3 + $0x78] sm:$0xff] %v750_v46 }

// kernel: generator_forward.12
= control target key start
LH: loop header
LB: loop body
LE: loop exit
PB: predicated region body
PF: predicated region fallthrough
CT: control target
= control target key end

     0   :  { %s404_s12 = smov 0   ;;  %s491_s0 = inlined_call_operand.vmem [shape: f32[2,16,16,128], index: 0, kind: input, shape index: {}]   ;;  %s492_s1 = inlined_call_operand.vmem [shape: f32[1,128], index: 1, kind: input, shape index: {}]   ;;  %s493_s2 = inlined_call_operand.vmem [shape: f32[1,128], index: 2, kind: input, shape index: {}]   ;;  %s494_s3 = inlined_call_operand.vmem [shape: f32[2,128], index: 3, kind: output, shape index: {}]  }
   0x1 LB: > { %s410_s13 = sadd.s32 4294967295, %s381_s12   ;;  %p356_p0 = scmp.ge.s32.totalorder %s381_s12, 1  ;;  %s381_s12 = sphi %s404_s12, %s13_s12  }
   0x2   : > { %p132_p1 = scmp.lt.s32.totalorder %s381_s12, 3 }
   0x4   : > { %p133_p2 = pnand %p356_p0, %p132_p1 }
   0x5   : > { %p151_p3 = scmp.lt.s32.totalorder (!%p133_p2), %s410_s13, 1  ;;  %p359_p4 = scmp.ne.s32.totalorder (!%p133_p2), %s410_s13, 0 }
   0x6   : > { %136 = sbr.rel (%p133_p2) target bundleno = 134 (0x86), region = 32 }
   0xd   : > { %s152_s14 = scalar_select %p151_p3, %s410_s13, 1 }
   0xe   : > { %159 = sbr.rel (%p359_p4) target bundleno = 21 (0x15), region = 36  ;;  %v383_v0 = vmov (!%p359_p4), 0.0  }
   0xf   : > { %s363_s15 = sshll.u32 %s152_s14, 8  ;;  %160 = vst [vmem:[%s494_s3] sm:$0x3] (!%p359_p4), %v383_v0 }
  0x10   : > { %s419_s18 = scalar_lea.vmem %s491_s0, %s363_s15 }
  0x15 PF: > { %v161_v1 = vld [vmem:[%s419_s18] sm:$0xff]  ;;  %v162_v2 = vld [vmem:[%s419_s18 + $0x8] sm:$0xff]  ;;  %v163_v3 = vld [vmem:[%s419_s18 + $0x10] sm:$0xff]  ;;  %p360_p5 = scmp.ne.s32.totalorder %s410_s13, 1 }
  0x16   : > { %v164_v4 = vld [vmem:[%s419_s18 + $0x18] sm:$0xff]  ;;  %v193_v5 = vadd.f32 %v162_v2, %v161_v1  ;;  %v230_v6 = vmul.f32 %v161_v1, %v161_v1  ;;  %v231_v7 = vmul.f32 %v162_v2, %v162_v2  ;;  %v232_v8 = vmul.f32 %v163_v3, %v163_v3  ;;  %v165_v9 = vld [vmem:[%s419_s18 + $0x20] sm:$0xff]  ;;  %v166_v13 = vld [vmem:[%s419_s18 + $0x28] sm:$0xff] }
  0x17   : > { %v233_v11 = vmul.f32 %v164_v4, %v164_v4  ;;  %v234_v15 = vmul.f32 %v165_v9, %v165_v9  ;;  %v167_v17 = vld [vmem:[%s419_s18 + $0x30] sm:$0xff]  ;;  %v235_v19 = vmul.f32 %v166_v13, %v166_v13  ;;  %v168_v21 = vld [vmem:[%s419_s18 + $0x38] sm:$0xff]  ;;  %v169_v25 = vld [vmem:[%s419_s18 + $0x40] sm:$0xff] }
  0x18   : > { %v194_v10 = vadd.f32 %v193_v5, %v163_v3  ;;  %v262_v12 = vadd.f32 %v231_v7, %v230_v6  ;;  %v236_v23 = vmul.f32 %v167_v17, %v167_v17  ;;  %v237_v27 = vmul.f32 %v168_v21, %v168_v21  ;;  %v170_v29 = vld [vmem:[%s419_s18 + $0x48] sm:$0xff]  ;;  %v171_v33 = vld [vmem:[%s419_s18 + $0x50] sm:$0xff]  ;;  %v172_v37 = vld [vmem:[%s419_s18 + $0x58] sm:$0xff] }
  0x19   : > { %v238_v31 = vmul.f32 %v169_v25, %v169_v25  ;;  %v239_v35 = vmul.f32 %v170_v29, %v170_v29  ;;  %v240_v39 = vmul.f32 %v171_v33, %v171_v33  ;;  %v173_v41 = vld [vmem:[%s419_s18 + $0x60] sm:$0xff]  ;;  %v241_v43 = vmul.f32 %v172_v37, %v172_v37  ;;  %v174_v45 = vld [vmem:[%s419_s18 + $0x68] sm:$0xff]  ;;  %v175_v49 = vld [vmem:[%s419_s18 + $0x70] sm:$0xff] }
  0x1a   : > { %v195_v14 = vadd.f32 %v194_v10, %v164_v4  ;;  %v263_v16 = vadd.f32 %v262_v12, %v232_v8  ;;  %v242_v47 = vmul.f32 %v173_v41, %v173_v41  ;;  %v243_v51 = vmul.f32 %v174_v45, %v174_v45  ;;  %v176_v53 = vld [vmem:[%s419_s18 + $0x78] sm:$0xff]  ;;  %v177_v57 = vld [vmem:[%s419_s18 + $0x80] sm:$0xff]  ;;  %v178_v61 = vld [vmem:[%s419_s18 + $0x88] sm:$0xff] }
  0x1b   : > { %v244_v55 = vmul.f32 %v175_v49, %v175_v49  ;;  %v245_v59 = vmul.f32 %v176_v53, %v176_v53  ;;  %v246_v63 = vmul.f32 %v177_v57, %v177_v57  ;;  %v179_v1 = vld [vmem:[%s419_s18 + $0x90] sm:$0xff]  ;;  %v247_v3 = vmul.f32 %v178_v61, %v178_v61  ;;  %v180_v5 = vld [vmem:[%s419_s18 + $0x98] sm:$0xff] }
  0x1c   : > { %v196_v18 = vadd.f32 %v195_v14, %v165_v9  ;;  %v264_v20 = vadd.f32 %v263_v16, %v233_v11  ;;  %v248_v7 = vmul.f32 %v179_v1, %v179_v1  ;;  %v181_v9 = vld [vmem:[%s419_s18 + $0xa0] sm:$0xff]  ;;  %v249_v11 = vmul.f32 %v180_v5, %v180_v5 }
  0x1e   : > { %v197_v22 = vadd.f32 %v196_v18, %v166_v13  ;;  %v265_v24 = vadd.f32 %v264_v20, %v234_v15  ;;  %v182_v13 = vld [vmem:[%s419_s18 + $0xa8] sm:$0xff]  ;;  %v250_v15 = vmul.f32 %v181_v9, %v181_v9 }
  0x20   : > { %v198_v26 = vadd.f32 %v197_v22, %v167_v17  ;;  %v266_v28 = vadd.f32 %v265_v24, %v235_v19  ;;  %v183_v17 = vld [vmem:[%s419_s18 + $0xb0] sm:$0xff]  ;;  %v251_v19 = vmul.f32 %v182_v13, %v182_v13 }
  0x22   : > { %v199_v30 = vadd.f32 %v198_v26, %v168_v21  ;;  %v267_v32 = vadd.f32 %v266_v28, %v236_v23  ;;  %v184_v21 = vld [vmem:[%s419_s18 + $0xb8] sm:$0xff]  ;;  %v252_v23 = vmul.f32 %v183_v17, %v183_v17 }
  0x24   : > { %v200_v34 = vadd.f32 %v199_v30, %v169_v25  ;;  %v268_v36 = vadd.f32 %v267_v32, %v237_v27  ;;  %v185_v25 = vld [vmem:[%s419_s18 + $0xc0] sm:$0xff]  ;;  %v253_v27 = vmul.f32 %v184_v21, %v184_v21 }
  0x26   : > { %v201_v38 = vadd.f32 %v200_v34, %v170_v29  ;;  %v269_v40 = vadd.f32 %v268_v36, %v238_v31  ;;  %v186_v29 = vld [vmem:[%s419_s18 + $0xc8] sm:$0xff]  ;;  %v254_v31 = vmul.f32 %v185_v25, %v185_v25 }
  0x28   : > { %v202_v42 = vadd.f32 %v201_v38, %v171_v33  ;;  %v270_v44 = vadd.f32 %v269_v40, %v239_v35  ;;  %v187_v33 = vld [vmem:[%s419_s18 + $0xd0] sm:$0xff]  ;;  %v255_v35 = vmul.f32 %v186_v29, %v186_v29 }
  0x2a   : > { %v203_v46 = vadd.f32 %v202_v42, %v172_v37  ;;  %v271_v48 = vadd.f32 %v270_v44, %v240_v39  ;;  %v188_v37 = vld [vmem:[%s419_s18 + $0xd8] sm:$0xff]  ;;  %v256_v39 = vmul.f32 %v187_v33, %v187_v33 }
  0x2c   : > { %v204_v50 = vadd.f32 %v203_v46, %v173_v41  ;;  %v272_v52 = vadd.f32 %v271_v48, %v241_v43  ;;  %v189_v41 = vld [vmem:[%s419_s18 + $0xe0] sm:$0xff]  ;;  %v257_v43 = vmul.f32 %v188_v37, %v188_v37 }
  0x2e   : > { %v205_v54 = vadd.f32 %v204_v50, %v174_v45  ;;  %v273_v56 = vadd.f32 %v272_v52, %v242_v47  ;;  %v190_v45 = vld [vmem:[%s419_s18 + $0xe8] sm:$0xff]  ;;  %v258_v47 = vmul.f32 %v189_v41, %v189_v41 }
  0x30   : > { %v206_v58 = vadd.f32 %v205_v54, %v175_v49  ;;  %v274_v60 = vadd.f32 %v273_v56, %v243_v51  ;;  %v191_v49 = vld [vmem:[%s419_s18 + $0xf0] sm:$0xff]  ;;  %v259_v51 = vmul.f32 %v190_v45, %v190_v45 }
  0x32   : > { %v207_v62 = vadd.f32 %v206_v58, %v176_v53  ;;  %v275_v0 = vadd.f32 %v274_v60, %v244_v55  ;;  %v192_v53 = vld [vmem:[%s419_s18 + $0xf8] sm:$0xff]  ;;  %v260_v55 = vmul.f32 %v191_v49, %v191_v49 }
  0x33   : > { %v261_v58 = vmul.f32 %v192_v53, %v192_v53 }
  0x34   : > { %v208_v2 = vadd.f32 %v207_v62, %v177_v57  ;;  %v276_v4 = vadd.f32 %v275_v0, %v245_v59 }
  0x36   : > { %v209_v6 = vadd.f32 %v208_v2, %v178_v61  ;;  %v277_v8 = vadd.f32 %v276_v4, %v246_v63 }
  0x38   : > { %v210_v10 = vadd.f32 %v209_v6, %v179_v1  ;;  %v278_v12 = vadd.f32 %v277_v8, %v247_v3  ;;  %v299_v8 = vld [vmem:[%s494_s3] sm:$0x1] }
  0x3a   : > { %v211_v14 = vadd.f32 %v210_v10, %v180_v5  ;;  %v279_v16 = vadd.f32 %v278_v12, %v248_v7  ;;  %v302_v12 = vld [vmem:[%s494_s3 + $0x1] sm:$0x1] }
  0x3c   : > { %v212_v18 = vadd.f32 %v211_v14, %v181_v9  ;;  %v280_v20 = vadd.f32 %v279_v16, %v249_v11 }
  0x3e   : > { %v213_v22 = vadd.f32 %v212_v18, %v182_v13  ;;  %v281_v24 = vadd.f32 %v280_v20, %v250_v15 }
  0x40   : > { %v214_v26 = vadd.f32 %v213_v22, %v183_v17  ;;  %v282_v28 = vadd.f32 %v281_v24, %v251_v19 }
  0x42   : > { %v215_v30 = vadd.f32 %v214_v26, %v184_v21  ;;  %v283_v32 = vadd.f32 %v282_v28, %v252_v23  ;;  %v316_v23 = vld [vmem:[%s492_s1] sm:$0x1] (!%p360_p5) }
  0x43   : > { %v320_v26 = vld [vmem:[%s493_s2] sm:$0x1] (!%p360_p5) }
  0x44   : > { %v216_v34 = vadd.f32 %v215_v30, %v185_v25  ;;  %v284_v36 = vadd.f32 %v283_v32, %v253_v27 }
  0x46   : > { %v217_v38 = vadd.f32 %v216_v34, %v186_v29  ;;  %v285_v40 = vadd.f32 %v284_v36, %v254_v31 }
  0x48   : > { %v218_v42 = vadd.f32 %v217_v38, %v187_v33  ;;  %v286_v44 = vadd.f32 %v285_v40, %v255_v35 }
  0x4a   : > { %v219_v46 = vadd.f32 %v218_v42, %v188_v37  ;;  %v287_v48 = vadd.f32 %v286_v44, %v256_v39 }
  0x4c   : > { %v220_v50 = vadd.f32 %v219_v46, %v189_v41  ;;  %v288_v52 = vadd.f32 %v287_v48, %v257_v43 }
  0x4e   : > { %v221_v54 = vadd.f32 %v220_v50, %v190_v45  ;;  %v289_v56 = vadd.f32 %v288_v52, %v258_v47 }
  0x50   : > { %v222_v57 = vadd.f32 %v221_v54, %v191_v49  ;;  %v290_v59 = vadd.f32 %v289_v56, %v259_v51 }
  0x52   : > { %v223_v60 = vadd.f32 %v222_v57, %v192_v53  ;;  %v291_v61 = vadd.f32 %v290_v59, %v260_v55 }
  0x54   : > { %v224_v62 = vrot.slane %v223_v60, 4  ;;  %v292_v63 = vadd.f32 %v291_v61, %v261_v58 }
  0x56   : > { %v225_v0 = vadd.f32 %v224_v62, %v223_v60  ;;  %v293_v1 = vrot.slane %v292_v63, 4 }
  0x58   : > { %v226_v2 = vrot.slane %v225_v0, 2  ;;  %v294_v3 = vadd.f32 %v293_v1, %v292_v63 }
  0x5a   : > { %v227_v4 = vadd.f32 %v226_v2, %v225_v0  ;;  %v295_v5 = vrot.slane %v294_v3, 2 }
  0x5c   : > { %v228_v6 = vrot.slane %v227_v4, 1  ;;  %v296_v7 = vadd.f32 %v295_v5, %v294_v3 }
  0x5e   : > { %v229_v9 = vadd.f32 %v228_v6, %v227_v4  ;;  %v297_v10 = vrot.slane %v296_v7, 1  ;;  %308 = sbr.rel (%p360_p5) target bundleno = 134 (0x86), region = 40 }
  0x60   : > { %v300_v11 = vadd.f32 %v299_v8, %v229_v9  ;;  %v298_v13 = vadd.f32 %v297_v10, %v296_v7 }
  0x62   : > { %301 = vst [vmem:[%s494_s3] sm:$0x1] %v300_v11  ;;  %v303_v14 = vadd.f32 %v302_v12, %v298_v13 }
  0x64   : > { %304 = vst [vmem:[%s494_s3 + $0x1] sm:$0x1] %v303_v14 }
  0x69   : > { %v309_v15 = vld [vmem:[%s494_s3] sm:$0x1] }
  0x6a   : > { %v310_v17 = vmul.f32 0.001953125, %v309_v15 }
  0x6b   : > { %v311_v16 = vld [vmem:[%s494_s3 + $0x1] sm:$0x1] }
  0x6c   : > { %v312_v18 = vmul.f32 0.001953125, %v311_v16  ;;  %v313_v19 = vmul.f32 %v310_v17, %v310_v17 }
  0x6e   : > { %v314_v20 = vsub.f32 %v312_v18, %v313_v19 }
  0x70   : > { %v315_v21 = vmax.f32 %v314_v20, 0.0 }
  0x72   : > { %v317_v22 = vadd.f32 0.8, %v315_v21 }
  0x74   : > { %373 = vrsqrt.f32 %v317_v22 }
  0x7e   : > { %v374_v24 = vpop.eup %373 }
  0x7f   : > { %v319_v25 = vmul.f32 %v374_v24, %v316_v23 }
  0x81   : > { %323 = vst [vmem:[%s494_s3] sm:$0x1] %v319_v25  ;;  %v321_v27 = vmul.f32 %v319_v25, %v310_v17 }
  0x83   : > { %v322_v28 = vsub.f32 %v320_v26, %v321_v27 }
  0x85   : > { %324 = vst [vmem:[%s494_s3 + $0x1] sm:$0x1] %v322_v28 }
  0x86 PF: > { %s13_s12 = sadd.s32 1, %s381_s12  }
  0x87   : > { %p10_p6 = scmp.ge.s32.totalorder %s13_s12, 4  }
  0x89   :  { %12 = sbr.rel (!%p10_p6) target bundleno = 1 (0x1), region = 66 }

// kernel: generator_forward.9
= control target key start
LH: loop header
LB: loop body
LE: loop exit
PB: predicated region body
PF: predicated region fallthrough
CT: control target
= control target key end

     0   :  { %s2779_s15 = smov 0   ;;  %s3287_s0 = inlined_call_operand.vmem [shape: f32[2,4,4,128], index: 0, kind: input, shape index: {}]   ;;  %s3288_s1 = inlined_call_operand.vmem [shape: f32[2,128], index: 1, kind: input, shape index: {}]   ;;  %s3289_s2 = inlined_call_operand.vmem [shape: bf16[3,384,128], index: 2, kind: input, shape index: {}]   ;;  %s3290_s3 = inlined_call_operand.vmem [shape: f32[1,128], index: 3, kind: input, shape index: {}]   ;;  %s3291_s4 = inlined_call_operand.vmem [shape: f32[2,8,8,128], index: 4, kind: output, shape index: {}]  }
   0x1 LB: > { %s2131_s16 = sadd.s32 4294967295, %s2749_s15   ;;  %p2135_p0 = scmp.ge.s32.totalorder %s2749_s15, 1  ;;  %s2749_s15 = sphi %s2779_s15, %s14_s15  }
   0x2   : > { %p162_p1 = scmp.lt.s32.totalorder %s2749_s15, 3 }
   0x4   : > { %p163_p2 = pnand %p2135_p0, %p162_p1 }
   0x5   : > { %v2654_v0 = vld [vmem:[%s3289_s2 + $0x40] sm:$0xff] (!%p163_p2)   ;;  %v2751_v3 = vmov (!%p163_p2), 0   ;;  %v2657_v4 = vld [vmem:[%s3289_s2 + $0x48] sm:$0xff] (!%p163_p2)   ;;  %v2660_v7 = vld [vmem:[%s3289_s2 + $0x50] sm:$0xff] (!%p163_p2)   ;;  %p188_p3 = scmp.lt.s32.totalorder (!%p163_p2), %s2131_s16, 1  ;;  %v232_v18 = vlaneseq (!%p163_p2)  ;;  %vm531_vm0 = vcmask (!%p163_p2), 1040384  }
   0x6   : > { %166 = sbr.rel (%p163_p2) target bundleno = 386 (0x182), region = 36  ;;  %v2655_v1 = vld [vmem:[%s3289_s2] sm:$0xff] (!%p163_p2)   ;;  %2367 = vmatprep.subr.bf16.mxu0 (!%p163_p2), %v2654_v0  ;;  %525 = vst [vmem:[#allocation2] sm:$0xff] (!%p163_p2), %v2751_v3  ;;  %526 = vst [vmem:[#allocation2 + $0x8] sm:$0xf] (!%p163_p2), %v2751_v3  ;;  %v2658_v5 = vld [vmem:[%s3289_s2 + $0x8] sm:$0xff] (!%p163_p2)  }
   0x7   : > { %v2656_v2 = vld [vmem:[%s3289_s2 + $0x80] sm:$0xff] (!%p163_p2)   ;;  %529 = vst [vmem:[#allocation2 + $0x74] sm:$0xf] (!%p163_p2), %v2751_v3  ;;  %2368 = vmatpush3.bf16.msra.mxu0 (!%p163_p2), %v2655_v1  ;;  %v2659_v6 = vld [vmem:[%s3289_s2 + $0x88] sm:$0xff] (!%p163_p2)   ;;  %v2661_v8 = vld [vmem:[%s3289_s2 + $0x10] sm:$0xff] (!%p163_p2)   ;;  %v233_v23 = vshrl.u32 (!%p163_p2), %v232_v18, 7 }
   0x8   : > { %2523 = vmatprep.subr.bf16.mxu1 (!%p163_p2), %v2656_v2  ;;  %2369 = vmatprep.subr.bf16.mxu0 (!%p163_p2), %v2657_v4  ;;  %v2662_v9 = vld [vmem:[%s3289_s2 + $0x90] sm:$0xff] (!%p163_p2)   ;;  %v2663_v10 = vld [vmem:[%s3289_s2 + $0x58] sm:$0xff] (!%p163_p2)   ;;  %v2666_v13 = vld [vmem:[%s3289_s2 + $0x60] sm:$0xff] (!%p163_p2)   ;;  %vm532_vm1 = vsmask.f32 (!%p163_p2), 256  ;;  %vm558_vm3 = vcmask (!%p163_p2), 1043459  }
   0x9   : > { %2524 = vmatpush3.bf16.msra.mxu1 (!%p163_p2), %v2656_v2  ;;  %v2664_v11 = vld [vmem:[%s3289_s2 + $0x18] sm:$0xff] (!%p163_p2)   ;;  %v2668_v14 = vld [vmem:[%s3289_s2 + $0xa0] sm:$0xff] (!%p163_p2)   ;;  %v2669_v16 = vld [vmem:[%s3289_s2 + $0x68] sm:$0xff] (!%p163_p2)   ;;  %v2752_v32 = vmov (!%p163_p2), 1966171168   ;;  %v2917_v57 = vsub.s32 (!%p163_p2), 0, %v233_v23 }
   0xa   : > { %2525 = vmatprep.subr.bf16.mxu1 (!%p163_p2), %v2659_v6  ;;  %v2665_v12 = vld [vmem:[%s3289_s2 + $0x98] sm:$0xff] (!%p163_p2)   ;;  %v2667_v15 = vld [vmem:[%s3289_s2 + $0x20] sm:$0xff] (!%p163_p2)   ;;  %v2671_v17 = vld [vmem:[%s3289_s2 + $0xa8] sm:$0xff] (!%p163_p2)   ;;  %v230_v33 = vunpack.c.l.s4 (!%p163_p2), %v2752_v32  ;;  %v2753_v39 = vmov (!%p163_p2), 1935823168   ;;  %vm729_vm6 = vcmask (!%p163_p2), 1043456  }
   0xb   : > { %2370 = vmatpush3.bf16.msra.mxu0 (!%p163_p2), %v2658_v5  ;;  %v2670_v19 = vld [vmem:[%s3289_s2 + $0x28] sm:$0xff] (!%p163_p2)   ;;  %v2672_v20 = vld [vmem:[%s3289_s2 + $0x70] sm:$0xff] (!%p163_p2)   ;;  %v2675_v24 = vld [vmem:[%s3289_s2 + $0x78] sm:$0xff] (!%p163_p2)   ;;  %v604_v40 = vunpack.c.l.s4 (!%p163_p2), %v2753_v39  ;;  %vm559_vm4 = vsmask.f32 (!%p163_p2), 7950 }
   0xc   : > { %2371 = vmatprep.subr.bf16.mxu0 (!%p163_p2), %v2660_v7  ;;  %v2673_v21 = vld [vmem:[%s3289_s2 + $0x30] sm:$0xff] (!%p163_p2)   ;;  %v2871_v25 = vld [vmem:[%s3288_s1] ss:$0 sm:$0xff] (!%p163_p2)  ;;  %v2876_v26 = vld [vmem:[%s3288_s1 + $0x1] ss:$0 sm:$0xff] (!%p163_p2)  ;;  %v231_v42 = vunpack.c.0.s8 (!%p163_p2), %v230_v33 }
   0xd   : > { %2526 = vmatpush3.bf16.msra.mxu1 %v2659_v6  ;;  %s3301_s16 = smov (!%p188_p3, %s2131_s16), 1  ;;  %v2674_v22 = vld [vmem:[%s3289_s2 + $0xb0] sm:$0xff]   ;;  %v2677_v30 = vld [vmem:[%s3289_s2 + $0xb8] sm:$0xff]   ;;  %vm2885_vm2 = vmand %vm531_vm0, %vm532_vm1  ;;  %v605_v50 = vunpack.c.0.s8 %v604_v40  ;;  %vm730_vm7 = vsmask.f32 7938 }
   0xe   : > { %2527 = vmatprep.subr.bf16.mxu1 %v2662_v9  ;;  %s2365_s27 = sshll.u32 %s3301_s16, 4  ;;  %v534_v35 = vld [vmem:[#allocation2 + $0xc] sm:$0x1]  ;;  %v2676_v36 = vld [vmem:[%s3289_s2 + $0x38] sm:$0xff]   ;;  %v2678_v43 = vld [vmem:[%s3289_s2 + $0x100] sm:$0xff]   ;;  %v2904_v48 = vsub.s32 %v231_v42, %v233_v23 }
   0xf   : > { %2372 = vmatpush3.bf16.msra.mxu0 %v2661_v8  ;;  %s2860_s10 = scalar_lea.vmem %s3287_s0, %s2365_s27  ;;  %v535_v38 = vsel %vm2885_vm2, 0, %v534_v35  ;;  %v561_v45 = vld [vmem:[#allocation2 + $0x14] sm:$0x8]  ;;  %v2902_v46 = vld [vmem:[%s3289_s2 + $0x140] sm:$0xff]   ;;  %vm2907_vm5 = vmand %vm558_vm3, %vm559_vm4  ;;  %v2924_v63 = vsub.s32 %v605_v50, %v233_v23  ;;  %vm788_vm8 = vsmask.f32 3328 }
  0x10   : > { %2373 = vmatprep.subr.bf16.mxu0 %v2663_v10  ;;  %v201_v27 = vld [vmem:[%s2860_s10] sm:$0xf]  ;;  %v202_v28 = vld [vmem:[%s2860_s10 + $0x4] sm:$0xf]  ;;  %536 = vst [vmem:[#allocation2 + $0xc] sm:$0x1] %v535_v38  ;;  %vm2976_vm9 = vmand %vm729_vm6, %vm730_vm7 }
  0x11   : > { %2528 = vmatpush3.bf16.msra.mxu1 %v2662_v9  ;;  %v209_v29 = vmul.f32 %v2871_v25, %v201_v27  ;;  %v210_v31 = vmul.f32 %v2871_v25, %v202_v28  ;;  %v562_v51 = vsel %vm2907_vm5, 0, %v561_v45  ;;  %v564_v52 = vld [vmem:[#allocation2 + $0x20] sm:$0x8]  ;;  %v567_v56 = vld [vmem:[#allocation2 + $0x2c] sm:$0x8]  ;;  %vm2982_vm10 = vmand %vm729_vm6, %vm788_vm8  ;;  %s2366_s27 = sshll.u32 %s3301_s16, 6 }
  0x12   : > { %2529 = vmatprep.subr.bf16.mxu1 %v2665_v12  ;;  %563 = vst [vmem:[#allocation2 + $0x14] sm:$0x8] %v562_v51  ;;  %v565_v55 = vsel %vm2907_vm5, 0, %v564_v52  ;;  %v568_v58 = vsel %vm2907_vm5, 0, %v567_v56  ;;  %v537_v0 = vld [vmem:[#allocation2 + $0x18] sm:$0x1]  ;;  %s3274_s30 = scalar_lea.vmem %s3291_s4, %s2366_s27 }
  0x13   : > { %2374 = vmatpush3.bf16.msra.mxu0 %v2664_v11  ;;  %v217_v37 = vadd.f32 %v2876_v26, %v209_v29  ;;  %v218_v41 = vadd.f32 %v2876_v26, %v210_v31  ;;  %566 = vst [vmem:[#allocation2 + $0x20] sm:$0x8] %v565_v55  ;;  %569 = vst [vmem:[#allocation2 + $0x2c] sm:$0x8] %v568_v58  ;;  %v540_v6 = vld [vmem:[#allocation2 + $0x24] sm:$0x1] }
  0x14   : > { %2375 = vmatprep.subr.bf16.mxu0 %v2666_v13  ;;  %v538_v9 = vsel %vm2885_vm2, 0, %v537_v0  ;;  %v541_v10 = vsel %vm2885_vm2, 0, %v540_v6  ;;  %v203_v38 = vld [vmem:[%s2860_s10 + $0x8] sm:$0xf]  ;;  %v543_v39 = vld [vmem:[#allocation2 + $0x30] sm:$0x1] }
  0x15   : > { %2530 = vmatpush3.bf16.msra.mxu1 %v2665_v12  ;;  %v221_v44 = vpack.c.bf16 %v217_v37, %v217_v37  ;;  %v222_v47 = vpack.c.bf16 %v218_v41, %v218_v41  ;;  %539 = vst [vmem:[#allocation2 + $0x18] sm:$0x1] %v538_v9  ;;  %542 = vst [vmem:[#allocation2 + $0x24] sm:$0x1] %v541_v10  ;;  %v544_v51 = vsel %vm2885_vm2, 0, %v543_v39  ;;  %v2702_v34 = vld [vmem:[%s3289_s2 + $0x130] sm:$0xff]  }
  0x16   : > { %2531 = vmatprep.subr.bf16.mxu1 %v2668_v14  ;;  %545 = vst [vmem:[#allocation2 + $0x30] sm:$0x1] %v544_v51  ;;  %v549_v6 = vld [vmem:[#allocation2 + $0x48] sm:$0x1] }
  0x17   : > { %2376 = vmatpush3.bf16.msra.mxu0 %v2667_v15  ;;  %v235_v53 = vrot.slane %v221_v44, %v2904_v48  ;;  %v257_v54 = vrot.slane %v222_v47, %v2904_v48  ;;  %v546_v44 = vld [vmem:[#allocation2 + $0x3c] sm:$0x1] }
  0x18   : > { %2377 = vmatprep.subr.bf16.mxu0 %v2669_v16  ;;  %v547_v55 = vsel %vm2885_vm2, 0, %v546_v44 }
  0x19   : > { %2532 = vmatpush3.bf16.msra.mxu1 %v2668_v14  ;;  %v236_v59 = vcombine.high %v235_v53, %v235_v53  ;;  %v243_v60 = vrot.slane %v235_v53, %v2904_v48  ;;  %v258_v61 = vcombine.high %v257_v54, %v257_v54  ;;  %v265_v62 = vrot.slane %v257_v54, %v2904_v48  ;;  %v790_v39 = vld [vmem:[#allocation2 + $0x14] sm:$0xf] }
  0x1a   : > { %2533 = vmatprep.subr.bf16.mxu1 %v2671_v17  ;;  %548 = vst [vmem:[#allocation2 + $0x3c] sm:$0x1] %v547_v55 }
  0x1b   : > { %2378 = vmatpush3.bf16.msra.mxu0 %v2670_v19  ;;  %v250_v1 = vrot.slane %v236_v59, %v2904_v48  ;;  %v318_v2 = vunpack.i.h.s16 %v243_v60  ;;  %v2142_v4 = vpack.i.b16 %v243_v60, %v243_v60  ;;  %v272_v5 = vrot.slane %v258_v61, %v2904_v48 }
  0x1c   : > { %2379 = vmatprep.subr.bf16.mxu0 %v2672_v20  ;;  %v322_v7 = vunpack.i.h.s16 %v265_v62  ;;  %v2144_v8 = vpack.i.b16 %v265_v62, %v265_v62 }
  0x1d   : > { %2534 = vmatpush3.bf16.msra.mxu1 %v2671_v17  ;;  %v320_v11 = vunpack.i.h.s16 %v250_v1  ;;  %v334_v12 = vpack.i.b16 %v318_v2, %v318_v2  ;;  %v2143_v13 = vpack.i.b16 %v250_v1, %v250_v1  ;;  %v352_v14 = vrot.slane %v2142_v4, %v2917_v57 }
  0x1e   : > { %2535 = vmatprep.subr.bf16.mxu1 %v2674_v22  ;;  %v324_v15 = vunpack.i.h.s16 %v272_v5  ;;  %v338_v16 = vpack.i.b16 %v322_v7, %v322_v7  ;;  %v2145_v17 = vpack.i.b16 %v272_v5, %v272_v5  ;;  %v368_v18 = vrot.slane %v2144_v8, %v2917_v57  ;;  %v204_v5 = vld [vmem:[%s2860_s10 + $0xc] sm:$0xf]  ;;  %v552_v7 = vld [vmem:[#allocation2 + $0x54] sm:$0x1] }
  0x1f   : > { %2380 = vmatpush3.bf16.msra.mxu0 %v2673_v21  ;;  %v336_v19 = vpack.i.b16 %v320_v11, %v320_v11  ;;  %v356_v20 = vrot.slane %v334_v12, %v2917_v57  ;;  %v360_v21 = vrot.slane %v2143_v13, %v2917_v57  ;;  %v212_v11 = vmul.f32 %v2871_v25, %v204_v5 }
  0x20   : > { %2381 = vmatprep.subr.bf16.mxu0 %v2675_v24  ;;  %v340_v23 = vpack.i.b16 %v324_v15, %v324_v15  ;;  %v372_v24 = vrot.slane %v338_v16, %v2917_v57  ;;  %v376_v27 = vrot.slane %v2145_v17, %v2917_v57  ;;  %v442_v28 = vpack.i.b16 %v368_v18, %v368_v18 }
  0x21   : > { %2536 = vmatpush3.bf16.msra.mxu1 %v2674_v22  ;;  %v414_v22 = vpack.i.b16 %v352_v14, %v352_v14  ;;  %v364_v29 = vrot.slane %v336_v19, %v2917_v57  ;;  %v421_v31 = vpack.i.b16 %v356_v20, %v356_v20  ;;  %v428_v32 = vpack.i.b16 %v360_v21, %v360_v21 }
  0x22   : > { %2537 = vmatprep.subr.bf16.mxu1 %v2677_v30  ;;  %v380_v33 = vrot.slane %v340_v23, %v2917_v57  ;;  %v447_v35 = vrot.slane %v442_v28, %v2917_v57  ;;  %v456_v37 = vpack.i.b16 %v376_v27, %v376_v27  ;;  %v550_v13 = vsel %vm2885_vm2, 0, %v549_v6 }
  0x23   : > { %2382 = vmatpush3.bf16.msra.mxu0 %v2676_v36  ;;  %v449_v36 = vpack.i.b16 %v372_v24, %v372_v24  ;;  %v426_v40 = vrot.slane %v421_v31, %v2917_v57  ;;  %v433_v41 = vrot.slane %v428_v32, %v2917_v57  ;;  %v435_v42 = vpack.i.b16 %v364_v29, %v364_v29  ;;  %v732_v24 = vld [vmem:[#allocation2 + $0xc] sm:$0xf]  ;;  %v735_v29 = vld [vmem:[#allocation2 + $0x18] sm:$0xf] }
  0x24   : > { %2419 = vmatprep.subr.bf16.mxu0 %v2678_v43  ;;  %v211_v43 = vmul.f32 %v2871_v25, %v203_v38  ;;  %v461_v47 = vrot.slane %v456_v37, %v2917_v57  ;;  %v463_v50 = vpack.i.b16 %v380_v33, %v380_v33  ;;  %v553_v14 = vsel %vm2885_vm2, 0, %v552_v7  ;;  %551 = vst [vmem:[#allocation2 + $0x48] sm:$0x1] %v550_v13  ;;  %v2713_v33 = vld [vmem:[%s3289_s2 + $0x200] sm:$0xff]  }
  0x25   : > { %2538 = vmatpush3.bf16.msra.mxu1 %v2677_v30  ;;  %v419_v30 = vrot.slane %v414_v22, %v2917_v57  ;;  %v454_v45 = vrot.slane %v449_v36, %v2917_v57  ;;  %v440_v52 = vrot.slane %v435_v42, %v2917_v57  ;;  %554 = vst [vmem:[#allocation2 + $0x54] sm:$0x1] %v553_v14  ;;  %v738_v36 = vld [vmem:[#allocation2 + $0x24] sm:$0xf]  ;;  %v793_v42 = vld [vmem:[#allocation2 + $0x20] sm:$0xf] }
  0x26   : > { %2547 = vmatprep.subr.bf16.mxu1 %v2902_v46  ;;  %v219_v54 = vadd.f32 %v2876_v26, %v211_v43  ;;  %v468_v56 = vrot.slane %v463_v50, %v2917_v57  ;;  %v625_v58 = vcombine.low %v447_v35, %v461_v47  ;;  %v2971_v19 = vadd.f32 %v2876_v26, %v212_v11  ;;  %v796_v50 = vld [vmem:[#allocation2 + $0x2c] sm:$0xf] }
  0x27   : > { %v601_v53 = vcombine.low %v419_v30, %v433_v41  ;;  %v602_v59 = vcombine.low %v426_v40, %v440_v52 }
  0x28   : > { %v223_v61 = vpack.c.bf16 %v219_v54, %v219_v54  ;;  %v626_v62 = vcombine.low %v454_v45, %v468_v56  ;;  %v633_v0 = vrot.slane %v625_v58, %v2924_v63  ;;  %v570_v54 = vld [vmem:[#allocation2 + $0x38] sm:$0x8] }
  0x29   : > { %v609_v60 = vrot.slane %v601_v53, %v2924_v63  ;;  %v616_v1 = vrot.slane %v602_v59, %v2924_v63  ;;  %v741_v53 = vld [vmem:[#allocation2 + $0x30] sm:$0xf] }
  0x2a   : > { %v279_v2 = vrot.slane %v223_v61, %v2904_v48  ;;  %v640_v4 = vrot.slane %v626_v62, %v2924_v63  ;;  %v576_v61 = vld [vmem:[#allocation2 + $0x50] sm:$0x8] }
  0x2b   : > { %v617_v8 = vcombine.low %v609_v60, %v616_v1  ;;  %v573_v60 = vld [vmem:[#allocation2 + $0x44] sm:$0x8] }
  0x2c   : > { %v280_v9 = vcombine.high %v279_v2, %v279_v2  ;;  %v287_v10 = vrot.slane %v279_v2, %v2904_v48  ;;  %v641_v12 = vcombine.low %v633_v0, %v640_v4 }
  0x2d   : > { %v624_v15 = vrot.slane %v617_v8, %v2924_v63  ;;  %2150 = vst.sshfl [vmem:[#allocation2 + $0x10] sm:$0x33 pattern:$0x75316420] %v617_v8 }
  0x2e   : > { %2151 = vst.sshfl [vmem:[#allocation2 + $0x1c] sm:$0x33 pattern:$0x75316420] %v617_v8  ;;  %v294_v16 = vrot.slane %v280_v9, %v2904_v48  ;;  %v326_v17 = vunpack.i.h.s16 %v287_v10  ;;  %v2146_v18 = vpack.i.b16 %v287_v10, %v287_v10  ;;  %v648_v25 = vrot.slane %v641_v12, %v2924_v63 }
  0x2f   : > { %2152 = vst.sshfl [vmem:[#allocation2 + $0x28] sm:$0x33 pattern:$0x75316420] %v641_v12  ;;  %v698_v20 = vshrl.u32 %v624_v15, 16  ;;  %v701_v21 = vshll.u32 %v624_v15, 16  ;;  %v224_v15 = vpack.c.bf16 %v2971_v19, %v2971_v19 }
  0x30   : > { %2153 = vst.sshfl [vmem:[#allocation2 + $0x34] sm:$0x33 pattern:$0x75316420] %v641_v12  ;;  %v328_v22 = vunpack.i.h.s16 %v294_v16  ;;  %v342_v23 = vpack.i.b16 %v326_v17, %v326_v17  ;;  %v705_v27 = vshrl.u32 %v648_v25, 16  ;;  %v708_v28 = vshll.u32 %v648_v25, 16 }
  0x31   : > { %v2147_v30 = vpack.i.b16 %v294_v16, %v294_v16  ;;  %v384_v31 = vrot.slane %v2146_v18, %v2917_v57  ;;  %v700_v32 = vrot.slane %v698_v20, 7  ;;  %v768_v26 = vrot.slane %v698_v20, 4  ;;  %v579_v12 = vld [vmem:[#allocation2 + $0x5c] sm:$0x8] }
  0x32   : > { %v769_v35 = vrot.slane %v701_v21, 5  ;;  %v344_v37 = vpack.i.b16 %v328_v22, %v328_v22  ;;  %v772_v40 = vrot.slane %v705_v27, 4  ;;  %v773_v41 = vrot.slane %v708_v28, 5 }
  0x33   : > { %v707_v43 = vrot.slane %v705_v27, 7  ;;  %v388_v44 = vrot.slane %v342_v23, %v2917_v57  ;;  %v703_v45 = vor.u32 %v701_v21, %v700_v32  ;;  %v392_v51 = vrot.slane %v2147_v30, %v2917_v57  ;;  %v2683_v30 = vld [vmem:[%s3289_s2 + $0x108] sm:$0xff]  }
  0x34   : > { %v770_v47 = vor.u32 %v769_v35, %v768_v26  ;;  %v396_v52 = vrot.slane %v344_v37, %v2917_v57  ;;  %v774_v55 = vor.u32 %v773_v41, %v772_v40  ;;  %v470_v58 = vpack.i.b16 %v384_v31, %v384_v31 }
  0x35   : > { %v710_v56 = vor.u32 %v708_v28, %v707_v43  ;;  %v477_v59 = vpack.i.b16 %v388_v44, %v388_v44  ;;  %v733_v62 = vsel %vm2976_vm9, %v703_v45, %v732_v24  ;;  %v736_v1 = vsel %vm2976_vm9, %v703_v45, %v735_v29  ;;  %v2679_v24 = vld [vmem:[%s3289_s2 + $0xc0] sm:$0xff]   ;;  %v2685_v44 = vld [vmem:[%s3289_s2 + $0x148] sm:$0xff]  }
  0x36   : > { %v771_v0 = vrot.slane %v770_v47, 4  ;;  %v484_v2 = vpack.i.b16 %v392_v51, %v392_v51  ;;  %734 = vst [vmem:[#allocation2 + $0xc] sm:$0xf] %v733_v62  ;;  %v2993_v4 = vrot.slane %v774_v55, 4  ;;  %737 = vst [vmem:[#allocation2 + $0x18] sm:$0xf] %v736_v1  ;;  %v475_v6 = vrot.slane %v470_v58, %v2917_v57 }
  0x37   : > { %v739_v5 = vsel %vm2976_vm9, %v710_v56, %v738_v36  ;;  %v482_v7 = vrot.slane %v477_v59, %v2917_v57  ;;  %v491_v11 = vpack.i.b16 %v396_v52, %v396_v52  ;;  %v742_v14 = vsel %vm2976_vm9, %v710_v56, %v741_v53  ;;  %v2687_v59 = vld [vmem:[%s3289_s2 + $0x110] sm:$0xff]  }
  0x38   : > { %v791_v8 = vsel %vm2982_vm10, %v771_v0, %v790_v39  ;;  %v794_v9 = vsel %vm2982_vm10, %v771_v0, %v793_v42  ;;  %740 = vst [vmem:[#allocation2 + $0x24] sm:$0xf] %v739_v5  ;;  %v489_v10 = vrot.slane %v484_v2, %v2917_v57  ;;  %v797_v13 = vsel %vm2982_vm10, %v2993_v4, %v796_v50  ;;  %v744_v2 = vld [vmem:[#allocation2 + $0x3c] sm:$0xf] }
  0x39   : > { %792 = vst [vmem:[#allocation2 + $0x14] sm:$0xf] %v791_v8  ;;  %795 = vst [vmem:[#allocation2 + $0x20] sm:$0xf] %v794_v9  ;;  %v571_v16 = vsel %vm2907_vm5, 0, %v570_v54  ;;  %v496_v17 = vrot.slane %v491_v11, %v2917_v57  ;;  %v574_v25 = vsel %vm2907_vm5, 0, %v573_v60  ;;  %v301_v21 = vrot.slane %v224_v15, %v2904_v48 }
  0x3a   : > { %798 = vst [vmem:[#allocation2 + $0x2c] sm:$0xf] %v797_v13  ;;  %v649_v18 = vcombine.low %v475_v6, %v489_v10  ;;  %743 = vst [vmem:[#allocation2 + $0x30] sm:$0xf] %v742_v14  ;;  %v577_v20 = vsel %vm2907_vm5, 0, %v576_v61  ;;  %v580_v19 = vsel %vm2907_vm5, 0, %v579_v12 }
  0x3b   : > { %572 = vst [vmem:[#allocation2 + $0x38] sm:$0x8] %v571_v16  ;;  %575 = vst [vmem:[#allocation2 + $0x44] sm:$0x8] %v574_v25  ;;  %v650_v22 = vcombine.low %v482_v7, %v496_v17  ;;  %v302_v27 = vcombine.high %v301_v21, %v301_v21  ;;  %v309_v28 = vrot.slane %v301_v21, %v2904_v48  ;;  %v2684_v54 = vld [vmem:[%s3289_s2 + $0xc8] sm:$0xff]   ;;  %v2690_v60 = vld [vmem:[%s3289_s2 + $0x150] sm:$0xff]  }
  0x3c   : > { %578 = vst [vmem:[#allocation2 + $0x50] sm:$0x8] %v577_v20  ;;  %v657_v23 = vrot.slane %v649_v18, %v2924_v63  ;;  %581 = vst [vmem:[#allocation2 + $0x5c] sm:$0x8] %v580_v19  ;;  %v2691_v8 = vld [vmem:[%s3289_s2 + $0x118] sm:$0xff]  }
  0x3d   : > { %v3026_v29 = vld [vmem:[#allocation2 + $0xc] sm:$0xff]  ;;  %v3031_v31 = vld [vmem:[#allocation2 + $0x18] sm:$0xff]  ;;  %v664_v32 = vrot.slane %v650_v22, %v2924_v63  ;;  %v316_v37 = vrot.slane %v302_v27, %v2904_v48  ;;  %v330_v39 = vunpack.i.h.s16 %v309_v28  ;;  %v2148_v42 = vpack.i.b16 %v309_v28, %v309_v28  ;;  %v747_v16 = vld [vmem:[#allocation2 + $0x48] sm:$0xf] }
  0x3e   : > { %v2159_v26 = vcombine.low %v2751_v3, %v3026_v29  ;;  %v2160_v35 = vcombine.high %v2751_v3, %v3026_v29  ;;  %v2693_v12 = vld [vmem:[%s3289_s2 + $0x158] sm:$0xff]   ;;  %v2244_v38 = vcombine.high %v3026_v29, %v3031_v31 }
  0x3f   : > { %v3038_v36 = vld [vmem:[#allocation2 + $0x24] sm:$0xff]  ;;  %v665_v41 = vcombine.low %v657_v23, %v664_v32  ;;  %v332_v47 = vunpack.i.h.s16 %v316_v37  ;;  %v346_v3 = vpack.i.b16 %v330_v39, %v330_v39  ;;  %v2149_v50 = vpack.i.b16 %v316_v37, %v316_v37  ;;  %v2692_v27 = vld [vmem:[%s3289_s2 + $0xd8] sm:$0xff]  }
  0x40   : > { %v2680_v40 = vld [vmem:[#allocation2 + $0x8] ss:$12 sps:$4 sm:$0xff]   ;;  %1128 = vmatprep.mubr.bf16.mxu0 %v2160_v35  ;;  %v3046_v45 = vcombine.high %v3031_v31, %v3038_v36  ;;  %v3050_v48 = vcombine.low %v3031_v31, %v3038_v36  ;;  %v400_v52 = vrot.slane %v2148_v42, %v2917_v57  ;;  %v2697_v35 = vld [vmem:[%s3289_s2 + $0x160] sm:$0xff]  }
  0x41   : > { %v2682_v43 = vld [vmem:[#allocation2 + $0x20] ss:$12 sps:$4 sm:$0xff]   ;;  %1129 = vmatmul.mubr.bf16.vlgmr.msra.gmra.mrb[0].mxu0 %v2159_v26  ;;  %2539 = vmatprep.mubr.bf16.mxu1 %v2680_v40  ;;  %v672_v51 = vrot.slane %v665_v41, %v2924_v63  ;;  %2154 = vst.sshfl [vmem:[#allocation2 + $0x40] sm:$0x33 pattern:$0x75316420] %v665_v41  ;;  %v348_v55 = vpack.i.b16 %v332_v47, %v332_v47 }
  0x42   : > { %2155 = vst.sshfl [vmem:[#allocation2 + $0x4c] sm:$0x33 pattern:$0x75316420] %v665_v41  ;;  %v799_v53 = vld [vmem:[#allocation2 + $0x38] sm:$0xf]  ;;  %2420 = vmatpush3.bf16.msra.mxu0 %v2679_v24  ;;  %2540 = vmatmul.mubr.bf16.vlgmr.msra.gmra.mrb[0].mxu1 %v2682_v43  ;;  %v404_v56 = vrot.slane %v346_v3, %v2917_v57  ;;  %v408_v58 = vrot.slane %v2149_v50, %v2917_v57 }
  0x43   : > { %2548 = vmatpush3.bf16.msra.mxu1 %v2902_v46  ;;  %2421 = vmatprep.subr.bf16.mxu0 %v2683_v30  ;;  %v712_v61 = vshrl.u32 %v672_v51, 16  ;;  %v715_v62 = vshll.u32 %v672_v51, 16  ;;  %v498_v0 = vpack.i.b16 %v400_v52, %v400_v52  ;;  %v800_v1 = vsel %vm2982_vm10, %v2993_v4, %v799_v53  ;;  %v2689_v46 = vld [vmem:[%s3289_s2 + $0xd0] sm:$0xff]   ;;  %v802_v25 = vld [vmem:[#allocation2 + $0x44] sm:$0xf]  ;;  %v2698_v40 = vld [vmem:[%s3289_s2 + $0x128] sm:$0xff]  }
  0x44   : > { %2549 = vmatprep.subr.bf16.mxu1 %v2685_v44  ;;  %1136 = vmatprep.mubr.bf16.mxu0 %v3046_v45  ;;  %v412_v5 = vrot.slane %v348_v55, %v2917_v57  ;;  %v505_v6 = vpack.i.b16 %v404_v56, %v404_v56  ;;  %v512_v7 = vpack.i.b16 %v408_v58, %v408_v58  ;;  %v805_v19 = vld [vmem:[#allocation2 + $0x50] sm:$0xf]  ;;  %v2695_v30 = vld [vmem:[%s3289_s2 + $0x120] sm:$0xff]   ;;  %v2699_v47 = vld [vmem:[%s3289_s2 + $0xe8] sm:$0xff]  }
  0x45   : > { %801 = vst [vmem:[#allocation2 + $0x38] sm:$0xf] %v800_v1  ;;  %v714_v9 = vrot.slane %v712_v61, 7  ;;  %v503_v4 = vrot.slane %v498_v0, %v2917_v57  ;;  %v776_v10 = vrot.slane %v712_v61, 4  ;;  %v777_v11 = vrot.slane %v715_v62, 5  ;;  %v2696_v39 = vld [vmem:[%s3289_s2 + $0xe0] sm:$0xff]  }
  0x46   : > { %2422 = vmatpush3.bf16.msra.mxu0 %v2684_v54  ;;  %v510_v13 = vrot.slane %v505_v6, %v2917_v57  ;;  %v517_v14 = vrot.slane %v512_v7, %v2917_v57  ;;  %v519_v15 = vpack.i.b16 %v412_v5, %v412_v5  ;;  %v555_v42 = vld [vmem:[#allocation2 + $0x60] sm:$0x1]  ;;  %v3110_v43 = vld [vmem:[#allocation2 + $0x30] sm:$0xff]  ;;  %v2700_v3 = vld [vmem:[%s3289_s2 + $0x168] sm:$0xff]  }
  0x47   : > { %2550 = vmatpush3.bf16.msra.mxu1 %v2685_v44  ;;  %2423 = vmatprep.subr.bf16.mxu0 %v2687_v59  ;;  %v717_v17 = vor.u32 %v715_v62, %v714_v9  ;;  %v778_v18 = vor.u32 %v777_v11, %v776_v10  ;;  %v556_v44 = vsel %vm2885_vm2, 0, %v555_v42  ;;  %v582_v52 = vld [vmem:[#allocation2 + $0x68] sm:$0x8]  ;;  %v2705_v56 = vld [vmem:[%s3289_s2 + $0x170] sm:$0xff]   ;;  %v808_v6 = vld [vmem:[#allocation2 + $0x5c] sm:$0xf] }
  0x48   : > { %2551 = vmatprep.subr.bf16.mxu1 %v2690_v60  ;;  %v524_v20 = vrot.slane %v519_v15, %v2917_v57  ;;  %v673_v21 = vcombine.low %v503_v4, %v517_v14  ;;  %557 = vst [vmem:[#allocation2 + $0x60] sm:$0x1] %v556_v44  ;;  %v583_v0 = vsel %vm2907_vm5, 0, %v582_v52  ;;  %v750_v1 = vld [vmem:[#allocation2 + $0x54] sm:$0xf]  ;;  %v2709_v9 = vld [vmem:[%s3289_s2 + $0x178] sm:$0xff]  }
  0x49   : > { %1137 = vmatmul.mubr.bf16.gmra.mrb[4].mxu0 %v3050_v48  ;;  %v745_v22 = vsel %vm2976_vm9, %v717_v17, %v744_v2  ;;  %v748_v23 = vsel %vm2976_vm9, %v717_v17, %v747_v16  ;;  %v779_v24 = vrot.slane %v778_v18, 4  ;;  %584 = vst [vmem:[#allocation2 + $0x68] sm:$0x8] %v583_v0  ;;  %v2708_v11 = vld [vmem:[%s3289_s2 + $0xf8] sm:$0xff]   ;;  %v2726_v42 = vld [vmem:[%s3289_s2 + $0x220] sm:$0xff]   ;;  %v2730_v52 = vld [vmem:[%s3289_s2 + $0x1f0] sm:$0xff]  }
  0x4a   : > { %2424 = vmatpush3.bf16.msra.mxu0 %v2689_v46  ;;  %746 = vst [vmem:[#allocation2 + $0x3c] sm:$0xf] %v745_v22  ;;  %v674_v28 = vcombine.low %v510_v13, %v524_v20  ;;  %v681_v57 = vrot.slane %v673_v21, %v2924_v63  ;;  %749 = vst [vmem:[#allocation2 + $0x48] sm:$0xf] %v748_v23  ;;  %v2707_v46 = vld [vmem:[%s3289_s2 + $0x138] sm:$0xff]   ;;  %v2243_v21 = vcombine.low %v3026_v29, %v3031_v31  ;;  %v2711_v22 = vld [vmem:[%s3289_s2 + $0x180] sm:$0xff]  }
  0x4b   : > { %2552 = vmatpush3.bf16.msra.mxu1 %v2690_v60  ;;  %2425 = vmatprep.subr.bf16.mxu0 %v2691_v8  ;;  %v803_v32 = vsel %vm2982_vm10, %v779_v24, %v802_v25  ;;  %v806_v26 = vsel %vm2982_vm10, %v779_v24, %v805_v19  ;;  %v2703_v60 = vld [vmem:[%s3289_s2 + $0xf0] sm:$0xff]   ;;  %v2715_v23 = vld [vmem:[%s3289_s2 + $0x1c8] sm:$0xff]  }
  0x4c   : > { %2553 = vmatprep.subr.bf16.mxu1 %v2693_v12  ;;  %v688_v37 = vrot.slane %v674_v28, %v2924_v63  ;;  %804 = vst [vmem:[#allocation2 + $0x44] sm:$0xf] %v803_v32  ;;  %807 = vst [vmem:[#allocation2 + $0x50] sm:$0xf] %v806_v26  ;;  %v2712_v25 = vld [vmem:[#allocation2 + $0x14] ss:$12 sps:$4 sm:$0xff]  }
  0x4d   : > { %v2714_v19 = vld [vmem:[#allocation2 + $0x2c] ss:$12 sps:$4 sm:$0xff]   ;;  %v2718_v31 = vld [vmem:[%s3289_s2 + $0x1d0] sm:$0xff]  }
  0x4e   : > { %2426 = vmatpush3.bf16.msra.mxu0 %v2692_v27  ;;  %v689_v41 = vcombine.low %v681_v57, %v688_v37  ;;  %v2717_v24 = vld [vmem:[%s3289_s2 + $0x208] sm:$0xff]   ;;  %v2247_v27 = vcombine.high %v3038_v36, %v3110_v43  ;;  %v2720_v57 = vld [vmem:[%s3289_s2 + $0x210] sm:$0xff]   ;;  %v2723_v37 = vld [vmem:[%s3289_s2 + $0x218] sm:$0xff]  }
  0x4f   : > { %2554 = vmatpush3.bf16.msra.mxu1 %v2693_v12  ;;  %2427 = vmatprep.subr.bf16.mxu0 %v2695_v30  ;;  %v753_v7 = vld [vmem:[#allocation2 + $0x60] sm:$0xf]  ;;  %v2716_v29 = vld [vmem:[%s3289_s2 + $0x188] sm:$0xff]   ;;  %v2246_v30 = vcombine.low %v3038_v36, %v3110_v43  ;;  %v2719_v26 = vld [vmem:[%s3289_s2 + $0x190] sm:$0xff]  }
  0x50   : > { %2555 = vmatprep.subr.bf16.mxu1 %v2697_v35  ;;  %v696_v50 = vrot.slane %v689_v41, %v2924_v63  ;;  %2156 = vst.sshfl [vmem:[#allocation2 + $0x58] sm:$0x33 pattern:$0x75316420] %v689_v41  ;;  %v2710_v12 = vld [vmem:[%s3289_s2 + $0x1c0] sm:$0xff]  }
  0x51   : > { %2157 = vst.sshfl [vmem:[#allocation2 + $0x64] sm:$0x33 pattern:$0x75316420] %v689_v41  ;;  %v3121_v51 = vld [vmem:[#allocation2 + $0x3c] sm:$0xff]  ;;  %v3167_v15 = vld [vmem:[#allocation2 + $0x48] sm:$0xff] }
  0x52   : > { %v3128_v53 = vcombine.high %v3110_v43, %v3121_v51  ;;  %v3132_v54 = vcombine.low %v3110_v43, %v3121_v51  ;;  %2428 = vmatpush3.bf16.msra.mxu0 %v2696_v39  ;;  %v719_v63 = vshrl.u32 %v696_v50, 16  ;;  %v722_v55 = vshll.u32 %v696_v50, 16  ;;  %v811_v13 = vld [vmem:[#allocation2 + $0x68] sm:$0xf]  ;;  %v2738_v39 = vld [vmem:[#allocation2 + $0x20] ss:$12 sps:$4 sm:$0xff]  }
  0x53   : > { %2556 = vmatpush3.bf16.msra.mxu1 %v2697_v35  ;;  %2429 = vmatprep.subr.bf16.mxu0 %v2698_v40  ;;  %v2704_v58 = vld [vmem:[#allocation2 + $0x38] ss:$12 sps:$4 sm:$0xff]   ;;  %v2250_v36 = vcombine.high %v3121_v51, %v3167_v15  ;;  %v2249_v43 = vcombine.low %v3121_v51, %v3167_v15  ;;  %v2729_v50 = vld [vmem:[%s3289_s2 + $0x228] sm:$0xff]  }
  0x54   : > { %1144 = vmatprep.mubr.bf16.mxu0 %v3128_v53  ;;  %2557 = vmatprep.subr.bf16.mxu1 %v2700_v3  ;;  %v721_v59 = vrot.slane %v719_v63, 7  ;;  %v780_v61 = vrot.slane %v719_v63, 4  ;;  %v781_v62 = vrot.slane %v722_v55, 5  ;;  %v2731_v28 = vld [vmem:[#allocation2 + $0x44] ss:$12 sps:$4 sm:$0xff]   ;;  %v2721_v35 = vld [vmem:[%s3289_s2 + $0x1d8] sm:$0xff]  }
  0x55   : > { %1145 = vmatmul.mubr.bf16.gmra.mrb[8].mxu0 %v3132_v54  ;;  %2543 = vmatprep.mubr.bf16.mxu1 %v2704_v58  ;;  %v2722_v40 = vld [vmem:[%s3289_s2 + $0x198] sm:$0xff]   ;;  %v2724_v41 = vld [vmem:[%s3289_s2 + $0x1e0] sm:$0xff]   ;;  %v2728_v51 = vld [vmem:[%s3289_s2 + $0x1a8] sm:$0xff]  }
  0x56   : > { %2430 = vmatpush3.bf16.msra.mxu0 %v2699_v47  ;;  %v724_v2 = vor.u32 %v722_v55, %v721_v59  ;;  %v782_v5 = vor.u32 %v781_v62, %v780_v61  ;;  %v2725_v47 = vld [vmem:[%s3289_s2 + $0x1a0] sm:$0xff]   ;;  %v2734_v63 = vld [vmem:[%s3289_s2 + $0x230] sm:$0xff]   ;;  %v2735_v58 = vld [vmem:[%s3289_s2 + $0x1f8] sm:$0xff]  }
  0x57   : > { %2558 = vmatpush3.bf16.msra.mxu1 %v2700_v3  ;;  %2431 = vmatprep.subr.bf16.mxu0 %v2702_v34  ;;  %v2727_v3 = vld [vmem:[%s3289_s2 + $0x1e8] sm:$0xff]   ;;  %v2737_v59 = vld [vmem:[%s3289_s2 + $0x238] sm:$0xff]  }
  0x58   : > { %v751_v49 = vsel %vm2976_vm9, %v724_v2, %v750_v1  ;;  %2559 = vmatprep.subr.bf16.mxu1 %v2705_v56  ;;  %v783_v8 = vrot.slane %v782_v5, 4  ;;  %v754_v4 = vsel %vm2976_vm9, %v724_v2, %v753_v7  ;;  %v2739_v61 = vld [vmem:[#allocation2 + $0x38] ss:$12 sps:$4 sm:$0xff]  }
  0x59   : > { %752 = vst [vmem:[#allocation2 + $0x54] sm:$0xf] %v751_v49  ;;  %755 = vst [vmem:[#allocation2 + $0x60] sm:$0xf] %v754_v4  ;;  %v2742_v1 = vld [vmem:[#allocation2] sm:$0xff] }
  0x5a   : > { %2432 = vmatpush3.bf16.msra.mxu0 %v2703_v60  ;;  %v809_v10 = vsel %vm2982_vm10, %v783_v8, %v808_v6  ;;  %v812_v14 = vsel %vm2982_vm10, %v783_v8, %v811_v13  ;;  %v2736_v60 = vld [vmem:[%s3289_s2 + $0x1b8] sm:$0xff]  }
  0x5b   : > { %810 = vst [vmem:[#allocation2 + $0x5c] sm:$0xf] %v809_v10  ;;  %2560 = vmatpush3.bf16.msra.mxu1 %v2705_v56  ;;  %2433 = vmatprep.subr.bf16.mxu0 %v2707_v46  ;;  %813 = vst [vmem:[#allocation2 + $0x68] sm:$0xf] %v812_v14  ;;  %v2732_v56 = vld [vmem:[%s3289_s2 + $0x1b0] sm:$0xff]  }
  0x5c   : > { %2561 = vmatprep.subr.bf16.mxu1 %v2709_v9 }
  0x5e   : > { %2434 = vmatpush3.bf16.msra.mxu0 %v2708_v11 }
  0x5f   : > { %2562 = vmatpush3.bf16.msra.mxu1 %v2709_v9  ;;  %2471 = vmatprep.subr.bf16.mxu0 %v2710_v12 }
  0x60   : > { %v3169_v16 = vld [vmem:[#allocation2 + $0x54] sm:$0xff]  ;;  %2571 = vmatprep.subr.bf16.mxu1 %v2713_v33  ;;  %v1252_v44 = vld [vmem:[#allocation2 + $0x60] sm:$0xff] }
  0x61   : > { %v3173_v17 = vcombine.high %v3167_v15, %v3169_v16  ;;  %v3177_v18 = vcombine.low %v3167_v15, %v3169_v16  ;;  %v2253_v34 = vcombine.high %v3169_v16, %v1252_v44  ;;  %v2252_v55 = vcombine.low %v3169_v16, %v1252_v44 }
  0x62   : > { %v2706_v20 = vld [vmem:[#allocation2 + $0x50] ss:$12 sps:$4 sm:$0xff]   ;;  %v2741_v0 = vld [vmem:[#allocation2 + $0x68] ss:$12 sps:$4 sm:$0xff]   ;;  %v2337_v46 = vcombine.high %v1252_v44, %v2742_v1 }
  0x63   : > { %1152 = vmatprep.mubr.bf16.mxu0 %v3173_v17  ;;  %2544 = vmatmul.mubr.bf16.gmra.mrb[4].mxu1 %v2706_v20  ;;  %v2733_v32 = vld [vmem:[#allocation2 + $0x5c] ss:$12 sps:$4 sm:$0xff]  }
  0x64   : > { %1153 = vmatmul.mubr.bf16.gmra.mrb[12].mxu0 %v3177_v18  ;;  %2563 = vmatprep.mubr.bf16.mxu1 %v2712_v25  ;;  %v2740_v62 = vld [vmem:[#allocation2 + $0x50] ss:$12 sps:$4 sm:$0xff]  }
  0x65   : > { %1543 = vmatprep.mubr.bf16.mxu0 %v2244_v38 }
  0x6b   : > { %2564 = vmatmul.mubr.bf16.vlgmr.msra.gmra.mrb[0].mxu1 %v2714_v19 }
  0x6c   : > { %1544 = vmatmul.mubr.bf16.vlgmr.msra.gmra.mrb[16].mxu0 %v2243_v21  ;;  %2572 = vmatpush3.bf16.msra.mxu1 %v2713_v33  ;;  %v2158_v21 = vld [vmem:[%s3290_s3] ss:$0 sm:$0xff] }
  0x6d   : > { %2472 = vmatpush3.bf16.msra.mxu0 %v2711_v22  ;;  %2573 = vmatprep.subr.bf16.mxu1 %v2717_v24 }
  0x6e   : > { %2473 = vmatprep.subr.bf16.mxu0 %v2715_v23  ;;  %1551 = vmatprep.mubr.bf16.mxu0 %v2247_v27 }
  0x6f   : > { %2567 = vmatprep.mubr.bf16.mxu1 %v2731_v28 }
  0x70   : > { %2574 = vmatpush3.bf16.msra.mxu1 %v2717_v24 }
  0x71   : > { %2474 = vmatpush3.bf16.msra.mxu0 %v2716_v29  ;;  %2575 = vmatprep.subr.bf16.mxu1 %v2720_v57 }
  0x72   : > { %2475 = vmatprep.subr.bf16.mxu0 %v2718_v31 }
  0x73   : > { %2568 = vmatmul.mubr.bf16.gmra.mrb[4].mxu1 %v2733_v32 }
  0x74   : > { %1552 = vmatmul.mubr.bf16.gmra.mrb[20].mxu0 %v2246_v30  ;;  %2576 = vmatpush3.bf16.msra.mxu1 %v2720_v57 }
  0x75   : > { %2476 = vmatpush3.bf16.msra.mxu0 %v2719_v26  ;;  %2577 = vmatprep.subr.bf16.mxu1 %v2723_v37 }
  0x76   : > { %2477 = vmatprep.subr.bf16.mxu0 %v2721_v35  ;;  %1559 = vmatprep.mubr.bf16.mxu0 %v2250_v36 }
  0x77   : > { %2587 = vmatprep.mubr.bf16.mxu1 %v2738_v39 }
  0x78   : > { %2578 = vmatpush3.bf16.msra.mxu1 %v2723_v37 }
  0x79   : > { %2478 = vmatpush3.bf16.msra.mxu0 %v2722_v40  ;;  %2579 = vmatprep.subr.bf16.mxu1 %v2726_v42 }
  0x7a   : > { %2479 = vmatprep.subr.bf16.mxu0 %v2724_v41 }
  0x7c   : > { %1560 = vmatmul.mubr.bf16.gmra.mrb[24].mxu0 %v2249_v43  ;;  %2580 = vmatpush3.bf16.msra.mxu1 %v2726_v42 }
  0x7d   : > { %2480 = vmatpush3.bf16.msra.mxu0 %v2725_v47  ;;  %2581 = vmatprep.subr.bf16.mxu1 %v2729_v50 }
  0x7e   : > { %2481 = vmatprep.subr.bf16.mxu0 %v2727_v3  ;;  %1567 = vmatprep.mubr.bf16.mxu0 %v2253_v34 }
  0x80   : > { %2582 = vmatpush3.bf16.msra.mxu1 %v2729_v50 }
  0x81   : > { %2482 = vmatpush3.bf16.msra.mxu0 %v2728_v51  ;;  %2583 = vmatprep.subr.bf16.mxu1 %v2734_v63 }
  0x82   : > { %2483 = vmatprep.subr.bf16.mxu0 %v2730_v52 }
  0x84   : > { %1568 = vmatmul.mubr.bf16.gmra.mrb[28].mxu0 %v2252_v55  ;;  %2584 = vmatpush3.bf16.msra.mxu1 %v2734_v63 }
  0x85   : > { %2484 = vmatpush3.bf16.msra.mxu0 %v2732_v56  ;;  %2585 = vmatprep.subr.bf16.mxu1 %v2737_v59 }
  0x86   : > { %2485 = vmatprep.subr.bf16.mxu0 %v2735_v58  ;;  %1958 = vmatprep.mubr.bf16.mxu0 %v3046_v45  ;;  %v2336_v45 = vcombine.low %v1252_v44, %v2742_v1 }
  0x88   : > { %2586 = vmatpush3.bf16.msra.mxu1 %v2737_v59 }
  0x89   : > { %2486 = vmatpush3.bf16.msra.mxu0 %v2736_v60 }
  0x8b   : > { %2588 = vmatmul.mubr.bf16.vlgmr.msra.gmra.mrb[0].mxu1 %v2739_v61 }
  0x8c   : > { %1959 = vmatmul.mubr.bf16.vlgmr.msra.gmra.mrb[32].mxu0 %v3050_v48  ;;  %2591 = vmatprep.mubr.bf16.mxu1 %v2740_v62 }
  0x8d   : > { %1966 = vmatprep.mubr.bf16.mxu0 %v3128_v53 }
  0x93   : > { %2592 = vmatmul.mubr.bf16.gmra.mrb[4].mxu1 %v2741_v0 }
  0x94   : > { %1967 = vmatmul.mubr.bf16.gmra.mrb[36].mxu0 %v3132_v54 }
  0x95   : > { %1974 = vmatprep.mubr.bf16.mxu0 %v3173_v17 }
  0x9c   : > { %1975 = vmatmul.mubr.bf16.gmra.mrb[40].mxu0 %v3177_v18 }
  0x9d   : > { %1982 = vmatprep.mubr.bf16.mxu0 %v2337_v46 }
  0xa4   : > { %1983 = vmatmul.mubr.bf16.gmra.mrb[44].mxu0 %v2336_v45 }
 0x114   : > { %v2383_v2 = vpop.f32.mrb[0].mxu0 }
 0x115   : > { %v2384_v5 = vpop.f32.mrb[1].mxu0 }
 0x116   : > { %v2385_v48 = vadd.f32 %v2384_v5, %v2383_v2  ;;  %v2386_v6 = vpop.f32.mrb[2].mxu0 }
 0x117   : > { %v2387_v7 = vpop.f32.mrb[3].mxu0 }
 0x118   : > { %v2388_v53 = vadd.f32 %v2387_v7, %v2386_v6  ;;  %v2599_v23 = vadd.f32 %v2385_v48, %v2158_v21 }
 0x11a   : > { %v2607_v29 = vadd.f32 %v2388_v53, %v2158_v21 }
 0x11c   : > { %v2389_v49 = vpop.f32.mrb[4].mxu0 }
 0x11d   : > { %v2390_v8 = vpop.f32.mrb[5].mxu0 }
 0x11e   : > { %v2391_v9 = vadd.f32 %v2390_v8, %v2389_v49  ;;  %v2392_v54 = vpop.f32.mrb[6].mxu0 }
 0x11f   : > { %v2393_v4 = vpop.f32.mrb[7].mxu0 }
 0x120   : > { %v2394_v10 = vadd.f32 %v2393_v4, %v2392_v54  ;;  %v2595_v35 = vadd.f32 %v2391_v9, %v2158_v21 }
 0x122   : > { %v2603_v40 = vadd.f32 %v2394_v10, %v2158_v21 }
 0x128   : > { %v2395_v11 = vpop.f32.mrb[8].mxu0 }
 0x129   : > { %v2396_v12 = vpop.f32.mrb[9].mxu0 }
 0x12a   : > { %v2397_v33 = vadd.f32 %v2396_v12, %v2395_v11  ;;  %v2398_v13 = vpop.f32.mrb[10].mxu0 }
 0x12b   : > { %v2399_v14 = vpop.f32.mrb[11].mxu0 }
 0x12c   : > { %v2400_v15 = vadd.f32 %v2399_v14, %v2398_v13  ;;  %v2615_v3 = vadd.f32 %v2397_v33, %v2158_v21 }
 0x12e   : > { %v2623_v52 = vadd.f32 %v2400_v15, %v2158_v21 }
 0x137   : > { %v2401_v16 = vpop.f32.mrb[12].mxu0 }
 0x138   : > { %v2402_v17 = vpop.f32.mrb[13].mxu0 }
 0x139   : > { %v2403_v18 = vadd.f32 %v2402_v17, %v2401_v16  ;;  %v2404_v38 = vpop.f32.mrb[14].mxu0 }
 0x13a   : > { %v2405_v25 = vpop.f32.mrb[15].mxu0 }
 0x13b   : > { %v2406_v20 = vadd.f32 %v2405_v25, %v2404_v38  ;;  %v2611_v60 = vadd.f32 %v2403_v18, %v2158_v21 }
 0x13d   : > { %v2619_v1 = vadd.f32 %v2406_v20, %v2158_v21 }
 0x13f   : > { %v2435_v19 = vpop.f32.mrb[16].mxu0 }
 0x140   : > { %v2436_v22 = vpop.f32.mrb[17].mxu0 }
 0x141   : > { %v2437_v24 = vadd.f32 %v2436_v22, %v2435_v19  ;;  %v2438_v27 = vpop.f32.mrb[18].mxu0 }
 0x142   : > { %v2439_v28 = vpop.f32.mrb[19].mxu0 }
 0x143   : > { %v2600_v31 = vadd.f32 %v2599_v23, %v2437_v24  ;;  %v2440_v57 = vadd.f32 %v2439_v28, %v2438_v27 }
 0x145   : > { %v2608_v30 = vadd.f32 %v2607_v29, %v2440_v57 }
 0x147   : > { %v2441_v32 = vpop.f32.mrb[20].mxu0 }
 0x148   : > { %v2442_v26 = vpop.f32.mrb[21].mxu0 }
 0x149   : > { %v2443_v37 = vadd.f32 %v2442_v26, %v2441_v32  ;;  %v2444_v36 = vpop.f32.mrb[22].mxu0 }
 0x14a   : > { %v2445_v39 = vpop.f32.mrb[23].mxu0 }
 0x14b   : > { %v2596_v41 = vadd.f32 %v2595_v35, %v2443_v37  ;;  %v2446_v42 = vadd.f32 %v2445_v39, %v2444_v36 }
 0x14d   : > { %v2604_v43 = vadd.f32 %v2603_v40, %v2446_v42 }
 0x14f   : > { %v2447_v44 = vpop.f32.mrb[24].mxu0 }
 0x150   : > { %v2448_v47 = vpop.f32.mrb[25].mxu0 }
 0x151   : > { %v2449_v50 = vadd.f32 %v2448_v47, %v2447_v44  ;;  %v2450_v34 = vpop.f32.mrb[26].mxu0 }
 0x152   : > { %v2451_v51 = vpop.f32.mrb[27].mxu0 }
 0x153   : > { %v2616_v63 = vadd.f32 %v2615_v3, %v2449_v50  ;;  %v2452_v55 = vadd.f32 %v2451_v51, %v2450_v34 }
 0x155   : > { %v2624_v56 = vadd.f32 %v2623_v52, %v2452_v55 }
 0x157   : > { %v2453_v58 = vpop.f32.mrb[28].mxu0 }
 0x158   : > { %v2454_v59 = vpop.f32.mrb[29].mxu0 }
 0x159   : > { %v2455_v61 = vadd.f32 %v2454_v59, %v2453_v58  ;;  %v2456_v62 = vpop.f32.mrb[30].mxu0 }
 0x15a   : > { %v2457_v0 = vpop.f32.mrb[31].mxu0 }
 0x15b   : > { %v2612_v46 = vadd.f32 %v2611_v60, %v2455_v61  ;;  %v2458_v45 = vadd.f32 %v2457_v0, %v2456_v62 }
 0x15d   : > { %v2620_v2 = vadd.f32 %v2619_v1, %v2458_v45 }
 0x15e   : > { %v2589_v48 = vpop.f32.mrb[0].mxu1 }
 0x15f   : > { %v2487_v5 = vpop.f32.mrb[32].mxu0  ;;  %v2025_v7 = vpop.f32.mrb[1].mxu1 }
 0x160   : > { %v2488_v6 = vpop.f32.mrb[33].mxu0  ;;  %v2590_v8 = vpop.f32.mrb[2].mxu1 }
 0x161   : > { %v2489_v53 = vadd.f32 %v2488_v6, %v2487_v5  ;;  %v2490_v49 = vpop.f32.mrb[34].mxu0  ;;  %v2028_v54 = vpop.f32.mrb[3].mxu1 }
 0x162   : > { %v2491_v9 = vpop.f32.mrb[35].mxu0 }
 0x163   : > { %v2601_v4 = vadd.f32 %v2600_v31, %v2489_v53  ;;  %v2492_v10 = vadd.f32 %v2491_v9, %v2490_v49 }
 0x165   : > { %v2602_v11 = vadd.f32 %v2601_v4, %v2025_v7  ;;  %v2609_v12 = vadd.f32 %v2608_v30, %v2492_v10 }
 0x166   : > { %v2593_v14 = vpop.f32.mrb[4].mxu1 }
 0x167   : > { %2066 = vst [vmem:[%s3274_s30] sm:$0xff] %v2602_v11  ;;  %v2610_v33 = vadd.f32 %v2609_v12, %v2028_v54  ;;  %v2493_v13 = vpop.f32.mrb[36].mxu0  ;;  %v2041_v16 = vpop.f32.mrb[5].mxu1 }
 0x168   : > { %v2494_v15 = vpop.f32.mrb[37].mxu0  ;;  %v2594_v38 = vpop.f32.mrb[6].mxu1 }
 0x169   : > { %2067 = vst [vmem:[%s3274_s30 + $0x8] sm:$0xff] %v2610_v33  ;;  %v2495_v17 = vadd.f32 %v2494_v15, %v2493_v13  ;;  %v2496_v18 = vpop.f32.mrb[38].mxu0  ;;  %v2044_v20 = vpop.f32.mrb[7].mxu1 }
 0x16a   : > { %v2497_v25 = vpop.f32.mrb[39].mxu0 }
 0x16b   : > { %v2597_v21 = vadd.f32 %v2596_v41, %v2495_v17  ;;  %v2498_v19 = vadd.f32 %v2497_v25, %v2496_v18 }
 0x16d   : > { %v2598_v22 = vadd.f32 %v2597_v21, %v2589_v48  ;;  %v2605_v23 = vadd.f32 %v2604_v43, %v2498_v19 }
 0x16f   : > { %2068 = vst [vmem:[%s3274_s30 + $0x10] sm:$0xff] %v2598_v22  ;;  %v2606_v24 = vadd.f32 %v2605_v23, %v2590_v8  ;;  %v2499_v27 = vpop.f32.mrb[40].mxu0 }
 0x170   : > { %v2500_v28 = vpop.f32.mrb[41].mxu0 }
 0x171   : > { %2069 = vst [vmem:[%s3274_s30 + $0x18] sm:$0xff] %v2606_v24  ;;  %v2501_v29 = vadd.f32 %v2500_v28, %v2499_v27  ;;  %v2502_v31 = vpop.f32.mrb[42].mxu0 }
 0x172   : > { %v2503_v57 = vpop.f32.mrb[43].mxu0 }
 0x173   : > { %v2617_v30 = vadd.f32 %v2616_v63, %v2501_v29  ;;  %v2504_v32 = vadd.f32 %v2503_v57, %v2502_v31 }
 0x175   : > { %v2618_v26 = vadd.f32 %v2617_v30, %v2041_v16  ;;  %v2625_v35 = vadd.f32 %v2624_v56, %v2504_v32 }
 0x177   : > { %2070 = vst [vmem:[%s3274_s30 + $0x20] sm:$0xff] %v2618_v26  ;;  %v2626_v37 = vadd.f32 %v2625_v35, %v2044_v20  ;;  %v2505_v36 = vpop.f32.mrb[44].mxu0 }
 0x178   : > { %v2506_v39 = vpop.f32.mrb[45].mxu0 }
 0x179   : > { %2071 = vst [vmem:[%s3274_s30 + $0x28] sm:$0xff] %v2626_v37  ;;  %v2507_v40 = vadd.f32 %v2506_v39, %v2505_v36  ;;  %v2508_v41 = vpop.f32.mrb[46].mxu0 }
 0x17a   : > { %v2509_v42 = vpop.f32.mrb[47].mxu0 }
 0x17b   : > { %v2613_v43 = vadd.f32 %v2612_v46, %v2507_v40  ;;  %v2510_v44 = vadd.f32 %v2509_v42, %v2508_v41 }
 0x17d   : > { %v2614_v47 = vadd.f32 %v2613_v43, %v2593_v14  ;;  %v2621_v3 = vadd.f32 %v2620_v2, %v2510_v44 }
 0x17f   : > { %2072 = vst [vmem:[%s3274_s30 + $0x30] sm:$0xff] %v2614_v47  ;;  %v2622_v50 = vadd.f32 %v2621_v3, %v2594_v38 }
 0x181   : > { %2073 = vst [vmem:[%s3274_s30 + $0x38] sm:$0xff] %v2622_v50 }
 0x182 PF: > { %s14_s15 = sadd.s32 1, %s2749_s15  }
 0x183   : > { %p11_p4 = scmp.ge.s32.totalorder %s14_s15, 4  }
 0x185   :  { %13 = sbr.rel (!%p11_p4) target bundleno = 1 (0x1), region = 74 }

// kernel: generator_forward.13
= control target key start
LH: loop header
LB: loop body
LE: loop exit
PB: predicated region body
PF: predicated region fallthrough
CT: control target
= control target key end

     0   :  { %s4163_s15 = smov 0   ;;  %s5482_s0 = inlined_call_operand.vmem [shape: f32[2,16,16,128], index: 0, kind: input, shape index: {}]   ;;  %s5483_s1 = inlined_call_operand.vmem [shape: f32[2,128], index: 1, kind: input, shape index: {}]   ;;  %s5484_s2 = inlined_call_operand.vmem [shape: bf16[3,384,128], index: 2, kind: input, shape index: {}]   ;;  %s5485_s3 = inlined_call_operand.vmem [shape: f32[1,128], index: 3, kind: input, shape index: {}]   ;;  %s5486_s4 = inlined_call_operand.vmem [shape: bf16[2,16,16,128], index: 4, kind: output, shape index: {}]  }
   0x1 LB: > { %s2874_s16 = sadd.s32 4294967295, %s4135_s15   ;;  %p2878_p0 = scmp.ge.s32.totalorder %s4135_s15, 1  ;;  %s4135_s15 = sphi %s4163_s15, %s14_s15  }
   0x2   : > { %p162_p1 = scmp.lt.s32.totalorder %s4135_s15, 3 }
   0x4   : > { %p163_p2 = pnand %p2878_p0, %p162_p1 }
   0x5   : > { %v3986_v0 = vld [vmem:[%s5484_s2 + $0x40] sm:$0xff] (!%p163_p2)   ;;  %v4137_v2 = vmov (!%p163_p2), 0   ;;  %v3989_v4 = vld [vmem:[%s5484_s2 + $0x48] sm:$0xff] (!%p163_p2)   ;;  %v3992_v7 = vld [vmem:[%s5484_s2 + $0x50] sm:$0xff] (!%p163_p2)   ;;  %p188_p3 = scmp.lt.s32.totalorder (!%p163_p2), %s2874_s16, 1  ;;  %vm476_vm0 = vcmask (!%p163_p2), 1047559  }
   0x6   : > { %166 = sbr.rel (%p163_p2) target bundleno = 571 (0x23b), region = 36  ;;  %v4177_v1 = vld [vmem:[%s5484_s2 + $0x80] sm:$0xff] (!%p163_p2)   ;;  %418 = vst [vmem:[#allocation2 + $0x8] sm:$0xff] (!%p163_p2), %v4137_v2  ;;  %1102 = vmatprep.mubr.bf16.mxu0 (!%p163_p2), %v4137_v2  ;;  %3217 = vmatprep.subr.bf16.mxu0 (!%p163_p2), %v3986_v0  ;;  %v4192_v5 = vld [vmem:[%s5484_s2 + $0x88] sm:$0xff] (!%p163_p2)   ;;  %v4204_v8 = vld [vmem:[%s5484_s2 + $0x90] sm:$0xff] (!%p163_p2)   ;;  %vm425_vm7 = vcmask (!%p163_p2), 1040384  }
   0x7   : > { %v3988_v3 = vld [vmem:[%s5484_s2] sm:$0xff] (!%p163_p2)   ;;  %3769 = vmatprep.subr.bf16.mxu1 (!%p163_p2), %v4177_v1  ;;  %v3991_v6 = vld [vmem:[%s5484_s2 + $0x8] sm:$0xff] (!%p163_p2)   ;;  %v3994_v9 = vld [vmem:[%s5484_s2 + $0x10] sm:$0xff] (!%p163_p2)   ;;  %vm477_vm1 = vsmask.f32 (!%p163_p2), 7966  ;;  %vm655_vm9 = vcmask (!%p163_p2), 1047552  }
   0x8   : > { %3218 = vmatpush3.bf16.msra.mxu0 (!%p163_p2), %v3988_v3  ;;  %3777 = vmatpush3.bf16.msra.mxu1 (!%p163_p2), %v4177_v1  ;;  %v3995_v10 = vld [vmem:[%s5484_s2 + $0x58] sm:$0xff] (!%p163_p2)   ;;  %v3998_v13 = vld [vmem:[%s5484_s2 + $0x60] sm:$0xff] (!%p163_p2)   ;;  %v4001_v16 = vld [vmem:[%s5484_s2 + $0x68] sm:$0xff] (!%p163_p2)   ;;  %vm770_vm8 = vsmask.f32 (!%p163_p2), 7424 }
   0x9   : > { %3219 = vmatprep.subr.bf16.mxu0 (!%p163_p2), %v3989_v4  ;;  %3770 = vmatprep.subr.bf16.mxu1 (!%p163_p2), %v4192_v5  ;;  %v4217_v11 = vld [vmem:[%s5484_s2 + $0x98] sm:$0xff] (!%p163_p2)   ;;  %v4232_v14 = vld [vmem:[%s5484_s2 + $0xa0] sm:$0xff] (!%p163_p2)   ;;  %v4249_v17 = vld [vmem:[%s5484_s2 + $0xa8] sm:$0xff] (!%p163_p2)   ;;  %vm426_vm10 = vsmask.f32 (!%p163_p2), 256 }
   0xa   : > { %v3997_v12 = vld [vmem:[%s5484_s2 + $0x18] sm:$0xff] (!%p163_p2)   ;;  %v4000_v15 = vld [vmem:[%s5484_s2 + $0x20] sm:$0xff] (!%p163_p2)   ;;  %v4003_v18 = vld [vmem:[%s5484_s2 + $0x28] sm:$0xff] (!%p163_p2)  }
   0xb   : > { %v4004_v19 = vld [vmem:[%s5484_s2 + $0x70] sm:$0xff] (!%p163_p2)   ;;  %v4007_v22 = vld [vmem:[%s5484_s2 + $0x78] sm:$0xff] (!%p163_p2)   ;;  %v4285_v24 = vld [vmem:[%s5483_s1] ss:$0 sm:$0xff] (!%p163_p2) }
   0xc   : > { %3220 = vmatpush3.bf16.msra.mxu0 (!%p163_p2), %v3991_v6  ;;  %3778 = vmatpush3.bf16.msra.mxu1 (!%p163_p2), %v4192_v5  ;;  %v4263_v20 = vld [vmem:[%s5484_s2 + $0xb0] sm:$0xff] (!%p163_p2)   ;;  %v4279_v23 = vld [vmem:[%s5484_s2 + $0xb8] sm:$0xff] (!%p163_p2)   ;;  %v4290_v25 = vld [vmem:[%s5483_s1 + $0x1] ss:$0 sm:$0xff] (!%p163_p2) }
   0xd   : > { %3221 = vmatprep.subr.bf16.mxu0 %v3992_v7  ;;  %3771 = vmatprep.subr.bf16.mxu1 %v4204_v8  ;;  %s5508_s16 = smov (!%p188_p3, %s2874_s16), 1  ;;  %v4006_v21 = vld [vmem:[%s5484_s2 + $0x30] sm:$0xff]   ;;  %vm4298_vm2 = vmand %vm476_vm0, %vm477_vm1  ;;  %v503_v35 = vld [vmem:[#allocation2 + $0xe8] sm:$0x80]  ;;  %vm656_vm1 = vsmask.f32 7938 }
   0xe   : > { %s3088_s27 = sshll.u32 %s5508_s16, 8  ;;  %v500_v29 = vld [vmem:[#allocation2 + $0xd0] sm:$0x80]  ;;  %v504_v39 = vsel %vm4298_vm2, 0, %v503_v35  ;;  %v4009_v40 = vld [vmem:[%s5484_s2 + $0x38] sm:$0xff]   ;;  %v4010_v45 = vld [vmem:[%s5484_s2 + $0x100] sm:$0xff]  }
   0xf   : > { %s4268_s10 = scalar_lea.vmem %s5482_s0, %s3088_s27  ;;  %v501_v37 = vsel %vm4298_vm2, 0, %v500_v29  ;;  %505 = vst [vmem:[#allocation2 + $0xe8] sm:$0x80] %v504_v39  ;;  %v506_v62 = vld [vmem:[#allocation2 + $0x100] sm:$0x80]  ;;  %vm4335_vm11 = vmand %vm425_vm7, %vm426_vm10  ;;  %v4012_v39 = vld [vmem:[%s5484_s2 + $0x108] sm:$0xff]  }
  0x10   : > { %3222 = vmatpush3.bf16.msra.mxu0 %v3994_v9  ;;  %3779 = vmatpush3.bf16.msra.mxu1 %v4204_v8  ;;  %v215_v26 = vld [vmem:[%s4268_s10 + $0x70] sm:$0xff]  ;;  %v216_v27 = vld [vmem:[%s4268_s10 + $0x78] sm:$0xff]  ;;  %v217_v30 = vld [vmem:[%s4268_s10 + $0x80] sm:$0xff]  ;;  %502 = vst [vmem:[#allocation2 + $0xd0] sm:$0x80] %v501_v37  ;;  %v507_v6 = vsel %vm4298_vm2, 0, %v506_v62 }
  0x11   : > { %3223 = vmatprep.subr.bf16.mxu0 %v3995_v10  ;;  %3772 = vmatprep.subr.bf16.mxu1 %v4217_v11  ;;  %v251_v28 = vmul.f32 %v4285_v24, %v215_v26  ;;  %v252_v31 = vmul.f32 %v4285_v24, %v216_v27  ;;  %v218_v33 = vld [vmem:[%s4268_s10 + $0x88] sm:$0xff]  ;;  %v253_v34 = vmul.f32 %v4285_v24, %v217_v30  ;;  %v201_v54 = vld [vmem:[%s4268_s10] sm:$0xff]  ;;  %v219_v56 = vld [vmem:[%s4268_s10 + $0x90] sm:$0xff]  ;;  %s3089_s6 = sshll.u32 %s5508_s16, 7 }
  0x12   : > { %v254_v38 = vmul.f32 %v4285_v24, %v218_v33  ;;  %v202_v55 = vld [vmem:[%s4268_s10 + $0x8] sm:$0xff]  ;;  %v237_v58 = vmul.f32 %v4285_v24, %v201_v54  ;;  %v220_v60 = vld [vmem:[%s4268_s10 + $0x98] sm:$0xff]  ;;  %v255_v61 = vmul.f32 %v4285_v24, %v219_v56  ;;  %508 = vst [vmem:[#allocation2 + $0x100] sm:$0x80] %v507_v6  ;;  %vm4362_vm12 = vmand %vm655_vm9, %vm770_vm8  ;;  %s5431_s9 = scalar_lea.vmem %s5486_s4, %s3089_s6 }
  0x13   : > { %v287_v36 = vadd.f32 %v4290_v25, %v251_v28  ;;  %v288_v41 = vadd.f32 %v4290_v25, %v252_v31  ;;  %v289_v42 = vadd.f32 %v4290_v25, %v253_v34  ;;  %v238_v59 = vmul.f32 %v4285_v24, %v202_v55  ;;  %v4011_v27 = vld [vmem:[%s5484_s2 + $0xc0] sm:$0xff]   ;;  %v222_v29 = vld [vmem:[%s4268_s10 + $0xa8] sm:$0xff]  ;;  %v509_v30 = vld [vmem:[#allocation2 + $0x118] sm:$0x80] }
  0x14   : > { %3224 = vmatpush3.bf16.msra.mxu0 %v3997_v12  ;;  %3780 = vmatpush3.bf16.msra.mxu1 %v4217_v11  ;;  %v290_v44 = vadd.f32 %v4290_v25, %v254_v38  ;;  %v256_v4 = vmul.f32 %v4285_v24, %v220_v60  ;;  %v273_v12 = vadd.f32 %v4290_v25, %v237_v58  ;;  %v204_v54 = vld [vmem:[%s4268_s10 + $0x18] sm:$0xff]  ;;  %v4015_v62 = vld [vmem:[%s5484_s2 + $0xd0] sm:$0xff]   ;;  %v4979_v32 = vld [vmem:[#allocation2 + $0x8] sm:$0xff] }
  0x15   : > { %3225 = vmatprep.subr.bf16.mxu0 %v3998_v13  ;;  %3773 = vmatprep.subr.bf16.mxu1 %v4232_v14  ;;  %vm319_vm3 = vcmp.ge.f32.partialorder %v287_v36, 0.0  ;;  %v351_v43 = vmul.f32 0.2, %v287_v36  ;;  %vm320_vm4 = vcmp.ge.f32.partialorder %v288_v41, 0.0  ;;  %v352_v46 = vmul.f32 0.2, %v288_v41 }
  0x16   : > { %vm321_vm5 = vcmp.ge.f32.partialorder %v289_v42, 0.0  ;;  %v353_v47 = vmul.f32 0.2, %v289_v42  ;;  %vm322_vm6 = vcmp.ge.f32.partialorder %v290_v44, 0.0  ;;  %v354_v49 = vmul.f32 0.2, %v290_v44 }
  0x17   : > { %v383_v48 = vsel %vm319_vm3, %v287_v36, %v351_v43  ;;  %v384_v50 = vsel %vm320_vm4, %v288_v41, %v352_v46  ;;  %v793_v7 = vld [vmem:[#allocation2 + $0xd0] sm:$0xff]  ;;  %v274_v13 = vadd.f32 %v4290_v25, %v238_v59  ;;  %vm305_vm13 = vcmp.ge.f32.partialorder %v273_v12, 0.0  ;;  %vm4429_vm4 = vmand %vm655_vm9, %vm656_vm1 }
  0x18   : > { %3226 = vmatpush3.bf16.msra.mxu0 %v4000_v15  ;;  %3781 = vmatpush3.bf16.msra.mxu1 %v4232_v14  ;;  %v385_v51 = vsel %vm321_vm5, %v289_v42, %v353_v47  ;;  %v4322_v52 = vpack.c.bf16 %v384_v50, %v383_v48  ;;  %v386_v53 = vsel %vm322_vm6, %v290_v44, %v354_v49  ;;  %v337_v28 = vmul.f32 0.2, %v273_v12  ;;  %v4014_v59 = vld [vmem:[%s5484_s2 + $0x110] sm:$0xff]  }
  0x19   : > { %3227 = vmatprep.subr.bf16.mxu0 %v4001_v16  ;;  %3774 = vmatprep.subr.bf16.mxu1 %v4249_v17  ;;  %v4328_v57 = vpack.c.bf16 %v386_v53, %v385_v51  ;;  %v796_v16 = vld [vmem:[#allocation2 + $0xe8] sm:$0xff]  ;;  %vm306_vm14 = vcmp.ge.f32.partialorder %v274_v13, 0.0  ;;  %v338_v33 = vmul.f32 0.2, %v274_v13  ;;  %v258_v47 = vmul.f32 %v4285_v24, %v222_v29  ;;  %v203_v53 = vld [vmem:[%s4268_s10 + $0x10] sm:$0xff] }
  0x1a   : > { %v577_v0 = vshrl.u32 %v4322_v52, 16  ;;  %v580_v3 = vshll.u32 %v4322_v52, 16  ;;  %713 = vst [vmem:[#allocation2 + $0xc8] sm:$0xff] %v4322_v52  ;;  %v369_v35 = vsel %vm305_vm13, %v273_v12, %v337_v28  ;;  %v510_v49 = vsel %vm4298_vm2, 0, %v509_v30  ;;  %v223_v6 = vld [vmem:[%s4268_s10 + $0xb0] sm:$0xff] }
  0x1b   : > { %v584_v9 = vshrl.u32 %v4328_v57, 16  ;;  %v587_v10 = vshll.u32 %v4328_v57, 16  ;;  %714 = vst [vmem:[#allocation2 + $0xe0] sm:$0xff] %v4328_v57  ;;  %511 = vst [vmem:[#allocation2 + $0x118] sm:$0x80] %v510_v49  ;;  %v294_v58 = vadd.f32 %v4290_v25, %v258_v47 }
  0x1c   : > { %3228 = vmatpush3.bf16.msra.mxu0 %v4003_v18  ;;  %3782 = vmatpush3.bf16.msra.mxu1 %v4249_v17  ;;  %v736_v15 = vrot.slane %v580_v3, 1  ;;  %v291_v18 = vadd.f32 %v4290_v25, %v255_v61  ;;  %v515_v47 = vld [vmem:[#allocation2 + $0x148] sm:$0x80] }
  0x1d   : > { %3229 = vmatprep.subr.bf16.mxu0 %v4004_v19  ;;  %3775 = vmatprep.subr.bf16.mxu1 %v4263_v20  ;;  %v292_v19 = vadd.f32 %v4290_v25, %v256_v4  ;;  %v738_v26 = vrot.slane %v587_v10, 1  ;;  %v239_v4 = vmul.f32 %v4285_v24, %v203_v53  ;;  %vm326_vm5 = vcmp.ge.f32.partialorder %v294_v58, 0.0 }
  0x1e   : > { %v737_v31 = vor.u32 %v736_v15, %v577_v0  ;;  %vm323_vm15 = vcmp.ge.f32.partialorder %v291_v18, 0.0  ;;  %v355_v36 = vmul.f32 0.2, %v291_v18  ;;  %v4016_v15 = vld [vmem:[%s5484_s2 + $0x118] sm:$0xff]  }
  0x1f   : > { %vm324_vm0 = vcmp.ge.f32.partialorder %v292_v19, 0.0  ;;  %v739_v34 = vor.u32 %v738_v26, %v584_v9  ;;  %v356_v37 = vmul.f32 0.2, %v292_v19  ;;  %v224_v26 = vld [vmem:[%s4268_s10 + $0xb8] sm:$0xff] }
  0x20   : > { %3230 = vmatpush3.bf16.msra.mxu0 %v4006_v21  ;;  %3783 = vmatpush3.bf16.msra.mxu1 %v4263_v20  ;;  %v794_v38 = vsel %vm4362_vm12, %v737_v31, %v793_v7  ;;  %v4423_v7 = vrot.slane %v577_v0, 7  ;;  %v259_v31 = vmul.f32 %v4285_v24, %v223_v6 }
  0x21   : > { %3231 = vmatprep.subr.bf16.mxu0 %v4007_v22  ;;  %3776 = vmatprep.subr.bf16.mxu1 %v4279_v23  ;;  %v221_v22 = vld [vmem:[%s4268_s10 + $0xa0] sm:$0xff]  ;;  %795 = vst [vmem:[#allocation2 + $0xd0] sm:$0xff] %v794_v38  ;;  %v797_v42 = vsel %vm4362_vm12, %v739_v34, %v796_v16  ;;  %v388_v44 = vsel %vm324_vm0, %v292_v19, %v356_v37  ;;  %v4124_v63 = vld [vmem:[#allocation2 + $0xc8] sm:$0xff] }
  0x22   : > { %v257_v41 = vmul.f32 %v4285_v24, %v221_v22  ;;  %3657 = vmatprep.mubr.bf16.mxu1 %v794_v38  ;;  %798 = vst [vmem:[#allocation2 + $0xe8] sm:$0xff] %v797_v42  ;;  %v240_v16 = vmul.f32 %v4285_v24, %v204_v54  ;;  %v275_v22 = vadd.f32 %v4290_v25, %v239_v4  ;;  %v225_v38 = vld [vmem:[%s4268_s10 + $0xc0] sm:$0xff]  ;;  %v4951_v12 = vld [vmem:[#allocation2 + $0xc8] sm:$0xff] }
  0x23   : > { %v4018_v54 = vld [vmem:[%s5484_s2 + $0x120] sm:$0xff]   ;;  %v261_v4 = vmul.f32 %v4285_v24, %v225_v38 }
  0x24   : > { %3232 = vmatpush3.bf16.msra.mxu0 %v4009_v40  ;;  %3784 = vmatpush3.bf16.msra.mxu1 %v4279_v23  ;;  %v370_v40 = vsel %vm306_vm14, %v274_v13, %v338_v33  ;;  %v293_v48 = vadd.f32 %v4290_v25, %v257_v41  ;;  %v276_v30 = vadd.f32 %v4290_v25, %v240_v16  ;;  %v431_v33 = vld [vmem:[#allocation2 + $0x30] sm:$0x1]  ;;  %vm307_vm6 = vcmp.ge.f32.partialorder %v275_v22, 0.0  ;;  %v4019_v16 = vld [vmem:[%s5484_s2 + $0xe0] sm:$0xff]  }
  0x25   : > { %3625 = vmatprep.subr.bf16.mxu0 %v4177_v1  ;;  %3353 = vmatprep.subr.bf16.mxu1 %v4010_v45  ;;  %v4387_v43 = vpack.c.bf16 %v370_v40, %v369_v35  ;;  %v4013_v45 = vld [vmem:[%s5484_s2 + $0xc8] sm:$0xff]   ;;  %v339_v37 = vmul.f32 0.2, %v275_v22  ;;  %v260_v41 = vmul.f32 %v4285_v24, %v224_v26  ;;  %v432_v53 = vsel %vm4335_vm11, 0, %v431_v33 }
  0x26   : > { %vm325_vm3 = vcmp.ge.f32.partialorder %v293_v48, 0.0  ;;  %v357_v61 = vmul.f32 0.2, %v293_v48  ;;  %vm308_vm7 = vcmp.ge.f32.partialorder %v276_v30, 0.0  ;;  %v340_v40 = vmul.f32 0.2, %v276_v30 }
  0x27   : > { %1103 = vmatmul.mubr.bf16.vlgmr.msra.gmra.mrb[0].mxu0 %v4137_v2  ;;  %v428_v2 = vld [vmem:[#allocation2 + $0x18] sm:$0x1]  ;;  %3658 = vmatmul.mubr.bf16.vlgmr.msra.gmra.mrb[0].mxu1 %v797_v42  ;;  %v5491_v50 = vshrl.u32 %v4387_v43, 16  ;;  %v531_v51 = vshll.u32 %v4387_v43, 16  ;;  %v226_v42 = vld [vmem:[%s4268_s10 + $0xc8] sm:$0xff]  ;;  %v296_v49 = vadd.f32 %v4290_v25, %v260_v41 }
  0x28   : > { %3626 = vmatpush3.bf16.msra.mxu0 %v4177_v1  ;;  %v429_v21 = vsel %vm4335_vm11, 0, %v428_v2  ;;  %3354 = vmatpush3.bf16.msra.mxu1 %v4011_v27  ;;  %v358_v2 = vmul.f32 0.2, %v294_v58  ;;  %v512_v27 = vld [vmem:[#allocation2 + $0x130] sm:$0x80]  ;;  %v262_v6 = vmul.f32 %v4285_v24, %v226_v42  ;;  %v4020_v26 = vld [vmem:[%s5484_s2 + $0x128] sm:$0xff]  }
  0x29   : > { %3627 = vmatprep.subr.bf16.mxu0 %v4192_v5  ;;  %430 = vst [vmem:[#allocation2 + $0x18] sm:$0x1] %v429_v21  ;;  %1110 = vmatprep.mubr.bf16.mxu0 %v4387_v43  ;;  %v530_v60 = vrot.slane %v5491_v50, 7  ;;  %v4437_v0 = vrot.slane %v531_v51, 1  ;;  %v389_v21 = vsel %vm325_vm3, %v293_v48, %v357_v61  ;;  %v372_v48 = vsel %vm308_vm7, %v276_v30, %v340_v40  ;;  %v802_v61 = vld [vmem:[#allocation2 + $0x118] sm:$0xff]  ;;  %v4021_v33 = vld [vmem:[%s5484_s2 + $0xe8] sm:$0xff]  }
  0x2a   : > { %3355 = vmatprep.subr.bf16.mxu1 %v4012_v39  ;;  %v390_v29 = vsel %vm326_vm5, %v294_v58, %v358_v2  ;;  %433 = vst [vmem:[#allocation2 + $0x30] sm:$0x1] %v432_v53  ;;  %vm328_vm9 = vcmp.ge.f32.partialorder %v296_v49, 0.0  ;;  %v4022_v53 = vld [vmem:[%s5484_s2 + $0x130] sm:$0xff]   ;;  %v461_v50 = vld [vmem:[#allocation2 + $0x120] sm:$0x1] }
  0x2b   : > { %v533_v19 = vor.u32 %v531_v51, %v530_v60  ;;  %v4450_v35 = vpack.c.bf16 %v390_v29, %v389_v21  ;;  %v513_v51 = vsel %vm4298_vm2, 0, %v512_v27  ;;  %v298_v21 = vadd.f32 %v4290_v25, %v262_v6  ;;  %v206_v27 = vld [vmem:[%s4268_s10 + $0x28] sm:$0xff]  ;;  %v4033_v1 = vld [vmem:[%s5484_s2 + $0x180] sm:$0xff]  }
  0x2c   : > { %3628 = vmatpush3.bf16.msra.mxu0 %v4192_v5  ;;  %v387_v5 = vsel %vm323_vm15, %v291_v18, %v355_v36  ;;  %3356 = vmatpush3.bf16.msra.mxu1 %v4013_v45  ;;  %v799_v18 = vld [vmem:[#allocation2 + $0x100] sm:$0xff]  ;;  %v4017_v36 = vld [vmem:[%s5484_s2 + $0xd8] sm:$0xff]   ;;  %v295_v45 = vadd.f32 %v4290_v25, %v259_v31  ;;  %514 = vst [vmem:[#allocation2 + $0x130] sm:$0x80] %v513_v51 }
  0x2d   : > { %3629 = vmatprep.subr.bf16.mxu0 %v4204_v8  ;;  %v4394_v46 = vpack.c.bf16 %v388_v44, %v387_v5  ;;  %3357 = vmatprep.subr.bf16.mxu1 %v4014_v59  ;;  %v598_v5 = vshrl.u32 %v4450_v35, 16  ;;  %716 = vst [vmem:[#allocation2 + $0x110] sm:$0xff] %v4450_v35  ;;  %v371_v44 = vsel %vm307_vm6, %v275_v22, %v339_v37  ;;  %v516_v22 = vsel %vm4298_vm2, 0, %v515_v47  ;;  %v228_v37 = vld [vmem:[%s4268_s10 + $0xd8] sm:$0xff]  ;;  %v518_v51 = vld [vmem:[#allocation2 + $0x160] sm:$0x80] }
  0x2e   : > { %v4479_v59 = vpack.c.bf16 %v372_v48, %v371_v44  ;;  %vm327_vm8 = vcmp.ge.f32.partialorder %v295_v45, 0.0  ;;  %v359_v60 = vmul.f32 0.2, %v295_v45  ;;  %517 = vst [vmem:[#allocation2 + $0x148] sm:$0x80] %v516_v22  ;;  %vm330_vm13 = vcmp.ge.f32.partialorder %v298_v21, 0.0 }
  0x2f   : > { %v591_v55 = vshrl.u32 %v4394_v46, 16  ;;  %v594_v56 = vshll.u32 %v4394_v46, 16  ;;  %715 = vst [vmem:[#allocation2 + $0xf8] sm:$0xff] %v4394_v46 }
  0x30   : > { %3630 = vmatpush3.bf16.msra.mxu0 %v4204_v8  ;;  %v658_v13 = vld [vmem:[#allocation2 + $0x18] sm:$0xff]  ;;  %3358 = vmatpush3.bf16.msra.mxu1 %v4015_v62  ;;  %v360_v62 = vmul.f32 0.2, %v296_v49  ;;  %v5488_v2 = vshrl.u32 %v4479_v59, 16  ;;  %707 = vst [vmem:[#allocation2 + $0x38] sm:$0xff] %v4479_v59 }
  0x31   : > { %3631 = vmatprep.subr.bf16.mxu0 %v4217_v11  ;;  %v740_v8 = vrot.slane %v594_v56, 1  ;;  %v4448_v34 = vsel %vm4429_vm4, %v533_v19, %v658_v13  ;;  %3359 = vmatprep.subr.bf16.mxu1 %v4016_v15  ;;  %v391_v15 = vsel %vm327_vm8, %v295_v45, %v359_v60  ;;  %v297_v19 = vadd.f32 %v4290_v25, %v261_v4  ;;  %v661_v44 = vld [vmem:[#allocation2 + $0x30] sm:$0xff] }
  0x32   : > { %660 = vst [vmem:[#allocation2 + $0x18] sm:$0xff] %v4448_v34  ;;  %1111 = vmatmul.mubr.bf16.gmra.mrb[4].mxu0 %v4448_v34  ;;  %v537_v31 = vrot.slane %v5488_v2, 7  ;;  %v449_v2 = vld [vmem:[#allocation2 + $0xc0] sm:$0x1] }
  0x33   : > { %v741_v28 = vor.u32 %v740_v8, %v591_v55  ;;  %v205_v8 = vld [vmem:[%s4268_s10 + $0x20] sm:$0xff]  ;;  %1118 = vmatprep.mubr.bf16.mxu0 %v4479_v59  ;;  %vm329_vm10 = vcmp.ge.f32.partialorder %v297_v19, 0.0  ;;  %v361_v38 = vmul.f32 0.2, %v297_v19  ;;  %v805_v4 = vld [vmem:[#allocation2 + $0x130] sm:$0xff] }
  0x34   : > { %3632 = vmatpush3.bf16.msra.mxu0 %v4217_v11  ;;  %v601_v11 = vshll.u32 %v4450_v35, 16  ;;  %3360 = vmatpush3.bf16.msra.mxu1 %v4017_v36  ;;  %v241_v36 = vmul.f32 %v4285_v24, %v205_v8  ;;  %v264_v8 = vmul.f32 %v4285_v24, %v228_v37 }
  0x35   : > { %v800_v39 = vsel %vm4362_vm12, %v741_v28, %v799_v18  ;;  %3633 = vmatprep.subr.bf16.mxu0 %v4232_v14  ;;  %v392_v18 = vsel %vm328_vm9, %v296_v49, %v360_v62  ;;  %3361 = vmatprep.subr.bf16.mxu1 %v4018_v54  ;;  %v227_v28 = vld [vmem:[%s4268_s10 + $0xd0] sm:$0xff]  ;;  %v393_v45 = vsel %vm329_vm10, %v297_v19, %v361_v38  ;;  %v434_v62 = vld [vmem:[#allocation2 + $0x48] sm:$0x1]  ;;  %v519_v38 = vsel %vm4298_vm2, 0, %v518_v51  ;;  %v208_v51 = vld [vmem:[%s4268_s10 + $0x38] sm:$0xff] }
  0x36   : > { %801 = vst [vmem:[#allocation2 + $0x100] sm:$0xff] %v800_v39  ;;  %3661 = vmatprep.mubr.bf16.mxu1 %v800_v39  ;;  %v742_v58 = vrot.slane %v601_v11, 1  ;;  %v4507_v30 = vpack.c.bf16 %v392_v18, %v391_v15  ;;  %v362_v39 = vmul.f32 0.2, %v298_v21  ;;  %v277_v48 = vadd.f32 %v4290_v25, %v241_v36  ;;  %v229_v15 = vld [vmem:[%s4268_s10 + $0xe0] sm:$0xff]  ;;  %v230_v19 = vld [vmem:[%s4268_s10 + $0xe8] sm:$0xff] }
  0x37   : > { %v263_v49 = vmul.f32 %v4285_v24, %v227_v28  ;;  %v521_v28 = vld [vmem:[#allocation2 + $0x178] sm:$0x80]  ;;  %v808_v36 = vld [vmem:[#allocation2 + $0x148] sm:$0xff]  ;;  %520 = vst [vmem:[#allocation2 + $0x160] sm:$0x80] %v519_v38 }
  0x38   : > { %3634 = vmatpush3.bf16.msra.mxu0 %v4232_v14  ;;  %v743_v13 = vor.u32 %v742_v58, %v598_v5  ;;  %v538_v14 = vshll.u32 %v4479_v59, 16  ;;  %v605_v40 = vshrl.u32 %v4507_v30, 16  ;;  %v608_v41 = vshll.u32 %v4507_v30, 16  ;;  %717 = vst [vmem:[#allocation2 + $0x128] sm:$0xff] %v4507_v30  ;;  %3362 = vmatpush3.bf16.msra.mxu1 %v4019_v16 }
  0x39   : > { %3635 = vmatprep.subr.bf16.mxu0 %v4249_v17  ;;  %v394_v47 = vsel %vm330_vm13, %v298_v21, %v362_v39  ;;  %3363 = vmatprep.subr.bf16.mxu1 %v4020_v26  ;;  %vm309_vm14 = vcmp.ge.f32.partialorder %v277_v48, 0.0  ;;  %v341_v6 = vmul.f32 0.2, %v277_v48  ;;  %v4023_v21 = vld [vmem:[%s5484_s2 + $0xf0] sm:$0xff]  }
  0x3a   : > { %v803_v29 = vsel %vm4362_vm12, %v743_v13, %v802_v61  ;;  %v540_v42 = vor.u32 %v538_v14, %v537_v31  ;;  %v744_v54 = vrot.slane %v608_v41, 1  ;;  %v4535_v60 = vpack.c.bf16 %v394_v47, %v393_v45  ;;  %v207_v39 = vld [vmem:[%s4268_s10 + $0x30] sm:$0xff] }
  0x3b   : > { %804 = vst [vmem:[#allocation2 + $0x118] sm:$0xff] %v803_v29  ;;  %3662 = vmatmul.mubr.bf16.gmra.mrb[4].mxu1 %v803_v29  ;;  %v299_v13 = vadd.f32 %v4290_v25, %v263_v49  ;;  %v373_v26 = vsel %vm309_vm14, %v277_v48, %v341_v6  ;;  %v4024_v29 = vld [vmem:[%s5484_s2 + $0x138] sm:$0xff]   ;;  %v4586_v6 = vld [vmem:[%s5484_s2 + $0x140] sm:$0xff]  }
  0x3c   : > { %3636 = vmatpush3.bf16.msra.mxu0 %v4249_v17  ;;  %v242_v17 = vmul.f32 %v4285_v24, %v206_v27  ;;  %v4533_v58 = vsel %vm4429_vm4, %v540_v42, %v661_v44  ;;  %v745_v16 = vor.u32 %v744_v54, %v605_v40  ;;  %v615_v18 = vshll.u32 %v4535_v60, 16  ;;  %718 = vst [vmem:[#allocation2 + $0x140] sm:$0xff] %v4535_v60  ;;  %v4025_v49 = vld [vmem:[%s5484_s2 + $0xf8] sm:$0xff]  }
  0x3d   : > { %3637 = vmatprep.subr.bf16.mxu0 %v4263_v20  ;;  %663 = vst [vmem:[#allocation2 + $0x30] sm:$0xff] %v4533_v58  ;;  %1119 = vmatmul.mubr.bf16.gmra.mrb[8].mxu0 %v4533_v58  ;;  %v300_v27 = vadd.f32 %v4290_v25, %v264_v8  ;;  %vm331_vm0 = vcmp.ge.f32.partialorder %v299_v13, 0.0  ;;  %v363_v37 = vmul.f32 0.2, %v299_v13  ;;  %v435_v44 = vsel %vm4335_vm11, 0, %v434_v62 }
  0x3e   : > { %v278_v61 = vadd.f32 %v4290_v25, %v242_v17  ;;  %3364 = vmatpush3.bf16.msra.mxu1 %v4021_v33  ;;  %v806_v31 = vsel %vm4362_vm12, %v745_v16, %v805_v4  ;;  %v746_v33 = vrot.slane %v615_v18, 1  ;;  %436 = vst [vmem:[#allocation2 + $0x48] sm:$0x1] %v435_v44  ;;  %v266_v54 = vmul.f32 %v4285_v24, %v230_v19  ;;  %v437_v4 = vld [vmem:[#allocation2 + $0x60] sm:$0x1] }
  0x3f   : > { %3365 = vmatprep.subr.bf16.mxu1 %v4022_v53  ;;  %807 = vst [vmem:[#allocation2 + $0x130] sm:$0xff] %v806_v31  ;;  %3665 = vmatprep.mubr.bf16.mxu1 %v806_v31  ;;  %vm332_vm1 = vcmp.ge.f32.partialorder %v300_v27, 0.0  ;;  %v364_v17 = vmul.f32 0.2, %v300_v27  ;;  %v395_v48 = vsel %vm331_vm0, %v299_v13, %v363_v37  ;;  %v243_v62 = vmul.f32 %v4285_v24, %v207_v39  ;;  %v811_v44 = vld [vmem:[#allocation2 + $0x160] sm:$0xff] }
  0x40   : > { %3638 = vmatpush3.bf16.msra.mxu0 %v4263_v20  ;;  %v612_v20 = vshrl.u32 %v4535_v60, 16  ;;  %vm310_vm15 = vcmp.ge.f32.partialorder %v278_v61, 0.0  ;;  %v342_v22 = vmul.f32 0.2, %v278_v61  ;;  %v438_v31 = vsel %vm4335_vm11, 0, %v437_v4 }
  0x41   : > { %3639 = vmatprep.subr.bf16.mxu0 %v4279_v23  ;;  %v396_v53 = vsel %vm332_vm1, %v300_v27, %v364_v17  ;;  %439 = vst [vmem:[#allocation2 + $0x60] sm:$0x1] %v438_v31  ;;  %v210_v17 = vld [vmem:[%s4268_s10 + $0x48] sm:$0xff] }
  0x42   : > { %v374_v42 = vsel %vm310_vm15, %v278_v61, %v342_v22  ;;  %v747_v45 = vor.u32 %v746_v33, %v612_v20  ;;  %3366 = vmatpush3.bf16.msra.mxu1 %v4023_v21  ;;  %v522_v61 = vsel %vm4298_vm2, 0, %v521_v28  ;;  %v4594_v16 = vpack.c.bf16 %v396_v53, %v395_v48  ;;  %v209_v33 = vld [vmem:[%s4268_s10 + $0x40] sm:$0xff]  ;;  %v440_v53 = vld [vmem:[#allocation2 + $0x78] sm:$0x1] }
  0x43   : > { %v4571_v47 = vpack.c.bf16 %v374_v42, %v373_v26  ;;  %3367 = vmatprep.subr.bf16.mxu1 %v4024_v29  ;;  %523 = vst [vmem:[#allocation2 + $0x178] sm:$0x80] %v522_v61  ;;  %v302_v21 = vadd.f32 %v4290_v25, %v266_v54  ;;  %v244_v22 = vmul.f32 %v4285_v24, %v208_v51  ;;  %v614_v52 = vrot.slane %v612_v20, 7 }
  0x44   : > { %3640 = vmatpush3.bf16.msra.mxu0 %v4279_v23  ;;  %v265_v23 = vmul.f32 %v4285_v24, %v229_v15  ;;  %v809_v8 = vsel %vm4362_vm12, %v747_v45, %v808_v36  ;;  %v279_v26 = vadd.f32 %v4290_v25, %v243_v62  ;;  %v619_v27 = vshrl.u32 %v4594_v16, 16  ;;  %719 = vst [vmem:[#allocation2 + $0x158] sm:$0xff] %v4594_v16 }
  0x45   : > { %v5487_v13 = vshrl.u32 %v4571_v47, 16  ;;  %v545_v15 = vshll.u32 %v4571_v47, 16  ;;  %708 = vst [vmem:[#allocation2 + $0x50] sm:$0xff] %v4571_v47  ;;  %1126 = vmatprep.mubr.bf16.mxu0 %v4571_v47  ;;  %810 = vst [vmem:[#allocation2 + $0x148] sm:$0xff] %v809_v8  ;;  %3666 = vmatmul.mubr.bf16.gmra.mrb[8].mxu1 %v809_v8  ;;  %v622_v28 = vshll.u32 %v4594_v16, 16  ;;  %vm334_vm5 = vcmp.ge.f32.partialorder %v302_v21, 0.0 }
  0x46   : > { %v301_v19 = vadd.f32 %v4290_v25, %v265_v23  ;;  %3368 = vmatpush3.bf16.msra.mxu1 %v4025_v49  ;;  %v366_v37 = vmul.f32 0.2, %v302_v21  ;;  %v280_v42 = vadd.f32 %v4290_v25, %v244_v22  ;;  %vm311_vm6 = vcmp.ge.f32.partialorder %v279_v26, 0.0  ;;  %v664_v45 = vld [vmem:[#allocation2 + $0x48] sm:$0xff]  ;;  %v211_v22 = vld [vmem:[%s4268_s10 + $0x50] sm:$0xff] }
  0x47   : > { %v544_v29 = vrot.slane %v5487_v13, 7  ;;  %3673 = vmatprep.subr.bf16.mxu1 %v4586_v6  ;;  %v748_v38 = vrot.slane %v622_v28, 1  ;;  %v343_v49 = vmul.f32 0.2, %v279_v26  ;;  %v245_v51 = vmul.f32 %v4285_v24, %v209_v33  ;;  %v446_v13 = vld [vmem:[#allocation2 + $0xa8] sm:$0x1] }
  0x48   : > { %vm333_vm3 = vcmp.ge.f32.partialorder %v301_v19, 0.0  ;;  %v365_v36 = vmul.f32 0.2, %v301_v19  ;;  %v398_v23 = vsel %vm334_vm5, %v302_v21, %v366_v37  ;;  %vm312_vm7 = vcmp.ge.f32.partialorder %v280_v42, 0.0  ;;  %v443_v37 = vld [vmem:[#allocation2 + $0x90] sm:$0x1] }
  0x49   : > { %v547_v39 = vor.u32 %v545_v15, %v544_v29  ;;  %v749_v54 = vor.u32 %v748_v38, %v619_v27  ;;  %v344_v4 = vmul.f32 0.2, %v280_v42  ;;  %v375_v8 = vsel %vm311_vm6, %v279_v26, %v343_v49  ;;  %v212_v29 = vld [vmem:[%s4268_s10 + $0x58] sm:$0xff] }
  0x4a   : > { %v397_v48 = vsel %vm333_vm3, %v301_v19, %v365_v36  ;;  %v246_v19 = vmul.f32 %v4285_v24, %v210_v17  ;;  %v281_v21 = vadd.f32 %v4290_v25, %v245_v51  ;;  %v441_v26 = vsel %vm4335_vm11, 0, %v440_v53  ;;  %v213_v51 = vld [vmem:[%s4268_s10 + $0x60] sm:$0xff]  ;;  %v814_v53 = vld [vmem:[#allocation2 + $0x178] sm:$0xff] }
  0x4b   : > { %v4620_v61 = vsel %vm4429_vm4, %v547_v39, %v664_v45  ;;  %v4622_v62 = vpack.c.bf16 %v398_v23, %v397_v48  ;;  %v812_v31 = vsel %vm4362_vm12, %v749_v54, %v811_v44  ;;  %v376_v38 = vsel %vm312_vm7, %v280_v42, %v344_v4  ;;  %442 = vst [vmem:[#allocation2 + $0x78] sm:$0x1] %v441_v26  ;;  %v4032_v44 = vld [vmem:[%s5484_s2 + $0x1c0] sm:$0xff]   ;;  %v214_v42 = vld [vmem:[%s4268_s10 + $0x68] sm:$0xff] }
  0x4c   : > { %666 = vst [vmem:[#allocation2 + $0x48] sm:$0xff] %v4620_v61  ;;  %1127 = vmatmul.mubr.bf16.gmra.mrb[12].mxu0 %v4620_v61  ;;  %813 = vst [vmem:[#allocation2 + $0x160] sm:$0xff] %v812_v31  ;;  %3669 = vmatprep.mubr.bf16.mxu1 %v812_v31  ;;  %v282_v39 = vadd.f32 %v4290_v25, %v246_v19  ;;  %vm313_vm8 = vcmp.ge.f32.partialorder %v281_v21, 0.0  ;;  %v345_v17 = vmul.f32 0.2, %v281_v21  ;;  %v444_v19 = vsel %vm4335_vm11, 0, %v443_v37 }
  0x4d   : > { %v626_v33 = vshrl.u32 %v4622_v62, 16  ;;  %v629_v36 = vshll.u32 %v4622_v62, 16  ;;  %720 = vst [vmem:[#allocation2 + $0x170] sm:$0xff] %v4622_v62  ;;  %v4645_v48 = vpack.c.bf16 %v376_v38, %v375_v8  ;;  %v247_v23 = vmul.f32 %v4285_v24, %v211_v22  ;;  %3489 = vmatprep.subr.bf16.mxu0 %v4032_v44  ;;  %445 = vst [vmem:[#allocation2 + $0x90] sm:$0x1] %v444_v19 }
  0x4e   : > { %v248_v49 = vmul.f32 %v4285_v24, %v212_v29  ;;  %vm314_vm9 = vcmp.ge.f32.partialorder %v282_v39, 0.0  ;;  %v346_v54 = vmul.f32 0.2, %v282_v39  ;;  %v377_v4 = vsel %vm313_vm8, %v281_v21, %v345_v17  ;;  %v455_v19 = vld [vmem:[#allocation2 + $0xf0] sm:$0x1] }
  0x4f   : > { %v750_v45 = vrot.slane %v629_v36, 1  ;;  %v5489_v8 = vshrl.u32 %v4645_v48, 16  ;;  %v5490_v26 = vshll.u32 %v4645_v48, 16  ;;  %1134 = vmatprep.mubr.bf16.mxu0 %v4645_v48  ;;  %v283_v22 = vadd.f32 %v4290_v25, %v247_v23 }
  0x50   : > { %v378_v29 = vsel %vm314_vm9, %v282_v39, %v346_v54  ;;  %v284_v38 = vadd.f32 %v4290_v25, %v248_v49  ;;  %v249_v21 = vmul.f32 %v4285_v24, %v213_v51  ;;  %v250_v37 = vmul.f32 %v4285_v24, %v214_v42  ;;  %v667_v39 = vld [vmem:[#allocation2 + $0x60] sm:$0xff] }
  0x51   : > { %v751_v31 = vor.u32 %v750_v45, %v626_v33  ;;  %v551_v44 = vrot.slane %v5489_v8, 7  ;;  %v4666_v45 = vpack.c.bf16 %v378_v29, %v377_v4  ;;  %vm315_vm10 = vcmp.ge.f32.partialorder %v283_v22, 0.0  ;;  %v452_v4 = vld [vmem:[#allocation2 + $0xd8] sm:$0x1] }
  0x52   : > { %vm316_vm13 = vcmp.ge.f32.partialorder %v284_v38, 0.0  ;;  %v347_v23 = vmul.f32 0.2, %v283_v22  ;;  %v348_v49 = vmul.f32 0.2, %v284_v38  ;;  %v285_v51 = vadd.f32 %v4290_v25, %v249_v21 }
  0x53   : > { %v815_v17 = vsel %vm4362_vm12, %v751_v31, %v814_v53  ;;  %v554_v24 = vor.u32 %v5490_v26, %v551_v44  ;;  %v5492_v42 = vshrl.u32 %v4666_v45, 16  ;;  %v559_v53 = vshll.u32 %v4666_v45, 16  ;;  %v458_v26 = vld [vmem:[#allocation2 + $0x108] sm:$0x1] }
  0x54   : > { %816 = vst [vmem:[#allocation2 + $0x178] sm:$0xff] %v815_v17  ;;  %3670 = vmatmul.mubr.bf16.gmra.mrb[12].mxu1 %v815_v17  ;;  %v286_v54 = vadd.f32 %v4290_v25, %v250_v37  ;;  %v379_v31 = vsel %vm315_vm10, %v283_v22, %v347_v23  ;;  %v380_v29 = vsel %vm316_vm13, %v284_v38, %v348_v49  ;;  %vm317_vm14 = vcmp.ge.f32.partialorder %v285_v51, 0.0  ;;  %v670_v25 = vld [vmem:[#allocation2 + $0x78] sm:$0xff] }
  0x55   : > { %1701 = vmatprep.mubr.bf16.mxu1 %v4387_v43  ;;  %v349_v17 = vmul.f32 0.2, %v285_v51  ;;  %v4678_v21 = vsel %vm4429_vm4, %v554_v24, %v667_v39  ;;  %v558_v44 = vrot.slane %v5492_v42, 7  ;;  %v4682_v8 = vpack.c.bf16 %v380_v29, %v379_v31  ;;  %v464_v31 = vld [vmem:[#allocation2 + $0x138] sm:$0x1] }
  0x56   : > { %vm318_vm15 = vcmp.ge.f32.partialorder %v286_v54, 0.0  ;;  %669 = vst [vmem:[#allocation2 + $0x60] sm:$0xff] %v4678_v21  ;;  %1135 = vmatmul.mubr.bf16.gmra.mrb[16].mxu0 %v4678_v21  ;;  %v350_v22 = vmul.f32 0.2, %v286_v54  ;;  %v447_v37 = vsel %vm4335_vm11, 0, %v446_v13  ;;  %v450_v39 = vsel %vm4335_vm11, 0, %v449_v2 }
  0x57   : > { %v381_v38 = vsel %vm317_vm14, %v285_v51, %v349_v17  ;;  %1142 = vmatprep.mubr.bf16.mxu0 %v4666_v45  ;;  %v561_v23 = vor.u32 %v559_v53, %v558_v44  ;;  %v563_v49 = vshrl.u32 %v4682_v8, 16  ;;  %v566_v24 = vshll.u32 %v4682_v8, 16  ;;  %448 = vst [vmem:[#allocation2 + $0xa8] sm:$0x1] %v447_v37  ;;  %451 = vst [vmem:[#allocation2 + $0xc0] sm:$0x1] %v450_v39 }
  0x58   : > { %v4027_v51 = vld [vmem:[%s5484_s2 + $0x148] sm:$0xff]   ;;  %v382_v13 = vsel %vm318_vm15, %v286_v54, %v350_v22  ;;  %v453_v2 = vsel %vm4335_vm11, 0, %v452_v4  ;;  %v586_v29 = vrot.slane %v584_v9, 7  ;;  %v456_v17 = vsel %vm4335_vm11, 0, %v455_v19  ;;  %v467_v44 = vld [vmem:[#allocation2 + $0x150] sm:$0x1] }
  0x59   : > { %v4707_v37 = vsel %vm4429_vm4, %v561_v23, %v670_v25  ;;  %v565_v39 = vrot.slane %v563_v49, 7  ;;  %v4711_v42 = vpack.c.bf16 %v382_v13, %v381_v38  ;;  %454 = vst [vmem:[#allocation2 + $0xd8] sm:$0x1] %v453_v2  ;;  %457 = vst [vmem:[#allocation2 + $0xf0] sm:$0x1] %v456_v17  ;;  %v593_v54 = vrot.slane %v591_v55, 7 }
  0x5a   : > { %v470_v4 = vld [vmem:[#allocation2 + $0x168] sm:$0x1]  ;;  %672 = vst [vmem:[#allocation2 + $0x78] sm:$0xff] %v4707_v37  ;;  %v673_v9 = vld [vmem:[#allocation2 + $0x90] sm:$0xff]  ;;  %v459_v19 = vsel %vm4335_vm11, 0, %v458_v26  ;;  %v600_v25 = vrot.slane %v598_v5, 7  ;;  %v582_v26 = vor.u32 %v580_v3, %v4423_v7 }
  0x5b   : > { %v462_v22 = vsel %vm4335_vm11, 0, %v461_v50  ;;  %v568_v55 = vor.u32 %v566_v24, %v565_v39  ;;  %v573_v38 = vshll.u32 %v4711_v42, 16  ;;  %460 = vst [vmem:[#allocation2 + $0x108] sm:$0x1] %v459_v19  ;;  %v479_v5 = vld [vmem:[#allocation2 + $0x28] sm:$0x80]  ;;  %v596_v57 = vor.u32 %v594_v56, %v593_v54 }
  0x5c   : > { %1702 = vmatmul.mubr.bf16.vlgmr.msra.gmra.mrb[16].mxu1 %v4448_v34  ;;  %v570_v34 = vshrl.u32 %v4711_v42, 16  ;;  %463 = vst [vmem:[#allocation2 + $0x120] sm:$0x1] %v462_v22  ;;  %v4028_v50 = vld [vmem:[%s5484_s2 + $0x150] sm:$0xff]   ;;  %v607_v23 = vrot.slane %v605_v40, 7  ;;  %v465_v13 = vsel %vm4335_vm11, 0, %v464_v31  ;;  %v617_v54 = vor.u32 %v615_v18, %v614_v52 }
  0x5d   : > { %3674 = vmatpush3.bf16.msra.mxu1 %v4586_v6  ;;  %1709 = vmatprep.mubr.bf16.mxu1 %v4479_v59  ;;  %v589_v6 = vor.u32 %v587_v10, %v586_v29  ;;  %v482_v3 = vld [vmem:[#allocation2 + $0x40] sm:$0x80]  ;;  %v4745_v7 = vsel %vm4429_vm4, %v568_v55, %v673_v9  ;;  %466 = vst [vmem:[#allocation2 + $0x138] sm:$0x1] %v465_v13  ;;  %v468_v10 = vsel %vm4335_vm11, 0, %v467_v44  ;;  %v621_v46 = vrot.slane %v619_v27, 7 }
  0x5e   : > { %3675 = vmatprep.subr.bf16.mxu1 %v4027_v51  ;;  %v572_v2 = vrot.slane %v570_v34, 7  ;;  %v485_v40 = vld [vmem:[#allocation2 + $0x58] sm:$0x80]  ;;  %1143 = vmatmul.mubr.bf16.gmra.mrb[20].mxu0 %v4707_v37  ;;  %675 = vst [vmem:[#allocation2 + $0x90] sm:$0xff] %v4745_v7  ;;  %v676_v20 = vld [vmem:[#allocation2 + $0xa8] sm:$0xff]  ;;  %v679_v31 = vld [vmem:[#allocation2 + $0xc0] sm:$0xff]  ;;  %v603_v29 = vor.u32 %v601_v11, %v600_v25  ;;  %v610_v17 = vor.u32 %v608_v41, %v607_v23 }
  0x5f   : > { %469 = vst [vmem:[#allocation2 + $0x150] sm:$0x1] %v468_v10  ;;  %v471_v56 = vsel %vm4335_vm11, 0, %v470_v4  ;;  %1150 = vmatprep.mubr.bf16.mxu0 %v4682_v8  ;;  %v4768_v35 = vsel %vm4429_vm4, %v582_v26, %v679_v31  ;;  %v628_v11 = vrot.slane %v626_v33, 7  ;;  %v480_v41 = vsel %vm4298_vm2, 0, %v479_v5  ;;  %v4030_v26 = vld [vmem:[%s5484_s2 + $0x160] sm:$0xff]  }
  0x60   : > { %v575_v44 = vor.u32 %v573_v38, %v572_v2  ;;  %472 = vst [vmem:[#allocation2 + $0x168] sm:$0x1] %v471_v56  ;;  %681 = vst [vmem:[#allocation2 + $0xc0] sm:$0xff] %v4768_v35  ;;  %v682_v27 = vld [vmem:[#allocation2 + $0xd8] sm:$0xff]  ;;  %v685_v39 = vld [vmem:[#allocation2 + $0xf0] sm:$0xff]  ;;  %v483_v4 = vsel %vm4298_vm2, 0, %v482_v3  ;;  %v624_v5 = vor.u32 %v622_v28, %v621_v46 }
  0x61   : > { %3676 = vmatpush3.bf16.msra.mxu1 %v4027_v51  ;;  %v4029_v51 = vld [vmem:[%s5484_s2 + $0x158] sm:$0xff]   ;;  %481 = vst [vmem:[#allocation2 + $0x28] sm:$0x80] %v480_v41  ;;  %v724_v33 = vrot.slane %v538_v14, 1  ;;  %v486_v9 = vsel %vm4298_vm2, 0, %v485_v40  ;;  %v4792_v25 = vsel %vm4429_vm4, %v589_v6, %v682_v27  ;;  %v4796_v18 = vsel %vm4429_vm4, %v596_v57, %v685_v39 }
  0x62   : > { %3677 = vmatprep.subr.bf16.mxu1 %v4028_v50  ;;  %v4788_v19 = vsel %vm4429_vm4, %v575_v44, %v676_v20  ;;  %484 = vst [vmem:[#allocation2 + $0x40] sm:$0x80] %v483_v4  ;;  %487 = vst [vmem:[#allocation2 + $0x58] sm:$0x80] %v486_v9  ;;  %v726_v14 = vrot.slane %v545_v15, 1  ;;  %v688_v22 = vld [vmem:[#allocation2 + $0x108] sm:$0xff]  ;;  %v631_v6 = vor.u32 %v629_v36, %v628_v11 }
  0x63   : > { %678 = vst [vmem:[#allocation2 + $0xa8] sm:$0xff] %v4788_v19  ;;  %684 = vst [vmem:[#allocation2 + $0xd8] sm:$0xff] %v4792_v25  ;;  %v691_v55 = vld [vmem:[#allocation2 + $0x120] sm:$0xff]  ;;  %v488_v23 = vld [vmem:[#allocation2 + $0x70] sm:$0x80]  ;;  %v5501_v52 = vshrl.u32 %v4387_v43, 16 }
  0x64   : > { %1710 = vmatmul.mubr.bf16.gmra.mrb[20].mxu1 %v4533_v58  ;;  %687 = vst [vmem:[#allocation2 + $0xf0] sm:$0xff] %v4796_v18  ;;  %v4812_v58 = vsel %vm4429_vm4, %v603_v29, %v688_v22  ;;  %v4816_v15 = vsel %vm4429_vm4, %v610_v17, %v691_v55  ;;  %v491_v13 = vld [vmem:[#allocation2 + $0x88] sm:$0x80]  ;;  %v489_v3 = vsel %vm4298_vm2, 0, %v488_v23  ;;  %v5502_v2 = vshll.u32 %v4645_v48, 16  ;;  %v231_v22 = vld [vmem:[%s4268_s10 + $0xf0] sm:$0xff] }
  0x65   : > { %1717 = vmatprep.mubr.bf16.mxu1 %v4571_v47  ;;  %3678 = vmatpush3.bf16.msra.mxu1 %v4028_v50  ;;  %v723_v28 = vor.u32 %v4437_v0, %v5501_v52  ;;  %690 = vst [vmem:[#allocation2 + $0x108] sm:$0xff] %v4812_v58  ;;  %693 = vst [vmem:[#allocation2 + $0x120] sm:$0xff] %v4816_v15  ;;  %v694_v50 = vld [vmem:[#allocation2 + $0x138] sm:$0xff]  ;;  %v492_v36 = vsel %vm4298_vm2, 0, %v491_v13  ;;  %v5503_v10 = vshrl.u32 %v4479_v59, 16  ;;  %v5504_v20 = vshrl.u32 %v4571_v47, 16 }
  0x66   : > { %3679 = vmatprep.subr.bf16.mxu1 %v4029_v51  ;;  %v728_v57 = vrot.slane %v5502_v2, 1  ;;  %v4833_v43 = vsel %vm4429_vm4, %v617_v54, %v694_v50  ;;  %v697_v0 = vld [vmem:[#allocation2 + $0x150] sm:$0xff]  ;;  %490 = vst [vmem:[#allocation2 + $0x70] sm:$0x80] %v489_v3  ;;  %493 = vst [vmem:[#allocation2 + $0x88] sm:$0x80] %v492_v36  ;;  %1151 = vmatmul.mubr.bf16.gmra.mrb[24].mxu0 %v4745_v7 }
  0x67   : > { %v725_v40 = vor.u32 %v724_v33, %v5503_v10  ;;  %v727_v31 = vor.u32 %v726_v14, %v5504_v20  ;;  %v730_v29 = vrot.slane %v559_v53, 1  ;;  %696 = vst [vmem:[#allocation2 + $0x138] sm:$0xff] %v4833_v43  ;;  %v4845_v17 = vsel %vm4429_vm4, %v624_v5, %v697_v0  ;;  %v4031_v59 = vld [vmem:[%s5484_s2 + $0x168] sm:$0xff]   ;;  %1158 = vmatprep.mubr.bf16.mxu0 %v4711_v42  ;;  %v4034_v33 = vld [vmem:[%s5484_s2 + $0x170] sm:$0xff]   ;;  %v494_v9 = vld [vmem:[#allocation2 + $0xa0] sm:$0x80] }
  0x68   : > { %v700_v46 = vld [vmem:[#allocation2 + $0x168] sm:$0xff]  ;;  %699 = vst [vmem:[#allocation2 + $0x150] sm:$0xff] %v4845_v17  ;;  %v5505_v39 = vshrl.u32 %v4645_v48, 16  ;;  %v5506_v54 = vshrl.u32 %v4666_v45, 16  ;;  %v732_v14 = vrot.slane %v566_v24, 1  ;;  %v232_v55 = vld [vmem:[%s4268_s10 + $0xf8] sm:$0xff] }
  0x69   : > { %3680 = vmatpush3.bf16.msra.mxu1 %v4029_v51  ;;  %v4854_v47 = vsel %vm4429_vm4, %v631_v6, %v700_v46  ;;  %v772_v53 = vld [vmem:[#allocation2 + $0x28] sm:$0xff]  ;;  %v775_v44 = vld [vmem:[#allocation2 + $0x40] sm:$0xff]  ;;  %v778_v11 = vld [vmem:[#allocation2 + $0x58] sm:$0xff]  ;;  %v734_v52 = vrot.slane %v573_v38, 1 }
  0x6a   : > { %3681 = vmatprep.subr.bf16.mxu1 %v4030_v26  ;;  %702 = vst [vmem:[#allocation2 + $0x168] sm:$0xff] %v4854_v47  ;;  %v4859_v56 = vsel %vm4362_vm12, %v723_v28, %v772_v53  ;;  %v4864_v41 = vsel %vm4362_vm12, %v725_v40, %v775_v44  ;;  %v4868_v27 = vsel %vm4362_vm12, %v727_v31, %v778_v11  ;;  %v4122_v5 = vld [vmem:[%s5483_s1] ss:$0 sm:$0xff]  ;;  %v497_v13 = vld [vmem:[#allocation2 + $0xb8] sm:$0x80] }
  0x6b   : > { %774 = vst [vmem:[#allocation2 + $0x28] sm:$0xff] %v4859_v56  ;;  %v729_v51 = vor.u32 %v728_v57, %v5505_v39  ;;  %v731_v4 = vor.u32 %v730_v29, %v5506_v54  ;;  %777 = vst [vmem:[#allocation2 + $0x40] sm:$0xff] %v4864_v41  ;;  %v267_v6 = vmul.f32 %v4122_v5, %v231_v22  ;;  %v473_v28 = vld [vmem:[#allocation2 + $0x180] sm:$0x1]  ;;  %v4123_v38 = vld [vmem:[%s5483_s1 + $0x1] ss:$0 sm:$0xff] }
  0x6c   : > { %1718 = vmatmul.mubr.bf16.gmra.mrb[24].mxu1 %v4620_v61  ;;  %780 = vst [vmem:[#allocation2 + $0x58] sm:$0xff] %v4868_v27  ;;  %v495_v61 = vsel %vm4298_vm2, 0, %v494_v9  ;;  %v268_v23 = vmul.f32 %v4122_v5, %v232_v55  ;;  %v474_v3 = vsel %vm4335_vm11, 0, %v473_v28  ;;  %v4043_v20 = vld [vmem:[%s5484_s2 + $0x178] sm:$0xff]   ;;  %v733_v31 = vor.u32 %v732_v14, %v563_v49  ;;  %v524_v5 = vld [vmem:[#allocation2 + $0x190] sm:$0x80] }
  0x6d   : > { %1725 = vmatprep.mubr.bf16.mxu1 %v4645_v48  ;;  %3682 = vmatpush3.bf16.msra.mxu1 %v4030_v26  ;;  %v781_v24 = vld [vmem:[#allocation2 + $0x70] sm:$0xff]  ;;  %v784_v50 = vld [vmem:[#allocation2 + $0x88] sm:$0xff]  ;;  %496 = vst [vmem:[#allocation2 + $0xa0] sm:$0x80] %v495_v61  ;;  %v498_v26 = vsel %vm4298_vm2, 0, %v497_v13  ;;  %v303_v36 = vadd.f32 %v4123_v38, %v267_v6  ;;  %v735_v53 = vor.u32 %v734_v52, %v570_v34  ;;  %v4930_v34 = vld [vmem:[%s5484_s2 + $0x200] sm:$0xff]  }
  0x6e   : > { %3683 = vmatprep.subr.bf16.mxu1 %v4031_v59  ;;  %v4898_v2 = vsel %vm4362_vm12, %v729_v51, %v781_v24  ;;  %v4902_v57 = vsel %vm4362_vm12, %v731_v4, %v784_v50  ;;  %v304_v0 = vadd.f32 %v4123_v38, %v268_v23  ;;  %499 = vst [vmem:[#allocation2 + $0xb8] sm:$0x80] %v498_v26  ;;  %475 = vst [vmem:[#allocation2 + $0x180] sm:$0x1] %v474_v3  ;;  %v4126_v55 = vld [vmem:[#allocation2 + $0xf8] sm:$0xff]  ;;  %v4127_v61 = vld [vmem:[#allocation2 + $0x110] sm:$0xff] }
  0x6f   : > { %1159 = vmatmul.mubr.bf16.gmra.mrb[28].mxu0 %v4788_v19  ;;  %783 = vst [vmem:[#allocation2 + $0x70] sm:$0xff] %v4898_v2  ;;  %786 = vst [vmem:[#allocation2 + $0x88] sm:$0xff] %v4902_v57  ;;  %vm335_vm11 = vcmp.ge.f32.partialorder %v303_v36, 0.0  ;;  %v367_v10 = vmul.f32 0.2, %v303_v36  ;;  %v525_v6 = vsel %vm4298_vm2, 0, %v524_v5 }
  0x70   : > { %1166 = vmatprep.mubr.bf16.mxu0 %v4124_v63  ;;  %vm336_vm0 = vcmp.ge.f32.partialorder %v304_v0, 0.0  ;;  %v368_v40 = vmul.f32 0.2, %v304_v0  ;;  %526 = vst [vmem:[#allocation2 + $0x190] sm:$0x80] %v525_v6  ;;  %v4959_v52 = vld [vmem:[#allocation2 + $0xe0] sm:$0xff] }
  0x71   : > { %3684 = vmatpush3.bf16.msra.mxu1 %v4031_v59  ;;  %v399_v29 = vsel %vm335_vm11, %v303_v36, %v367_v10  ;;  %v4035_v50 = vld [vmem:[%s5484_s2 + $0x1c8] sm:$0xff]   ;;  %v4038_v26 = vld [vmem:[%s5484_s2 + $0x190] sm:$0xff]   ;;  %v4039_v3 = vld [vmem:[%s5484_s2 + $0x1d8] sm:$0xff]  }
  0x72   : > { %3685 = vmatprep.subr.bf16.mxu1 %v4034_v33  ;;  %v400_v46 = vsel %vm336_vm0, %v304_v0, %v368_v40  ;;  %v4040_v38 = vld [vmem:[%s5484_s2 + $0x198] sm:$0xff]   ;;  %v4042_v36 = vld [vmem:[%s5484_s2 + $0x1a0] sm:$0xff]   ;;  %v4044_v0 = vld [vmem:[%s5484_s2 + $0x1e8] sm:$0xff]  }
  0x73   : > { %v4918_v59 = vpack.c.bf16 %v400_v46, %v399_v29  ;;  %v4045_v63 = vld [vmem:[%s5484_s2 + $0x1a8] sm:$0xff]   ;;  %v4047_v10 = vld [vmem:[%s5484_s2 + $0x1b0] sm:$0xff]   ;;  %v4048_v40 = vld [vmem:[%s5484_s2 + $0x1f8] sm:$0xff]  }
  0x74   : > { %1726 = vmatmul.mubr.bf16.gmra.mrb[28].mxu1 %v4678_v21  ;;  %v787_v44 = vld [vmem:[#allocation2 + $0xa0] sm:$0xff]  ;;  %v2027_v29 = vld [vmem:[#allocation2 + $0x30] sm:$0xff] }
  0x75   : > { %1733 = vmatprep.mubr.bf16.mxu1 %v4666_v45  ;;  %3686 = vmatpush3.bf16.msra.mxu1 %v4034_v33  ;;  %v4923_v11 = vsel %vm4362_vm12, %v733_v31, %v787_v44  ;;  %v633_v49 = vshrl.u32 %v4918_v59, 16  ;;  %v636_v39 = vshll.u32 %v4918_v59, 16  ;;  %v790_v51 = vld [vmem:[#allocation2 + $0xb8] sm:$0xff]  ;;  %v4125_v33 = vld [vmem:[#allocation2 + $0xe0] sm:$0xff]  ;;  %v2031_v46 = vld [vmem:[#allocation2 + $0x50] sm:$0xff] }
  0x76   : > { %3687 = vmatprep.subr.bf16.mxu1 %v4043_v20  ;;  %789 = vst [vmem:[#allocation2 + $0xa0] sm:$0xff] %v4923_v11  ;;  %v4935_v54 = vsel %vm4362_vm12, %v735_v53, %v790_v51  ;;  %v703_v9 = vld [vmem:[#allocation2 + $0x180] sm:$0xff]  ;;  %v4049_v31 = vld [vmem:[%s5484_s2 + $0x1b8] sm:$0xff]   ;;  %v4051_v53 = vld [vmem:[%s5484_s2 + $0x208] sm:$0xff]  }
  0x77   : > { %1167 = vmatmul.mubr.bf16.gmra.mrb[32].mxu0 %v4768_v35  ;;  %792 = vst [vmem:[#allocation2 + $0xb8] sm:$0xff] %v4935_v54  ;;  %v635_v4 = vrot.slane %v633_v49, 7  ;;  %v752_v23 = vrot.slane %v636_v39, 1  ;;  %v817_v28 = vld [vmem:[#allocation2 + $0x190] sm:$0xff]  ;;  %v2030_v44 = vld [vmem:[#allocation2 + $0x48] sm:$0xff] }
  0x78   : > { %1174 = vmatprep.mubr.bf16.mxu0 %v4125_v33  ;;  %v4056_v51 = vld [vmem:[%s5484_s2 + $0x230] sm:$0xff]  }
  0x79   : > { %3688 = vmatpush3.bf16.msra.mxu1 %v4043_v20  ;;  %v638_v14 = vor.u32 %v636_v39, %v635_v4  ;;  %v753_v13 = vor.u32 %v752_v23, %v633_v49  ;;  %v2028_v20 = vld [vmem:[#allocation2 + $0x38] sm:$0xff]  ;;  %v4054_v39 = vld [vmem:[%s5484_s2 + $0x220] sm:$0xff]   ;;  %v5096_v5 = vld [vmem:[#allocation2 + $0x130] sm:$0xff] }
  0x7a   : > { %3721 = vmatprep.subr.bf16.mxu1 %v4930_v34  ;;  %v4053_v49 = vld [vmem:[%s5484_s2 + $0x218] sm:$0xff]  }
  0x7b   : > { %v4943_v22 = vsel %vm4429_vm4, %v638_v14, %v703_v9  ;;  %v4963_v24 = vsel %vm4362_vm12, %v753_v13, %v817_v28  ;;  %v5086_v14 = vld [vmem:[#allocation2 + $0x100] sm:$0xff] }
  0x7c   : > { %1734 = vmatmul.mubr.bf16.gmra.mrb[32].mxu1 %v4707_v37  ;;  %705 = vst [vmem:[#allocation2 + $0x180] sm:$0xff] %v4943_v22  ;;  %819 = vst [vmem:[#allocation2 + $0x190] sm:$0xff] %v4963_v24 }
  0x7d   : > { %1741 = vmatprep.mubr.bf16.mxu1 %v4682_v8 }
  0x7f   : > { %1175 = vmatmul.mubr.bf16.gmra.mrb[36].mxu0 %v4792_v25 }
  0x80   : > { %1182 = vmatprep.mubr.bf16.mxu0 %v4126_v55 }
  0x84   : > { %1742 = vmatmul.mubr.bf16.gmra.mrb[36].mxu1 %v4745_v7 }
  0x85   : > { %1749 = vmatprep.mubr.bf16.mxu1 %v4711_v42 }
  0x87   : > { %1183 = vmatmul.mubr.bf16.gmra.mrb[40].mxu0 %v4796_v18 }
  0x88   : > { %1190 = vmatprep.mubr.bf16.mxu0 %v4127_v61 }
  0x8c   : > { %1750 = vmatmul.mubr.bf16.gmra.mrb[40].mxu1 %v4788_v19 }
  0x8d   : > { %1757 = vmatprep.mubr.bf16.mxu1 %v4951_v12 }
  0x8f   : > { %1191 = vmatmul.mubr.bf16.gmra.mrb[44].mxu0 %v4812_v58 }
  0x90   : > { %1198 = vmatprep.mubr.bf16.mxu0 %v4507_v30 }
  0x94   : > { %1758 = vmatmul.mubr.bf16.gmra.mrb[44].mxu1 %v4768_v35 }
  0x95   : > { %1765 = vmatprep.mubr.bf16.mxu1 %v4959_v52 }
  0x97   : > { %1199 = vmatmul.mubr.bf16.gmra.mrb[48].mxu0 %v4816_v15 }
  0x98   : > { %1206 = vmatprep.mubr.bf16.mxu0 %v4535_v60 }
  0x9c   : > { %1766 = vmatmul.mubr.bf16.gmra.mrb[48].mxu1 %v4792_v25 }
  0x9d   : > { %1773 = vmatprep.mubr.bf16.mxu1 %v4126_v55 }
  0x9f   : > { %1207 = vmatmul.mubr.bf16.gmra.mrb[52].mxu0 %v4833_v43 }
  0xa0   : > { %1214 = vmatprep.mubr.bf16.mxu0 %v4594_v16 }
  0xa4   : > { %1774 = vmatmul.mubr.bf16.gmra.mrb[52].mxu1 %v4796_v18 }
  0xa5   : > { %1781 = vmatprep.mubr.bf16.mxu1 %v4127_v61  ;;  %v5091_v61 = vld [vmem:[#allocation2 + $0x118] sm:$0xff] }
  0xa7   : > { %1215 = vmatmul.mubr.bf16.gmra.mrb[56].mxu0 %v4845_v17 }
  0xa8   : > { %1222 = vmatprep.mubr.bf16.mxu0 %v4622_v62 }
  0xac   : > { %1782 = vmatmul.mubr.bf16.gmra.mrb[56].mxu1 %v4812_v58 }
  0xad   : > { %1789 = vmatprep.mubr.bf16.mxu1 %v4507_v30  ;;  %v4036_v30 = vld [vmem:[%s5484_s2 + $0x188] sm:$0xff]  }
  0xaf   : > { %1223 = vmatmul.mubr.bf16.gmra.mrb[60].mxu0 %v4854_v47 }
  0xb0   : > { %3641 = vmatprep.mubr.bf16.mxu0 %v4979_v32 }
  0xb4   : > { %1790 = vmatmul.mubr.bf16.gmra.mrb[60].mxu1 %v4816_v15 }
  0xb5   : > { %1797 = vmatprep.mubr.bf16.mxu1 %v4535_v60  ;;  %v4037_v60 = vld [vmem:[%s5484_s2 + $0x1d0] sm:$0xff]  }
  0xb7   : > { %3642 = vmatmul.mubr.bf16.vlgmr.msra.gmra.mrb[64].mxu0 %v4859_v56 }
  0xb8   : > { %3490 = vmatpush3.bf16.msra.mxu0 %v4033_v1  ;;  %3645 = vmatprep.mubr.bf16.mxu0 %v4864_v41  ;;  %v5106_v1 = vld [vmem:[#allocation2 + $0x160] sm:$0xff] }
  0xb9   : > { %3491 = vmatprep.subr.bf16.mxu0 %v4035_v50  ;;  %v2052_v50 = vld [vmem:[#allocation2 + $0xf8] sm:$0xff] }
  0xbc   : > { %1798 = vmatmul.mubr.bf16.gmra.mrb[64].mxu1 %v4833_v43  ;;  %3492 = vmatpush3.bf16.msra.mxu0 %v4036_v30 }
  0xbd   : > { %1805 = vmatprep.mubr.bf16.mxu1 %v4594_v16  ;;  %3493 = vmatprep.subr.bf16.mxu0 %v4037_v60  ;;  %v4041_v16 = vld [vmem:[%s5484_s2 + $0x1e0] sm:$0xff]  }
  0xbf   : > { %3646 = vmatmul.mubr.bf16.gmra.mrb[68].mxu0 %v4868_v27 }
  0xc0   : > { %3494 = vmatpush3.bf16.msra.mxu0 %v4038_v26  ;;  %3649 = vmatprep.mubr.bf16.mxu0 %v4898_v2 }
  0xc1   : > { %3495 = vmatprep.subr.bf16.mxu0 %v4039_v3 }
  0xc4   : > { %1806 = vmatmul.mubr.bf16.gmra.mrb[68].mxu1 %v4845_v17  ;;  %3496 = vmatpush3.bf16.msra.mxu0 %v4040_v38  ;;  %v2055_v38 = vld [vmem:[#allocation2 + $0x110] sm:$0xff] }
  0xc5   : > { %1813 = vmatprep.mubr.bf16.mxu1 %v4622_v62  ;;  %3497 = vmatprep.subr.bf16.mxu0 %v4041_v16  ;;  %v4046_v62 = vld [vmem:[%s5484_s2 + $0x1f0] sm:$0xff]  }
  0xc7   : > { %3650 = vmatmul.mubr.bf16.gmra.mrb[72].mxu0 %v4902_v57 }
  0xc8   : > { %3498 = vmatpush3.bf16.msra.mxu0 %v4042_v36  ;;  %3653 = vmatprep.mubr.bf16.mxu0 %v4923_v11 }
  0xc9   : > { %3499 = vmatprep.subr.bf16.mxu0 %v4044_v0 }
  0xcc   : > { %1814 = vmatmul.mubr.bf16.gmra.mrb[72].mxu1 %v4854_v47  ;;  %3500 = vmatpush3.bf16.msra.mxu0 %v4045_v63 }
  0xcd   : > { %1821 = vmatprep.mubr.bf16.mxu1 %v4918_v59  ;;  %3501 = vmatprep.subr.bf16.mxu0 %v4046_v62 }
  0xcf   : > { %3654 = vmatmul.mubr.bf16.gmra.mrb[76].mxu0 %v4935_v54 }
  0xd0   : > { %3502 = vmatpush3.bf16.msra.mxu0 %v4047_v10  ;;  %2300 = vmatprep.mubr.bf16.mxu0 %v2028_v20  ;;  %v2064_v20 = vld [vmem:[#allocation2 + $0x158] sm:$0xff] }
  0xd1   : > { %3503 = vmatprep.subr.bf16.mxu0 %v4048_v40 }
  0xd4   : > { %1822 = vmatmul.mubr.bf16.gmra.mrb[76].mxu1 %v4943_v22  ;;  %3504 = vmatpush3.bf16.msra.mxu0 %v4049_v31 }
  0xd5   : > { %3689 = vmatprep.mubr.bf16.mxu1 %v4859_v56  ;;  %v4052_v56 = vld [vmem:[%s5484_s2 + $0x210] sm:$0xff]  }
  0xd7   : > { %2301 = vmatmul.mubr.bf16.vlgmr.msra.gmra.mrb[80].mxu0 %v2027_v29 }
  0xd8   : > { %2308 = vmatprep.mubr.bf16.mxu0 %v2031_v46 }
  0xdc   : > { %3690 = vmatmul.mubr.bf16.vlgmr.msra.gmra.mrb[80].mxu1 %v4864_v41 }
  0xdd   : > { %3722 = vmatpush3.bf16.msra.mxu1 %v4930_v34  ;;  %3693 = vmatprep.mubr.bf16.mxu1 %v4868_v27  ;;  %v4057_v34 = vld [vmem:[%s5484_s2 + $0x238] sm:$0xff]  }
  0xde   : > { %3723 = vmatprep.subr.bf16.mxu1 %v4051_v53 }
  0xdf   : > { %2309 = vmatmul.mubr.bf16.gmra.mrb[84].mxu0 %v2030_v44 }
  0xe0   : > { %2316 = vmatprep.mubr.bf16.mxu0 %v4645_v48  ;;  %v4055_v48 = vld [vmem:[%s5484_s2 + $0x228] sm:$0xff]  }
  0xe1   : > { %3724 = vmatpush3.bf16.msra.mxu1 %v4051_v53 }
  0xe2   : > { %3725 = vmatprep.subr.bf16.mxu1 %v4052_v56 }
  0xe4   : > { %3694 = vmatmul.mubr.bf16.gmra.mrb[84].mxu1 %v4898_v2 }
  0xe5   : > { %3697 = vmatprep.mubr.bf16.mxu1 %v4902_v57  ;;  %3726 = vmatpush3.bf16.msra.mxu1 %v4052_v56 }
  0xe6   : > { %3727 = vmatprep.subr.bf16.mxu1 %v4053_v49 }
  0xe7   : > { %2317 = vmatmul.mubr.bf16.gmra.mrb[88].mxu0 %v4678_v21  ;;  %v5073_v21 = vld [vmem:[#allocation2 + $0xd0] sm:$0xff] }
  0xe8   : > { %2324 = vmatprep.mubr.bf16.mxu0 %v4666_v45  ;;  %v5076_v45 = vld [vmem:[#allocation2 + $0xe8] sm:$0xff] }
  0xe9   : > { %3728 = vmatpush3.bf16.msra.mxu1 %v4053_v49 }
  0xea   : > { %3729 = vmatprep.subr.bf16.mxu1 %v4054_v39 }
  0xec   : > { %3698 = vmatmul.mubr.bf16.gmra.mrb[88].mxu1 %v4923_v11 }
  0xed   : > { %3701 = vmatprep.mubr.bf16.mxu1 %v4935_v54  ;;  %3730 = vmatpush3.bf16.msra.mxu1 %v4054_v39 }
  0xee   : > { %3731 = vmatprep.subr.bf16.mxu1 %v4055_v48 }
  0xef   : > { %2325 = vmatmul.mubr.bf16.gmra.mrb[92].mxu0 %v4707_v37 }
  0xf0   : > { %2332 = vmatprep.mubr.bf16.mxu0 %v4682_v8 }
  0xf1   : > { %3732 = vmatpush3.bf16.msra.mxu1 %v4055_v48  ;;  %v2067_v48 = vld [vmem:[#allocation2 + $0x170] sm:$0xff] }
  0xf2   : > { %3733 = vmatprep.subr.bf16.mxu1 %v4056_v51 }
  0xf4   : > { %3702 = vmatmul.mubr.bf16.gmra.mrb[92].mxu1 %v5073_v21 }
  0xf5   : > { %3705 = vmatprep.mubr.bf16.mxu1 %v5076_v45  ;;  %3734 = vmatpush3.bf16.msra.mxu1 %v4056_v51 }
  0xf6   : > { %3735 = vmatprep.subr.bf16.mxu1 %v4057_v34 }
  0xf7   : > { %2333 = vmatmul.mubr.bf16.gmra.mrb[96].mxu0 %v4745_v7  ;;  %v5099_v7 = vld [vmem:[#allocation2 + $0x148] sm:$0xff] }
  0xf8   : > { %2340 = vmatprep.mubr.bf16.mxu0 %v4711_v42 }
  0xf9   : > { %3736 = vmatpush3.bf16.msra.mxu1 %v4057_v34 }
  0xfa   : > { %v3233_v4 = vpop.f32.mrb[0].mxu0 }
  0xfb   : > { %v3234_v33 = vpop.f32.mrb[1].mxu0 }
  0xfc   : > { %v5083_v37 = vadd.f32 %v3234_v33, %v3233_v4  ;;  %v3236_v9 = vpop.f32.mrb[2].mxu0  ;;  %3706 = vmatmul.mubr.bf16.gmra.mrb[0].mxu1 %v5086_v14 }
  0xfd   : > { %v3237_v8 = vpop.f32.mrb[3].mxu0  ;;  %3709 = vmatprep.mubr.bf16.mxu1 %v5091_v61 }
  0xfe   : > { %v5089_v55 = vadd.f32 %v3237_v8, %v3236_v9 }
  0xff   : > { %2341 = vmatmul.mubr.bf16.gmra.mrb[100].mxu0 %v4788_v19 }
 0x100   : > { %2348 = vmatprep.mubr.bf16.mxu0 %v4951_v12  ;;  %v5111_v12 = vld [vmem:[#allocation2 + $0x178] sm:$0xff] }
 0x104   : > { %3710 = vmatmul.mubr.bf16.gmra.mrb[4].mxu1 %v5096_v5 }
 0x105   : > { %3713 = vmatprep.mubr.bf16.mxu1 %v5099_v7  ;;  %v3239_v42 = vpop.f32.mrb[4].mxu0 }
 0x106   : > { %v3240_v6 = vpop.f32.mrb[5].mxu0 }
 0x107   : > { %v5103_v23 = vadd.f32 %v3240_v6, %v3239_v42  ;;  %v3242_v13 = vpop.f32.mrb[6].mxu0  ;;  %2349 = vmatmul.mubr.bf16.gmra.mrb[104].mxu0 %v4768_v35 }
 0x108   : > { %v3243_v28 = vpop.f32.mrb[7].mxu0  ;;  %2356 = vmatprep.mubr.bf16.mxu0 %v4959_v52 }
 0x109   : > { %v5109_v19 = vadd.f32 %v3243_v28, %v3242_v13 }
 0x10c   : > { %3714 = vmatmul.mubr.bf16.gmra.mrb[8].mxu1 %v5106_v1 }
 0x10d   : > { %3717 = vmatprep.mubr.bf16.mxu1 %v5111_v12 }
 0x10f   : > { %2357 = vmatmul.mubr.bf16.gmra.mrb[108].mxu0 %v4792_v25  ;;  %v2058_v25 = vld [vmem:[#allocation2 + $0x128] sm:$0xff] }
 0x110   : > { %2364 = vmatprep.mubr.bf16.mxu0 %v2052_v50  ;;  %v3245_v30 = vpop.f32.mrb[8].mxu0 }
 0x111   : > { %v3246_v60 = vpop.f32.mrb[9].mxu0 }
 0x112   : > { %v5116_v35 = vadd.f32 %v3246_v60, %v3245_v30  ;;  %v3248_v26 = vpop.f32.mrb[10].mxu0 }
 0x113   : > { %v3249_v52 = vpop.f32.mrb[11].mxu0 }
 0x114   : > { %3718 = vmatmul.mubr.bf16.gmra.mrb[12].mxu1 %v4963_v24  ;;  %v5120_v3 = vadd.f32 %v3249_v52, %v3248_v26 }
 0x115   : > { %3737 = vmatprep.mubr.bf16.mxu1 %v4864_v41 }
 0x117   : > { %2365 = vmatmul.mubr.bf16.gmra.mrb[112].mxu0 %v4796_v18  ;;  %v2061_v18 = vld [vmem:[#allocation2 + $0x140] sm:$0xff] }
 0x118   : > { %2372 = vmatprep.mubr.bf16.mxu0 %v2055_v38 }
 0x11c   : > { %3738 = vmatmul.mubr.bf16.vlgmr.msra.gmra.mrb[80].mxu1 %v4868_v27 }
 0x11d   : > { %3741 = vmatprep.mubr.bf16.mxu1 %v4898_v2 }
 0x11f   : > { %v3251_v16 = vpop.f32.mrb[12].mxu0  ;;  %2373 = vmatmul.mubr.bf16.gmra.mrb[116].mxu0 %v4812_v58 }
 0x120   : > { %v3252_v36 = vpop.f32.mrb[13].mxu0  ;;  %2380 = vmatprep.mubr.bf16.mxu0 %v2058_v25 }
 0x121   : > { %v5126_v0 = vadd.f32 %v3252_v36, %v3251_v16  ;;  %v3254_v63 = vpop.f32.mrb[14].mxu0 }
 0x122   : > { %v3255_v41 = vpop.f32.mrb[15].mxu0 }
 0x123   : > { %v5128_v62 = vadd.f32 %v3255_v41, %v3254_v63 }
 0x124   : > { %3742 = vmatmul.mubr.bf16.gmra.mrb[84].mxu1 %v4902_v57 }
 0x125   : > { %3745 = vmatprep.mubr.bf16.mxu1 %v4923_v11 }
 0x127   : > { %2381 = vmatmul.mubr.bf16.gmra.mrb[120].mxu0 %v4816_v15 }
 0x128   : > { %2388 = vmatprep.mubr.bf16.mxu0 %v2061_v18 }
 0x129   : > { %v3257_v27 = vpop.f32.mrb[16].mxu0 }
 0x12a   : > { %v3258_v58 = vpop.f32.mrb[17].mxu0 }
 0x12b   : > { %v5134_v2 = vadd.f32 %v3258_v58, %v3257_v27  ;;  %v3260_v10 = vpop.f32.mrb[18].mxu0 }
 0x12c   : > { %3746 = vmatmul.mubr.bf16.gmra.mrb[88].mxu1 %v4935_v54  ;;  %v3261_v40 = vpop.f32.mrb[19].mxu0 }
 0x12d   : > { %3749 = vmatprep.mubr.bf16.mxu1 %v5073_v21  ;;  %v5137_v29 = vadd.f32 %v3261_v40, %v3260_v10 }
 0x12f   : > { %v3369_v31 = vpop.f32.mrb[16].mxu1  ;;  %2389 = vmatmul.mubr.bf16.gmra.mrb[124].mxu0 %v4833_v43 }
 0x130   : > { %v3370_v57 = vpop.f32.mrb[17].mxu1  ;;  %2396 = vmatprep.mubr.bf16.mxu0 %v2064_v20 }
 0x131   : > { %v5140_v11 = vadd.f32 %v3370_v57, %v3369_v31  ;;  %v3372_v15 = vpop.f32.mrb[18].mxu1  ;;  %v3263_v53 = vpop.f32.mrb[20].mxu0 }
 0x132   : > { %v3373_v46 = vpop.f32.mrb[19].mxu1  ;;  %v3264_v44 = vpop.f32.mrb[21].mxu0 }
 0x133   : > { %v5142_v54 = vadd.f32 %v3373_v46, %v3372_v15  ;;  %v5145_v56 = vadd.f32 %v3264_v44, %v3263_v53  ;;  %v3266_v49 = vpop.f32.mrb[22].mxu0 }
 0x134   : > { %3750 = vmatmul.mubr.bf16.gmra.mrb[92].mxu1 %v5076_v45  ;;  %v3267_v39 = vpop.f32.mrb[23].mxu0 }
 0x135   : > { %3753 = vmatprep.mubr.bf16.mxu1 %v5086_v14  ;;  %v5148_v43 = vadd.f32 %v3267_v39, %v3266_v49 }
 0x137   : > { %v3375_v51 = vpop.f32.mrb[20].mxu1  ;;  %2397 = vmatmul.mubr.bf16.gmra.mrb[128].mxu0 %v4845_v17 }
 0x138   : > { %v3376_v21 = vpop.f32.mrb[21].mxu1  ;;  %2404 = vmatprep.mubr.bf16.mxu0 %v2067_v48 }
 0x139   : > { %v5151_v34 = vadd.f32 %v3376_v21, %v3375_v51  ;;  %v3378_v4 = vpop.f32.mrb[22].mxu1  ;;  %v3269_v9 = vpop.f32.mrb[24].mxu0 }
 0x13a   : > { %v3379_v33 = vpop.f32.mrb[23].mxu1  ;;  %v3270_v8 = vpop.f32.mrb[25].mxu0 }
 0x13b   : > { %v5153_v45 = vadd.f32 %v3379_v33, %v3378_v4  ;;  %v5156_v14 = vadd.f32 %v3270_v8, %v3269_v9  ;;  %v3272_v42 = vpop.f32.mrb[26].mxu0 }
 0x13c   : > { %3754 = vmatmul.mubr.bf16.gmra.mrb[0].mxu1 %v5091_v61  ;;  %v3273_v6 = vpop.f32.mrb[27].mxu0 }
 0x13d   : > { %3757 = vmatprep.mubr.bf16.mxu1 %v5096_v5  ;;  %v5159_v28 = vadd.f32 %v3273_v6, %v3272_v42 }
 0x13f   : > { %v3381_v13 = vpop.f32.mrb[24].mxu1  ;;  %2405 = vmatmul.mubr.bf16.gmra.mrb[132].mxu0 %v4854_v47 }
 0x140   : > { %v3382_v17 = vpop.f32.mrb[25].mxu1  ;;  %2412 = vmatprep.mubr.bf16.mxu0 %v4918_v59 }
 0x141   : > { %v5162_v50 = vadd.f32 %v3382_v17, %v3381_v13  ;;  %v3384_v30 = vpop.f32.mrb[26].mxu1 }
 0x142   : > { %v3385_v60 = vpop.f32.mrb[27].mxu1  ;;  %v3275_v26 = vpop.f32.mrb[28].mxu0 }
 0x143   : > { %v5165_v61 = vadd.f32 %v3385_v60, %v3384_v30  ;;  %v3276_v52 = vpop.f32.mrb[29].mxu0 }
 0x144   : > { %3758 = vmatmul.mubr.bf16.gmra.mrb[4].mxu1 %v5099_v7  ;;  %v5168_v5 = vadd.f32 %v3276_v52, %v3275_v26  ;;  %v3278_v38 = vpop.f32.mrb[30].mxu0 }
 0x145   : > { %3761 = vmatprep.mubr.bf16.mxu1 %v5106_v1  ;;  %v3279_v25 = vpop.f32.mrb[31].mxu0 }
 0x146   : > { %v5171_v47 = vadd.f32 %v3279_v25, %v3278_v38 }
 0x147   : > { %v3387_v16 = vpop.f32.mrb[28].mxu1  ;;  %2413 = vmatmul.mubr.bf16.gmra.mrb[136].mxu0 %v4943_v22 }
 0x148   : > { %v3388_v36 = vpop.f32.mrb[29].mxu1  ;;  %2420 = vmatprep.mubr.bf16.mxu0 %v4979_v32 }
 0x149   : > { %v5174_v59 = vadd.f32 %v3388_v36, %v3387_v16  ;;  %v3390_v63 = vpop.f32.mrb[30].mxu1 }
 0x14a   : > { %v3391_v41 = vpop.f32.mrb[31].mxu1  ;;  %v3281_v18 = vpop.f32.mrb[32].mxu0 }
 0x14b   : > { %v5177_v7 = vadd.f32 %v3391_v41, %v3390_v63  ;;  %v3282_v27 = vpop.f32.mrb[33].mxu0 }
 0x14c   : > { %3762 = vmatmul.mubr.bf16.gmra.mrb[8].mxu1 %v5111_v12  ;;  %v3283_v1 = vadd.f32 %v3282_v27, %v3281_v18  ;;  %v3284_v58 = vpop.f32.mrb[34].mxu0 }
 0x14d   : > { %3765 = vmatprep.mubr.bf16.mxu1 %v4963_v24  ;;  %v3285_v10 = vpop.f32.mrb[35].mxu0 }
 0x14e   : > { %v3286_v20 = vadd.f32 %v3285_v10, %v3284_v58 }
 0x14f   : > { %v3393_v40 = vpop.f32.mrb[32].mxu1  ;;  %2421 = vmatmul.mubr.bf16.gmra.mrb[140].mxu0 %v4979_v32 }
 0x150   : > { %v3394_v22 = vpop.f32.mrb[33].mxu1 }
 0x151   : > { %v5182_v31 = vadd.f32 %v3394_v22, %v3393_v40  ;;  %v3396_v57 = vpop.f32.mrb[34].mxu1 }
 0x152   : > { %v3397_v15 = vpop.f32.mrb[35].mxu1  ;;  %v3287_v53 = vpop.f32.mrb[36].mxu0 }
 0x153   : > { %v5184_v46 = vadd.f32 %v3397_v15, %v3396_v57  ;;  %v3288_v12 = vpop.f32.mrb[37].mxu0 }
 0x154   : > { %3766 = vmatmul.mubr.bf16.gmra.mrb[12].mxu1 %v4979_v32  ;;  %v3289_v44 = vadd.f32 %v3288_v12, %v3287_v53  ;;  %v3290_v49 = vpop.f32.mrb[38].mxu0 }
 0x155   : > { %v3291_v39 = vpop.f32.mrb[39].mxu0 }
 0x156   : > { %v3292_v48 = vadd.f32 %v3291_v39, %v3290_v49 }
 0x157   : > { %v3399_v24 = vpop.f32.mrb[36].mxu1 }
 0x158   : > { %v3400_v51 = vpop.f32.mrb[37].mxu1 }
 0x159   : > { %v5187_v21 = vadd.f32 %v3400_v51, %v3399_v24  ;;  %v3402_v4 = vpop.f32.mrb[38].mxu1 }
 0x15a   : > { %v3403_v33 = vpop.f32.mrb[39].mxu1  ;;  %v3293_v8 = vpop.f32.mrb[40].mxu0 }
 0x15b   : > { %v5189_v9 = vadd.f32 %v3403_v33, %v3402_v4  ;;  %v3294_v42 = vpop.f32.mrb[41].mxu0  ;;  %v5214_v33 = vld [vmem:[%s5485_s3] ss:$0 sm:$0xff] }
 0x15c   : > { %v5191_v6 = vadd.f32 %v3294_v42, %v3293_v8  ;;  %v3296_v13 = vpop.f32.mrb[42].mxu0  ;;  %v3869_v42 = vadd.f32 %v3283_v1, %v5214_v33 }
 0x15d   : > { %v3297_v17 = vpop.f32.mrb[43].mxu0 }
 0x15e   : > { %v5193_v30 = vadd.f32 %v3297_v17, %v3296_v13 }
 0x15f   : > { %v3405_v32 = vpop.f32.mrb[40].mxu1 }
 0x160   : > { %v3406_v60 = vpop.f32.mrb[41].mxu1 }
 0x161   : > { %v5195_v26 = vadd.f32 %v3406_v60, %v3405_v32  ;;  %v3408_v52 = vpop.f32.mrb[42].mxu1  ;;  %v3877_v60 = vadd.f32 %v3286_v20, %v5214_v33 }
 0x162   : > { %v3409_v38 = vpop.f32.mrb[43].mxu1  ;;  %v3299_v16 = vpop.f32.mrb[44].mxu0 }
 0x163   : > { %v5197_v25 = vadd.f32 %v3409_v38, %v3408_v52  ;;  %v3300_v36 = vpop.f32.mrb[45].mxu0 }
 0x164   : > { %v5199_v63 = vadd.f32 %v3300_v36, %v3299_v16  ;;  %v3302_v41 = vpop.f32.mrb[46].mxu0 }
 0x165   : > { %v3303_v18 = vpop.f32.mrb[47].mxu0 }
 0x166   : > { %v5201_v58 = vadd.f32 %v3303_v18, %v3302_v41 }
 0x167   : > { %v3411_v27 = vpop.f32.mrb[44].mxu1 }
 0x168   : > { %v3412_v10 = vpop.f32.mrb[45].mxu1 }
 0x169   : > { %v5203_v40 = vadd.f32 %v3412_v10, %v3411_v27  ;;  %v3414_v22 = vpop.f32.mrb[46].mxu1 }
 0x16a   : > { %v3415_v57 = vpop.f32.mrb[47].mxu1  ;;  %v3305_v53 = vpop.f32.mrb[48].mxu0 }
 0x16b   : > { %v5205_v15 = vadd.f32 %v3415_v57, %v3414_v22  ;;  %v3306_v12 = vpop.f32.mrb[49].mxu0 }
 0x16c   : > { %v5207_v49 = vadd.f32 %v3306_v12, %v3305_v53  ;;  %v3308_v39 = vpop.f32.mrb[50].mxu0  ;;  %v3865_v53 = vadd.f32 %v3289_v44, %v5214_v33 }
 0x16d   : > { %v3309_v24 = vpop.f32.mrb[51].mxu0 }
 0x16e   : > { %v5209_v4 = vadd.f32 %v3309_v24, %v3308_v39  ;;  %v3873_v24 = vadd.f32 %v3292_v48, %v5214_v33 }
 0x16f   : > { %v3417_v51 = vpop.f32.mrb[48].mxu1 }
 0x170   : > { %v3418_v8 = vpop.f32.mrb[49].mxu1 }
 0x171   : > { %v3419_v13 = vadd.f32 %v3418_v8, %v3417_v51  ;;  %v3420_v17 = vpop.f32.mrb[50].mxu1 }
 0x172   : > { %v3421_v32 = vpop.f32.mrb[51].mxu1  ;;  %v3311_v16 = vpop.f32.mrb[52].mxu0 }
 0x173   : > { %v5218_v52 = vadd.f32 %v3869_v42, %v3419_v13  ;;  %v3422_v38 = vadd.f32 %v3421_v32, %v3420_v17  ;;  %v3312_v36 = vpop.f32.mrb[53].mxu0 }
 0x174   : > { %v5222_v18 = vadd.f32 %v3312_v36, %v3311_v16  ;;  %v3314_v27 = vpop.f32.mrb[54].mxu0 }
 0x175   : > { %v5220_v41 = vadd.f32 %v3877_v60, %v3422_v38  ;;  %v3315_v10 = vpop.f32.mrb[55].mxu0 }
 0x176   : > { %v5224_v57 = vadd.f32 %v3315_v10, %v3314_v27  ;;  %v3885_v27 = vadd.f32 %v5191_v6, %v5214_v33 }
 0x177   : > { %v3423_v22 = vpop.f32.mrb[52].mxu1 }
 0x178   : > { %v3424_v1 = vpop.f32.mrb[53].mxu1 }
 0x179   : > { %v3425_v12 = vadd.f32 %v3424_v1, %v3423_v22  ;;  %v3426_v39 = vpop.f32.mrb[54].mxu1  ;;  %v3893_v1 = vadd.f32 %v5193_v30, %v5214_v33 }
 0x17a   : > { %v3427_v20 = vpop.f32.mrb[55].mxu1  ;;  %v3317_v42 = vpop.f32.mrb[56].mxu0 }
 0x17b   : > { %v5228_v51 = vadd.f32 %v3865_v53, %v3425_v12  ;;  %v3428_v8 = vadd.f32 %v3427_v20, %v3426_v39  ;;  %v3318_v13 = vpop.f32.mrb[57].mxu0 }
 0x17c   : > { %v5232_v32 = vadd.f32 %v3318_v13, %v3317_v42  ;;  %v3320_v60 = vpop.f32.mrb[58].mxu0 }
 0x17d   : > { %v5230_v17 = vadd.f32 %v3873_v24, %v3428_v8  ;;  %v3321_v38 = vpop.f32.mrb[59].mxu0 }
 0x17e   : > { %v5234_v36 = vadd.f32 %v3321_v38, %v3320_v60 }
 0x17f   : > { %v3429_v16 = vpop.f32.mrb[56].mxu1 }
 0x180   : > { %v3430_v44 = vpop.f32.mrb[57].mxu1 }
 0x181   : > { %v3431_v10 = vadd.f32 %v3430_v44, %v3429_v16  ;;  %v3432_v48 = vpop.f32.mrb[58].mxu1  ;;  %v3881_v16 = vadd.f32 %v5199_v63, %v5214_v33  ;;  %v3795_v63 = vadd.f32 %v5109_v19, %v5214_v33 }
 0x182   : > { %v3433_v22 = vpop.f32.mrb[59].mxu1  ;;  %v3323_v39 = vpop.f32.mrb[60].mxu0 }
 0x183   : > { %v5240_v53 = vadd.f32 %v3885_v27, %v3431_v10  ;;  %v3434_v12 = vadd.f32 %v3433_v22, %v3432_v48  ;;  %v3324_v20 = vpop.f32.mrb[61].mxu0  ;;  %v3785_v10 = vadd.f32 %v5103_v23, %v5214_v33  ;;  %v3889_v48 = vadd.f32 %v5201_v58, %v5214_v33 }
 0x184   : > { %v5244_v8 = vadd.f32 %v3324_v20, %v3323_v39  ;;  %v3326_v42 = vpop.f32.mrb[62].mxu0  ;;  %v3790_v39 = vadd.f32 %v5083_v37, %v5214_v33  ;;  %v3800_v23 = vadd.f32 %v5089_v55, %v5214_v33 }
 0x185   : > { %v5242_v24 = vadd.f32 %v3893_v1, %v3434_v12  ;;  %v3327_v13 = vpop.f32.mrb[63].mxu0 }
 0x186   : > { %v5246_v38 = vadd.f32 %v3327_v13, %v3326_v42 }
 0x187   : > { %v3435_v60 = vpop.f32.mrb[60].mxu1 }
 0x188   : > { %v3436_v6 = vpop.f32.mrb[61].mxu1 }
 0x189   : > { %v3437_v44 = vadd.f32 %v3436_v6, %v3435_v60  ;;  %v3438_v30 = vpop.f32.mrb[62].mxu1 }
 0x18a   : > { %v3439_v27 = vpop.f32.mrb[63].mxu1  ;;  %v3643_v12 = vpop.f32.mrb[64].mxu0 }
 0x18b   : > { %v5254_v22 = vadd.f32 %v3881_v16, %v3437_v44  ;;  %v3440_v1 = vadd.f32 %v3439_v27, %v3438_v30  ;;  %v3786_v20 = vadd.f32 %v3785_v10, %v3643_v12  ;;  %v1265_v42 = vpop.f32.mrb[65].mxu0 }
 0x18c   : > { %v3791_v60 = vadd.f32 %v3790_v39, %v1265_v42  ;;  %v3644_v6 = vpop.f32.mrb[66].mxu0  ;;  %v3805_v39 = vadd.f32 %v5126_v0, %v5214_v33  ;;  %v3820_v0 = vadd.f32 %v5120_v3, %v5214_v33 }
 0x18d   : > { %v5260_v13 = vadd.f32 %v3889_v48, %v3440_v1  ;;  %v5265_v58 = vadd.f32 %v3786_v20, %v5151_v34  ;;  %v3796_v16 = vadd.f32 %v3795_v63, %v3644_v6  ;;  %v1268_v44 = vpop.f32.mrb[67].mxu0  ;;  %v3901_v48 = vadd.f32 %v5207_v49, %v5214_v33 }
 0x18e   : > { %v5268_v37 = vadd.f32 %v3791_v60, %v5140_v11  ;;  %v3801_v27 = vadd.f32 %v3800_v23, %v1268_v44  ;;  %v3909_v11 = vadd.f32 %v5209_v4, %v5214_v33  ;;  %v3810_v63 = vadd.f32 %v5116_v35, %v5214_v33 }
 0x18f   : > { %v3441_v30 = vpop.f32.mrb[64].mxu1  ;;  %v5271_v19 = vadd.f32 %v3796_v16, %v5153_v45 }
 0x190   : > { %v3442_v10 = vpop.f32.mrb[65].mxu1  ;;  %v5276_v55 = vadd.f32 %v3801_v27, %v5142_v54  ;;  %v3815_v54 = vadd.f32 %v5128_v62, %v5214_v33 }
 0x191   : > { %v3443_v1 = vadd.f32 %v3442_v10, %v3441_v30  ;;  %v3444_v12 = vpop.f32.mrb[66].mxu1 }
 0x192   : > { %v3445_v34 = vpop.f32.mrb[67].mxu1  ;;  %v3647_v45 = vpop.f32.mrb[68].mxu0 }
 0x193   : > { %v5282_v20 = vadd.f32 %v3901_v48, %v3443_v1  ;;  %v3446_v42 = vadd.f32 %v3445_v34, %v3444_v12  ;;  %v3806_v49 = vadd.f32 %v3805_v39, %v3647_v45  ;;  %v1281_v60 = vpop.f32.mrb[69].mxu0  ;;  %v3897_v1 = vadd.f32 %v5222_v18, %v5214_v33 }
 0x194   : > { %v3811_v23 = vadd.f32 %v3810_v63, %v1281_v60  ;;  %v3648_v16 = vpop.f32.mrb[70].mxu0  ;;  %v3825_v39 = vadd.f32 %v5145_v56, %v5214_v33  ;;  %v3830_v45 = vadd.f32 %v5134_v2, %v5214_v33  ;;  %v3840_v56 = vadd.f32 %v5137_v29, %v5214_v33 }
 0x195   : > { %v5288_v6 = vadd.f32 %v3909_v11, %v3446_v42  ;;  %v5293_v4 = vadd.f32 %v3806_v49, %v5174_v59  ;;  %v3816_v44 = vadd.f32 %v3815_v54, %v3648_v16  ;;  %v1284_v30 = vpop.f32.mrb[71].mxu0 }
 0x196   : > { %v5296_v35 = vadd.f32 %v3811_v23, %v5162_v50  ;;  %v3821_v10 = vadd.f32 %v3820_v0, %v1284_v30  ;;  %v3905_v50 = vadd.f32 %v5224_v57, %v5214_v33 }
 0x197   : > { %v3447_v27 = vpop.f32.mrb[68].mxu1  ;;  %v5299_v62 = vadd.f32 %v3816_v44, %v5177_v7 }
 0x198   : > { %v3448_v48 = vpop.f32.mrb[69].mxu1  ;;  %v5304_v3 = vadd.f32 %v3821_v10, %v5165_v61  ;;  %v3835_v61 = vadd.f32 %v5148_v43, %v5214_v33 }
 0x199   : > { %v3449_v12 = vadd.f32 %v3448_v48, %v3447_v27  ;;  %v3450_v34 = vpop.f32.mrb[70].mxu1  ;;  %v3917_v27 = vadd.f32 %v5232_v32, %v5214_v33 }
 0x19a   : > { %v3451_v59 = vpop.f32.mrb[71].mxu1  ;;  %v3651_v7 = vpop.f32.mrb[72].mxu0 }
 0x19b   : > { %v5310_v11 = vadd.f32 %v3897_v1, %v3449_v12  ;;  %v3452_v42 = vadd.f32 %v3451_v59, %v3450_v34  ;;  %v3826_v18 = vadd.f32 %v3825_v39, %v3651_v7  ;;  %v1297_v63 = vpop.f32.mrb[73].mxu0  ;;  %v3845_v1 = vadd.f32 %v5168_v5, %v5214_v33 }
 0x19c   : > { %v3831_v60 = vadd.f32 %v3830_v45, %v1297_v63  ;;  %v3652_v54 = vpop.f32.mrb[74].mxu0  ;;  %v3850_v59 = vadd.f32 %v5156_v14, %v5214_v33  ;;  %v3860_v5 = vadd.f32 %v5159_v28, %v5214_v33 }
 0x19d   : > { %v5316_v49 = vadd.f32 %v3905_v50, %v3452_v42  ;;  %v5321_v57 = vadd.f32 %v3826_v18, %v5187_v21  ;;  %v3836_v23 = vadd.f32 %v3835_v61, %v3652_v54  ;;  %v1300_v16 = vpop.f32.mrb[75].mxu0  ;;  %v3913_v54 = vadd.f32 %v5244_v8, %v5214_v33 }
 0x19e   : > { %v5324_v2 = vadd.f32 %v3831_v60, %v5182_v31  ;;  %v3841_v44 = vadd.f32 %v3840_v56, %v1300_v16  ;;  %v3925_v31 = vadd.f32 %v5234_v36, %v5214_v33  ;;  %v3921_v16 = vadd.f32 %v5246_v38, %v5214_v33 }
 0x19f   : > { %v3453_v0 = vpop.f32.mrb[72].mxu1  ;;  %v5327_v43 = vadd.f32 %v3836_v23, %v5189_v9 }
 0x1a0   : > { %v3454_v30 = vpop.f32.mrb[73].mxu1  ;;  %v5332_v29 = vadd.f32 %v3841_v44, %v5184_v46  ;;  %v3855_v46 = vadd.f32 %v5171_v47, %v5214_v33 }
 0x1a1   : > { %v3455_v10 = vadd.f32 %v3454_v30, %v3453_v0  ;;  %v3456_v48 = vpop.f32.mrb[74].mxu1 }
 0x1a2   : > { %v3457_v21 = vpop.f32.mrb[75].mxu1  ;;  %v3655_v9 = vpop.f32.mrb[76].mxu0 }
 0x1a3   : > { %v5338_v12 = vadd.f32 %v3917_v27, %v3455_v10  ;;  %v3458_v34 = vadd.f32 %v3457_v21, %v3456_v48  ;;  %v3846_v32 = vadd.f32 %v3845_v1, %v3655_v9  ;;  %v1313_v39 = vpop.f32.mrb[77].mxu0 }
 0x1a4   : > { %v3851_v42 = vadd.f32 %v3850_v59, %v1313_v39  ;;  %v3656_v7 = vpop.f32.mrb[78].mxu0 }
 0x1a5   : > { %v5344_v50 = vadd.f32 %v3925_v31, %v3458_v34  ;;  %v5349_v36 = vadd.f32 %v3846_v32, %v5203_v40  ;;  %v3856_v45 = vadd.f32 %v3855_v46, %v3656_v7  ;;  %v1316_v18 = vpop.f32.mrb[79].mxu0 }
 0x1a6   : > { %v5352_v14 = vadd.f32 %v3851_v42, %v5195_v26  ;;  %v3861_v61 = vadd.f32 %v3860_v5, %v1316_v18 }
 0x1a7   : > { %v3459_v63 = vpop.f32.mrb[76].mxu1  ;;  %v5355_v47 = vadd.f32 %v3856_v45, %v5205_v15 }
 0x1a8   : > { %v3460_v60 = vpop.f32.mrb[77].mxu1  ;;  %v3862_v28 = vadd.f32 %v3861_v61, %v5197_v25 }
 0x1a9   : > { %v3461_v56 = vadd.f32 %v3460_v60, %v3459_v63  ;;  %v3462_v23 = vpop.f32.mrb[78].mxu1 }
 0x1aa   : > { %v3463_v40 = vpop.f32.mrb[79].mxu1  ;;  %v3505_v44 = vpop.f32.mrb[80].mxu0 }
 0x1ab   : > { %v5362_v0 = vadd.f32 %v3913_v54, %v3461_v56  ;;  %v3464_v26 = vadd.f32 %v3463_v40, %v3462_v23  ;;  %v3506_v30 = vpop.f32.mrb[81].mxu0 }
 0x1ac   : > { %v3507_v15 = vadd.f32 %v3506_v30, %v3505_v44  ;;  %v3508_v10 = vpop.f32.mrb[82].mxu0 }
 0x1ad   : > { %v5364_v27 = vadd.f32 %v3921_v16, %v3464_v26  ;;  %v3509_v48 = vpop.f32.mrb[83].mxu0 }
 0x1ae   : > { %v3510_v21 = vadd.f32 %v3509_v48, %v3508_v10  ;;  %v5367_v8 = vadd.f32 %v5268_v37, %v3507_v15 }
 0x1b0   : > { %v5370_v25 = vadd.f32 %v5276_v55, %v3510_v21 }
 0x1b2   : > { %v3511_v1 = vpop.f32.mrb[84].mxu0 }
 0x1b3   : > { %v3512_v31 = vpop.f32.mrb[85].mxu0 }
 0x1b4   : > { %v3513_v33 = vadd.f32 %v3512_v31, %v3511_v1  ;;  %v3514_v38 = vpop.f32.mrb[86].mxu0 }
 0x1b5   : > { %v3515_v34 = vpop.f32.mrb[87].mxu0 }
 0x1b6   : > { %v3516_v9 = vadd.f32 %v3515_v34, %v3514_v38  ;;  %v3788_v59 = vadd.f32 %v5265_v58, %v3513_v33 }
 0x1b8   : > { %v5374_v32 = vadd.f32 %v5271_v19, %v3516_v9 }
 0x1ba   : > { %v3517_v39 = vpop.f32.mrb[88].mxu0 }
 0x1bb   : > { %v3518_v46 = vpop.f32.mrb[89].mxu0 }
 0x1bc   : > { %v3519_v42 = vadd.f32 %v3518_v46, %v3517_v39  ;;  %v3520_v7 = vpop.f32.mrb[90].mxu0 }
 0x1bd   : > { %v3521_v37 = vpop.f32.mrb[91].mxu0 }
 0x1be   : > { %v3522_v5 = vadd.f32 %v3521_v37, %v3520_v7  ;;  %v5377_v55 = vadd.f32 %v5296_v35, %v3519_v42 }
 0x1c0   : > { %v5380_v45 = vadd.f32 %v5304_v3, %v3522_v5 }
 0x1c2   : > { %v3523_v18 = vpop.f32.mrb[92].mxu0 }
 0x1c3   : > { %v3524_v63 = vpop.f32.mrb[93].mxu0 }
 0x1c4   : > { %v3525_v61 = vadd.f32 %v3524_v63, %v3523_v18  ;;  %v3526_v60 = vpop.f32.mrb[94].mxu0 }
 0x1c5   : > { %v3527_v58 = vpop.f32.mrb[95].mxu0 }
 0x1c6   : > { %v3528_v54 = vadd.f32 %v3527_v58, %v3526_v60  ;;  %v3808_v19 = vadd.f32 %v5293_v4, %v3525_v61 }
 0x1c8   : > { %v5384_v56 = vadd.f32 %v5299_v62, %v3528_v54 }
 0x1ca   : > { %v3529_v23 = vpop.f32.mrb[96].mxu0 }
 0x1cb   : > { %v3530_v40 = vpop.f32.mrb[97].mxu0 }
 0x1cc   : > { %v3531_v16 = vadd.f32 %v3530_v40, %v3529_v23  ;;  %v3532_v26 = vpop.f32.mrb[98].mxu0 }
 0x1cd   : > { %v3533_v35 = vpop.f32.mrb[99].mxu0 }
 0x1ce   : > { %v3534_v44 = vadd.f32 %v3533_v35, %v3532_v26  ;;  %v5387_v3 = vadd.f32 %v5324_v2, %v3531_v16 }
 0x1d0   : > { %v5390_v30 = vadd.f32 %v5332_v29, %v3534_v44 }
 0x1d2   : > { %v3535_v15 = vpop.f32.mrb[100].mxu0 }
 0x1d3   : > { %v3536_v10 = vpop.f32.mrb[101].mxu0 }
 0x1d4   : > { %v3537_v48 = vadd.f32 %v3536_v10, %v3535_v15  ;;  %v3538_v21 = vpop.f32.mrb[102].mxu0 }
 0x1d5   : > { %v3539_v4 = vpop.f32.mrb[103].mxu0 }
 0x1d6   : > { %v3540_v1 = vadd.f32 %v3539_v4, %v3538_v21  ;;  %v5393_v62 = vadd.f32 %v5321_v57, %v3537_v48 }
 0x1d8   : > { %v5396_v31 = vadd.f32 %v5327_v43, %v3540_v1 }
 0x1da   : > { %v3541_v33 = vpop.f32.mrb[104].mxu0 }
 0x1db   : > { %v3542_v38 = vpop.f32.mrb[105].mxu0 }
 0x1dc   : > { %v3543_v34 = vadd.f32 %v3542_v38, %v3541_v33  ;;  %v3544_v2 = vpop.f32.mrb[106].mxu0 }
 0x1dd   : > { %v3545_v9 = vpop.f32.mrb[107].mxu0 }
 0x1de   : > { %v3546_v39 = vadd.f32 %v3545_v9, %v3544_v2  ;;  %v5399_v29 = vadd.f32 %v5352_v14, %v3543_v34 }
 0x1e0   : > { %v5401_v46 = vadd.f32 %v3862_v28, %v3546_v39 }
 0x1e2   : > { %v3547_v42 = vpop.f32.mrb[108].mxu0 }
 0x1e3   : > { %v3548_v7 = vpop.f32.mrb[109].mxu0 }
 0x1e4   : > { %v3549_v37 = vadd.f32 %v3548_v7, %v3547_v42  ;;  %v3550_v5 = vpop.f32.mrb[110].mxu0 }
 0x1e5   : > { %v3551_v57 = vpop.f32.mrb[111].mxu0 }
 0x1e6   : > { %v3552_v18 = vadd.f32 %v3551_v57, %v3550_v5  ;;  %v5404_v43 = vadd.f32 %v5349_v36, %v3549_v37 }
 0x1e8   : > { %v5407_v63 = vadd.f32 %v5355_v47, %v3552_v18 }
 0x1ea   : > { %v3553_v61 = vpop.f32.mrb[112].mxu0 }
 0x1eb   : > { %v3554_v60 = vpop.f32.mrb[113].mxu0 }
 0x1ec   : > { %v3555_v58 = vadd.f32 %v3554_v60, %v3553_v61  ;;  %v3556_v54 = vpop.f32.mrb[114].mxu0 }
 0x1ed   : > { %v3557_v14 = vpop.f32.mrb[115].mxu0 }
 0x1ee   : > { %v3558_v28 = vadd.f32 %v3557_v14, %v3556_v54  ;;  %v5410_v40 = vadd.f32 %v5218_v52, %v3555_v58 }
 0x1ef   : > { %v3739_v23 = vpop.f32.mrb[80].mxu1 }
 0x1f0   : > { %v3789_v16 = vadd.f32 %v3788_v59, %v3739_v23  ;;  %v2463_v26 = vpop.f32.mrb[81].mxu1  ;;  %v5414_v36 = vadd.f32 %v5220_v41, %v3558_v28 }
 0x1f1   : > { %v3794_v35 = vadd.f32 %v5367_v8, %v2463_v26  ;;  %v3740_v44 = vpop.f32.mrb[82].mxu1 }
 0x1f2   : > { %4058 = vtanh.f32 %v3789_v16  ;;  %v3799_v47 = vadd.f32 %v5374_v32, %v3740_v44  ;;  %v2466_v15 = vpop.f32.mrb[83].mxu1  ;;  %v3559_v48 = vpop.f32.mrb[116].mxu0 }
 0x1f3   : > { %4060 = vtanh.f32 %v3794_v35  ;;  %v3804_v10 = vadd.f32 %v5370_v25, %v2466_v15  ;;  %v3560_v21 = vpop.f32.mrb[117].mxu0 }
 0x1f4   : > { %4062 = vtanh.f32 %v3799_v47  ;;  %v3561_v52 = vadd.f32 %v3560_v21, %v3559_v48  ;;  %v3562_v59 = vpop.f32.mrb[118].mxu0 }
 0x1f5   : > { %4064 = vtanh.f32 %v3804_v10  ;;  %v3563_v4 = vpop.f32.mrb[119].mxu0 }
 0x1f6   : > { %v3564_v1 = vadd.f32 %v3563_v4, %v3562_v59  ;;  %v5419_v41 = vadd.f32 %v5228_v51, %v3561_v52 }
 0x1f7   : > { %v3743_v8 = vpop.f32.mrb[84].mxu1 }
 0x1f8   : > { %v3809_v33 = vadd.f32 %v3808_v19, %v3743_v8  ;;  %v2479_v38 = vpop.f32.mrb[85].mxu1  ;;  %v5423_v25 = vadd.f32 %v5230_v17, %v3564_v1 }
 0x1f9   : > { %v3814_v32 = vadd.f32 %v5377_v55, %v2479_v38  ;;  %v3744_v34 = vpop.f32.mrb[86].mxu1 }
 0x1fa   : > { %4066 = vtanh.f32 %v3809_v33  ;;  %v3819_v2 = vadd.f32 %v5384_v56, %v3744_v34  ;;  %v2482_v9 = vpop.f32.mrb[87].mxu1  ;;  %v3565_v42 = vpop.f32.mrb[120].mxu0 }
 0x1fb   : > { %4068 = vtanh.f32 %v3814_v32  ;;  %v3824_v39 = vadd.f32 %v5380_v45, %v2482_v9  ;;  %v3566_v51 = vpop.f32.mrb[121].mxu0 }
 0x1fc   : > { %v4059_v7 = vpop.eup %4058  ;;  %4070 = vtanh.f32 %v3819_v2  ;;  %v3567_v37 = vadd.f32 %v3566_v51, %v3565_v42  ;;  %v3568_v55 = vpop.f32.mrb[122].mxu0 }
 0x1fd   : > { %v4061_v19 = vpop.eup %4060  ;;  %4072 = vtanh.f32 %v3824_v39  ;;  %v3569_v17 = vpop.f32.mrb[123].mxu0 }
 0x1fe   : > { %v4063_v5 = vpop.eup %4062  ;;  %v3570_v18 = vadd.f32 %v3569_v17, %v3568_v55  ;;  %v5434_v61 = vadd.f32 %v5240_v53, %v3567_v37 }
 0x1ff   : > { %v4065_v56 = vpop.eup %4064  ;;  %v3130_v57 = vpack.c.bf16 %v4063_v5, %v4059_v7  ;;  %v3747_v45 = vpop.f32.mrb[88].mxu1 }
 0x200   : > { %v3125_v60 = vpack.c.bf16 %v4065_v56, %v4061_v19  ;;  %v3829_v58 = vadd.f32 %v5393_v62, %v3747_v45  ;;  %v2495_v54 = vpop.f32.mrb[89].mxu1  ;;  %v5440_v28 = vadd.f32 %v5242_v24, %v3570_v18 }
 0x201   : > { %3202 = vst [vmem:[%s5431_s9 + $0x8] sm:$0xff] %v3130_v57   ;;  %v3834_v14 = vadd.f32 %v5387_v3, %v2495_v54  ;;  %v3748_v23 = vpop.f32.mrb[90].mxu1 }
 0x202   : > { %3126 = vst [vmem:[%s5431_s9] sm:$0xff] %v3125_v60   ;;  %4074 = vtanh.f32 %v3829_v58  ;;  %v3839_v16 = vadd.f32 %v5396_v31, %v3748_v23  ;;  %v2498_v26 = vpop.f32.mrb[91].mxu1  ;;  %v3571_v35 = vpop.f32.mrb[124].mxu0 }
 0x203   : > { %4076 = vtanh.f32 %v3834_v14  ;;  %v3844_v53 = vadd.f32 %v5390_v30, %v2498_v26  ;;  %v3572_v62 = vpop.f32.mrb[125].mxu0 }
 0x204   : > { %v4067_v44 = vpop.eup %4066  ;;  %4078 = vtanh.f32 %v3839_v16  ;;  %v3573_v3 = vadd.f32 %v3572_v62, %v3571_v35  ;;  %v3574_v15 = vpop.f32.mrb[126].mxu0 }
 0x205   : > { %v4069_v47 = vpop.eup %4068  ;;  %4080 = vtanh.f32 %v3844_v53  ;;  %v3575_v10 = vpop.f32.mrb[127].mxu0 }
 0x206   : > { %v4071_v24 = vpop.eup %4070  ;;  %v3576_v31 = vadd.f32 %v3575_v10, %v3574_v15  ;;  %v3883_v59 = vadd.f32 %v5254_v22, %v3573_v3 }
 0x207   : > { %v4073_v48 = vpop.eup %4072  ;;  %v3140_v21 = vpack.c.bf16 %v4071_v24, %v4067_v44  ;;  %v3751_v52 = vpop.f32.mrb[92].mxu1 }
 0x208   : > { %v3135_v4 = vpack.c.bf16 %v4073_v48, %v4069_v47  ;;  %v3849_v30 = vadd.f32 %v5404_v43, %v3751_v52  ;;  %v2511_v8 = vpop.f32.mrb[93].mxu1  ;;  %v3891_v38 = vadd.f32 %v5260_v13, %v3576_v31 }
 0x209   : > { %3204 = vst [vmem:[%s5431_s9 + $0x18] sm:$0xff] %v3140_v21   ;;  %v3854_v1 = vadd.f32 %v5399_v29, %v2511_v8  ;;  %v3752_v33 = vpop.f32.mrb[94].mxu1 }
 0x20a   : > { %3203 = vst [vmem:[%s5431_s9 + $0x10] sm:$0xff] %v3135_v4   ;;  %4082 = vtanh.f32 %v3849_v30  ;;  %v3859_v32 = vadd.f32 %v5407_v63, %v3752_v33  ;;  %v2514_v34 = vpop.f32.mrb[95].mxu1  ;;  %v3577_v9 = vpop.f32.mrb[128].mxu0 }
 0x20b   : > { %4084 = vtanh.f32 %v3854_v1  ;;  %v3864_v2 = vadd.f32 %v5401_v46, %v2514_v34  ;;  %v3578_v43 = vpop.f32.mrb[129].mxu0 }
 0x20c   : > { %v4075_v22 = vpop.eup %4074  ;;  %4086 = vtanh.f32 %v3859_v32  ;;  %v3579_v42 = vadd.f32 %v3578_v43, %v3577_v9  ;;  %v3580_v29 = vpop.f32.mrb[130].mxu0 }
 0x20d   : > { %v4077_v39 = vpop.eup %4076  ;;  %4088 = vtanh.f32 %v3864_v2  ;;  %v3581_v13 = vpop.f32.mrb[131].mxu0 }
 0x20e   : > { %v4079_v7 = vpop.eup %4078  ;;  %v3582_v63 = vadd.f32 %v3581_v13, %v3580_v29  ;;  %v3903_v55 = vadd.f32 %v5282_v20, %v3579_v42 }
 0x20f   : > { %v4081_v51 = vpop.eup %4080  ;;  %v3150_v19 = vpack.c.bf16 %v4079_v7, %v4075_v22  ;;  %v3755_v37 = vpop.f32.mrb[0].mxu1 }
 0x210   : > { %v3145_v5 = vpack.c.bf16 %v4081_v51, %v4077_v39  ;;  %v3868_v46 = vadd.f32 %v5419_v41, %v3755_v37  ;;  %v2527_v17 = vpop.f32.mrb[1].mxu1  ;;  %v3911_v45 = vadd.f32 %v5288_v6, %v3582_v63 }
 0x211   : > { %3206 = vst [vmem:[%s5431_s9 + $0x28] sm:$0xff] %v3150_v19   ;;  %v3872_v56 = vadd.f32 %v5410_v40, %v2527_v17  ;;  %v3756_v57 = vpop.f32.mrb[2].mxu1 }
 0x212   : > { %3205 = vst [vmem:[%s5431_s9 + $0x20] sm:$0xff] %v3145_v5   ;;  %4090 = vtanh.f32 %v3868_v46  ;;  %v3876_v18 = vadd.f32 %v5423_v25, %v3756_v57  ;;  %v2530_v60 = vpop.f32.mrb[3].mxu1  ;;  %v3583_v54 = vpop.f32.mrb[132].mxu0 }
 0x213   : > { %4092 = vtanh.f32 %v3872_v56  ;;  %v3880_v58 = vadd.f32 %v5414_v36, %v2530_v60  ;;  %v3584_v41 = vpop.f32.mrb[133].mxu0 }
 0x214   : > { %v4083_v20 = vpop.eup %4082  ;;  %4094 = vtanh.f32 %v3876_v18  ;;  %v3585_v23 = vadd.f32 %v3584_v41, %v3583_v54  ;;  %v3586_v40 = vpop.f32.mrb[134].mxu0 }
 0x215   : > { %v4085_v14 = vpop.eup %4084  ;;  %4096 = vtanh.f32 %v3880_v58  ;;  %v3587_v6 = vpop.f32.mrb[135].mxu0 }
 0x216   : > { %v4087_v16 = vpop.eup %4086  ;;  %v3588_v25 = vadd.f32 %v3587_v6, %v3586_v40  ;;  %v3899_v44 = vadd.f32 %v5310_v11, %v3585_v23 }
 0x217   : > { %v4089_v26 = vpop.eup %4088  ;;  %v3160_v53 = vpack.c.bf16 %v4087_v16, %v4083_v20  ;;  %v3759_v35 = vpop.f32.mrb[4].mxu1 }
 0x218   : > { %v3155_v62 = vpack.c.bf16 %v4089_v26, %v4085_v14  ;;  %v3884_v36 = vadd.f32 %v3883_v59, %v3759_v35  ;;  %v2543_v47 = vpop.f32.mrb[5].mxu1  ;;  %v3907_v24 = vadd.f32 %v5316_v49, %v3588_v25 }
 0x219   : > { %3208 = vst [vmem:[%s5431_s9 + $0x38] sm:$0xff] %v3160_v53   ;;  %v3888_v3 = vadd.f32 %v5434_v61, %v2543_v47  ;;  %v3760_v15 = vpop.f32.mrb[6].mxu1 }
 0x21a   : > { %3207 = vst [vmem:[%s5431_s9 + $0x30] sm:$0xff] %v3155_v62   ;;  %4098 = vtanh.f32 %v3884_v36  ;;  %v3892_v10 = vadd.f32 %v3891_v38, %v3760_v15  ;;  %v2546_v48 = vpop.f32.mrb[7].mxu1  ;;  %v3589_v52 = vpop.f32.mrb[136].mxu0 }
 0x21b   : > { %4100 = vtanh.f32 %v3888_v3  ;;  %v3896_v21 = vadd.f32 %v5440_v28, %v2546_v48  ;;  %v3590_v11 = vpop.f32.mrb[137].mxu0 }
 0x21c   : > { %v4091_v31 = vpop.eup %4090  ;;  %4102 = vtanh.f32 %v3892_v10  ;;  %v3591_v4 = vadd.f32 %v3590_v11, %v3589_v52  ;;  %v3592_v61 = vpop.f32.mrb[138].mxu0 }
 0x21d   : > { %v4093_v59 = vpop.eup %4092  ;;  %4104 = vtanh.f32 %v3896_v21  ;;  %v3593_v8 = vpop.f32.mrb[139].mxu0 }
 0x21e   : > { %v4095_v30 = vpop.eup %4094  ;;  %v3594_v38 = vadd.f32 %v3593_v8, %v3592_v61  ;;  %v3919_v32 = vadd.f32 %v5338_v12, %v3591_v4 }
 0x21f   : > { %v4097_v49 = vpop.eup %4096  ;;  %v3170_v1 = vpack.c.bf16 %v4095_v30, %v4091_v31  ;;  %v3763_v33 = vpop.f32.mrb[8].mxu1 }
 0x220   : > { %v3165_v34 = vpack.c.bf16 %v4097_v49, %v4093_v59  ;;  %v3900_v28 = vadd.f32 %v3899_v44, %v3763_v33  ;;  %v2559_v2 = vpop.f32.mrb[9].mxu1  ;;  %v3927_v43 = vadd.f32 %v5344_v50, %v3594_v38 }
 0x221   : > { %3210 = vst [vmem:[%s5431_s9 + $0x48] sm:$0xff] %v3170_v1   ;;  %v3904_v9 = vadd.f32 %v3903_v55, %v2559_v2  ;;  %v3764_v22 = vpop.f32.mrb[10].mxu1 }
 0x222   : > { %3209 = vst [vmem:[%s5431_s9 + $0x40] sm:$0xff] %v3165_v34   ;;  %4106 = vtanh.f32 %v3900_v28  ;;  %v3908_v39 = vadd.f32 %v3907_v24, %v3764_v22  ;;  %v2562_v42 = vpop.f32.mrb[11].mxu1  ;;  %v3595_v7 = vpop.f32.mrb[140].mxu0 }
 0x223   : > { %4108 = vtanh.f32 %v3904_v9  ;;  %v3912_v29 = vadd.f32 %v3911_v45, %v2562_v42  ;;  %v3596_v51 = vpop.f32.mrb[141].mxu0 }
 0x224   : > { %v4099_v13 = vpop.eup %4098  ;;  %4110 = vtanh.f32 %v3908_v39  ;;  %v3597_v19 = vadd.f32 %v3596_v51, %v3595_v7  ;;  %v3598_v37 = vpop.f32.mrb[142].mxu0 }
 0x225   : > { %v4101_v12 = vpop.eup %4100  ;;  %4112 = vtanh.f32 %v3912_v29  ;;  %v3599_v55 = vpop.f32.mrb[143].mxu0 }
 0x226   : > { %v4103_v63 = vpop.eup %4102  ;;  %v3915_v17 = vadd.f32 %v5362_v0, %v3597_v19  ;;  %v3600_v56 = vadd.f32 %v3599_v55, %v3598_v37 }
 0x227   : > { %v4105_v5 = vpop.eup %4104  ;;  %v3180_v50 = vpack.c.bf16 %v4103_v63, %v4099_v13  ;;  %v3767_v46 = vpop.f32.mrb[12].mxu1 }
 0x228   : > { %v3175_v57 = vpack.c.bf16 %v4105_v5, %v4101_v12  ;;  %v2575_v45 = vpop.f32.mrb[13].mxu1  ;;  %v3916_v18 = vadd.f32 %v3915_v17, %v3767_v46  ;;  %v3923_v54 = vadd.f32 %v5364_v27, %v3600_v56 }
 0x229   : > { %3212 = vst [vmem:[%s5431_s9 + $0x58] sm:$0xff] %v3180_v50   ;;  %v3920_v60 = vadd.f32 %v3919_v32, %v2575_v45  ;;  %v3768_v58 = vpop.f32.mrb[14].mxu1 }
 0x22a   : > { %3211 = vst [vmem:[%s5431_s9 + $0x50] sm:$0xff] %v3175_v57   ;;  %v2578_v20 = vpop.f32.mrb[15].mxu1  ;;  %4114 = vtanh.f32 %v3916_v18  ;;  %v3924_v41 = vadd.f32 %v3923_v54, %v3768_v58 }
 0x22b   : > { %v3928_v14 = vadd.f32 %v3927_v43, %v2578_v20  ;;  %4116 = vtanh.f32 %v3920_v60 }
 0x22c   : > { %v4107_v23 = vpop.eup %4106  ;;  %4118 = vtanh.f32 %v3924_v41 }
 0x22d   : > { %v4109_v0 = vpop.eup %4108  ;;  %4120 = vtanh.f32 %v3928_v14 }
 0x22e   : > { %v4111_v40 = vpop.eup %4110 }
 0x22f   : > { %v4113_v16 = vpop.eup %4112  ;;  %v3190_v6 = vpack.c.bf16 %v4111_v40, %v4107_v23 }
 0x230   : > { %v3185_v26 = vpack.c.bf16 %v4113_v16, %v4109_v0 }
 0x231   : > { %3214 = vst [vmem:[%s5431_s9 + $0x68] sm:$0xff] %v3190_v6  }
 0x232   : > { %3213 = vst [vmem:[%s5431_s9 + $0x60] sm:$0xff] %v3185_v26  }
 0x234   : > { %v4115_v27 = vpop.eup %4114 }
 0x235   : > { %v4117_v53 = vpop.eup %4116 }
 0x236   : > { %v4119_v35 = vpop.eup %4118 }
 0x237   : > { %v4121_v25 = vpop.eup %4120  ;;  %v3200_v44 = vpack.c.bf16 %v4119_v35, %v4115_v27 }
 0x238   : > { %v3195_v62 = vpack.c.bf16 %v4121_v25, %v4117_v53 }
 0x239   : > { %3216 = vst [vmem:[%s5431_s9 + $0x78] sm:$0xff] %v3200_v44  }
 0x23a   : > { %3215 = vst [vmem:[%s5431_s9 + $0x70] sm:$0xff] %v3195_v62  }
 0x23b PF: > { %s14_s15 = sadd.s32 1, %s4135_s15  }
 0x23c   : > { %p11_p4 = scmp.ge.s32.totalorder %s14_s15, 4  }
 0x23e   :  { %13 = sbr.rel (!%p11_p4) target bundleno = 1 (0x1), region = 74 }

// kernel: generator_forward.11
= control target key start
LH: loop header
LB: loop body
LE: loop exit
PB: predicated region body
PF: predicated region fallthrough
CT: control target
= control target key end

     0   :  { %s5065_s15 = smov 0   ;;  %s6476_s0 = inlined_call_operand.vmem [shape: f32[2,8,8,128], index: 0, kind: input, shape index: {}]   ;;  %s6477_s1 = inlined_call_operand.vmem [shape: f32[2,128], index: 1, kind: input, shape index: {}]   ;;  %s6478_s2 = inlined_call_operand.vmem [shape: bf16[3,384,128], index: 2, kind: input, shape index: {}]   ;;  %s6479_s3 = inlined_call_operand.vmem [shape: f32[1,128], index: 3, kind: input, shape index: {}]   ;;  %s6480_s4 = inlined_call_operand.vmem [shape: f32[2,16,16,128], index: 4, kind: output, shape index: {}]  }
   0x1 LB: > { %s3969_s16 = sadd.s32 4294967295, %s5036_s15   ;;  %p3973_p0 = scmp.ge.s32.totalorder %s5036_s15, 1  ;;  %s5036_s15 = sphi %s5065_s15, %s14_s15  }
   0x2   : > { %p162_p1 = scmp.lt.s32.totalorder %s5036_s15, 3 }
   0x4   : > { %p163_p2 = pnand %p3973_p0, %p162_p1 }
   0x6   : > { %166 = sbr.rel (%p163_p2) target bundleno = 651 (0x28b), region = 36 }
   0xd   : > { %v4955_v0 = vld [vmem:[%s6478_s2 + $0x40] sm:$0xff]   ;;  %v5038_v2 = vmov 0   ;;  %v4957_v3 = vld [vmem:[%s6478_s2 + $0x48] sm:$0xff]   ;;  %v4959_v5 = vld [vmem:[%s6478_s2 + $0x50] sm:$0xff]   ;;  %p188_p3 = scmp.lt.s32.totalorder %s3969_s16, 1  ;;  %v276_v22 = vlaneseq  ;;  %vm1305_vm0 = vcmask 1040384  }
   0xe   : > { %v4956_v1 = vld [vmem:[%s6478_s2] sm:$0xff]   ;;  %1298 = vst [vmem:[#allocation2 + $0x8] sm:$0xff] %v5038_v2  ;;  %2358 = vmatprep.mubr.bf16.mxu0 %v5038_v2  ;;  %4185 = vmatprep.subr.bf16.mxu0 %v4955_v0  ;;  %v4958_v4 = vld [vmem:[%s6478_s2 + $0x8] sm:$0xff]   ;;  %v4961_v7 = vld [vmem:[%s6478_s2 + $0x10] sm:$0xff]   ;;  %vm1356_vm1 = vcmask 1047559   ;;  %vm1927_vm9 = vcmask 1047552  }
   0xf   : > { %4186 = vmatpush3.bf16.msra.mxu0 %v4956_v1  ;;  %v5093_v6 = vld [vmem:[%s6478_s2 + $0x80] sm:$0xff]   ;;  %v4962_v8 = vld [vmem:[%s6478_s2 + $0x58] sm:$0xff]   ;;  %v5106_v9 = vld [vmem:[%s6478_s2 + $0x88] sm:$0xff]   ;;  %s6494_s16 = smov (!%p188_p3, %s3969_s16), 1  ;;  %vm1306_vm2 = vsmask.f32 256 }
  0x10   : > { %4187 = vmatprep.subr.bf16.mxu0 %v4957_v3  ;;  %4737 = vmatprep.subr.bf16.mxu1 %v5093_v6  ;;  %v4964_v10 = vld [vmem:[%s6478_s2 + $0x18] sm:$0xff]   ;;  %v5117_v11 = vld [vmem:[%s6478_s2 + $0x90] sm:$0xff]   ;;  %v4965_v12 = vld [vmem:[%s6478_s2 + $0x60] sm:$0xff]   ;;  %s4183_s25 = sshll.u32 %s6494_s16, 6  ;;  %v5039_v30 = vmov 1966171168  }
  0x11   : > { %4745 = vmatpush3.bf16.msra.mxu1 %v5093_v6  ;;  %v5127_v13 = vld [vmem:[%s6478_s2 + $0x98] sm:$0xff]   ;;  %v4967_v14 = vld [vmem:[%s6478_s2 + $0x20] sm:$0xff]   ;;  %v4968_v15 = vld [vmem:[%s6478_s2 + $0x68] sm:$0xff]   ;;  %s5166_s10 = scalar_lea.vmem %s6476_s0, %s4183_s25  ;;  %v274_v31 = vunpack.c.l.s4 %v5039_v30  ;;  %v277_v32 = vshrl.u32 %v276_v22, 7  ;;  %vm1357_vm4 = vsmask.f32 7966 }
  0x12   : > { %4738 = vmatprep.subr.bf16.mxu1 %v5106_v9  ;;  %v5144_v16 = vld [vmem:[%s6478_s2 + $0xa0] sm:$0xff]   ;;  %v4970_v17 = vld [vmem:[%s6478_s2 + $0x28] sm:$0xff]   ;;  %v4971_v18 = vld [vmem:[%s6478_s2 + $0x70] sm:$0xff]   ;;  %vm1928_vm10 = vsmask.f32 7938  ;;  %s4184_s29 = sshll.u32 %s6494_s16, 8 }
  0x13   : > { %4188 = vmatpush3.bf16.msra.mxu0 %v4958_v4  ;;  %v4973_v19 = vld [vmem:[%s6478_s2 + $0x30] sm:$0xff]   ;;  %v5161_v20 = vld [vmem:[%s6478_s2 + $0xa8] sm:$0xff]   ;;  %v4974_v21 = vld [vmem:[%s6478_s2 + $0x78] sm:$0xff]   ;;  %v275_v41 = vunpack.c.0.s8 %v274_v31  ;;  %vm2026_vm12 = vsmask.f32 7424  ;;  %s6404_s6 = scalar_lea.vmem %s6480_s4, %s4184_s29 }
  0x14   : > { %4189 = vmatprep.subr.bf16.mxu0 %v4959_v5  ;;  %v5174_v23 = vld [vmem:[%s6478_s2 + $0xb0] sm:$0xff]   ;;  %v5180_v24 = vld [vmem:[%s6477_s1] ss:$0 sm:$0xff]  ;;  %v5185_v25 = vld [vmem:[%s6477_s1 + $0x1] ss:$0 sm:$0xff]  ;;  %v5241_v5 = vsub.s32 0, %v277_v32 }
  0x15   : > { %4746 = vmatpush3.bf16.msra.mxu1 %v5106_v9  ;;  %v201_v26 = vld [vmem:[%s5166_s10] sm:$0xff]  ;;  %v1308_v28 = vld [vmem:[#allocation2 + $0x18] sm:$0x1]  ;;  %vm5194_vm3 = vmand %vm1305_vm0, %vm1306_vm2  ;;  %v5220_v48 = vsub.s32 %v275_v41, %v277_v32 }
  0x16   : > { %4739 = vmatprep.subr.bf16.mxu1 %v5117_v11  ;;  %v213_v27 = vmul.f32 %v5180_v24, %v201_v26  ;;  %v4976_v29 = vld [vmem:[%s6478_s2 + $0x38] sm:$0xff]   ;;  %v1309_v37 = vsel %vm5194_vm3, 0, %v1308_v28  ;;  %v1380_v39 = vld [vmem:[#allocation2 + $0xd0] sm:$0x80]  ;;  %v205_v40 = vld [vmem:[%s5166_s10 + $0x20] sm:$0xff] }
  0x17   : > { %4190 = vmatpush3.bf16.msra.mxu0 %v4961_v7  ;;  %v204_v34 = vld [vmem:[%s5166_s10 + $0x18] sm:$0xff]  ;;  %1310 = vst [vmem:[#allocation2 + $0x18] sm:$0x1] %v1309_v37  ;;  %vm5211_vm5 = vmand %vm1356_vm1, %vm1357_vm4  ;;  %v217_v43 = vmul.f32 %v5180_v24, %v205_v40  ;;  %v1383_v47 = vld [vmem:[#allocation2 + $0xe8] sm:$0x80] }
  0x18   : > { %4191 = vmatprep.subr.bf16.mxu0 %v4962_v8  ;;  %v5202_v35 = vld [vmem:[%s6478_s2 + $0xb8] sm:$0xff]   ;;  %v225_v36 = vadd.f32 %v5185_v25, %v213_v27  ;;  %v216_v38 = vmul.f32 %v5180_v24, %v204_v34  ;;  %v1381_v46 = vsel %vm5211_vm5, 0, %v1380_v39  ;;  %v1384_v50 = vsel %vm5211_vm5, 0, %v1383_v47  ;;  %v4979_v54 = vld [vmem:[%s6478_s2 + $0x100] sm:$0xff]   ;;  %v1311_v57 = vld [vmem:[#allocation2 + $0x30] sm:$0x1] }
  0x19   : > { %4747 = vmatpush3.bf16.msra.mxu1 %v5117_v11  ;;  %1382 = vst [vmem:[#allocation2 + $0xd0] sm:$0x80] %v1381_v46  ;;  %v229_v49 = vadd.f32 %v5185_v25, %v217_v43  ;;  %1385 = vst [vmem:[#allocation2 + $0xe8] sm:$0x80] %v1384_v50  ;;  %v1312_v61 = vsel %vm5194_vm3, 0, %v1311_v57 }
  0x1a   : > { %4740 = vmatprep.subr.bf16.mxu1 %v5127_v13  ;;  %vm233_vm6 = vcmp.ge.f32.partialorder %v225_v36, 0.0  ;;  %v241_v44 = vmul.f32 0.2, %v225_v36  ;;  %v228_v45 = vadd.f32 %v5185_v25, %v216_v38  ;;  %v1386_v62 = vld [vmem:[#allocation2 + $0x100] sm:$0x80]  ;;  %vm5335_vm11 = vmand %vm1927_vm9, %vm1928_vm10 }
  0x1b   : > { %4192 = vmatpush3.bf16.msra.mxu0 %v4964_v10  ;;  %vm237_vm8 = vcmp.ge.f32.partialorder %v229_v49, 0.0  ;;  %v245_v55 = vmul.f32 0.2, %v229_v49  ;;  %1313 = vst [vmem:[#allocation2 + $0x30] sm:$0x1] %v1312_v61  ;;  %v1387_v0 = vsel %vm5211_vm5, 0, %v1386_v62  ;;  %vm5385_vm13 = vmand %vm1927_vm9, %vm2026_vm12 }
  0x1c   : > { %4193 = vmatprep.subr.bf16.mxu0 %v4965_v12  ;;  %v249_v51 = vsel %vm233_vm6, %v225_v36, %v241_v44  ;;  %vm236_vm7 = vcmp.ge.f32.partialorder %v228_v45, 0.0  ;;  %v244_v52 = vmul.f32 0.2, %v228_v45  ;;  %1388 = vst [vmem:[#allocation2 + $0x100] sm:$0x80] %v1387_v0 }
  0x1d   : > { %4748 = vmatpush3.bf16.msra.mxu1 %v5127_v13  ;;  %v257_v53 = vpack.c.bf16 %v249_v51, %v249_v51  ;;  %v253_v60 = vsel %vm237_vm8, %v229_v49, %v245_v55  ;;  %v1389_v4 = vld [vmem:[#allocation2 + $0x118] sm:$0x80] }
  0x1e   : > { %4741 = vmatprep.subr.bf16.mxu1 %v5144_v16  ;;  %v252_v56 = vsel %vm236_vm7, %v228_v45, %v244_v52  ;;  %v261_v63 = vpack.c.bf16 %v253_v60, %v253_v60 }
  0x1f   : > { %4194 = vmatpush3.bf16.msra.mxu0 %v4967_v14  ;;  %v279_v58 = vrot.slane %v257_v53, %v5220_v48  ;;  %v260_v59 = vpack.c.bf16 %v252_v56, %v252_v56 }
  0x20   : > { %4195 = vmatprep.subr.bf16.mxu0 %v4968_v15  ;;  %v5244_v7 = vrot.slane %v261_v63, %v5220_v48 }
  0x21   : > { %4749 = vmatpush3.bf16.msra.mxu1 %v5144_v16  ;;  %v280_v1 = vcombine.high %v279_v58, %v279_v58  ;;  %v351_v3 = vrot.slane %v260_v59, %v5220_v48 }
  0x22   : > { %4742 = vmatprep.subr.bf16.mxu1 %v5161_v20 }
  0x23   : > { %4196 = vmatpush3.bf16.msra.mxu0 %v4970_v17  ;;  %v294_v8 = vrot.slane %v280_v1, %v5220_v48  ;;  %v352_v15 = vcombine.high %v351_v3, %v351_v3  ;;  %v5251_v17 = vrot.slane %v351_v3, %v5220_v48 }
  0x24   : > { %4197 = vmatprep.subr.bf16.mxu0 %v4971_v18  ;;  %v376_v18 = vcombine.high %v5244_v7, %v5244_v7 }
  0x25   : > { %4750 = vmatpush3.bf16.msra.mxu1 %v5161_v20  ;;  %v468_v22 = vunpack.i.h.s16 %v294_v8  ;;  %v3981_v28 = vpack.i.b16 %v294_v8, %v294_v8  ;;  %v5263_v31 = vrot.slane %v352_v15, %v5220_v48  ;;  %v367_v57 = vcombine.high %v5251_v17, %v5251_v17 }
  0x26   : > { %4743 = vmatprep.subr.bf16.mxu1 %v5174_v23  ;;  %v490_v0 = vunpack.i.h.s16 %v5251_v17 }
  0x27   : > { %4198 = vmatpush3.bf16.msra.mxu0 %v4973_v19  ;;  %v5257_v19 = vrot.slane %v5244_v7, %v5220_v48  ;;  %v532_v34 = vpack.i.b16 %v468_v22, %v468_v22  ;;  %v368_v63 = vcombine.high %v5263_v31, %v5263_v31  ;;  %v492_v1 = vunpack.i.h.s16 %v5263_v31 }
  0x28   : > { %4199 = vmatprep.subr.bf16.mxu0 %v4974_v21  ;;  %v296_v21 = vcombine.high %v294_v8, %v294_v8  ;;  %v3993_v22 = vpack.i.b16 %v5263_v31, %v5263_v31 }
  0x29   : > { %4751 = vmatpush3.bf16.msra.mxu1 %v5174_v23  ;;  %v608_v43 = vrot.slane %v532_v34, %v5241_v5  ;;  %v496_v8 = vunpack.i.h.s16 %v368_v63 }
  0x2a   : > { %4744 = vmatprep.subr.bf16.mxu1 %v5202_v35  ;;  %v472_v32 = vunpack.i.h.s16 %v296_v21  ;;  %v3983_v37 = vpack.i.b16 %v296_v21, %v296_v21 }
  0x2b   : > { %4200 = vmatpush3.bf16.msra.mxu0 %v4976_v29  ;;  %v871_v52 = vpack.i.b16 %v608_v43, %v608_v43 }
  0x2c   : > { %4593 = vmatprep.subr.bf16.mxu0 %v5093_v6  ;;  %v536_v41 = vpack.i.b16 %v472_v32, %v472_v32  ;;  %v620_v45 = vrot.slane %v3983_v37, %v5241_v5  ;;  %v560_v32 = vpack.i.b16 %v496_v8, %v496_v8 }
  0x2d   : > { %4752 = vmatpush3.bf16.msra.mxu1 %v5202_v35 }
  0x2e   : > { %2359 = vmatmul.mubr.bf16.vlgmr.msra.gmra.mrb[0].mxu0 %v5038_v2  ;;  %v287_v2 = vrot.slane %v279_v58, %v5220_v48  ;;  %4321 = vmatprep.subr.bf16.mxu1 %v4979_v54  ;;  %v624_v51 = vrot.slane %v536_v41, %v5241_v5  ;;  %v892_v54 = vpack.i.b16 %v620_v45, %v620_v45 }
  0x2f   : > { %4594 = vmatpush3.bf16.msra.mxu0 %v5093_v6  ;;  %v1390_v6 = vsel %vm5211_vm5, 0, %v1389_v4  ;;  %v876_v58 = vrot.slane %v871_v52, %v5241_v5  ;;  %v494_v4 = vunpack.i.h.s16 %v367_v57  ;;  %v720_v41 = vrot.slane %v560_v32, %v5241_v5 }
  0x30   : > { %4595 = vmatprep.subr.bf16.mxu0 %v5106_v9  ;;  %v295_v10 = vcombine.high %v287_v2, %v287_v2  ;;  %v466_v12 = vunpack.i.h.s16 %v287_v2  ;;  %v3980_v14 = vpack.i.b16 %v287_v2, %v287_v2  ;;  %1391 = vst [vmem:[#allocation2 + $0x118] sm:$0x80] %v1390_v6  ;;  %v897_v60 = vrot.slane %v892_v54, %v5241_v5 }
  0x31   : > { %v899_v61 = vpack.i.b16 %v624_v51, %v624_v51 }
  0x32   : > { %v470_v26 = vunpack.i.h.s16 %v295_v10  ;;  %v530_v27 = vpack.i.b16 %v466_v12, %v466_v12  ;;  %v3982_v29 = vpack.i.b16 %v295_v10, %v295_v10  ;;  %v596_v30 = vrot.slane %v3980_v14, %v5241_v5 }
  0x33   : > { %4596 = vmatpush3.bf16.msra.mxu0 %v5106_v9  ;;  %v604_v9 = vrot.slane %v3981_v28, %v5241_v5  ;;  %v904_v2 = vrot.slane %v899_v61, %v5241_v5  ;;  %v3992_v10 = vpack.i.b16 %v5251_v17, %v5251_v17  ;;  %v554_v12 = vpack.i.b16 %v490_v0, %v490_v0 }
  0x34   : > { %4597 = vmatprep.subr.bf16.mxu0 %v5117_v11  ;;  %v534_v36 = vpack.i.b16 %v470_v26, %v470_v26  ;;  %v600_v38 = vrot.slane %v530_v27, %v5241_v5  ;;  %v612_v39 = vrot.slane %v3982_v29, %v5241_v5  ;;  %v850_v40 = vpack.i.b16 %v596_v30, %v596_v30 }
  0x35   : > { %v864_v49 = vpack.i.b16 %v604_v9, %v604_v9  ;;  %v1474_v14 = vcombine.low %v897_v60, %v904_v2  ;;  %v556_v26 = vpack.i.b16 %v492_v1, %v492_v1  ;;  %v3994_v27 = vpack.i.b16 %v367_v57, %v367_v57 }
  0x36   : > { %v616_v44 = vrot.slane %v534_v36, %v5241_v5  ;;  %v855_v46 = vrot.slane %v850_v40, %v5241_v5  ;;  %v857_v47 = vpack.i.b16 %v600_v38, %v600_v38  ;;  %v878_v50 = vpack.i.b16 %v612_v39, %v612_v39 }
  0x37   : > { %4598 = vmatpush3.bf16.msra.mxu0 %v5117_v11  ;;  %v869_v55 = vrot.slane %v864_v49, %v5241_v5  ;;  %v558_v28 = vpack.i.b16 %v494_v4, %v494_v4  ;;  %v3995_v29 = vpack.i.b16 %v368_v63, %v368_v63  ;;  %v1502_v30 = vrot.slane %v1474_v14, %v5220_v48  ;;  %v1930_v4 = vld [vmem:[#allocation2 + $0x18] sm:$0xff] }
  0x38   : > { %4599 = vmatprep.subr.bf16.mxu0 %v5127_v13  ;;  %v885_v53 = vpack.i.b16 %v616_v44, %v616_v44  ;;  %v862_v11 = vrot.slane %v857_v47, %v5241_v5  ;;  %v883_v56 = vrot.slane %v878_v50, %v5241_v5  ;;  %v696_v34 = vrot.slane %v554_v12, %v5241_v5 }
  0x39   : > { %v700_v36 = vrot.slane %v3993_v22, %v5241_v5  ;;  %v704_v37 = vrot.slane %v556_v26, %v5241_v5  ;;  %v708_v31 = vrot.slane %v3994_v27, %v5241_v5  ;;  %v712_v39 = vrot.slane %v558_v28, %v5241_v5 }
  0x3a   : > { %v890_v59 = vrot.slane %v885_v53, %v5241_v5  ;;  %v1471_v62 = vcombine.low %v855_v46, %v862_v11  ;;  %v716_v40 = vrot.slane %v3995_v29, %v5241_v5  ;;  %v1025_v44 = vpack.i.b16 %v696_v34, %v696_v34 }
  0x3b   : > { %4600 = vmatpush3.bf16.msra.mxu0 %v5127_v13  ;;  %v1472_v13 = vcombine.low %v869_v55, %v876_v58  ;;  %v1032_v45 = vpack.i.b16 %v700_v36, %v700_v36  ;;  %v1039_v47 = vpack.i.b16 %v704_v37, %v704_v37  ;;  %v1046_v49 = vpack.i.b16 %v708_v31, %v708_v31 }
  0x3c   : > { %4601 = vmatprep.subr.bf16.mxu0 %v5144_v16  ;;  %v1473_v3 = vcombine.low %v883_v56, %v890_v59  ;;  %v1481_v6 = vrot.slane %v1471_v62, %v5220_v48  ;;  %v1030_v51 = vrot.slane %v1025_v44, %v5241_v5  ;;  %v1060_v53 = vpack.i.b16 %v716_v40, %v716_v40 }
  0x3d   : > { %v1488_v15 = vrot.slane %v1472_v13, %v5220_v48  ;;  %v1037_v52 = vrot.slane %v1032_v45, %v5241_v5  ;;  %v1044_v11 = vrot.slane %v1039_v47, %v5241_v5  ;;  %v1051_v55 = vrot.slane %v1046_v49, %v5241_v5 }
  0x3e   : > { %v1495_v21 = vrot.slane %v1473_v3, %v5220_v48  ;;  %v1065_v57 = vrot.slane %v1060_v53, %v5241_v5  ;;  %v1067_v58 = vpack.i.b16 %v720_v41, %v720_v41  ;;  %v390_v60 = vrot.slane %v376_v18, %v5220_v48 }
  0x3f   : > { %4602 = vmatpush3.bf16.msra.mxu0 %v5144_v16  ;;  %v1503_v17 = vcombine.low %v1481_v6, %v1488_v15  ;;  %v692_v16 = vrot.slane %v3992_v10, %v5241_v5  ;;  %v1619_v0 = vcombine.low %v1037_v52, %v1044_v11  ;;  %v391_v2 = vcombine.high %v5257_v19, %v5257_v19 }
  0x40   : > { %4603 = vmatprep.subr.bf16.mxu0 %v5161_v20  ;;  %v1504_v38 = vcombine.low %v1495_v21, %v1502_v30  ;;  %v1072_v18 = vrot.slane %v1067_v58, %v5241_v5  ;;  %v392_v13 = vcombine.high %v390_v60, %v390_v60  ;;  %v498_v14 = vunpack.i.h.s16 %v5257_v19 }
  0x41   : > { %v1511_v9 = vrot.slane %v1503_v17, %v5220_v48  ;;  %v1018_v43 = vpack.i.b16 %v692_v16, %v692_v16  ;;  %v1635_v6 = vrot.slane %v1619_v0, %v5220_v48  ;;  %v500_v15 = vunpack.i.h.s16 %v390_v60 }
  0x42   : > { %v1518_v46 = vrot.slane %v1504_v38, %v5220_v48  ;;  %v1621_v12 = vcombine.low %v1065_v57, %v1072_v18  ;;  %v502_v21 = vunpack.i.h.s16 %v391_v2  ;;  %v504_v26 = vunpack.i.h.s16 %v392_v13 }
  0x43   : > { %4604 = vmatpush3.bf16.msra.mxu0 %v5161_v20  ;;  %v1053_v20 = vpack.i.b16 %v712_v39, %v712_v39  ;;  %v1023_v50 = vrot.slane %v1018_v43, %v5241_v5  ;;  %v3996_v27 = vpack.i.b16 %v5257_v19, %v5257_v19  ;;  %v562_v29 = vpack.i.b16 %v498_v14, %v498_v14 }
  0x44   : > { %4605 = vmatprep.subr.bf16.mxu0 %v5174_v23  ;;  %v5316_v54 = vcombine.low %v1511_v9, %v1518_v46  ;;  %v1649_v28 = vrot.slane %v1621_v12, %v5220_v48  ;;  %v3997_v30 = vpack.i.b16 %v390_v60, %v390_v60  ;;  %v564_v17 = vpack.i.b16 %v500_v15, %v500_v15 }
  0x45   : > { %v1058_v56 = vrot.slane %v1053_v20, %v5241_v5  ;;  %v1618_v59 = vcombine.low %v1023_v50, %v1030_v51  ;;  %v3998_v34 = vpack.i.b16 %v391_v2, %v391_v2  ;;  %v566_v36 = vpack.i.b16 %v502_v21, %v502_v21  ;;  %v1933_v51 = vld [vmem:[#allocation2 + $0x30] sm:$0xff]  ;;  %v1314_v21 = vld [vmem:[#allocation2 + $0x48] sm:$0x1] }
  0x46   : > { %1986 = vst [vmem:[#allocation2 + $0x20] sm:$0xff] %v5316_v54  ;;  %2366 = vmatprep.mubr.bf16.mxu0 %v5316_v54  ;;  %1987 = vst [vmem:[#allocation2 + $0x38] sm:$0xff] %v5316_v54  ;;  %v1864_v61 = vshrl.u32 %v5316_v54, 16  ;;  %v1867_v62 = vshll.u32 %v5316_v54, 16  ;;  %v3999_v31 = vpack.i.b16 %v392_v13, %v392_v13  ;;  %v568_v38 = vpack.i.b16 %v504_v26, %v504_v26 }
  0x47   : > { %4606 = vmatpush3.bf16.msra.mxu0 %v5174_v23  ;;  %v206_v23 = vld [vmem:[%s5166_s10 + $0x28] sm:$0xff]  ;;  %v1620_v7 = vcombine.low %v1051_v55, %v1058_v56  ;;  %v1628_v1 = vrot.slane %v1618_v59, %v5220_v48  ;;  %v724_v9 = vrot.slane %v3996_v27, %v5241_v5  ;;  %v728_v19 = vrot.slane %v562_v29, %v5241_v5  ;;  %v1392_v29 = vld [vmem:[#allocation2 + $0x130] sm:$0x80] }
  0x48   : > { %4607 = vmatprep.subr.bf16.mxu0 %v5202_v35  ;;  %v1866_v3 = vrot.slane %v1864_v61, 7  ;;  %v5349_v10 = vmul.f32 %v5180_v24, %v206_v23  ;;  %v732_v39 = vrot.slane %v3997_v30, %v5241_v5  ;;  %v736_v40 = vrot.slane %v564_v17, %v5241_v5  ;;  %v202_v56 = vld [vmem:[%s5166_s10 + $0x8] sm:$0xff]  ;;  %v207_v30 = vld [vmem:[%s5166_s10 + $0x30] sm:$0xff] }
  0x49   : > { %v1642_v8 = vrot.slane %v1620_v7, %v5220_v48  ;;  %v1650_v22 = vcombine.low %v1628_v1, %v1635_v6  ;;  %v740_v41 = vrot.slane %v3998_v34, %v5241_v5  ;;  %v744_v44 = vrot.slane %v566_v36, %v5241_v5 }
  0x4a   : > { %v748_v45 = vrot.slane %v3999_v31, %v5241_v5  ;;  %v752_v46 = vrot.slane %v568_v38, %v5241_v5  ;;  %v1074_v47 = vpack.i.b16 %v724_v9, %v724_v9  ;;  %v1081_v49 = vpack.i.b16 %v728_v19, %v728_v19  ;;  %v1317_v31 = vld [vmem:[#allocation2 + $0x60] sm:$0x1] }
  0x4b   : > { %4608 = vmatpush3.bf16.msra.mxu0 %v5202_v35  ;;  %v1869_v35 = vor.u32 %v1867_v62, %v1866_v3  ;;  %v1658_v16 = vrot.slane %v1650_v22, %v5220_v48  ;;  %v1651_v37 = vcombine.low %v1642_v8, %v1649_v28  ;;  %v1088_v20 = vpack.i.b16 %v732_v39, %v732_v39  ;;  %v2049_v8 = vld [vmem:[#allocation2 + $0xd0] sm:$0xff] }
  0x4c   : > { %v1095_v50 = vpack.i.b16 %v736_v40, %v736_v40  ;;  %v1102_v53 = vpack.i.b16 %v740_v41, %v740_v41  ;;  %v1109_v11 = vpack.i.b16 %v744_v44, %v744_v44  ;;  %v1116_v55 = vpack.i.b16 %v748_v45, %v748_v45  ;;  %v1398_v40 = vld [vmem:[#allocation2 + $0x160] sm:$0x80]  ;;  %v208_v41 = vld [vmem:[%s5166_s10 + $0x38] sm:$0xff] }
  0x4d   : > { %v1931_v32 = vsel %vm5335_vm11, %v1869_v35, %v1930_v4  ;;  %v1665_v43 = vrot.slane %v1651_v37, %v5220_v48  ;;  %v1079_v57 = vrot.slane %v1074_v47, %v5241_v5  ;;  %v1086_v58 = vrot.slane %v1081_v49, %v5241_v5  ;;  %v1395_v37 = vld [vmem:[#allocation2 + $0x148] sm:$0x80] }
  0x4e   : > { %1932 = vst [vmem:[#allocation2 + $0x18] sm:$0xff] %v1931_v32  ;;  %2367 = vmatmul.mubr.bf16.gmra.mrb[4].mxu0 %v1931_v32  ;;  %v1093_v59 = vrot.slane %v1088_v20, %v5241_v5  ;;  %v1100_v60 = vrot.slane %v1095_v50, %v5241_v5  ;;  %v1107_v7 = vrot.slane %v1102_v53, %v5241_v5  ;;  %v1315_v36 = vsel %vm5194_vm3, 0, %v1314_v21 }
  0x4f   : > { %2374 = vmatprep.mubr.bf16.mxu0 %v5316_v54  ;;  %v5370_v52 = vcombine.low %v1658_v16, %v1665_v43  ;;  %v1114_v18 = vrot.slane %v1109_v11, %v5241_v5  ;;  %v1121_v2 = vrot.slane %v1116_v55, %v5241_v5  ;;  %v1123_v13 = vpack.i.b16 %v752_v46, %v752_v46  ;;  %v1401_v46 = vld [vmem:[#allocation2 + $0x178] sm:$0x80] }
  0x50   : > { %v1667_v3 = vcombine.low %v1079_v57, %v1086_v58  ;;  %v1668_v4 = vcombine.low %v1093_v59, %v1100_v60  ;;  %v1934_v14 = vsel %vm5335_vm11, %v1869_v35, %v1933_v51  ;;  %v230_v15 = vadd.f32 %v5185_v25, %v5349_v10  ;;  %1316 = vst [vmem:[#allocation2 + $0x48] sm:$0x1] %v1315_v36  ;;  %v1320_v57 = vld [vmem:[#allocation2 + $0x78] sm:$0x1] }
  0x51   : > { %v1885_v23 = vshrl.u32 %v5370_v52, 16  ;;  %v1888_v0 = vshll.u32 %v5370_v52, 16  ;;  %1992 = vst [vmem:[#allocation2 + $0xb0] sm:$0xff] %v5370_v52  ;;  %1993 = vst [vmem:[#allocation2 + $0xc8] sm:$0xff] %v5370_v52  ;;  %v1669_v12 = vcombine.low %v1107_v7, %v1114_v18  ;;  %v1128_v22 = vrot.slane %v1123_v13, %v5241_v5 }
  0x52   : > { %v1677_v26 = vrot.slane %v1667_v3, %v5220_v48  ;;  %v1684_v27 = vrot.slane %v1668_v4, %v5220_v48  ;;  %1935 = vst [vmem:[#allocation2 + $0x30] sm:$0xff] %v1934_v14  ;;  %v214_v28 = vmul.f32 %v5180_v24, %v202_v56  ;;  %vm238_vm14 = vcmp.ge.f32.partialorder %v230_v15, 0.0  ;;  %v203_v56 = vld [vmem:[%s5166_s10 + $0x10] sm:$0xff] }
  0x53   : > { %v2008_v6 = vrot.slane %v1888_v0, 1  ;;  %v1691_v10 = vrot.slane %v1669_v12, %v5220_v48  ;;  %v246_v35 = vmul.f32 0.2, %v230_v15  ;;  %v1670_v32 = vcombine.low %v1121_v2, %v1128_v22 }
  0x54   : > { %v1699_v16 = vcombine.low %v1677_v26, %v1684_v27  ;;  %v226_v34 = vadd.f32 %v5185_v25, %v214_v28  ;;  %v1393_v19 = vsel %vm5211_vm5, 0, %v1392_v29  ;;  %v219_v39 = vmul.f32 %v5180_v24, %v207_v30 }
  0x55   : > { %v5403_v17 = vor.u32 %v2008_v6, %v1885_v23  ;;  %v254_v9 = vsel %vm238_vm14, %v230_v15, %v246_v35  ;;  %v1698_v43 = vrot.slane %v1670_v32, %v5220_v48  ;;  %1394 = vst [vmem:[#allocation2 + $0x130] sm:$0x80] %v1393_v19  ;;  %v1396_v20 = vsel %vm5211_vm5, 0, %v1395_v37 }
  0x56   : > { %2375 = vmatmul.mubr.bf16.gmra.mrb[8].mxu0 %v1934_v14  ;;  %v1707_v44 = vrot.slane %v1699_v16, %v5220_v48  ;;  %v262_v45 = vpack.c.bf16 %v254_v9, %v254_v9  ;;  %vm234_vm15 = vcmp.ge.f32.partialorder %v226_v34, 0.0  ;;  %v242_v47 = vmul.f32 0.2, %v226_v34  ;;  %1397 = vst [vmem:[#allocation2 + $0x148] sm:$0x80] %v1396_v20 }
  0x57   : > { %v2050_v38 = vsel %vm5385_vm13, %v5403_v17, %v2049_v8  ;;  %v231_v49 = vadd.f32 %v5185_v25, %v219_v39  ;;  %v1318_v50 = vsel %vm5194_vm3, 0, %v1317_v31  ;;  %v1700_v51 = vcombine.low %v1691_v10, %v1698_v43  ;;  %v2052_v31 = vld [vmem:[#allocation2 + $0xe8] sm:$0xff]  ;;  %v4980_v43 = vld [vmem:[%s6478_s2 + $0xc0] sm:$0xff]  }
  0x58   : > { %2051 = vst [vmem:[#allocation2 + $0xd0] sm:$0xff] %v2050_v38  ;;  %4625 = vmatprep.mubr.bf16.mxu1 %v2050_v38  ;;  %v399_v53 = vrot.slane %v262_v45, %v5220_v48  ;;  %1319 = vst [vmem:[#allocation2 + $0x60] sm:$0x1] %v1318_v50  ;;  %v1399_v11 = vsel %vm5211_vm5, 0, %v1398_v40  ;;  %v220_v55 = vmul.f32 %v5180_v24, %v208_v41  ;;  %v1402_v60 = vsel %vm5211_vm5, 0, %v1401_v46  ;;  %v2055_v38 = vld [vmem:[#allocation2 + $0x100] sm:$0xff] }
  0x59   : > { %v250_v58 = vsel %vm234_vm15, %v226_v34, %v242_v47  ;;  %vm239_vm0 = vcmp.ge.f32.partialorder %v231_v49, 0.0  ;;  %v247_v59 = vmul.f32 0.2, %v231_v49  ;;  %1400 = vst [vmem:[#allocation2 + $0x160] sm:$0x80] %v1399_v11  ;;  %v1714_v7 = vrot.slane %v1700_v51, %v5220_v48  ;;  %v4981_v47 = vld [vmem:[%s6478_s2 + $0x108] sm:$0xff]  }
  0x5a   : > { %v400_v18 = vcombine.high %v399_v53, %v399_v53  ;;  %v407_v2 = vrot.slane %v399_v53, %v5220_v48  ;;  %v258_v13 = vpack.c.bf16 %v250_v58, %v250_v58  ;;  %1403 = vst [vmem:[#allocation2 + $0x178] sm:$0x80] %v1402_v60  ;;  %v5434_v3 = vrot.slane %v1867_v62, 1  ;;  %v5028_v63 = vld [vmem:[#allocation2 + $0x30] sm:$0xff] }
  0x5b   : > { %v5436_v4 = vsel %vm239_vm0, %v231_v49, %v247_v59  ;;  %v5439_v6 = vmul.f32 %v5180_v24, %v203_v56  ;;  %v1321_v8 = vsel %vm5194_vm3, 0, %v1320_v57  ;;  %v5443_v12 = vcombine.low %v1707_v44, %v1714_v7  ;;  %v4982_v7 = vld [vmem:[%s6478_s2 + $0xc8] sm:$0xff]  }
  0x5c   : > { %v414_v14 = vrot.slane %v400_v18, %v5220_v48  ;;  %v415_v15 = vcombine.high %v407_v2, %v407_v2  ;;  %v506_v21 = vunpack.i.h.s16 %v407_v2  ;;  %1322 = vst [vmem:[#allocation2 + $0x78] sm:$0x1] %v1321_v8  ;;  %v4000_v22 = vpack.i.b16 %v407_v2, %v407_v2 }
  0x5d   : > { %v5447_v26 = vrot.slane %v258_v13, %v5220_v48  ;;  %v263_v62 = vpack.c.bf16 %v5436_v4, %v5436_v4  ;;  %v5452_v24 = vadd.f32 %v5185_v25, %v220_v55  ;;  %v1892_v27 = vshrl.u32 %v5443_v12, 16  ;;  %1994 = vst [vmem:[#allocation2 + $0xe0] sm:$0xff] %v5443_v12  ;;  %1995 = vst [vmem:[#allocation2 + $0xf8] sm:$0xff] %v5443_v12  ;;  %v4985_v4 = vld [vmem:[%s6478_s2 + $0x118] sm:$0xff]  }
  0x5e   : > { %v1895_v28 = vshll.u32 %v5443_v12, 16  ;;  %v416_v29 = vcombine.high %v414_v14, %v414_v14  ;;  %v508_v30 = vunpack.i.h.s16 %v414_v14  ;;  %v510_v10 = vunpack.i.h.s16 %v415_v15  ;;  %v1359_v12 = vld [vmem:[#allocation2 + $0x28] sm:$0x80] }
  0x5f   : > { %v570_v35 = vpack.i.b16 %v506_v21, %v506_v21  ;;  %v4001_v32 = vpack.i.b16 %v414_v14, %v414_v14  ;;  %v4002_v16 = vpack.i.b16 %v415_v15, %v415_v15  ;;  %v756_v19 = vrot.slane %v4000_v22, %v5241_v5  ;;  %v4983_v14 = vld [vmem:[%s6478_s2 + $0x110] sm:$0xff]  }
  0x60   : > { %v2010_v34 = vrot.slane %v1895_v28, 1  ;;  %v512_v36 = vunpack.i.h.s16 %v416_v29  ;;  %v572_v25 = vpack.i.b16 %v508_v30, %v508_v30  ;;  %v4003_v37 = vpack.i.b16 %v416_v29, %v416_v29 }
  0x61   : > { %v574_v9 = vpack.i.b16 %v510_v10, %v510_v10  ;;  %v760_v39 = vrot.slane %v570_v35, %v5241_v5  ;;  %v764_v40 = vrot.slane %v4001_v32, %v5241_v5  ;;  %v772_v46 = vrot.slane %v4002_v16, %v5241_v5 }
  0x62   : > { %v2011_v41 = vor.u32 %v2010_v34, %v1892_v27  ;;  %v576_v44 = vpack.i.b16 %v512_v36, %v512_v36  ;;  %v768_v45 = vrot.slane %v572_v25, %v5241_v5  ;;  %v780_v20 = vrot.slane %v4003_v37, %v5241_v5 }
  0x63   : > { %v776_v49 = vrot.slane %v574_v9, %v5241_v5  ;;  %v1130_v50 = vpack.i.b16 %v756_v19, %v756_v19  ;;  %v1137_v51 = vpack.i.b16 %v760_v39, %v760_v39  ;;  %v1144_v56 = vpack.i.b16 %v764_v40, %v764_v40 }
  0x64   : > { %v2053_v53 = vsel %vm5385_vm13, %v2011_v41, %v2052_v31  ;;  %v2056_v11 = vsel %vm5385_vm13, %v2011_v41, %v2055_v38  ;;  %v784_v55 = vrot.slane %v576_v44, %v5241_v5  ;;  %v1151_v59 = vpack.i.b16 %v768_v45, %v768_v45  ;;  %v4984_v31 = vld [vmem:[%s6478_s2 + $0xd0] sm:$0xff]  }
  0x65   : > { %2054 = vst [vmem:[#allocation2 + $0xe8] sm:$0xff] %v2053_v53  ;;  %4626 = vmatmul.mubr.bf16.vlgmr.msra.gmra.mrb[0].mxu1 %v2053_v53  ;;  %2057 = vst [vmem:[#allocation2 + $0x100] sm:$0xff] %v2056_v11  ;;  %v1135_v57 = vrot.slane %v1130_v50, %v5241_v5  ;;  %v1142_v58 = vrot.slane %v1137_v51, %v5241_v5  ;;  %v1158_v60 = vpack.i.b16 %v772_v46, %v772_v46  ;;  %v4986_v50 = vld [vmem:[%s6478_s2 + $0xd8] sm:$0xff]  }
  0x66   : > { %4322 = vmatpush3.bf16.msra.mxu1 %v4980_v43  ;;  %4629 = vmatprep.mubr.bf16.mxu1 %v2056_v11  ;;  %v1149_v18 = vrot.slane %v1144_v56, %v5241_v5  ;;  %v1165_v2 = vpack.i.b16 %v776_v49, %v776_v49  ;;  %v1172_v13 = vpack.i.b16 %v780_v20, %v780_v20  ;;  %v5487_v8 = vmul.f32 0.2, %v5452_v24 }
  0x67   : > { %4323 = vmatprep.subr.bf16.mxu1 %v4981_v47  ;;  %v1156_v15 = vrot.slane %v1151_v59, %v5241_v5  ;;  %v1163_v21 = vrot.slane %v1158_v60, %v5241_v5  ;;  %v1179_v22 = vpack.i.b16 %v784_v55, %v784_v55  ;;  %v1716_v29 = vcombine.low %v1135_v57, %v1142_v58  ;;  %v4987_v60 = vld [vmem:[%s6478_s2 + $0x120] sm:$0xff]  }
  0x68   : > { %v1170_v30 = vrot.slane %v1165_v2, %v5241_v5  ;;  %v1177_v10 = vrot.slane %v1172_v13, %v5241_v5  ;;  %v304_v35 = vcombine.high %v5447_v26, %v5447_v26  ;;  %v311_v32 = vrot.slane %v5447_v26, %v5220_v48 }
  0x69   : > { %v1184_v16 = vrot.slane %v1179_v22, %v5241_v5  ;;  %v1717_v34 = vcombine.low %v1149_v18, %v1156_v15  ;;  %v1726_v36 = vrot.slane %v1716_v29, %v5220_v48  ;;  %v5506_v25 = vrot.slane %v263_v62, %v5220_v48 }
  0x6a   : > { %4324 = vmatpush3.bf16.msra.mxu1 %v4982_v7  ;;  %v1718_v37 = vcombine.low %v1163_v21, %v1170_v30  ;;  %v318_v38 = vrot.slane %v304_v35, %v5220_v48  ;;  %v319_v26 = vcombine.high %v311_v32, %v311_v32  ;;  %v474_v9 = vunpack.i.h.s16 %v311_v32 }
  0x6b   : > { %4325 = vmatprep.subr.bf16.mxu1 %v4983_v14  ;;  %v1719_v19 = vcombine.low %v1177_v10, %v1184_v16  ;;  %v1733_v39 = vrot.slane %v1717_v34, %v5220_v48  ;;  %v3984_v62 = vpack.i.b16 %v311_v32, %v311_v32  ;;  %v424_v40 = vcombine.high %v5506_v25, %v5506_v25  ;;  %v4988_v32 = vld [vmem:[%s6478_s2 + $0xe0] sm:$0xff]  }
  0x6c   : > { %v1740_v41 = vrot.slane %v1718_v37, %v5220_v48  ;;  %v320_v43 = vcombine.high %v318_v38, %v318_v38  ;;  %v476_v44 = vunpack.i.h.s16 %v318_v38  ;;  %v478_v45 = vunpack.i.h.s16 %v319_v26 }
  0x6d   : > { %v1747_v46 = vrot.slane %v1719_v19, %v5220_v48  ;;  %v1748_v47 = vcombine.low %v1726_v36, %v1733_v39  ;;  %v538_v49 = vpack.i.b16 %v474_v9, %v474_v9  ;;  %v3985_v20 = vpack.i.b16 %v318_v38, %v318_v38 }
  0x6e   : > { %vm240_vm1 = vcmp.ge.f32.partialorder %v5452_v24, 0.0  ;;  %4326 = vmatpush3.bf16.msra.mxu1 %v4984_v31  ;;  %v480_v51 = vunpack.i.h.s16 %v320_v43  ;;  %v540_v53 = vpack.i.b16 %v476_v44, %v476_v44  ;;  %v3986_v11 = vpack.i.b16 %v319_v26, %v319_v26  ;;  %v4989_v31 = vld [vmem:[%s6478_s2 + $0x128] sm:$0xff]  }
  0x6f   : > { %v542_v55 = vpack.i.b16 %v478_v45, %v478_v45  ;;  %v1749_v56 = vcombine.low %v1740_v41, %v1747_v46  ;;  %v1756_v57 = vrot.slane %v1748_v47, %v5220_v48  ;;  %4327 = vmatprep.subr.bf16.mxu1 %v4985_v4  ;;  %v3987_v58 = vpack.i.b16 %v320_v43, %v320_v43  ;;  %v4990_v47 = vld [vmem:[%s6478_s2 + $0xe8] sm:$0xff]  }
  0x70   : > { %v628_v59 = vrot.slane %v3984_v62, %v5241_v5  ;;  %v544_v7 = vpack.i.b16 %v480_v51, %v480_v51  ;;  %v632_v18 = vrot.slane %v538_v49, %v5241_v5  ;;  %v636_v2 = vrot.slane %v3985_v20, %v5241_v5 }
  0x71   : > { %v640_v13 = vrot.slane %v540_v53, %v5241_v5  ;;  %v1763_v14 = vrot.slane %v1749_v56, %v5220_v48  ;;  %v644_v15 = vrot.slane %v3986_v11, %v5241_v5  ;;  %v648_v21 = vrot.slane %v542_v55, %v5241_v5  ;;  %v4991_v53 = vld [vmem:[%s6478_s2 + $0x130] sm:$0xff]   ;;  %v2058_v11 = vld [vmem:[#allocation2 + $0x118] sm:$0xff] }
  0x72   : > { %v652_v22 = vrot.slane %v3987_v58, %v5241_v5  ;;  %4328 = vmatpush3.bf16.msra.mxu1 %v4986_v50  ;;  %v656_v29 = vrot.slane %v544_v7, %v5241_v5  ;;  %v906_v30 = vpack.i.b16 %v628_v59, %v628_v59  ;;  %v913_v10 = vpack.i.b16 %v632_v18, %v632_v18  ;;  %v2061_v58 = vld [vmem:[#allocation2 + $0x130] sm:$0xff] }
  0x73   : > { %v920_v35 = vpack.i.b16 %v636_v2, %v636_v2  ;;  %v5540_v16 = vcombine.low %v1756_v57, %v1763_v14  ;;  %v927_v34 = vpack.i.b16 %v640_v13, %v640_v13  ;;  %v934_v36 = vpack.i.b16 %v644_v15, %v644_v15  ;;  %4329 = vmatprep.subr.bf16.mxu1 %v4987_v60  ;;  %v4992_v15 = vld [vmem:[%s6478_s2 + $0xf0] sm:$0xff]  }
  0x74   : > { %v941_v37 = vpack.i.b16 %v648_v21, %v648_v21  ;;  %v911_v38 = vrot.slane %v906_v30, %v5241_v5  ;;  %v918_v26 = vrot.slane %v913_v10, %v5241_v5  ;;  %v948_v19 = vpack.i.b16 %v652_v22, %v652_v22 }
  0x75   : > { %v925_v9 = vrot.slane %v920_v35, %v5241_v5  ;;  %v1899_v39 = vshrl.u32 %v5540_v16, 16  ;;  %v1902_v4 = vshll.u32 %v5540_v16, 16  ;;  %1996 = vst [vmem:[#allocation2 + $0x110] sm:$0xff] %v5540_v16  ;;  %1997 = vst [vmem:[#allocation2 + $0x128] sm:$0xff] %v5540_v16  ;;  %v932_v62 = vrot.slane %v927_v34, %v5241_v5 }
  0x76   : > { %v939_v41 = vrot.slane %v934_v36, %v5241_v5  ;;  %v946_v43 = vrot.slane %v941_v37, %v5241_v5  ;;  %v953_v44 = vrot.slane %v948_v19, %v5241_v5  ;;  %v955_v45 = vpack.i.b16 %v656_v29, %v656_v29  ;;  %4330 = vmatpush3.bf16.msra.mxu1 %v4988_v32  ;;  %v4993_v29 = vld [vmem:[%s6478_s2 + $0x138] sm:$0xff]  }
  0x77   : > { %v1520_v46 = vcombine.low %v911_v38, %v918_v26  ;;  %v2012_v49 = vrot.slane %v1902_v4, 1  ;;  %v1521_v20 = vcombine.low %v925_v9, %v932_v62  ;;  %v431_v50 = vrot.slane %v5506_v25, %v5220_v48  ;;  %4331 = vmatprep.subr.bf16.mxu1 %v4989_v31  ;;  %v4994_v62 = vld [vmem:[%s6478_s2 + $0xf8] sm:$0xff]  }
  0x78   : > { %v438_v51 = vrot.slane %v424_v40, %v5220_v48  ;;  %v960_v55 = vrot.slane %v955_v45, %v5241_v5  ;;  %v1522_v56 = vcombine.low %v939_v41, %v946_v43  ;;  %v5573_v59 = vsel %vm240_vm1, %v5452_v24, %v5487_v8 }
  0x79   : > { %v1530_v57 = vrot.slane %v1520_v46, %v5220_v48  ;;  %v2013_v25 = vor.u32 %v2012_v49, %v1899_v39  ;;  %v1537_v40 = vrot.slane %v1521_v20, %v5220_v48  ;;  %v439_v60 = vcombine.high %v431_v50, %v431_v50  ;;  %v5601_v46 = vld [vmem:[%s6478_s2 + $0x140] sm:$0xff]  }
  0x7a   : > { %v440_v7 = vcombine.high %v438_v51, %v438_v51  ;;  %v1523_v18 = vcombine.low %v953_v44, %v960_v55  ;;  %v1544_v2 = vrot.slane %v1522_v56, %v5220_v48  ;;  %v514_v13 = vunpack.i.h.s16 %v431_v50  ;;  %4332 = vmatpush3.bf16.msra.mxu1 %v4990_v47 }
  0x7b   : > { %v516_v14 = vunpack.i.h.s16 %v438_v51  ;;  %v2059_v24 = vsel %vm5385_vm13, %v2013_v25, %v2058_v11  ;;  %v1552_v8 = vcombine.low %v1530_v57, %v1537_v40  ;;  %v2062_v21 = vsel %vm5385_vm13, %v2013_v25, %v2061_v58  ;;  %4333 = vmatprep.subr.bf16.mxu1 %v4991_v53 }
  0x7c   : > { %v518_v22 = vunpack.i.h.s16 %v439_v60  ;;  %2060 = vst [vmem:[#allocation2 + $0x118] sm:$0xff] %v2059_v24  ;;  %4630 = vmatmul.mubr.bf16.gmra.mrb[4].mxu1 %v2059_v24  ;;  %v1551_v30 = vrot.slane %v1523_v18, %v5220_v48  ;;  %2063 = vst [vmem:[#allocation2 + $0x130] sm:$0xff] %v2062_v21  ;;  %v520_v10 = vunpack.i.h.s16 %v440_v7  ;;  %v4004_v35 = vpack.i.b16 %v431_v50, %v431_v50  ;;  %v1323_v24 = vld [vmem:[#allocation2 + $0x90] sm:$0x1] }
  0x7d   : > { %v578_v32 = vpack.i.b16 %v514_v13, %v514_v13  ;;  %v1560_v34 = vrot.slane %v1552_v8, %v5220_v48  ;;  %4633 = vmatprep.mubr.bf16.mxu1 %v2062_v21  ;;  %v4005_v36 = vpack.i.b16 %v438_v51, %v438_v51  ;;  %v580_v37 = vpack.i.b16 %v516_v14, %v516_v14 }
  0x7e   : > { %v4006_v31 = vpack.i.b16 %v439_v60, %v439_v60  ;;  %v1553_v38 = vcombine.low %v1544_v2, %v1551_v30  ;;  %v582_v26 = vpack.i.b16 %v518_v22, %v518_v22  ;;  %v4007_v9 = vpack.i.b16 %v440_v7, %v440_v7  ;;  %4334 = vmatpush3.bf16.msra.mxu1 %v4992_v15 }
  0x7f   : > { %v584_v19 = vpack.i.b16 %v520_v10, %v520_v10  ;;  %v788_v41 = vrot.slane %v4004_v35, %v5241_v5  ;;  %v792_v43 = vrot.slane %v578_v32, %v5241_v5  ;;  %v796_v44 = vrot.slane %v4005_v36, %v5241_v5  ;;  %4335 = vmatprep.subr.bf16.mxu1 %v4993_v29  ;;  %v5027_v32 = vld [vmem:[%s6477_s1 + $0x1] ss:$0 sm:$0xff]  ;;  %v1326_v36 = vld [vmem:[#allocation2 + $0xa8] sm:$0x1] }
  0x80   : > { %v800_v45 = vrot.slane %v580_v37, %v5241_v5  ;;  %v1567_v47 = vrot.slane %v1553_v38, %v5220_v48  ;;  %v804_v49 = vrot.slane %v4006_v31, %v5241_v5  ;;  %v808_v20 = vrot.slane %v582_v26, %v5241_v5  ;;  %v1936_v37 = vld [vmem:[#allocation2 + $0x48] sm:$0xff] }
  0x81   : > { %v812_v50 = vrot.slane %v4007_v9, %v5241_v5  ;;  %v816_v51 = vrot.slane %v584_v19, %v5241_v5  ;;  %v1186_v53 = vpack.i.b16 %v788_v41, %v788_v41  ;;  %v1193_v11 = vpack.i.b16 %v792_v43, %v792_v43  ;;  %v1939_v9 = vld [vmem:[#allocation2 + $0x60] sm:$0xff] }
  0x82   : > { %v1200_v55 = vpack.i.b16 %v796_v44, %v796_v44  ;;  %v5608_v56 = vcombine.low %v1560_v34, %v1567_v47  ;;  %v1207_v57 = vpack.i.b16 %v800_v45, %v800_v45  ;;  %v1214_v58 = vpack.i.b16 %v804_v49, %v804_v49  ;;  %4336 = vmatpush3.bf16.msra.mxu1 %v4994_v62  ;;  %v1329_v47 = vld [vmem:[#allocation2 + $0xc0] sm:$0x1] }
  0x83   : > { %v1221_v25 = vpack.i.b16 %v808_v20, %v808_v20  ;;  %v1191_v40 = vrot.slane %v1186_v53, %v5241_v5  ;;  %v1198_v60 = vrot.slane %v1193_v11, %v5241_v5  ;;  %v1228_v18 = vpack.i.b16 %v812_v50, %v812_v50  ;;  %4641 = vmatprep.subr.bf16.mxu1 %v5601_v46 }
  0x84   : > { %v1205_v7 = vrot.slane %v1200_v55, %v5241_v5  ;;  %1988 = vst [vmem:[#allocation2 + $0x50] sm:$0xff] %v5608_v56  ;;  %2382 = vmatprep.mubr.bf16.mxu0 %v5608_v56  ;;  %1989 = vst [vmem:[#allocation2 + $0x68] sm:$0xff] %v5608_v56  ;;  %v1871_v2 = vshrl.u32 %v5608_v56, 16  ;;  %v1874_v13 = vshll.u32 %v5608_v56, 16  ;;  %v1212_v14 = vrot.slane %v1207_v57, %v5241_v5 }
  0x85   : > { %v1219_v15 = vrot.slane %v1214_v58, %v5241_v5  ;;  %v1226_v8 = vrot.slane %v1221_v25, %v5241_v5  ;;  %v1233_v21 = vrot.slane %v1228_v18, %v5241_v5  ;;  %v1235_v22 = vpack.i.b16 %v816_v51, %v816_v51 }
  0x86   : > { %v1765_v29 = vcombine.low %v1191_v40, %v1198_v60  ;;  %v1873_v30 = vrot.slane %v1871_v2, 7  ;;  %v1766_v10 = vcombine.low %v1205_v7, %v1212_v14  ;;  %v264_v35 = vpack.c.bf16 %v5573_v59, %v5573_v59 }
  0x87   : > { %v227_v34 = vadd.f32 %v5027_v32, %v5439_v6  ;;  %v1240_v31 = vrot.slane %v1235_v22, %v5241_v5  ;;  %v1767_v38 = vcombine.low %v1219_v15, %v1226_v8  ;;  %v1324_v19 = vsel %vm5194_vm3, 0, %v1323_v24 }
  0x88   : > { %v1775_v26 = vrot.slane %v1765_v29, %v5220_v48  ;;  %v1876_v59 = vor.u32 %v1874_v13, %v1873_v30  ;;  %v1782_v62 = vrot.slane %v1766_v10, %v5220_v48  ;;  %v447_v41 = vrot.slane %v264_v35, %v5220_v48  ;;  %1325 = vst [vmem:[#allocation2 + $0x90] sm:$0x1] %v1324_v19 }
  0x89   : > { %vm235_vm2 = vcmp.ge.f32.partialorder %v227_v34, 0.0  ;;  %v1768_v6 = vcombine.low %v1233_v21, %v1240_v31  ;;  %v1789_v43 = vrot.slane %v1767_v38, %v5220_v48  ;;  %v243_v44 = vmul.f32 0.2, %v227_v34 }
  0x8a   : > { %v1327_v45 = vsel %vm5194_vm3, 0, %v1326_v36  ;;  %v5644_v49 = vsel %vm5335_vm11, %v1876_v59, %v1936_v37  ;;  %v1797_v20 = vcombine.low %v1775_v26, %v1782_v62  ;;  %v5648_v50 = vsel %vm5335_vm11, %v1876_v59, %v1939_v9 }
  0x8b   : > { %v448_v51 = vcombine.high %v447_v41, %v447_v41  ;;  %1328 = vst [vmem:[#allocation2 + $0xa8] sm:$0x1] %v1327_v45  ;;  %1938 = vst [vmem:[#allocation2 + $0x48] sm:$0xff] %v5644_v49  ;;  %2383 = vmatmul.mubr.bf16.gmra.mrb[12].mxu0 %v5644_v49  ;;  %v1796_v53 = vrot.slane %v1768_v6, %v5220_v48  ;;  %v455_v11 = vrot.slane %v447_v41, %v5220_v48  ;;  %v5001_v41 = vld [vmem:[%s6478_s2 + $0x1c0] sm:$0xff]  }
  0x8c   : > { %1941 = vst [vmem:[#allocation2 + $0x60] sm:$0xff] %v5648_v50  ;;  %v251_v55 = vsel %vm235_vm2, %v227_v34, %v243_v44  ;;  %v5658_v57 = vrot.slane %v1885_v23, 7  ;;  %v1805_v58 = vrot.slane %v1797_v20, %v5220_v48  ;;  %2390 = vmatprep.mubr.bf16.mxu0 %v5608_v56  ;;  %v1330_v60 = vsel %vm5194_vm3, 0, %v1329_v47  ;;  %4457 = vmatprep.subr.bf16.mxu0 %v5001_v41 }
  0x8d   : > { %v462_v25 = vrot.slane %v448_v51, %v5220_v48  ;;  %v259_v40 = vpack.c.bf16 %v251_v55, %v251_v55  ;;  %v1798_v7 = vcombine.low %v1789_v43, %v1796_v53  ;;  %v463_v18 = vcombine.high %v455_v11, %v455_v11  ;;  %1331 = vst [vmem:[#allocation2 + $0xc0] sm:$0x1] %v1330_v60  ;;  %v2067_v60 = vld [vmem:[#allocation2 + $0x160] sm:$0xff] }
  0x8e   : > { %v522_v14 = vunpack.i.h.s16 %v455_v11  ;;  %v4008_v15 = vpack.i.b16 %v455_v11, %v455_v11 }
  0x8f   : > { %v464_v24 = vcombine.high %v462_v25, %v462_v25  ;;  %v524_v8 = vunpack.i.h.s16 %v462_v25  ;;  %v4009_v21 = vpack.i.b16 %v462_v25, %v462_v25  ;;  %v327_v23 = vrot.slane %v259_v40, %v5220_v48  ;;  %v2064_v40 = vld [vmem:[#allocation2 + $0x148] sm:$0xff] }
  0x90   : > { %v1812_v22 = vrot.slane %v1798_v7, %v5220_v48  ;;  %v526_v29 = vunpack.i.h.s16 %v463_v18  ;;  %v586_v30 = vpack.i.b16 %v522_v14, %v522_v14  ;;  %v4010_v10 = vpack.i.b16 %v463_v18, %v463_v18 }
  0x91   : > { %v528_v35 = vunpack.i.h.s16 %v464_v24  ;;  %v588_v32 = vpack.i.b16 %v524_v8, %v524_v8  ;;  %v4011_v34 = vpack.i.b16 %v464_v24, %v464_v24  ;;  %v820_v36 = vrot.slane %v4008_v15, %v5241_v5 }
  0x92   : > { %v5668_v37 = vcombine.low %v1805_v58, %v1812_v22  ;;  %v590_v31 = vpack.i.b16 %v526_v29, %v526_v29  ;;  %v824_v38 = vrot.slane %v586_v30, %v5241_v5  ;;  %v828_v26 = vrot.slane %v4009_v21, %v5241_v5 }
  0x93   : > { %v592_v9 = vpack.i.b16 %v528_v35, %v528_v35  ;;  %v832_v19 = vrot.slane %v588_v32, %v5241_v5  ;;  %v836_v59 = vrot.slane %v4010_v10, %v5241_v5  ;;  %v844_v62 = vrot.slane %v4011_v34, %v5241_v5  ;;  %2391 = vmatmul.mubr.bf16.gmra.mrb[16].mxu0 %v5648_v50  ;;  %v1332_v32 = vld [vmem:[#allocation2 + $0xd8] sm:$0x1] }
  0x94   : > { %v1906_v6 = vshrl.u32 %v5668_v37, 16  ;;  %v1909_v43 = vshll.u32 %v5668_v37, 16  ;;  %1998 = vst [vmem:[#allocation2 + $0x140] sm:$0xff] %v5668_v37  ;;  %1999 = vst [vmem:[#allocation2 + $0x158] sm:$0xff] %v5668_v37  ;;  %v840_v44 = vrot.slane %v590_v31, %v5241_v5  ;;  %v1242_v45 = vpack.i.b16 %v820_v36, %v820_v36 }
  0x95   : > { %v848_v47 = vrot.slane %v592_v9, %v5241_v5  ;;  %v1249_v20 = vpack.i.b16 %v824_v38, %v824_v38  ;;  %v1256_v51 = vpack.i.b16 %v828_v26, %v828_v26  ;;  %v1263_v53 = vpack.i.b16 %v832_v19, %v832_v19 }
  0x96   : > { %v2014_v11 = vrot.slane %v1909_v43, 1  ;;  %v1247_v55 = vrot.slane %v1242_v45, %v5241_v5  ;;  %v1270_v58 = vpack.i.b16 %v836_v59, %v836_v59  ;;  %v1277_v25 = vpack.i.b16 %v840_v44, %v840_v44 }
  0x97   : > { %v1254_v7 = vrot.slane %v1249_v20, %v5241_v5  ;;  %v1261_v18 = vrot.slane %v1256_v51, %v5241_v5  ;;  %v1268_v14 = vrot.slane %v1263_v53, %v5241_v5  ;;  %v1284_v15 = vpack.i.b16 %v844_v62, %v844_v62 }
  0x98   : > { %v2015_v24 = vor.u32 %v2014_v11, %v1906_v6  ;;  %v1275_v8 = vrot.slane %v1270_v58, %v5241_v5  ;;  %v1282_v21 = vrot.slane %v1277_v25, %v5241_v5  ;;  %v1291_v22 = vpack.i.b16 %v848_v47, %v848_v47 }
  0x99   : > { %v1289_v29 = vrot.slane %v1284_v15, %v5241_v5  ;;  %v1814_v30 = vcombine.low %v1247_v55, %v1254_v7  ;;  %v1815_v10 = vcombine.low %v1261_v18, %v1268_v14  ;;  %v328_v35 = vcombine.high %v327_v23, %v327_v23 }
  0x9a   : > { %v2065_v34 = vsel %vm5385_vm13, %v2015_v24, %v2064_v40  ;;  %v2068_v36 = vsel %vm5385_vm13, %v2015_v24, %v2067_v60  ;;  %v1296_v31 = vrot.slane %v1291_v22, %v5241_v5  ;;  %v1816_v38 = vcombine.low %v1275_v8, %v1282_v21 }
  0x9b   : > { %2066 = vst [vmem:[#allocation2 + $0x148] sm:$0xff] %v2065_v34  ;;  %4634 = vmatmul.mubr.bf16.gmra.mrb[8].mxu1 %v2065_v34  ;;  %2069 = vst [vmem:[#allocation2 + $0x160] sm:$0xff] %v2068_v36  ;;  %v1824_v26 = vrot.slane %v1814_v30, %v5220_v48  ;;  %v1831_v9 = vrot.slane %v1815_v10, %v5220_v48  ;;  %v335_v19 = vrot.slane %v327_v23, %v5220_v48 }
  0x9c   : > { %v342_v59 = vrot.slane %v328_v35, %v5220_v48  ;;  %4637 = vmatprep.mubr.bf16.mxu1 %v2068_v36  ;;  %v1817_v62 = vcombine.low %v1289_v29, %v1296_v31  ;;  %v1838_v41 = vrot.slane %v1816_v38, %v5220_v48  ;;  %v1890_v44 = vor.u32 %v1888_v0, %v5658_v57 }
  0x9d   : > { %v1333_v45 = vsel %vm5194_vm3, 0, %v1332_v32  ;;  %v1846_v47 = vcombine.low %v1824_v26, %v1831_v9  ;;  %v343_v20 = vcombine.high %v335_v19, %v335_v19  ;;  %v482_v53 = vunpack.i.h.s16 %v335_v19 }
  0x9e   : > { %v344_v51 = vcombine.high %v342_v59, %v342_v59  ;;  %1334 = vst [vmem:[#allocation2 + $0xd8] sm:$0x1] %v1333_v45  ;;  %v1845_v23 = vrot.slane %v1817_v62, %v5220_v48  ;;  %v484_v11 = vunpack.i.h.s16 %v342_v59  ;;  %v3988_v55 = vpack.i.b16 %v335_v19, %v335_v19 }
  0x9f   : > { %v3989_v58 = vpack.i.b16 %v342_v59, %v342_v59  ;;  %v1854_v25 = vrot.slane %v1846_v47, %v5220_v48  ;;  %v486_v40 = vunpack.i.h.s16 %v343_v20  ;;  %v546_v7 = vpack.i.b16 %v482_v53, %v482_v53  ;;  %v1951_v53 = vld [vmem:[#allocation2 + $0xc0] sm:$0xff] }
  0xa0   : > { %v488_v60 = vunpack.i.h.s16 %v344_v51  ;;  %v1847_v52 = vcombine.low %v1838_v41, %v1845_v23  ;;  %v548_v0 = vpack.i.b16 %v484_v11, %v484_v11  ;;  %v3990_v57 = vpack.i.b16 %v343_v20, %v343_v20  ;;  %v1948_v41 = vld [vmem:[#allocation2 + $0xa8] sm:$0xff] }
  0xa1   : > { %v3991_v18 = vpack.i.b16 %v344_v51, %v344_v51  ;;  %v550_v14 = vpack.i.b16 %v486_v40, %v486_v40  ;;  %v660_v24 = vrot.slane %v3988_v55, %v5241_v5  ;;  %v664_v8 = vrot.slane %v546_v7, %v5241_v5 }
  0xa2   : > { %v552_v15 = vpack.i.b16 %v488_v60, %v488_v60  ;;  %v1861_v21 = vrot.slane %v1847_v52, %v5220_v48  ;;  %v668_v22 = vrot.slane %v3989_v58, %v5241_v5  ;;  %v672_v29 = vrot.slane %v548_v0, %v5241_v5  ;;  %v1338_v0 = vld [vmem:[#allocation2 + $0x108] sm:$0x1] }
  0xa3   : > { %v676_v30 = vrot.slane %v3990_v57, %v5241_v5  ;;  %v680_v10 = vrot.slane %v550_v14, %v5241_v5  ;;  %v684_v35 = vrot.slane %v3991_v18, %v5241_v5  ;;  %v962_v34 = vpack.i.b16 %v660_v24, %v660_v24  ;;  %v2070_v57 = vld [vmem:[#allocation2 + $0x178] sm:$0xff] }
  0xa4   : > { %v688_v32 = vrot.slane %v552_v15, %v5241_v5  ;;  %v5722_v36 = vcombine.low %v1854_v25, %v1861_v21  ;;  %v969_v31 = vpack.i.b16 %v664_v8, %v664_v8  ;;  %v976_v38 = vpack.i.b16 %v668_v22, %v668_v22  ;;  %v1335_v25 = vld [vmem:[#allocation2 + $0xf0] sm:$0x1]  ;;  %v1341_v8 = vld [vmem:[#allocation2 + $0x120] sm:$0x1] }
  0xa5   : > { %v983_v26 = vpack.i.b16 %v672_v29, %v672_v29  ;;  %v967_v9 = vrot.slane %v962_v34, %v5241_v5  ;;  %v990_v19 = vpack.i.b16 %v676_v30, %v676_v30  ;;  %v997_v59 = vpack.i.b16 %v680_v10, %v680_v10  ;;  %v1954_v30 = vld [vmem:[#allocation2 + $0xd8] sm:$0xff] }
  0xa6   : > { %v1004_v62 = vpack.i.b16 %v684_v35, %v684_v35  ;;  %v1913_v45 = vshrl.u32 %v5722_v36, 16  ;;  %v1916_v47 = vshll.u32 %v5722_v36, 16  ;;  %2000 = vst [vmem:[#allocation2 + $0x170] sm:$0xff] %v5722_v36  ;;  %2001 = vst [vmem:[#allocation2 + $0x188] sm:$0xff] %v5722_v36  ;;  %v974_v20 = vrot.slane %v969_v31, %v5241_v5  ;;  %v1347_v31 = vld [vmem:[#allocation2 + $0x150] sm:$0x1] }
  0xa7   : > { %v981_v51 = vrot.slane %v976_v38, %v5241_v5  ;;  %v988_v23 = vrot.slane %v983_v26, %v5241_v5  ;;  %v995_v11 = vrot.slane %v990_v19, %v5241_v5  ;;  %v1002_v55 = vrot.slane %v997_v59, %v5241_v5  ;;  %v1350_v38 = vld [vmem:[#allocation2 + $0x168] sm:$0x1] }
  0xa8   : > { %v1009_v58 = vrot.slane %v1004_v62, %v5241_v5  ;;  %v2016_v40 = vrot.slane %v1916_v47, 1  ;;  %v1011_v60 = vpack.i.b16 %v688_v32, %v688_v32  ;;  %v1569_v7 = vcombine.low %v967_v9, %v974_v20  ;;  %v2685_v32 = vld [vmem:[#allocation2 + $0x20] sm:$0xff] }
  0xa9   : > { %v5739_v52 = vsel %vm5335_vm11, %v1890_v44, %v1948_v41  ;;  %v1570_v18 = vcombine.low %v981_v51, %v988_v23  ;;  %v1571_v14 = vcombine.low %v995_v11, %v1002_v55  ;;  %v5744_v15 = vsel %vm5335_vm11, %v1890_v44, %v1951_v53  ;;  %v1344_v44 = vld [vmem:[#allocation2 + $0x138] sm:$0x1]  ;;  %v1368_v53 = vld [vmem:[#allocation2 + $0x70] sm:$0x80] }
  0xaa   : > { %1950 = vst [vmem:[#allocation2 + $0xa8] sm:$0xff] %v5739_v52  ;;  %v1894_v24 = vrot.slane %v1892_v27, 7  ;;  %v5750_v21 = vor.u32 %v2016_v40, %v1913_v45  ;;  %v1016_v22 = vrot.slane %v1011_v60, %v5241_v5  ;;  %v1579_v29 = vrot.slane %v1569_v7, %v5220_v48  ;;  %1953 = vst [vmem:[#allocation2 + $0xc0] sm:$0xff] %v5744_v15  ;;  %v1377_v7 = vld [vmem:[#allocation2 + $0xb8] sm:$0x80] }
  0xab   : > { %v1336_v10 = vsel %vm5194_vm3, 0, %v1335_v25  ;;  %v1586_v35 = vrot.slane %v1570_v18, %v5220_v48  ;;  %v1593_v27 = vrot.slane %v1571_v14, %v5220_v48  ;;  %v1339_v5 = vsel %vm5194_vm3, 0, %v1338_v0  ;;  %v1374_v25 = vld [vmem:[#allocation2 + $0xa0] sm:$0x80]  ;;  %v1353_v0 = vld [vmem:[#allocation2 + $0x180] sm:$0x1] }
  0xac   : > { %v1897_v34 = vor.u32 %v1895_v28, %v1894_v24  ;;  %1337 = vst [vmem:[#allocation2 + $0xf0] sm:$0x1] %v1336_v10  ;;  %v2071_v26 = vsel %vm5385_vm13, %v5750_v21, %v2070_v57  ;;  %v1572_v9 = vcombine.low %v1009_v58, %v1016_v22  ;;  %1340 = vst [vmem:[#allocation2 + $0x108] sm:$0x1] %v1339_v5  ;;  %v1901_v19 = vrot.slane %v1899_v39, 7 }
  0xad   : > { %v1342_v59 = vsel %vm5194_vm3, 0, %v1341_v8  ;;  %v1362_v28 = vld [vmem:[#allocation2 + $0x40] sm:$0x80]  ;;  %2072 = vst [vmem:[#allocation2 + $0x178] sm:$0xff] %v2071_v26  ;;  %4638 = vmatmul.mubr.bf16.gmra.mrb[12].mxu1 %v2071_v26  ;;  %v1601_v62 = vcombine.low %v1579_v29, %v1586_v35  ;;  %v1345_v20 = vsel %vm5194_vm3, 0, %v1344_v44  ;;  %v1908_v51 = vrot.slane %v1906_v6, 7 }
  0xae   : > { %v5772_v41 = vsel %vm5335_vm11, %v1897_v34, %v1954_v30  ;;  %1343 = vst [vmem:[#allocation2 + $0x120] sm:$0x1] %v1342_v59  ;;  %v1365_v39 = vld [vmem:[#allocation2 + $0x58] sm:$0x80]  ;;  %v1600_v23 = vrot.slane %v1572_v9, %v5220_v48  ;;  %2957 = vmatprep.mubr.bf16.mxu1 %v2685_v32  ;;  %1346 = vst [vmem:[#allocation2 + $0x138] sm:$0x1] %v1345_v20  ;;  %v1904_v40 = vor.u32 %v1902_v4, %v1901_v19 }
  0xaf   : > { %1956 = vst [vmem:[#allocation2 + $0xd8] sm:$0xff] %v5772_v41  ;;  %v1348_v11 = vsel %vm5194_vm3, 0, %v1347_v31  ;;  %v1351_v55 = vsel %vm5194_vm3, 0, %v1350_v38  ;;  %v1371_v58 = vld [vmem:[#allocation2 + $0x88] sm:$0x80]  ;;  %v1915_v6 = vrot.slane %v1913_v45, 7  ;;  %v1609_v18 = vrot.slane %v1601_v62, %v5220_v48 }
  0xb0   : > { %1349 = vst [vmem:[#allocation2 + $0x150] sm:$0x1] %v1348_v11  ;;  %1352 = vst [vmem:[#allocation2 + $0x168] sm:$0x1] %v1351_v55  ;;  %v1360_v60 = vsel %vm5211_vm5, 0, %v1359_v12  ;;  %v1602_v57 = vcombine.low %v1593_v27, %v1600_v23  ;;  %v1363_v14 = vsel %vm5211_vm5, 0, %v1362_v28  ;;  %v1911_v24 = vor.u32 %v1909_v43, %v1908_v51 }
  0xb1   : > { %1361 = vst [vmem:[#allocation2 + $0x28] sm:$0x80] %v1360_v60  ;;  %v1366_v4 = vsel %vm5211_vm5, 0, %v1365_v39  ;;  %1364 = vst [vmem:[#allocation2 + $0x40] sm:$0x80] %v1363_v14  ;;  %v2004_v45 = vrot.slane %v1874_v13, 1  ;;  %v1918_v32 = vor.u32 %v1916_v47, %v1915_v6 }
  0xb2   : > { %1367 = vst [vmem:[#allocation2 + $0x58] sm:$0x80] %v1366_v4  ;;  %v1369_v8 = vsel %vm5211_vm5, 0, %v1368_v53  ;;  %v1372_v22 = vsel %vm5211_vm5, 0, %v1371_v58  ;;  %v1616_v29 = vrot.slane %v1602_v57, %v5220_v48  ;;  %v2684_v30 = vld [vmem:[#allocation2 + $0x18] sm:$0xff]  ;;  %v1375_v43 = vsel %vm5211_vm5, 0, %v1374_v25 }
  0xb3   : > { %v1957_v10 = vld [vmem:[#allocation2 + $0xf0] sm:$0xff]  ;;  %1370 = vst [vmem:[#allocation2 + $0x70] sm:$0x80] %v1369_v8  ;;  %1373 = vst [vmem:[#allocation2 + $0x88] sm:$0x80] %v1372_v22  ;;  %v1378_v44 = vsel %vm5211_vm5, 0, %v1377_v7  ;;  %v2005_v9 = vor.u32 %v2004_v45, %v1871_v2 }
  0xb4   : > { %v1354_v13 = vsel %vm5194_vm3, 0, %v1353_v0  ;;  %v4996_v35 = vld [vmem:[%s6478_s2 + $0x148] sm:$0xff]   ;;  %v5815_v48 = vsel %vm5335_vm11, %v1897_v34, %v1957_v10  ;;  %1376 = vst [vmem:[#allocation2 + $0xa0] sm:$0x80] %v1375_v43  ;;  %1379 = vst [vmem:[#allocation2 + $0xb8] sm:$0x80] %v1378_v44  ;;  %v5819_v5 = vcombine.low %v1609_v18, %v1616_v29  ;;  %v2003_v34 = vor.u32 %v5434_v3, %v1864_v61 }
  0xb5   : > { %v1960_v27 = vld [vmem:[#allocation2 + $0x108] sm:$0xff]  ;;  %1355 = vst [vmem:[#allocation2 + $0x180] sm:$0x1] %v1354_v13  ;;  %v5821_v31 = vld [vmem:[#allocation2 + $0x38] sm:$0xff]  ;;  %1959 = vst [vmem:[#allocation2 + $0xf0] sm:$0xff] %v5815_v48  ;;  %2958 = vmatmul.mubr.bf16.vlgmr.msra.gmra.mrb[16].mxu1 %v2684_v30 }
  0xb6   : > { %v5826_v33 = vsel %vm5335_vm11, %v1904_v40, %v1960_v27  ;;  %v1963_v38 = vld [vmem:[#allocation2 + $0x120] sm:$0xff]  ;;  %v1966_v26 = vld [vmem:[#allocation2 + $0x138] sm:$0xff]  ;;  %2398 = vmatprep.mubr.bf16.mxu0 %v5819_v5  ;;  %v1878_v19 = vshrl.u32 %v5819_v5, 16  ;;  %v1881_v59 = vshll.u32 %v5819_v5, 16  ;;  %4642 = vmatpush3.bf16.msra.mxu1 %v5601_v46  ;;  %v4997_v2 = vld [vmem:[%s6478_s2 + $0x150] sm:$0xff]  }
  0xb7   : > { %1962 = vst [vmem:[#allocation2 + $0x108] sm:$0xff] %v5826_v33  ;;  %v5834_v47 = vsel %vm5335_vm11, %v1904_v40, %v1963_v38  ;;  %v5845_v54 = vsel %vm5335_vm11, %v1911_v24, %v1966_v26  ;;  %v1969_v61 = vld [vmem:[#allocation2 + $0x150] sm:$0xff]  ;;  %v1972_v3 = vld [vmem:[#allocation2 + $0x168] sm:$0xff]  ;;  %2965 = vmatprep.mubr.bf16.mxu1 %v5821_v31  ;;  %4643 = vmatprep.subr.bf16.mxu1 %v4996_v35  ;;  %v1942_v20 = vld [vmem:[#allocation2 + $0x78] sm:$0xff] }
  0xb8   : > { %1965 = vst [vmem:[#allocation2 + $0x120] sm:$0xff] %v5834_v47  ;;  %1968 = vst [vmem:[#allocation2 + $0x138] sm:$0xff] %v5845_v54  ;;  %v5854_v46 = vsel %vm5335_vm11, %v1911_v24, %v1969_v61  ;;  %v5858_v12 = vsel %vm5335_vm11, %v1918_v32, %v1972_v3  ;;  %v2028_v28 = vld [vmem:[#allocation2 + $0x28] sm:$0xff]  ;;  %v1880_v62 = vrot.slane %v1878_v19, 7  ;;  %v2031_v39 = vld [vmem:[#allocation2 + $0x40] sm:$0xff]  ;;  %v2006_v23 = vrot.slane %v1881_v59, 1 }
  0xb9   : > { %1971 = vst [vmem:[#allocation2 + $0x150] sm:$0xff] %v5854_v46  ;;  %1974 = vst [vmem:[#allocation2 + $0x168] sm:$0xff] %v5858_v12  ;;  %v5864_v51 = vsel %vm5385_vm13, %v2003_v34, %v2028_v28  ;;  %v2034_v53 = vld [vmem:[#allocation2 + $0x58] sm:$0xff]  ;;  %v1945_v11 = vld [vmem:[#allocation2 + $0x90] sm:$0xff]  ;;  %v5869_v55 = vsel %vm5385_vm13, %v2003_v34, %v2031_v39 }
  0xba   : > { %2030 = vst [vmem:[#allocation2 + $0x28] sm:$0xff] %v5864_v51  ;;  %v5873_v58 = vsel %vm5385_vm13, %v2005_v9, %v2034_v53  ;;  %v2037_v25 = vld [vmem:[#allocation2 + $0x70] sm:$0xff]  ;;  %v2040_v40 = vld [vmem:[#allocation2 + $0x88] sm:$0xff]  ;;  %v1883_v6 = vor.u32 %v1881_v59, %v1880_v62  ;;  %4644 = vmatpush3.bf16.msra.mxu1 %v4996_v35  ;;  %2033 = vst [vmem:[#allocation2 + $0x40] sm:$0xff] %v5869_v55  ;;  %v2007_v7 = vor.u32 %v2006_v23, %v1878_v19 }
  0xbb   : > { %2036 = vst [vmem:[#allocation2 + $0x58] sm:$0xff] %v5873_v58  ;;  %v5879_v60 = vsel %vm5385_vm13, %v2005_v9, %v2037_v25  ;;  %v2043_v0 = vld [vmem:[#allocation2 + $0xa0] sm:$0xff]  ;;  %v2046_v57 = vld [vmem:[#allocation2 + $0xb8] sm:$0xff]  ;;  %4645 = vmatprep.subr.bf16.mxu1 %v4997_v2  ;;  %v5922_v30 = vld [vmem:[#allocation2 + $0xb0] sm:$0xff] }
  0xbc   : > { %v1975_v18 = vld [vmem:[#allocation2 + $0x180] sm:$0xff]  ;;  %2039 = vst [vmem:[#allocation2 + $0x70] sm:$0xff] %v5879_v60  ;;  %v5885_v14 = vsel %vm5385_vm13, %v5403_v17, %v2046_v57  ;;  %v5893_v24 = vsel %vm5335_vm11, %v1883_v6, %v1942_v20  ;;  %v5897_v45 = vsel %vm5335_vm11, %v1883_v6, %v1945_v11  ;;  %v4998_v8 = vld [vmem:[%s6478_s2 + $0x158] sm:$0xff]   ;;  %v5904_v17 = vsel %vm5385_vm13, %v2007_v7, %v2040_v40  ;;  %v5000_v10 = vld [vmem:[%s6478_s2 + $0x168] sm:$0xff]  }
  0xbd   : > { %v5889_v4 = vsel %vm5335_vm11, %v1918_v32, %v1975_v18  ;;  %v5908_v22 = vsel %vm5385_vm13, %v2007_v7, %v2043_v0  ;;  %2048 = vst [vmem:[#allocation2 + $0xb8] sm:$0xff] %v5885_v14  ;;  %1944 = vst [vmem:[#allocation2 + $0x78] sm:$0xff] %v5893_v24  ;;  %2399 = vmatmul.mubr.bf16.gmra.mrb[20].mxu0 %v5893_v24  ;;  %2966 = vmatmul.mubr.bf16.gmra.mrb[20].mxu1 %v5028_v63  ;;  %v4999_v29 = vld [vmem:[%s6478_s2 + $0x160] sm:$0xff]   ;;  %v5005_v43 = vld [vmem:[%s6478_s2 + $0x170] sm:$0xff]  }
  0xbe   : > { %1977 = vst [vmem:[#allocation2 + $0x180] sm:$0xff] %v5889_v4  ;;  %1947 = vst [vmem:[#allocation2 + $0x90] sm:$0xff] %v5897_v45  ;;  %2406 = vmatprep.mubr.bf16.mxu0 %v5819_v5  ;;  %2973 = vmatprep.mubr.bf16.mxu1 %v5608_v56  ;;  %v5934_v44 = vld [vmem:[#allocation2 + $0xc8] sm:$0xff]  ;;  %v5014_v13 = vld [vmem:[%s6478_s2 + $0x178] sm:$0xff]  }
  0xbf   : > { %2042 = vst [vmem:[#allocation2 + $0x88] sm:$0xff] %v5904_v17  ;;  %2045 = vst [vmem:[#allocation2 + $0xa0] sm:$0xff] %v5908_v22  ;;  %4646 = vmatpush3.bf16.msra.mxu1 %v4997_v2  ;;  %v1404_v35 = vld [vmem:[#allocation2 + $0x190] sm:$0x80]  ;;  %v5991_v19 = vld [vmem:[#allocation2 + $0x128] sm:$0xff] }
  0xc0   : > { %4647 = vmatprep.subr.bf16.mxu1 %v4998_v8  ;;  %v1405_v27 = vsel %vm5211_vm5, 0, %v1404_v35  ;;  %v5999_v59 = vld [vmem:[#allocation2 + $0x8] sm:$0xff]  ;;  %v5002_v61 = vld [vmem:[%s6478_s2 + $0x180] sm:$0xff]   ;;  %v5006_v28 = vld [vmem:[%s6478_s2 + $0x1d0] sm:$0xff]  }
  0xc1   : > { %1406 = vst [vmem:[#allocation2 + $0x190] sm:$0x80] %v1405_v27  ;;  %v5003_v3 = vld [vmem:[%s6478_s2 + $0x1c8] sm:$0xff]   ;;  %v5007_v62 = vld [vmem:[%s6478_s2 + $0x190] sm:$0xff]   ;;  %v5008_v20 = vld [vmem:[%s6478_s2 + $0x1d8] sm:$0xff]  }
  0xc2   : > { %v5004_v2 = vld [vmem:[%s6478_s2 + $0x188] sm:$0xff]   ;;  %v5010_v23 = vld [vmem:[%s6478_s2 + $0x1e0] sm:$0xff]   ;;  %v5017_v27 = vld [vmem:[%s6478_s2 + $0x1f8] sm:$0xff]  }
  0xc3   : > { %4648 = vmatpush3.bf16.msra.mxu1 %v4998_v8  ;;  %v5011_v7 = vld [vmem:[%s6478_s2 + $0x1a0] sm:$0xff]   ;;  %v5012_v0 = vld [vmem:[%s6478_s2 + $0x1e8] sm:$0xff]   ;;  %v5015_v8 = vld [vmem:[%s6478_s2 + $0x1f0] sm:$0xff]  }
  0xc4   : > { %4649 = vmatprep.subr.bf16.mxu1 %v4999_v29  ;;  %v5013_v57 = vld [vmem:[%s6478_s2 + $0x1a8] sm:$0xff]  }
  0xc5   : > { %2407 = vmatmul.mubr.bf16.gmra.mrb[24].mxu0 %v5897_v45  ;;  %2974 = vmatmul.mubr.bf16.gmra.mrb[24].mxu1 %v5644_v49  ;;  %v5948_v49 = vld [vmem:[#allocation2 + $0xe0] sm:$0xff] }
  0xc6   : > { %2414 = vmatprep.mubr.bf16.mxu0 %v5922_v30  ;;  %2981 = vmatprep.mubr.bf16.mxu1 %v5608_v56  ;;  %v5946_v56 = vld [vmem:[%s6478_s2 + $0x200] sm:$0xff]  }
  0xc7   : > { %4650 = vmatpush3.bf16.msra.mxu1 %v4999_v29 }
  0xc8   : > { %4651 = vmatprep.subr.bf16.mxu1 %v5000_v10  ;;  %v2073_v32 = vld [vmem:[#allocation2 + $0x190] sm:$0xff] }
  0xc9   : > { %v5976_v38 = vsel %vm5385_vm13, %v5750_v21, %v2073_v32  ;;  %v3283_v32 = vld [vmem:[#allocation2 + $0x30] sm:$0xff] }
  0xca   : > { %2075 = vst [vmem:[#allocation2 + $0x190] sm:$0xff] %v5976_v38 }
  0xcb   : > { %4652 = vmatpush3.bf16.msra.mxu1 %v5000_v10 }
  0xcc   : > { %4653 = vmatprep.subr.bf16.mxu1 %v5005_v43 }
  0xcd   : > { %2415 = vmatmul.mubr.bf16.gmra.mrb[28].mxu0 %v5739_v52  ;;  %2982 = vmatmul.mubr.bf16.gmra.mrb[28].mxu1 %v5648_v50  ;;  %v5955_v50 = vld [vmem:[#allocation2 + $0xf8] sm:$0xff] }
  0xce   : > { %2422 = vmatprep.mubr.bf16.mxu0 %v5934_v44  ;;  %2989 = vmatprep.mubr.bf16.mxu1 %v5819_v5 }
  0xcf   : > { %4654 = vmatpush3.bf16.msra.mxu1 %v5005_v43 }
  0xd0   : > { %4655 = vmatprep.subr.bf16.mxu1 %v5014_v13 }
  0xd3   : > { %4656 = vmatpush3.bf16.msra.mxu1 %v5014_v13  ;;  %v5016_v13 = vld [vmem:[%s6478_s2 + $0x1b0] sm:$0xff]  }
  0xd4   : > { %4689 = vmatprep.subr.bf16.mxu1 %v5946_v56 }
  0xd5   : > { %2423 = vmatmul.mubr.bf16.gmra.mrb[32].mxu0 %v5744_v15  ;;  %2990 = vmatmul.mubr.bf16.gmra.mrb[32].mxu1 %v5893_v24 }
  0xd6   : > { %2430 = vmatprep.mubr.bf16.mxu0 %v5948_v49  ;;  %2997 = vmatprep.mubr.bf16.mxu1 %v5819_v5 }
  0xdd   : > { %2431 = vmatmul.mubr.bf16.gmra.mrb[36].mxu0 %v5772_v41  ;;  %2998 = vmatmul.mubr.bf16.gmra.mrb[36].mxu1 %v5897_v45 }
  0xde   : > { %2438 = vmatprep.mubr.bf16.mxu0 %v5955_v50  ;;  %3005 = vmatprep.mubr.bf16.mxu1 %v5922_v30 }
  0xe5   : > { %2439 = vmatmul.mubr.bf16.gmra.mrb[40].mxu0 %v5815_v48  ;;  %3006 = vmatmul.mubr.bf16.gmra.mrb[40].mxu1 %v5739_v52 }
  0xe6   : > { %2446 = vmatprep.mubr.bf16.mxu0 %v5540_v16  ;;  %3013 = vmatprep.mubr.bf16.mxu1 %v5934_v44 }
  0xed   : > { %2447 = vmatmul.mubr.bf16.gmra.mrb[44].mxu0 %v5826_v33  ;;  %3014 = vmatmul.mubr.bf16.gmra.mrb[44].mxu1 %v5744_v15 }
  0xee   : > { %2454 = vmatprep.mubr.bf16.mxu0 %v5540_v16  ;;  %3021 = vmatprep.mubr.bf16.mxu1 %v5948_v49  ;;  %v5981_v16 = vld [vmem:[#allocation2 + $0x110] sm:$0xff] }
  0xf5   : > { %2455 = vmatmul.mubr.bf16.gmra.mrb[48].mxu0 %v5834_v47  ;;  %3022 = vmatmul.mubr.bf16.gmra.mrb[48].mxu1 %v5772_v41 }
  0xf6   : > { %2462 = vmatprep.mubr.bf16.mxu0 %v5668_v37  ;;  %3029 = vmatprep.mubr.bf16.mxu1 %v5955_v50 }
  0xfd   : > { %2463 = vmatmul.mubr.bf16.gmra.mrb[52].mxu0 %v5845_v54  ;;  %3030 = vmatmul.mubr.bf16.gmra.mrb[52].mxu1 %v5815_v48 }
  0xfe   : > { %2470 = vmatprep.mubr.bf16.mxu0 %v5668_v37  ;;  %3037 = vmatprep.mubr.bf16.mxu1 %v5981_v16 }
 0x101   : > { %v4201_v42 = vpop.f32.mrb[0].mxu0 }
 0x102   : > { %v4202_v34 = vpop.f32.mrb[1].mxu0 }
 0x103   : > { %v5983_v26 = vadd.f32 %v4202_v34, %v4201_v42  ;;  %v4204_v9 = vpop.f32.mrb[2].mxu0  ;;  %v3287_v42 = vld [vmem:[#allocation2 + $0x50] sm:$0xff]  ;;  %v5020_v34 = vld [vmem:[%s6478_s2 + $0x208] sm:$0xff]  }
 0x104   : > { %v4205_v1 = vpop.f32.mrb[3].mxu0 }
 0x105   : > { %v5989_v21 = vadd.f32 %v4205_v1, %v4204_v9  ;;  %2471 = vmatmul.mubr.bf16.gmra.mrb[56].mxu0 %v5854_v46  ;;  %3038 = vmatmul.mubr.bf16.gmra.mrb[56].mxu1 %v5826_v33  ;;  %v3290_v9 = vld [vmem:[#allocation2 + $0x68] sm:$0xff]  ;;  %v5022_v1 = vld [vmem:[%s6478_s2 + $0x218] sm:$0xff]  }
 0x106   : > { %2478 = vmatprep.mubr.bf16.mxu0 %v5722_v36  ;;  %3045 = vmatprep.mubr.bf16.mxu1 %v5991_v19 }
 0x10d   : > { %2479 = vmatmul.mubr.bf16.gmra.mrb[60].mxu0 %v5858_v12  ;;  %3046 = vmatmul.mubr.bf16.gmra.mrb[60].mxu1 %v5834_v47 }
 0x10e   : > { %4609 = vmatprep.mubr.bf16.mxu0 %v5999_v59  ;;  %3053 = vmatprep.mubr.bf16.mxu1 %v5668_v37 }
 0x115   : > { %4610 = vmatmul.mubr.bf16.vlgmr.msra.gmra.mrb[64].mxu0 %v5864_v51  ;;  %3054 = vmatmul.mubr.bf16.gmra.mrb[64].mxu1 %v5845_v54 }
 0x116   : > { %4458 = vmatpush3.bf16.msra.mxu0 %v5002_v61  ;;  %4613 = vmatprep.mubr.bf16.mxu0 %v5869_v55  ;;  %v3289_v61 = vld [vmem:[#allocation2 + $0x60] sm:$0xff] }
 0x117   : > { %4459 = vmatprep.subr.bf16.mxu0 %v5003_v3  ;;  %3061 = vmatprep.mubr.bf16.mxu1 %v5668_v37  ;;  %v5009_v37 = vld [vmem:[%s6478_s2 + $0x198] sm:$0xff]   ;;  %v5024_v3 = vld [vmem:[%s6478_s2 + $0x228] sm:$0xff]  }
 0x11a   : > { %4460 = vmatpush3.bf16.msra.mxu0 %v5004_v2  ;;  %v5025_v2 = vld [vmem:[%s6478_s2 + $0x230] sm:$0xff]  }
 0x11b   : > { %4461 = vmatprep.subr.bf16.mxu0 %v5006_v28  ;;  %v2707_v28 = vld [vmem:[#allocation2 + $0xd0] sm:$0xff] }
 0x11d   : > { %4614 = vmatmul.mubr.bf16.gmra.mrb[68].mxu0 %v5873_v58  ;;  %3062 = vmatmul.mubr.bf16.gmra.mrb[68].mxu1 %v5854_v46 }
 0x11e   : > { %4462 = vmatpush3.bf16.msra.mxu0 %v5007_v62  ;;  %4617 = vmatprep.mubr.bf16.mxu0 %v5879_v60  ;;  %v6098_v62 = vld [vmem:[#allocation2 + $0xe8] sm:$0xff] }
 0x11f   : > { %4463 = vmatprep.subr.bf16.mxu0 %v5008_v20  ;;  %3069 = vmatprep.mubr.bf16.mxu1 %v5722_v36  ;;  %v5026_v20 = vld [vmem:[%s6478_s2 + $0x238] sm:$0xff]  }
 0x121   : > { %v4207_v39 = vpop.f32.mrb[4].mxu0 }
 0x122   : > { %v4208_v53 = vpop.f32.mrb[5].mxu0  ;;  %4464 = vmatpush3.bf16.msra.mxu0 %v5009_v37  ;;  %v6106_v37 = vld [vmem:[#allocation2 + $0x118] sm:$0xff] }
 0x123   : > { %v6035_v11 = vadd.f32 %v4208_v53, %v4207_v39  ;;  %v4210_v25 = vpop.f32.mrb[6].mxu0  ;;  %4465 = vmatprep.subr.bf16.mxu0 %v5010_v23  ;;  %v2713_v39 = vld [vmem:[#allocation2 + $0x100] sm:$0xff]  ;;  %v6111_v53 = vld [vmem:[#allocation2 + $0x130] sm:$0xff] }
 0x124   : > { %v4211_v40 = vpop.f32.mrb[7].mxu0 }
 0x125   : > { %v6037_v6 = vadd.f32 %v4211_v40, %v4210_v25  ;;  %4618 = vmatmul.mubr.bf16.gmra.mrb[72].mxu0 %v5904_v17  ;;  %3070 = vmatmul.mubr.bf16.gmra.mrb[72].mxu1 %v5858_v12 }
 0x126   : > { %4466 = vmatpush3.bf16.msra.mxu0 %v5011_v7  ;;  %4621 = vmatprep.mubr.bf16.mxu0 %v5908_v22  ;;  %v6123_v7 = vld [vmem:[#allocation2 + $0x178] sm:$0xff] }
 0x127   : > { %4467 = vmatprep.subr.bf16.mxu0 %v5012_v0  ;;  %3077 = vmatprep.mubr.bf16.mxu1 %v5722_v36  ;;  %v5018_v36 = vld [vmem:[%s6478_s2 + $0x1b8] sm:$0xff]  }
 0x129   : > { %v4213_v18 = vpop.f32.mrb[8].mxu0 }
 0x12a   : > { %v4214_v63 = vpop.f32.mrb[9].mxu0  ;;  %4468 = vmatpush3.bf16.msra.mxu0 %v5013_v57 }
 0x12b   : > { %v6055_v29 = vadd.f32 %v4214_v63, %v4213_v18  ;;  %v4216_v10 = vpop.f32.mrb[10].mxu0  ;;  %4469 = vmatprep.subr.bf16.mxu0 %v5015_v8 }
 0x12c   : > { %v4217_v43 = vpop.f32.mrb[11].mxu0 }
 0x12d   : > { %v6060_v35 = vadd.f32 %v4217_v43, %v4216_v10  ;;  %4622 = vmatmul.mubr.bf16.gmra.mrb[76].mxu0 %v5885_v14  ;;  %3078 = vmatmul.mubr.bf16.gmra.mrb[76].mxu1 %v5889_v4 }
 0x12e   : > { %4470 = vmatpush3.bf16.msra.mxu0 %v5016_v13  ;;  %3556 = vmatprep.mubr.bf16.mxu0 %v5821_v31  ;;  %v5021_v31 = vld [vmem:[%s6478_s2 + $0x210] sm:$0xff]  }
 0x12f   : > { %4471 = vmatprep.subr.bf16.mxu0 %v5017_v27  ;;  %4657 = vmatprep.mubr.bf16.mxu1 %v5864_v51  ;;  %v3286_v51 = vld [vmem:[#allocation2 + $0x48] sm:$0xff]  ;;  %v3323_v27 = vld [vmem:[#allocation2 + $0x170] sm:$0xff] }
 0x132   : > { %4472 = vmatpush3.bf16.msra.mxu0 %v5018_v36 }
 0x135   : > { %3557 = vmatmul.mubr.bf16.vlgmr.msra.gmra.mrb[80].mxu0 %v3283_v32  ;;  %4658 = vmatmul.mubr.bf16.vlgmr.msra.gmra.mrb[80].mxu1 %v5869_v55 }
 0x136   : > { %3564 = vmatprep.mubr.bf16.mxu0 %v3287_v42  ;;  %4690 = vmatpush3.bf16.msra.mxu1 %v5946_v56  ;;  %v5023_v56 = vld [vmem:[%s6478_s2 + $0x220] sm:$0xff]  }
 0x137   : > { %4661 = vmatprep.mubr.bf16.mxu1 %v5873_v58  ;;  %4691 = vmatprep.subr.bf16.mxu1 %v5020_v34 }
 0x13a   : > { %4692 = vmatpush3.bf16.msra.mxu1 %v5020_v34 }
 0x13b   : > { %4693 = vmatprep.subr.bf16.mxu1 %v5021_v31 }
 0x13d   : > { %3565 = vmatmul.mubr.bf16.gmra.mrb[84].mxu0 %v3286_v51  ;;  %4662 = vmatmul.mubr.bf16.gmra.mrb[84].mxu1 %v5879_v60 }
 0x13e   : > { %3572 = vmatprep.mubr.bf16.mxu0 %v3290_v9  ;;  %4665 = vmatprep.mubr.bf16.mxu1 %v5904_v17 }
 0x13f   : > { %4694 = vmatpush3.bf16.msra.mxu1 %v5021_v31 }
 0x140   : > { %4695 = vmatprep.subr.bf16.mxu1 %v5022_v1 }
 0x143   : > { %4696 = vmatpush3.bf16.msra.mxu1 %v5022_v1 }
 0x144   : > { %4697 = vmatprep.subr.bf16.mxu1 %v5023_v56 }
 0x145   : > { %3573 = vmatmul.mubr.bf16.gmra.mrb[88].mxu0 %v3289_v61  ;;  %4666 = vmatmul.mubr.bf16.gmra.mrb[88].mxu1 %v5908_v22 }
 0x146   : > { %3580 = vmatprep.mubr.bf16.mxu0 %v5819_v5  ;;  %4669 = vmatprep.mubr.bf16.mxu1 %v5885_v14 }
 0x147   : > { %4698 = vmatpush3.bf16.msra.mxu1 %v5023_v56 }
 0x148   : > { %4699 = vmatprep.subr.bf16.mxu1 %v5024_v3 }
 0x14b   : > { %4700 = vmatpush3.bf16.msra.mxu1 %v5024_v3 }
 0x14c   : > { %4701 = vmatprep.subr.bf16.mxu1 %v5025_v2 }
 0x14d   : > { %3581 = vmatmul.mubr.bf16.gmra.mrb[92].mxu0 %v5893_v24  ;;  %4670 = vmatmul.mubr.bf16.gmra.mrb[92].mxu1 %v2707_v28  ;;  %v6113_v24 = vld [vmem:[#allocation2 + $0x148] sm:$0xff] }
 0x14e   : > { %3588 = vmatprep.mubr.bf16.mxu0 %v5819_v5  ;;  %4673 = vmatprep.mubr.bf16.mxu1 %v6098_v62 }
 0x14f   : > { %4702 = vmatpush3.bf16.msra.mxu1 %v5025_v2  ;;  %v3326_v2 = vld [vmem:[#allocation2 + $0x188] sm:$0xff] }
 0x150   : > { %4703 = vmatprep.subr.bf16.mxu1 %v5026_v20 }
 0x153   : > { %4704 = vmatpush3.bf16.msra.mxu1 %v5026_v20 }
 0x155   : > { %3589 = vmatmul.mubr.bf16.gmra.mrb[96].mxu0 %v5897_v45  ;;  %4674 = vmatmul.mubr.bf16.gmra.mrb[0].mxu1 %v2713_v39 }
 0x156   : > { %3596 = vmatprep.mubr.bf16.mxu0 %v5922_v30  ;;  %4677 = vmatprep.mubr.bf16.mxu1 %v6106_v37  ;;  %v6121_v30 = vld [vmem:[#allocation2 + $0x160] sm:$0xff] }
 0x15d   : > { %3597 = vmatmul.mubr.bf16.gmra.mrb[100].mxu0 %v5739_v52  ;;  %4678 = vmatmul.mubr.bf16.gmra.mrb[4].mxu1 %v6111_v53 }
 0x15e   : > { %3604 = vmatprep.mubr.bf16.mxu0 %v5934_v44  ;;  %4681 = vmatprep.mubr.bf16.mxu1 %v6113_v24  ;;  %v4219_v5 = vpop.f32.mrb[12].mxu0 }
 0x15f   : > { %v4220_v23 = vpop.f32.mrb[13].mxu0 }
 0x160   : > { %v6119_v45 = vadd.f32 %v4220_v23, %v4219_v5  ;;  %v4222_v25 = vpop.f32.mrb[14].mxu0 }
 0x161   : > { %v4223_v40 = vpop.f32.mrb[15].mxu0 }
 0x162   : > { %v6125_v0 = vadd.f32 %v4223_v40, %v4222_v25 }
 0x165   : > { %3605 = vmatmul.mubr.bf16.gmra.mrb[104].mxu0 %v5744_v15  ;;  %4682 = vmatmul.mubr.bf16.gmra.mrb[8].mxu1 %v6121_v30  ;;  %v3317_v15 = vld [vmem:[#allocation2 + $0x140] sm:$0xff] }
 0x166   : > { %3612 = vmatprep.mubr.bf16.mxu0 %v5948_v49  ;;  %4685 = vmatprep.mubr.bf16.mxu1 %v6123_v7  ;;  %v4225_v52 = vpop.f32.mrb[16].mxu0 }
 0x167   : > { %v4226_v44 = vpop.f32.mrb[17].mxu0 }
 0x168   : > { %v6131_v57 = vadd.f32 %v4226_v44, %v4225_v52  ;;  %v4228_v18 = vpop.f32.mrb[18].mxu0 }
 0x169   : > { %v4229_v8 = vpop.f32.mrb[19].mxu0 }
 0x16a   : > { %v6133_v63 = vadd.f32 %v4229_v8, %v4228_v18 }
 0x16d   : > { %3613 = vmatmul.mubr.bf16.gmra.mrb[108].mxu0 %v5772_v41  ;;  %4686 = vmatmul.mubr.bf16.gmra.mrb[12].mxu1 %v5976_v38 }
 0x16e   : > { %3620 = vmatprep.mubr.bf16.mxu0 %v5955_v50  ;;  %4705 = vmatprep.mubr.bf16.mxu1 %v5869_v55 }
 0x175   : > { %3621 = vmatmul.mubr.bf16.gmra.mrb[112].mxu0 %v5815_v48  ;;  %4706 = vmatmul.mubr.bf16.vlgmr.msra.gmra.mrb[80].mxu1 %v5873_v58 }
 0x176   : > { %3628 = vmatprep.mubr.bf16.mxu0 %v5981_v16  ;;  %4709 = vmatprep.mubr.bf16.mxu1 %v5879_v60 }
 0x17d   : > { %3629 = vmatmul.mubr.bf16.gmra.mrb[116].mxu0 %v5826_v33  ;;  %4710 = vmatmul.mubr.bf16.gmra.mrb[84].mxu1 %v5904_v17  ;;  %v3320_v33 = vld [vmem:[#allocation2 + $0x158] sm:$0xff] }
 0x17e   : > { %3636 = vmatprep.mubr.bf16.mxu0 %v5991_v19  ;;  %4713 = vmatprep.mubr.bf16.mxu1 %v5908_v22 }
 0x185   : > { %3637 = vmatmul.mubr.bf16.gmra.mrb[120].mxu0 %v5834_v47  ;;  %4714 = vmatmul.mubr.bf16.gmra.mrb[88].mxu1 %v5885_v14 }
 0x186   : > { %3644 = vmatprep.mubr.bf16.mxu0 %v3317_v15  ;;  %4717 = vmatprep.mubr.bf16.mxu1 %v2707_v28 }
 0x188   : > { %v4337_v41 = vpop.f32.mrb[16].mxu1 }
 0x189   : > { %v4338_v48 = vpop.f32.mrb[17].mxu1 }
 0x18a   : > { %v6149_v55 = vadd.f32 %v4338_v48, %v4337_v41  ;;  %v4340_v58 = vpop.f32.mrb[18].mxu1 }
 0x18b   : > { %v4341_v60 = vpop.f32.mrb[19].mxu1 }
 0x18c   : > { %v6151_v49 = vadd.f32 %v4341_v60, %v4340_v58 }
 0x18d   : > { %3645 = vmatmul.mubr.bf16.gmra.mrb[124].mxu0 %v5845_v54  ;;  %4718 = vmatmul.mubr.bf16.gmra.mrb[92].mxu1 %v6098_v62 }
 0x18e   : > { %3652 = vmatprep.mubr.bf16.mxu0 %v3320_v33  ;;  %4721 = vmatprep.mubr.bf16.mxu1 %v2713_v39 }
 0x190   : > { %v4231_v47 = vpop.f32.mrb[20].mxu0  ;;  %v4343_v17 = vpop.f32.mrb[20].mxu1 }
 0x191   : > { %v4232_v14 = vpop.f32.mrb[21].mxu0  ;;  %v4344_v22 = vpop.f32.mrb[21].mxu1 }
 0x192   : > { %v6155_v50 = vadd.f32 %v4232_v14, %v4231_v47  ;;  %v4234_v16 = vpop.f32.mrb[22].mxu0  ;;  %v6157_v19 = vadd.f32 %v4344_v22, %v4343_v17  ;;  %v4346_v10 = vpop.f32.mrb[22].mxu1 }
 0x193   : > { %v4235_v43 = vpop.f32.mrb[23].mxu0  ;;  %v4347_v13 = vpop.f32.mrb[23].mxu1 }
 0x194   : > { %v6159_v36 = vadd.f32 %v4235_v43, %v4234_v16  ;;  %v6161_v54 = vadd.f32 %v4347_v13, %v4346_v10 }
 0x195   : > { %3653 = vmatmul.mubr.bf16.gmra.mrb[128].mxu0 %v5854_v46  ;;  %4722 = vmatmul.mubr.bf16.gmra.mrb[0].mxu1 %v6106_v37 }
 0x196   : > { %3660 = vmatprep.mubr.bf16.mxu0 %v3323_v27  ;;  %4725 = vmatprep.mubr.bf16.mxu1 %v6111_v53 }
 0x198   : > { %v4237_v32 = vpop.f32.mrb[24].mxu0  ;;  %v4349_v42 = vpop.f32.mrb[24].mxu1 }
 0x199   : > { %v4238_v34 = vpop.f32.mrb[25].mxu0  ;;  %v4350_v31 = vpop.f32.mrb[25].mxu1 }
 0x19a   : > { %v6166_v51 = vadd.f32 %v4238_v34, %v4237_v32  ;;  %v4240_v9 = vpop.f32.mrb[26].mxu0  ;;  %v6168_v1 = vadd.f32 %v4350_v31, %v4349_v42  ;;  %v4352_v56 = vpop.f32.mrb[26].mxu1 }
 0x19b   : > { %v4241_v61 = vpop.f32.mrb[27].mxu0  ;;  %v4353_v3 = vpop.f32.mrb[27].mxu1 }
 0x19c   : > { %v6170_v28 = vadd.f32 %v4241_v61, %v4240_v9  ;;  %v6172_v46 = vadd.f32 %v4353_v3, %v4352_v56 }
 0x19d   : > { %3661 = vmatmul.mubr.bf16.gmra.mrb[132].mxu0 %v5858_v12  ;;  %4726 = vmatmul.mubr.bf16.gmra.mrb[4].mxu1 %v6113_v24 }
 0x19e   : > { %3668 = vmatprep.mubr.bf16.mxu0 %v3326_v2  ;;  %4729 = vmatprep.mubr.bf16.mxu1 %v6121_v30 }
 0x1a0   : > { %v4243_v62 = vpop.f32.mrb[28].mxu0  ;;  %v4355_v20 = vpop.f32.mrb[28].mxu1 }
 0x1a1   : > { %v4244_v39 = vpop.f32.mrb[29].mxu0  ;;  %v4356_v37 = vpop.f32.mrb[29].mxu1 }
 0x1a2   : > { %v6177_v53 = vadd.f32 %v4244_v39, %v4243_v62  ;;  %v4246_v5 = vpop.f32.mrb[30].mxu0  ;;  %v6179_v23 = vadd.f32 %v4356_v37, %v4355_v20  ;;  %v4358_v25 = vpop.f32.mrb[30].mxu1 }
 0x1a3   : > { %v4247_v40 = vpop.f32.mrb[31].mxu0  ;;  %v4359_v52 = vpop.f32.mrb[31].mxu1 }
 0x1a4   : > { %v6181_v44 = vadd.f32 %v4247_v40, %v4246_v5  ;;  %v6183_v12 = vadd.f32 %v4359_v52, %v4358_v25 }
 0x1a5   : > { %3669 = vmatmul.mubr.bf16.gmra.mrb[136].mxu0 %v5889_v4  ;;  %4730 = vmatmul.mubr.bf16.gmra.mrb[8].mxu1 %v6123_v7 }
 0x1a6   : > { %3676 = vmatprep.mubr.bf16.mxu0 %v5999_v59  ;;  %4733 = vmatprep.mubr.bf16.mxu1 %v5976_v38 }
 0x1a8   : > { %v4249_v24 = vpop.f32.mrb[32].mxu0  ;;  %v4361_v30 = vpop.f32.mrb[32].mxu1 }
 0x1a9   : > { %v4250_v18 = vpop.f32.mrb[33].mxu0  ;;  %v4362_v8 = vpop.f32.mrb[33].mxu1 }
 0x1aa   : > { %v4251_v15 = vadd.f32 %v4250_v18, %v4249_v24  ;;  %v4252_v41 = vpop.f32.mrb[34].mxu0  ;;  %v6189_v48 = vadd.f32 %v4362_v8, %v4361_v30  ;;  %v4364_v58 = vpop.f32.mrb[34].mxu1 }
 0x1ab   : > { %v4253_v60 = vpop.f32.mrb[35].mxu0  ;;  %v4365_v33 = vpop.f32.mrb[35].mxu1 }
 0x1ac   : > { %v4254_v47 = vadd.f32 %v4253_v60, %v4252_v41  ;;  %v6191_v17 = vadd.f32 %v4365_v33, %v4364_v58 }
 0x1ad   : > { %3677 = vmatmul.mubr.bf16.gmra.mrb[140].mxu0 %v5999_v59  ;;  %4734 = vmatmul.mubr.bf16.gmra.mrb[12].mxu1 %v5999_v59 }
 0x1b0   : > { %v4255_v4 = vpop.f32.mrb[36].mxu0  ;;  %v4367_v38 = vpop.f32.mrb[36].mxu1 }
 0x1b1   : > { %v4256_v7 = vpop.f32.mrb[37].mxu0  ;;  %v4368_v14 = vpop.f32.mrb[37].mxu1 }
 0x1b2   : > { %v4257_v22 = vadd.f32 %v4256_v7, %v4255_v4  ;;  %v4258_v16 = vpop.f32.mrb[38].mxu0  ;;  %v6195_v10 = vadd.f32 %v4368_v14, %v4367_v38  ;;  %v4370_v43 = vpop.f32.mrb[38].mxu1  ;;  %v6210_v7 = vld [vmem:[%s6479_s3] ss:$0 sm:$0xff] }
 0x1b3   : > { %v4259_v13 = vpop.f32.mrb[39].mxu0  ;;  %v4371_v27 = vpop.f32.mrb[39].mxu1 }
 0x1b4   : > { %v4260_v32 = vadd.f32 %v4259_v13, %v4258_v16  ;;  %v6197_v42 = vadd.f32 %v4371_v27, %v4370_v43  ;;  %v4837_v43 = vadd.f32 %v4251_v15, %v6210_v7 }
 0x1b8   : > { %v4261_v34 = vpop.f32.mrb[40].mxu0  ;;  %v4373_v31 = vpop.f32.mrb[40].mxu1 }
 0x1b9   : > { %v4262_v9 = vpop.f32.mrb[41].mxu0  ;;  %v4374_v56 = vpop.f32.mrb[41].mxu1 }
 0x1ba   : > { %v4263_v61 = vadd.f32 %v4262_v9, %v4261_v34  ;;  %v4264_v59 = vpop.f32.mrb[42].mxu0  ;;  %v6199_v3 = vadd.f32 %v4374_v56, %v4373_v31  ;;  %v4376_v2 = vpop.f32.mrb[42].mxu1 }
 0x1bb   : > { %v4265_v62 = vpop.f32.mrb[43].mxu0  ;;  %v4377_v20 = vpop.f32.mrb[43].mxu1 }
 0x1bc   : > { %v4266_v39 = vadd.f32 %v4265_v62, %v4264_v59  ;;  %v6201_v37 = vadd.f32 %v4377_v20, %v4376_v2  ;;  %v4845_v59 = vadd.f32 %v4254_v47, %v6210_v7 }
 0x1c0   : > { %v4267_v5 = vpop.f32.mrb[44].mxu0  ;;  %v4379_v25 = vpop.f32.mrb[44].mxu1 }
 0x1c1   : > { %v4268_v40 = vpop.f32.mrb[45].mxu0  ;;  %v4380_v52 = vpop.f32.mrb[45].mxu1 }
 0x1c2   : > { %v4269_v24 = vadd.f32 %v4268_v40, %v4267_v5  ;;  %v4270_v30 = vpop.f32.mrb[46].mxu0  ;;  %v6203_v18 = vadd.f32 %v4380_v52, %v4379_v25  ;;  %v4382_v8 = vpop.f32.mrb[46].mxu1 }
 0x1c3   : > { %v4271_v41 = vpop.f32.mrb[47].mxu0  ;;  %v4383_v58 = vpop.f32.mrb[47].mxu1 }
 0x1c4   : > { %v4272_v60 = vadd.f32 %v4271_v41, %v4270_v30  ;;  %v6205_v33 = vadd.f32 %v4383_v58, %v4382_v8  ;;  %v4833_v30 = vadd.f32 %v4257_v22, %v6210_v7 }
 0x1c8   : > { %v4273_v4 = vpop.f32.mrb[48].mxu0  ;;  %v4385_v38 = vpop.f32.mrb[48].mxu1 }
 0x1c9   : > { %v4274_v14 = vpop.f32.mrb[49].mxu0  ;;  %v4386_v16 = vpop.f32.mrb[49].mxu1 }
 0x1ca   : > { %v6213_v13 = vadd.f32 %v4274_v14, %v4273_v4  ;;  %v4276_v27 = vpop.f32.mrb[50].mxu0  ;;  %v4387_v34 = vadd.f32 %v4386_v16, %v4385_v38  ;;  %v4388_v31 = vpop.f32.mrb[50].mxu1  ;;  %v4841_v14 = vadd.f32 %v4260_v32, %v6210_v7 }
 0x1cb   : > { %v4277_v9 = vpop.f32.mrb[51].mxu0  ;;  %v4389_v56 = vpop.f32.mrb[51].mxu1 }
 0x1cc   : > { %v6216_v2 = vadd.f32 %v4277_v9, %v4276_v27  ;;  %v6218_v62 = vadd.f32 %v4837_v43, %v4387_v34  ;;  %v4390_v20 = vadd.f32 %v4389_v56, %v4388_v31 }
 0x1ce   : > { %v6220_v5 = vadd.f32 %v4845_v59, %v4390_v20  ;;  %v4853_v59 = vadd.f32 %v4263_v61, %v6210_v7 }
 0x1d0   : > { %v4279_v25 = vpop.f32.mrb[52].mxu0  ;;  %v4391_v40 = vpop.f32.mrb[52].mxu1 }
 0x1d1   : > { %v4280_v52 = vpop.f32.mrb[53].mxu0  ;;  %v4392_v15 = vpop.f32.mrb[53].mxu1 }
 0x1d2   : > { %v6223_v8 = vadd.f32 %v4280_v52, %v4279_v25  ;;  %v4282_v41 = vpop.f32.mrb[54].mxu0  ;;  %v4393_v58 = vadd.f32 %v4392_v15, %v4391_v40  ;;  %v4394_v4 = vpop.f32.mrb[54].mxu1 }
 0x1d3   : > { %v4283_v38 = vpop.f32.mrb[55].mxu0  ;;  %v4395_v47 = vpop.f32.mrb[55].mxu1 }
 0x1d4   : > { %v6226_v16 = vadd.f32 %v4283_v38, %v4282_v41  ;;  %v6228_v43 = vadd.f32 %v4833_v30, %v4393_v58  ;;  %v4396_v27 = vadd.f32 %v4395_v47, %v4394_v4  ;;  %v4861_v41 = vadd.f32 %v4266_v39, %v6210_v7 }
 0x1d6   : > { %6489 = vst [vmem:[#allocation3_spill] sm:$0xff] %v6228_v43  ;;  %v6230_v34 = vadd.f32 %v4841_v14, %v4396_v27 }
 0x1d8   : > { %6490 = vst [vmem:[#allocation4_spill] sm:$0xff] %v6230_v34  ;;  %v4285_v31 = vpop.f32.mrb[56].mxu0  ;;  %v4397_v9 = vpop.f32.mrb[56].mxu1 }
 0x1d9   : > { %v4286_v56 = vpop.f32.mrb[57].mxu0  ;;  %v4398_v22 = vpop.f32.mrb[57].mxu1 }
 0x1da   : > { %v6233_v20 = vadd.f32 %v4286_v56, %v4285_v31  ;;  %v4288_v25 = vpop.f32.mrb[58].mxu0  ;;  %v4399_v40 = vadd.f32 %v4398_v22, %v4397_v9  ;;  %v4400_v52 = vpop.f32.mrb[58].mxu1  ;;  %v4849_v31 = vadd.f32 %v4269_v24, %v6210_v7 }
 0x1db   : > { %v4289_v15 = vpop.f32.mrb[59].mxu0  ;;  %v4401_v32 = vpop.f32.mrb[59].mxu1 }
 0x1dc   : > { %v6236_v30 = vadd.f32 %v4289_v15, %v4288_v25  ;;  %v6238_v58 = vadd.f32 %v4853_v59, %v4399_v40  ;;  %v4402_v4 = vadd.f32 %v4401_v32, %v4400_v52  ;;  %v4857_v25 = vadd.f32 %v4272_v60, %v6210_v7 }
 0x1dd   : > { %v4753_v32 = vadd.f32 %v6035_v11, %v6210_v7  ;;  %v4763_v60 = vadd.f32 %v6037_v6, %v6210_v7 }
 0x1de   : > { %v6240_v38 = vadd.f32 %v4861_v41, %v4402_v4  ;;  %v4758_v41 = vadd.f32 %v5983_v26, %v6210_v7  ;;  %v4877_v26 = vadd.f32 %v6216_v2, %v6210_v7 }
 0x1e0   : > { %v4291_v47 = vpop.f32.mrb[60].mxu0  ;;  %v4403_v14 = vpop.f32.mrb[60].mxu1 }
 0x1e1   : > { %v4292_v27 = vpop.f32.mrb[61].mxu0  ;;  %v4404_v61 = vpop.f32.mrb[61].mxu1 }
 0x1e2   : > { %v6243_v56 = vadd.f32 %v4292_v27, %v4291_v47  ;;  %v4294_v9 = vpop.f32.mrb[62].mxu0  ;;  %v4405_v22 = vadd.f32 %v4404_v61, %v4403_v14  ;;  %v4406_v34 = vpop.f32.mrb[62].mxu1  ;;  %v4869_v27 = vadd.f32 %v6213_v13, %v6210_v7 }
 0x1e3   : > { %v4295_v43 = vpop.f32.mrb[63].mxu0  ;;  %v4407_v39 = vpop.f32.mrb[63].mxu1 }
 0x1e4   : > { %v6246_v59 = vadd.f32 %v4295_v43, %v4294_v9  ;;  %v6248_v40 = vadd.f32 %v4849_v31, %v4405_v22  ;;  %v4408_v52 = vadd.f32 %v4407_v39, %v4406_v34  ;;  %v4768_v31 = vadd.f32 %v5989_v21, %v6210_v7 }
 0x1e6   : > { %v6250_v15 = vadd.f32 %v4857_v25, %v4408_v52 }
 0x1e8   : > { %v4611_v24 = vpop.f32.mrb[64].mxu0  ;;  %v4409_v4 = vpop.f32.mrb[64].mxu1 }
 0x1e9   : > { %v4754_v47 = vadd.f32 %v4753_v32, %v4611_v24  ;;  %v2521_v14 = vpop.f32.mrb[65].mxu0  ;;  %v4410_v43 = vpop.f32.mrb[65].mxu1 }
 0x1ea   : > { %v4759_v34 = vadd.f32 %v4758_v41, %v2521_v14  ;;  %v4612_v61 = vpop.f32.mrb[66].mxu0  ;;  %v4411_v11 = vadd.f32 %v4410_v43, %v4409_v4  ;;  %v4412_v9 = vpop.f32.mrb[66].mxu1  ;;  %v4783_v43 = vadd.f32 %v6125_v0, %v6210_v7 }
 0x1eb   : > { %v6265_v22 = vadd.f32 %v4754_v47, %v6157_v19  ;;  %v4764_v39 = vadd.f32 %v4763_v60, %v4612_v61  ;;  %v2524_v25 = vpop.f32.mrb[67].mxu0  ;;  %v4413_v6 = vpop.f32.mrb[67].mxu1  ;;  %v4773_v19 = vadd.f32 %v6119_v45, %v6210_v7  ;;  %v4788_v61 = vadd.f32 %v6060_v35, %v6210_v7 }
 0x1ec   : > { %v6268_v52 = vadd.f32 %v4759_v34, %v6149_v55  ;;  %v4769_v13 = vadd.f32 %v4768_v31, %v2524_v25  ;;  %v6270_v32 = vadd.f32 %v4869_v27, %v4411_v11  ;;  %v4414_v24 = vadd.f32 %v4413_v6, %v4412_v9 }
 0x1ed   : > { %v6273_v21 = vadd.f32 %v4764_v39, %v6161_v54  ;;  %v4778_v55 = vadd.f32 %v6055_v29, %v6210_v7  ;;  %v4873_v29 = vadd.f32 %v6226_v16, %v6210_v7 }
 0x1ee   : > { %v6276_v41 = vadd.f32 %v4769_v13, %v6151_v49  ;;  %v6278_v2 = vadd.f32 %v4877_v26, %v4414_v24  ;;  %v4865_v49 = vadd.f32 %v6223_v8, %v6210_v7 }
 0x1f0   : > { %v4615_v4 = vpop.f32.mrb[68].mxu0  ;;  %v4415_v47 = vpop.f32.mrb[68].mxu1 }
 0x1f1   : > { %v4774_v14 = vadd.f32 %v4773_v19, %v4615_v4  ;;  %v2537_v60 = vpop.f32.mrb[69].mxu0  ;;  %v4416_v54 = vpop.f32.mrb[69].mxu1 }
 0x1f2   : > { %v4779_v27 = vadd.f32 %v4778_v55, %v2537_v60  ;;  %v4616_v34 = vpop.f32.mrb[70].mxu0  ;;  %v4417_v45 = vadd.f32 %v4416_v54, %v4415_v47  ;;  %v4418_v31 = vpop.f32.mrb[70].mxu1  ;;  %v4803_v47 = vadd.f32 %v6159_v36, %v6210_v7 }
 0x1f3   : > { %v6293_v11 = vadd.f32 %v4774_v14, %v6179_v23  ;;  %v4784_v9 = vadd.f32 %v4783_v43, %v4616_v34  ;;  %v2540_v26 = vpop.f32.mrb[71].mxu0  ;;  %v4419_v0 = vpop.f32.mrb[71].mxu1  ;;  %v4793_v23 = vadd.f32 %v6155_v50, %v6210_v7  ;;  %v4808_v43 = vadd.f32 %v6133_v63, %v6210_v7 }
 0x1f4   : > { %v6296_v39 = vadd.f32 %v4779_v27, %v6168_v1  ;;  %v4789_v8 = vadd.f32 %v4788_v61, %v2540_v26  ;;  %v6298_v25 = vadd.f32 %v4865_v49, %v4417_v45  ;;  %v4420_v6 = vadd.f32 %v4419_v0, %v4418_v31 }
 0x1f5   : > { %v6301_v35 = vadd.f32 %v4784_v9, %v6183_v12  ;;  %v4798_v1 = vadd.f32 %v6131_v57, %v6210_v7  ;;  %v4893_v57 = vadd.f32 %v6236_v30, %v6210_v7 }
 0x1f6   : > { %v6304_v13 = vadd.f32 %v4789_v8, %v6172_v46  ;;  %v6306_v16 = vadd.f32 %v4873_v29, %v4420_v6  ;;  %v4885_v46 = vadd.f32 %v6233_v20, %v6210_v7  ;;  %v4823_v6 = vadd.f32 %v6181_v44, %v6210_v7 }
 0x1f8   : > { %v4619_v24 = vpop.f32.mrb[72].mxu0  ;;  %v4421_v19 = vpop.f32.mrb[72].mxu1 }
 0x1f9   : > { %v4794_v4 = vadd.f32 %v4793_v23, %v4619_v24  ;;  %v2553_v55 = vpop.f32.mrb[73].mxu0  ;;  %v4422_v12 = vpop.f32.mrb[73].mxu1 }
 0x1fa   : > { %v4799_v14 = vadd.f32 %v4798_v1, %v2553_v55  ;;  %v4620_v60 = vpop.f32.mrb[74].mxu0  ;;  %v4423_v50 = vadd.f32 %v4422_v12, %v4421_v19  ;;  %v4424_v54 = vpop.f32.mrb[74].mxu1  ;;  %v4828_v1 = vadd.f32 %v6170_v28, %v6210_v7 }
 0x1fb   : > { %v6321_v49 = vadd.f32 %v4794_v4, %v6195_v10  ;;  %v4804_v27 = vadd.f32 %v4803_v47, %v4620_v60  ;;  %v2556_v34 = vpop.f32.mrb[75].mxu0  ;;  %v4425_v36 = vpop.f32.mrb[75].mxu1  ;;  %v4813_v10 = vadd.f32 %v6177_v53, %v6210_v7 }
 0x1fc   : > { %v6324_v61 = vadd.f32 %v4799_v14, %v6189_v48  ;;  %v4809_v20 = vadd.f32 %v4808_v43, %v2556_v34  ;;  %v6326_v45 = vadd.f32 %v4885_v46, %v4423_v50  ;;  %v4426_v31 = vadd.f32 %v4425_v36, %v4424_v54 }
 0x1fd   : > { %v6329_v63 = vadd.f32 %v4804_v27, %v6197_v42  ;;  %v4818_v48 = vadd.f32 %v6166_v51, %v6210_v7  ;;  %v4889_v51 = vadd.f32 %v6246_v59, %v6210_v7 }
 0x1fe   : > { %v6332_v29 = vadd.f32 %v4809_v20, %v6191_v17  ;;  %v6334_v30 = vadd.f32 %v4893_v57, %v4426_v31  ;;  %v4881_v17 = vadd.f32 %v6243_v56, %v6210_v7 }
 0x200   : > { %v4623_v9 = vpop.f32.mrb[76].mxu0  ;;  %v4427_v26 = vpop.f32.mrb[76].mxu1 }
 0x201   : > { %v4814_v0 = vadd.f32 %v4813_v10, %v4623_v9  ;;  %v2569_v8 = vpop.f32.mrb[77].mxu0  ;;  %v4428_v42 = vpop.f32.mrb[77].mxu1 }
 0x202   : > { %v4819_v23 = vadd.f32 %v4818_v48, %v2569_v8  ;;  %v4624_v24 = vpop.f32.mrb[78].mxu0  ;;  %v4429_v53 = vadd.f32 %v4428_v42, %v4427_v26  ;;  %v4430_v19 = vpop.f32.mrb[78].mxu1 }
 0x203   : > { %v6349_v4 = vadd.f32 %v4814_v0, %v6203_v18  ;;  %v4824_v55 = vadd.f32 %v4823_v6, %v4624_v24  ;;  %v2572_v47 = vpop.f32.mrb[79].mxu0  ;;  %v4431_v44 = vpop.f32.mrb[79].mxu1 }
 0x204   : > { %v4820_v12 = vadd.f32 %v4819_v23, %v6199_v3  ;;  %v4829_v46 = vadd.f32 %v4828_v1, %v2572_v47  ;;  %v6352_v56 = vadd.f32 %v4881_v17, %v4429_v53  ;;  %v4432_v14 = vadd.f32 %v4431_v44, %v4430_v19 }
 0x205   : > { %v6355_v60 = vadd.f32 %v4824_v55, %v6205_v33 }
 0x206   : > { %v4830_v28 = vadd.f32 %v4829_v46, %v6201_v37  ;;  %v6358_v43 = vadd.f32 %v4889_v51, %v4432_v14 }
 0x208   : > { %v4473_v7 = vpop.f32.mrb[80].mxu0 }
 0x209   : > { %v4474_v59 = vpop.f32.mrb[81].mxu0 }
 0x20a   : > { %v4475_v18 = vadd.f32 %v4474_v59, %v4473_v7  ;;  %v4476_v50 = vpop.f32.mrb[82].mxu0 }
 0x20b   : > { %v4477_v54 = vpop.f32.mrb[83].mxu0 }
 0x20c   : > { %v4478_v57 = vadd.f32 %v4477_v54, %v4476_v50  ;;  %v6361_v27 = vadd.f32 %v6268_v52, %v4475_v18 }
 0x20e   : > { %v6364_v3 = vadd.f32 %v6276_v41, %v4478_v57 }
 0x210   : > { %v4479_v34 = vpop.f32.mrb[84].mxu0 }
 0x211   : > { %v4480_v36 = vpop.f32.mrb[85].mxu0 }
 0x212   : > { %v4481_v33 = vadd.f32 %v4480_v36, %v4479_v34  ;;  %v4482_v20 = vpop.f32.mrb[86].mxu0 }
 0x213   : > { %v4483_v31 = vpop.f32.mrb[87].mxu0 }
 0x214   : > { %v4484_v37 = vadd.f32 %v4483_v31, %v4482_v20  ;;  %v4756_v10 = vadd.f32 %v6265_v22, %v4481_v33 }
 0x216   : > { %v4766_v9 = vadd.f32 %v6273_v21, %v4484_v37 }
 0x218   : > { %v4485_v48 = vpop.f32.mrb[88].mxu0 }
 0x219   : > { %v4486_v26 = vpop.f32.mrb[89].mxu0 }
 0x21a   : > { %v4487_v0 = vadd.f32 %v4486_v26, %v4485_v48  ;;  %v4488_v8 = vpop.f32.mrb[90].mxu0 }
 0x21b   : > { %v4489_v6 = vpop.f32.mrb[91].mxu0 }
 0x21c   : > { %v4490_v52 = vadd.f32 %v4489_v6, %v4488_v8  ;;  %v6369_v42 = vadd.f32 %v6296_v39, %v4487_v0 }
 0x21e   : > { %v6372_v41 = vadd.f32 %v6304_v13, %v4490_v52 }
 0x220   : > { %v4491_v17 = vpop.f32.mrb[92].mxu0 }
 0x221   : > { %v4492_v23 = vpop.f32.mrb[93].mxu0 }
 0x222   : > { %v4493_v24 = vadd.f32 %v4492_v23, %v4491_v17  ;;  %v4494_v1 = vpop.f32.mrb[94].mxu0 }
 0x223   : > { %v4495_v53 = vpop.f32.mrb[95].mxu0 }
 0x224   : > { %v4496_v22 = vadd.f32 %v4495_v53, %v4494_v1  ;;  %v4776_v21 = vadd.f32 %v6293_v11, %v4493_v24 }
 0x226   : > { %v6376_v19 = vadd.f32 %v6301_v35, %v4496_v22 }
 0x228   : > { %v4497_v51 = vpop.f32.mrb[96].mxu0 }
 0x229   : > { %v4498_v55 = vpop.f32.mrb[97].mxu0 }
 0x22a   : > { %v4499_v47 = vadd.f32 %v4498_v55, %v4497_v51  ;;  %v4500_v44 = vpop.f32.mrb[98].mxu0 }
 0x22b   : > { %v4501_v39 = vpop.f32.mrb[99].mxu0 }
 0x22c   : > { %v4502_v46 = vadd.f32 %v4501_v39, %v4500_v44  ;;  %v6379_v13 = vadd.f32 %v6324_v61, %v4499_v47 }
 0x22e   : > { %v6382_v14 = vadd.f32 %v6332_v29, %v4502_v46 }
 0x230   : > { %v4503_v7 = vpop.f32.mrb[100].mxu0 }
 0x231   : > { %v4504_v59 = vpop.f32.mrb[101].mxu0 }
 0x232   : > { %v4505_v18 = vadd.f32 %v4504_v59, %v4503_v7  ;;  %v4506_v50 = vpop.f32.mrb[102].mxu0 }
 0x233   : > { %v4507_v11 = vpop.f32.mrb[103].mxu0 }
 0x234   : > { %v4508_v54 = vadd.f32 %v4507_v11, %v4506_v50  ;;  %v6385_v35 = vadd.f32 %v6321_v49, %v4505_v18 }
 0x236   : > { %v6388_v57 = vadd.f32 %v6329_v63, %v4508_v54 }
 0x238   : > { %v4509_v34 = vpop.f32.mrb[104].mxu0 }
 0x239   : > { %v4510_v36 = vpop.f32.mrb[105].mxu0 }
 0x23a   : > { %v4511_v61 = vadd.f32 %v4510_v36, %v4509_v34  ;;  %v4512_v33 = vpop.f32.mrb[106].mxu0 }
 0x23b   : > { %v4513_v20 = vpop.f32.mrb[107].mxu0 }
 0x23c   : > { %v4514_v29 = vadd.f32 %v4513_v20, %v4512_v33  ;;  %v6390_v31 = vadd.f32 %v4820_v12, %v4511_v61  ;;  %v6491_v61 = vld [vmem:[#allocation3_spill] sm:$0xff] }
 0x23e   : > { %v6392_v37 = vadd.f32 %v4830_v28, %v4514_v29 }
 0x240   : > { %v4515_v48 = vpop.f32.mrb[108].mxu0 }
 0x241   : > { %v4516_v26 = vpop.f32.mrb[109].mxu0 }
 0x242   : > { %v4517_v0 = vadd.f32 %v4516_v26, %v4515_v48  ;;  %v4518_v8 = vpop.f32.mrb[110].mxu0 }
 0x243   : > { %v4519_v49 = vpop.f32.mrb[111].mxu0 }
 0x244   : > { %v4520_v6 = vadd.f32 %v4519_v49, %v4518_v8  ;;  %v6395_v63 = vadd.f32 %v6349_v4, %v4517_v0 }
 0x246   : > { %v6399_v52 = vadd.f32 %v6355_v60, %v4520_v6 }
 0x248   : > { %v4521_v12 = vpop.f32.mrb[112].mxu0  ;;  %v4707_v28 = vpop.f32.mrb[80].mxu1 }
 0x249   : > { %v4522_v17 = vpop.f32.mrb[113].mxu0  ;;  %v4757_v23 = vadd.f32 %v4756_v10, %v4707_v28  ;;  %v3719_v24 = vpop.f32.mrb[81].mxu1 }
 0x24a   : > { %v4523_v4 = vadd.f32 %v4522_v17, %v4521_v12  ;;  %v4524_v1 = vpop.f32.mrb[114].mxu0  ;;  %v4762_v53 = vadd.f32 %v6361_v27, %v3719_v24  ;;  %v4708_v60 = vpop.f32.mrb[82].mxu1 }
 0x24b   : > { %v4525_v22 = vpop.f32.mrb[115].mxu0  ;;  %3882 = vst [vmem:[%s6404_s6 + $0x10] sm:$0xff] %v4757_v23  ;;  %v4767_v51 = vadd.f32 %v4766_v9, %v4708_v60  ;;  %v3722_v55 = vpop.f32.mrb[83].mxu1 }
 0x24c   : > { %v4526_v47 = vadd.f32 %v4525_v22, %v4524_v1  ;;  %3880 = vst [vmem:[%s6404_s6] sm:$0xff] %v4762_v53  ;;  %v4772_v44 = vadd.f32 %v6364_v3, %v3722_v55  ;;  %v6411_v39 = vadd.f32 %v6218_v62, %v4523_v4 }
 0x24d   : > { %3883 = vst [vmem:[%s6404_s6 + $0x18] sm:$0xff] %v4767_v51 }
 0x24e   : > { %3881 = vst [vmem:[%s6404_s6 + $0x8] sm:$0xff] %v4772_v44  ;;  %v6416_v10 = vadd.f32 %v6220_v5, %v4526_v47 }
 0x250   : > { %v4527_v27 = vpop.f32.mrb[116].mxu0  ;;  %v4711_v46 = vpop.f32.mrb[84].mxu1 }
 0x251   : > { %v4528_v7 = vpop.f32.mrb[117].mxu0  ;;  %v4777_v9 = vadd.f32 %v4776_v21, %v4711_v46  ;;  %v3735_v59 = vpop.f32.mrb[85].mxu1  ;;  %v6492_v21 = vld [vmem:[#allocation4_spill] sm:$0xff] }
 0x252   : > { %v4529_v18 = vadd.f32 %v4528_v7, %v4527_v27  ;;  %v4530_v50 = vpop.f32.mrb[118].mxu0  ;;  %v4782_v3 = vadd.f32 %v6369_v42, %v3735_v59  ;;  %v4712_v11 = vpop.f32.mrb[86].mxu1 }
 0x253   : > { %v4531_v62 = vpop.f32.mrb[119].mxu0  ;;  %3886 = vst [vmem:[%s6404_s6 + $0x30] sm:$0xff] %v4777_v9  ;;  %v4787_v54 = vadd.f32 %v6376_v19, %v4712_v11  ;;  %v3738_v34 = vpop.f32.mrb[87].mxu1 }
 0x254   : > { %v4532_v36 = vadd.f32 %v4531_v62, %v4530_v50  ;;  %3884 = vst [vmem:[%s6404_s6 + $0x20] sm:$0xff] %v4782_v3  ;;  %v4792_v5 = vadd.f32 %v6372_v41, %v3738_v34  ;;  %v4835_v33 = vadd.f32 %v6491_v61, %v4529_v18 }
 0x255   : > { %3887 = vst [vmem:[%s6404_s6 + $0x38] sm:$0xff] %v4787_v54 }
 0x256   : > { %3885 = vst [vmem:[%s6404_s6 + $0x28] sm:$0xff] %v4792_v5  ;;  %v4843_v20 = vadd.f32 %v6492_v21, %v4532_v36 }
 0x258   : > { %v4533_v29 = vpop.f32.mrb[120].mxu0  ;;  %v4715_v42 = vpop.f32.mrb[88].mxu1 }
 0x259   : > { %v4534_v48 = vpop.f32.mrb[121].mxu0  ;;  %v4797_v19 = vadd.f32 %v6385_v35, %v4715_v42  ;;  %v3751_v26 = vpop.f32.mrb[89].mxu1 }
 0x25a   : > { %v4535_v0 = vadd.f32 %v4534_v48, %v4533_v29  ;;  %v4536_v8 = vpop.f32.mrb[122].mxu0  ;;  %v4802_v49 = vadd.f32 %v6379_v13, %v3751_v26  ;;  %v4716_v41 = vpop.f32.mrb[90].mxu1 }
 0x25b   : > { %v4537_v6 = vpop.f32.mrb[123].mxu0  ;;  %3890 = vst [vmem:[%s6404_s6 + $0x50] sm:$0xff] %v4797_v19  ;;  %v4807_v12 = vadd.f32 %v6388_v57, %v4716_v41  ;;  %v3754_v28 = vpop.f32.mrb[91].mxu1 }
 0x25c   : > { %v4538_v17 = vadd.f32 %v4537_v6, %v4536_v8  ;;  %3888 = vst [vmem:[%s6404_s6 + $0x40] sm:$0xff] %v4802_v49  ;;  %v4812_v23 = vadd.f32 %v6382_v14, %v3754_v28  ;;  %v4855_v24 = vadd.f32 %v6238_v58, %v4535_v0 }
 0x25d   : > { %3891 = vst [vmem:[%s6404_s6 + $0x58] sm:$0xff] %v4807_v12 }
 0x25e   : > { %3889 = vst [vmem:[%s6404_s6 + $0x48] sm:$0xff] %v4812_v23  ;;  %v4863_v35 = vadd.f32 %v6240_v38, %v4538_v17 }
 0x260   : > { %v4539_v4 = vpop.f32.mrb[124].mxu0  ;;  %v4719_v13 = vpop.f32.mrb[92].mxu1 }
 0x261   : > { %v4540_v1 = vpop.f32.mrb[125].mxu0  ;;  %v4817_v57 = vadd.f32 %v6395_v63, %v4719_v13  ;;  %v3767_v53 = vpop.f32.mrb[93].mxu1 }
 0x262   : > { %v4541_v60 = vadd.f32 %v4540_v1, %v4539_v4  ;;  %v4542_v22 = vpop.f32.mrb[126].mxu0  ;;  %v4822_v51 = vadd.f32 %v6390_v31, %v3767_v53  ;;  %v4720_v14 = vpop.f32.mrb[94].mxu1 }
 0x263   : > { %v4543_v55 = vpop.f32.mrb[127].mxu0  ;;  %3894 = vst [vmem:[%s6404_s6 + $0x70] sm:$0xff] %v4817_v57  ;;  %v4827_v58 = vadd.f32 %v6399_v52, %v4720_v14  ;;  %v3770_v47 = vpop.f32.mrb[95].mxu1 }
 0x264   : > { %v4544_v44 = vadd.f32 %v4543_v55, %v4542_v22  ;;  %3892 = vst [vmem:[%s6404_s6 + $0x60] sm:$0xff] %v4822_v51  ;;  %v4832_v38 = vadd.f32 %v6392_v37, %v3770_v47  ;;  %v4851_v27 = vadd.f32 %v6248_v40, %v4541_v60 }
 0x265   : > { %3895 = vst [vmem:[%s6404_s6 + $0x78] sm:$0xff] %v4827_v58 }
 0x266   : > { %3893 = vst [vmem:[%s6404_s6 + $0x68] sm:$0xff] %v4832_v38  ;;  %v4859_v63 = vadd.f32 %v6250_v15, %v4544_v44 }
 0x268   : > { %v4545_v46 = vpop.f32.mrb[128].mxu0  ;;  %v4723_v31 = vpop.f32.mrb[0].mxu1 }
 0x269   : > { %v4546_v7 = vpop.f32.mrb[129].mxu0  ;;  %v4836_v9 = vadd.f32 %v4835_v33, %v4723_v31  ;;  %v3783_v52 = vpop.f32.mrb[1].mxu1 }
 0x26a   : > { %v4547_v59 = vadd.f32 %v4546_v7, %v4545_v46  ;;  %v4548_v18 = vpop.f32.mrb[130].mxu0  ;;  %v4840_v50 = vadd.f32 %v6411_v39, %v3783_v52  ;;  %v4724_v3 = vpop.f32.mrb[2].mxu1 }
 0x26b   : > { %v4549_v37 = vpop.f32.mrb[131].mxu0  ;;  %3898 = vst [vmem:[%s6404_s6 + $0x90] sm:$0xff] %v4836_v9  ;;  %v4844_v40 = vadd.f32 %v4843_v20, %v4724_v3  ;;  %v3786_v11 = vpop.f32.mrb[3].mxu1 }
 0x26c   : > { %v4550_v62 = vadd.f32 %v4549_v37, %v4548_v18  ;;  %3896 = vst [vmem:[%s6404_s6 + $0x80] sm:$0xff] %v4840_v50  ;;  %v4848_v15 = vadd.f32 %v6416_v10, %v3786_v11  ;;  %v4871_v54 = vadd.f32 %v6270_v32, %v4547_v59 }
 0x26d   : > { %3899 = vst [vmem:[%s6404_s6 + $0x98] sm:$0xff] %v4844_v40 }
 0x26e   : > { %3897 = vst [vmem:[%s6404_s6 + $0x88] sm:$0xff] %v4848_v15  ;;  %v4879_v34 = vadd.f32 %v6278_v2, %v4550_v62 }
 0x270   : > { %v4551_v36 = vpop.f32.mrb[132].mxu0  ;;  %v4727_v5 = vpop.f32.mrb[4].mxu1 }
 0x271   : > { %v4552_v39 = vpop.f32.mrb[133].mxu0  ;;  %v4852_v61 = vadd.f32 %v4851_v27, %v4727_v5  ;;  %v3799_v33 = vpop.f32.mrb[5].mxu1 }
 0x272   : > { %v4553_v21 = vadd.f32 %v4552_v39, %v4551_v36  ;;  %v4554_v20 = vpop.f32.mrb[134].mxu0  ;;  %v4856_v29 = vadd.f32 %v4855_v24, %v3799_v33  ;;  %v4728_v42 = vpop.f32.mrb[6].mxu1 }
 0x273   : > { %v4555_v48 = vpop.f32.mrb[135].mxu0  ;;  %3902 = vst [vmem:[%s6404_s6 + $0xb0] sm:$0xff] %v4852_v61  ;;  %v4860_v10 = vadd.f32 %v4859_v63, %v4728_v42  ;;  %v3802_v32 = vpop.f32.mrb[7].mxu1 }
 0x274   : > { %v4556_v19 = vadd.f32 %v4555_v48, %v4554_v20  ;;  %3900 = vst [vmem:[%s6404_s6 + $0xa0] sm:$0xff] %v4856_v29  ;;  %v4864_v26 = vadd.f32 %v4863_v35, %v3802_v32  ;;  %v4867_v2 = vadd.f32 %v6298_v25, %v4553_v21 }
 0x275   : > { %3903 = vst [vmem:[%s6404_s6 + $0xb8] sm:$0xff] %v4860_v10 }
 0x276   : > { %3901 = vst [vmem:[%s6404_s6 + $0xa8] sm:$0xff] %v4864_v26  ;;  %v4875_v0 = vadd.f32 %v6306_v16, %v4556_v19 }
 0x278   : > { %v4557_v8 = vpop.f32.mrb[136].mxu0  ;;  %v4731_v49 = vpop.f32.mrb[8].mxu1 }
 0x279   : > { %v4558_v41 = vpop.f32.mrb[137].mxu0  ;;  %v4868_v6 = vadd.f32 %v4867_v2, %v4731_v49  ;;  %v3815_v12 = vpop.f32.mrb[9].mxu1 }
 0x27a   : > { %v4559_v28 = vadd.f32 %v4558_v41, %v4557_v8  ;;  %v4560_v17 = vpop.f32.mrb[138].mxu0  ;;  %v4872_v23 = vadd.f32 %v4871_v54, %v3815_v12  ;;  %v4732_v24 = vpop.f32.mrb[10].mxu1 }
 0x27b   : > { %v4561_v4 = vpop.f32.mrb[139].mxu0  ;;  %3906 = vst [vmem:[%s6404_s6 + $0xd0] sm:$0xff] %v4868_v6  ;;  %v4876_v35 = vadd.f32 %v4875_v0, %v4732_v24  ;;  %v3818_v25 = vpop.f32.mrb[11].mxu1 }
 0x27c   : > { %v4562_v13 = vadd.f32 %v4561_v4, %v4560_v17  ;;  %3904 = vst [vmem:[%s6404_s6 + $0xc0] sm:$0xff] %v4872_v23  ;;  %v4880_v1 = vadd.f32 %v4879_v34, %v3818_v25  ;;  %v4887_v16 = vadd.f32 %v6326_v45, %v4559_v28 }
 0x27d   : > { %3907 = vst [vmem:[%s6404_s6 + $0xd8] sm:$0xff] %v4876_v35 }
 0x27e   : > { %3905 = vst [vmem:[%s6404_s6 + $0xc8] sm:$0xff] %v4880_v1  ;;  %v4895_v57 = vadd.f32 %v6334_v30, %v4562_v13 }
 0x280   : > { %v4563_v53 = vpop.f32.mrb[140].mxu0  ;;  %v4735_v60 = vpop.f32.mrb[12].mxu1 }
 0x281   : > { %v4564_v22 = vpop.f32.mrb[141].mxu0  ;;  %v3831_v51 = vpop.f32.mrb[13].mxu1 }
 0x282   : > { %v4565_v14 = vadd.f32 %v4564_v22, %v4563_v53  ;;  %v4566_v55 = vpop.f32.mrb[142].mxu0  ;;  %v4888_v58 = vadd.f32 %v4887_v16, %v3831_v51  ;;  %v4736_v47 = vpop.f32.mrb[14].mxu1 }
 0x283   : > { %v4567_v44 = vpop.f32.mrb[143].mxu0  ;;  %v3834_v38 = vpop.f32.mrb[15].mxu1 }
 0x284   : > { %v4568_v27 = vadd.f32 %v4567_v44, %v4566_v55  ;;  %v4883_v45 = vadd.f32 %v6352_v56, %v4565_v14  ;;  %3908 = vst [vmem:[%s6404_s6 + $0xe0] sm:$0xff] %v4888_v58  ;;  %v4896_v63 = vadd.f32 %v4895_v57, %v3834_v38 }
 0x286   : > { %v4884_v46 = vadd.f32 %v4883_v45, %v4735_v60  ;;  %v4891_v30 = vadd.f32 %v6358_v43, %v4568_v27  ;;  %3909 = vst [vmem:[%s6404_s6 + $0xe8] sm:$0xff] %v4896_v63 }
 0x288   : > { %3910 = vst [vmem:[%s6404_s6 + $0xf0] sm:$0xff] %v4884_v46  ;;  %v4892_v31 = vadd.f32 %v4891_v30, %v4736_v47 }
 0x28a   : > { %3911 = vst [vmem:[%s6404_s6 + $0xf8] sm:$0xff] %v4892_v31 }
 0x28b PF: > { %s14_s15 = sadd.s32 1, %s5036_s15  }
 0x28c   : > { %p11_p4 = scmp.ge.s32.totalorder %s14_s15, 4  }
 0x28e   :  { %13 = sbr.rel (!%p11_p4) target bundleno = 1 (0x1), region = 74 }

</bundles_post_ra>
